<compile_context>
chip_gen: v7x
topology: tpu7x:2x2x1
jax: 0.10.0
libtpu: 0.0.40
codegen_flags: <defaults>
</compile_context>

<pallas_src>
import functools

import numpy as np
import jax
import jax.numpy as jnp
from jax.experimental import pallas as pl
from jax.experimental.pallas import tpu as pltpu

_EPS = 1e-5
_PPB = 12  # prepared arrays per encoder block


# ---------------------------------------------------------------------------
# Parameters (mirrors the PyTorch module's parameter structure)
# ---------------------------------------------------------------------------
def init_encoder_params(key, steps=4, input_channels=2, initial_filters=4):
    in_f = [input_channels] + [initial_filters * 2 ** i for i in range(steps - 1)]
    out_f = [initial_filters * 2 ** i for i in range(steps)]
    params = []
    for i in range(steps):
        cin, cout = in_f[i], out_f[i]
        cmid = cout  # in_middle_filters=None -> mid == end
        key, k1, k2, k3, k4 = jax.random.split(key, 5)
        w1 = jax.random.normal(k1, (9, cin, cmid), jnp.float32) * 0.1   # taps kh*3+kw
        b1 = jax.random.normal(k2, (1, cmid), jnp.float32) * 0.1
        w2 = jax.random.normal(k3, (9, cmid, cout), jnp.float32) * 0.1
        b2 = jax.random.normal(k4, (1, cout), jnp.float32) * 0.1
        g1 = jnp.ones((1, cmid), jnp.float32)
        be1 = jnp.zeros((1, cmid), jnp.float32)
        g2 = jnp.ones((1, cout), jnp.float32)
        be2 = jnp.zeros((1, cout), jnp.float32)
        params.append((w1, b1, g1, be1, w2, b2, g2, be2))
    return params


# ---------------------------------------------------------------------------
# One-time (host-side) preparation of kernel constants
# ---------------------------------------------------------------------------
def _banded_weights(w_taps, w_in, w_out):
    """(9, Cin, Cout) taps (kh*3+kw) -> (3, W_in*Cin, W_out*Cout) banded, bf16.

    band[kh, wi*Cin+ci, wo*Cout+co] = w[kh*3 + (wi-wo), ci, co] if 0<=wi-wo<=2.
    """
    w = np.asarray(w_taps, np.float32)
    _, cin, cout = w.shape
    band = np.zeros((3, w_in, cin, w_out, cout), np.float32)
    for kh in range(3):
        for kw in range(3):
            for wo in range(w_out):
                band[kh, wo + kw, :, wo, :] = w[kh * 3 + kw]
    return jnp.asarray(band.reshape(3, w_in * cin, w_out * cout), jnp.bfloat16)


def _group_reduce(w_out, cout):
    """Skinny BN-stat matrices.

    pr (L, C): averages lanes (w*C + c) over width within each channel group.
    pb (C, L): 0/1 broadcast of per-channel values back to lanes.
    """
    lidx = np.arange(w_out * cout)
    cidx = np.arange(cout)
    pr = ((lidx[:, None] % cout) == cidx[None, :]).astype(np.float32) / float(w_out)
    pb = (cidx[:, None] == (lidx[None, :] % cout)).astype(np.float32)
    return jnp.asarray(pr), jnp.asarray(pb)


def _pool_selectors(rows):
    """Precomputed 0/1 row selectors for max_pool2d(kernel=(2,1))."""
    half = rows // 2
    j = np.arange(half)[:, None]
    m = np.arange(rows)[None, :]
    sel_e = (m == 2 * j).astype(np.float32)
    sel_o = (m == 2 * j + 1).astype(np.float32)
    return jnp.asarray(sel_e), jnp.asarray(sel_o)


def _to_lanes(v, w_out):
    """Per-channel vector (1, C) -> lane vector (1, W_out*C), lane = w*C + c."""
    v = np.asarray(v, np.float32).reshape(-1)
    return jnp.asarray(np.tile(v, w_out).reshape(1, -1))


def prepare_encoder(params, batch, height, width):
    """Returns (dims, kernel_params).

    dims[i] = (H, W, Cin, Cmid, Cout, W1, W2) for block i (static ints).
    kernel_params = flat tuple of 12 arrays per block:
        (wb1, pr1, pb1, gamma1_lanes, beta1_lanes,
         wb2, pr2, pb2, gamma2_lanes, beta2_lanes, sel_even, sel_odd)
    """
    dims, kp = [], []
    N, H, W = batch, height, width
    cin = params[0][0].shape[1]
    for (w1, _b1, g1, be1, w2, _b2, g2, be2) in params:
        # _b1/_b2 (conv biases) intentionally unused: they cancel in the
        # training-mode BatchNorm that immediately follows.
        cmid, cout = w1.shape[2], w2.shape[2]
        assert w1.shape[1] == cin
        W1, W2 = W - 2, W - 4
        assert H % 2 == 0 and W2 >= 1, "input too small for this encoder block"
        dims.append((H, W, cin, cmid, cout, W1, W2))
        pr1, pb1 = _group_reduce(W1, cmid)
        pr2, pb2 = _group_reduce(W2, cout)
        se, so = _pool_selectors(N * H)
        kp += [_banded_weights(w1, W, W1), pr1, pb1, _to_lanes(g1, W1), _to_lanes(be1, W1),
               _banded_weights(w2, W1, W2), pr2, pb2, _to_lanes(g2, W2), _to_lanes(be2, W2),
               se, so]
        H, W, cin = H // 2, W2, cout
    return tuple(dims), tuple(kp)


# ---------------------------------------------------------------------------
# In-kernel fused conv + BN + ReLU
# ---------------------------------------------------------------------------
def _conv_bn_relu(y3, wb_ref, pr_ref, pb_ref, g_ref, b_ref):
    """3x3 conv (height pad 1, no width pad) + training-mode BN + ReLU.

    y3     : (N, H, W_in*C_in) lane-dense activations, f32
    wb_ref : (3, W_in*C_in, W_out*C_out) banded bf16 weights, one per kh tap
    pr_ref : (L_out, C_out) width-group average reduce matrix (f32)
    pb_ref : (C_out, L_out) 0/1 lane broadcast matrix (f32)
    g_ref, b_ref : (1, L_out) gamma / beta pre-broadcast over width
    returns (N*H, W_out*C_out) f32
    """
    N, H, Lin = y3.shape
    hi = jax.lax.Precision.HIGHEST

    # Single f32->bf16 cast and a single bf16 height-pad copy per conv
    # (cast hoisted out of the tap loop per perf review).
    yb = y3.astype(jnp.bfloat16)
    zrow = jnp.zeros((N, 1, Lin), jnp.bfloat16)
    ypad = jnp.concatenate([zrow, yb, zrow], axis=1)            # (N, H+2, Lin)

    # 3 big-K matmuls (one per vertical tap) accumulated in f32.
    # TODO(synk): fold into one matmul once unaligned lane-dim concat of the
    # shifted views is available/verified on all target generations.
    acc = jnp.dot(ypad[:, 0:H, :].reshape(N * H, Lin), wb_ref[0],
                  preferred_element_type=jnp.float32)
    for kh in (1, 2):
        acc = acc + jnp.dot(ypad[:, kh:kh + H, :].reshape(N * H, Lin), wb_ref[kh],
                            preferred_element_type=jnp.float32)

    # Training-mode BatchNorm (biased batch variance) + ReLU, single pass:
    # per-lane 1st/2nd moments -> per-channel via skinny matmul -> broadcast
    # back with a 0/1 matrix.  HIGHEST precision keeps stats f32-exact.
    m1 = jnp.mean(acc, axis=0, keepdims=True)                   # (1, Lout)
    m2 = jnp.mean(acc * acc, axis=0, keepdims=True)             # (1, Lout)
    mom = jnp.concatenate([m1, m2], axis=0)                     # (2, Lout)
    ch = jnp.dot(mom, pr_ref[...], precision=hi,
                 preferred_element_type=jnp.float32)            # (2, C)
    lanes = jnp.dot(ch, pb_ref[...], precision=hi,
                    preferred_element_type=jnp.float32)         # (2, Lout)
    mu = lanes[0:1, :]
    var = lanes[1:2, :] - mu * mu
    scale = g_ref[...] * jax.lax.rsqrt(var + _EPS)
    shift = b_ref[...] - mu * scale
    return jnp.maximum(acc * scale + shift, 0.0)


def _make_kernel(steps):
    def kernel(*refs):
        x_ref = refs[0]
        prefs = refs[1:1 + _PPB * steps]
        orefs = refs[1 + _PPB * steps:]
        hi = jax.lax.Precision.HIGHEST

        y3 = x_ref[...]                                  # (N, H0, W0*C0) f32
        N = y3.shape[0]
        pooled = None
        for i in range(steps):
            (wb1, pr1, pb1, g1, b1,
             wb2, pr2, pb2, g2, b2, se, so) = prefs[_PPB * i: _PPB * (i + 1)]
            H = y3.shape[1]

            h1 = _conv_bn_relu(y3, wb1, pr1, pb1, g1, b1)              # (N*H, L1)
            yb2 = _conv_bn_relu(h1.reshape(N, H, h1.shape[1]),
                                wb2, pr2, pb2, g2, b2)                 # (N*H, L2)
            orefs[i][...] = yb2                          # lane-dense skip output

            # max_pool2d(kernel=(2,1)): max over adjacent row pairs via
            # precomputed 0/1 selectors; HIGHEST precision => bit-exact max.
            pooled = jnp.maximum(
                jnp.dot(se[...], yb2, precision=hi,
                        preferred_element_type=jnp.float32),
                jnp.dot(so[...], yb2, precision=hi,
                        preferred_element_type=jnp.float32))
            y3 = pooled.reshape(N, H // 2, yb2.shape[1])

        orefs[steps][...] = pooled                       # final pooled output
    return kernel


# ---------------------------------------------------------------------------
# VMEM capacity query (generation aware; conservative fallback = v7x size)
# ---------------------------------------------------------------------------
def _vmem_capacity_bytes():
    try:
        info = pltpu.get_tpu_info()
        for name in ("vmem_capacity_bytes", "vmem_size_bytes", "vmem_bytes"):
            cap = getattr(info, name, None)
            if cap:
                return int(cap)
    except Exception:
        pass
    return 64 * 1024 * 1024


# ---------------------------------------------------------------------------
# Public forward (NCHW in / NCHW out, like the PyTorch module)
# ---------------------------------------------------------------------------
@functools.partial(jax.jit, static_argnames=("dims",))
def down_unet2d_encoder(x_nchw, kparams, dims):
    steps = len(dims)
    N, C0, H0, W0 = x_nchw.shape
    assert (H0, W0, C0) == (dims[0][0], dims[0][1], dims[0][2]), "shape mismatch"

    # NCHW -> NHWC -> lane-dense (N, H, W*C)  (the last reshape is a pure view)
    x = jnp.transpose(x_nchw, (0, 2, 3, 1)).reshape(N, H0, W0 * C0)

    out_shapes = tuple(
        jax.ShapeDtypeStruct((N * d[0], d[6] * d[4]), jnp.float32) for d in dims
    ) + (jax.ShapeDtypeStruct(
        (N * (dims[-1][0] // 2), dims[-1][6] * dims[-1][4]), jnp.float32),)

    # Generation-aware VMEM-residency guard (whole forward is VMEM-resident).
    cap = _vmem_capacity_bytes()
    est = x.size * 4
    est += sum(int(np.prod(k.shape)) * k.dtype.itemsize for k in kparams)
    est += sum(int(np.prod(s.shape)) * 4 for s in out_shapes)
    est *= 4  # headroom for in-kernel intermediates (padded acts, acc, ...)
    if est > int(0.45 * cap):
        raise ValueError(
            "input too large for the fused VMEM-resident encoder on this TPU "
            "generation; add a batch grid + two-pass BN reduction (see TODO).")
    vmem_limit = int(min(0.9 * cap, max(2 * est, 32 * 1024 * 1024)))

    vspec = pl.BlockSpec(memory_space=pltpu.MemorySpace.VMEM)
    outs = pl.pallas_call(
        _make_kernel(steps),
        out_shape=out_shapes,
        in_specs=[vspec] * (1 + _PPB * steps),
        out_specs=tuple(vspec for _ in out_shapes),
        compiler_params=pltpu.CompilerParams(vmem_limit_bytes=vmem_limit),
    )(x, *kparams)

    # Boundary-only layout conversion back to NCHW (matches the PyTorch module).
    skips = [
        jnp.transpose(outs[i].reshape(N, d[0], d[6], d[4]), (0, 3, 1, 2))
        for i, d in enumerate(dims)
    ]
    dl = dims[-1]
    y_final = jnp.transpose(
        outs[steps].reshape(N, dl[0] // 2, dl[6], dl[4]), (0, 3, 1, 2))
    return y_final, skips


if __name__ == "__main__":
    key = jax.random.PRNGKey(0)
    kx, kp = jax.random.split(key)

    # NCHW input: batch=2, channels=2, H=16, W=24 (W survives 4 blocks shrinking
    # width by 4 each; H divisible by 16 for the four (2,1) max-pools).
    x = jax.random.normal(kx, (2, 2, 16, 24), jnp.float32)
    params = init_encoder_params(kp, steps=4, input_channels=2, initial_filters=4)
    dims, kparams = prepare_encoder(params, batch=2, height=16, width=24)

    y_final, outs = down_unet2d_encoder(x, kparams, dims=dims)
    jax.block_until_ready(y_final)
    jax.block_until_ready(outs)

    expected_outs = [(2, 4, 16, 20), (2, 8, 8, 16), (2, 16, 4, 12), (2, 32, 2, 8)]
    assert y_final.shape == (2, 32, 1, 8), y_final.shape
    assert [tuple(o.shape) for o in outs] == expected_outs, [o.shape for o in outs]
    assert all(bool(jnp.isfinite(o).all()) for o in outs + [y_final])
    assert all(bool((o >= 0).all()) for o in outs + [y_final])   # post-ReLU/max
    print("KERNEL_OK")
</pallas_src>

<mosaic_0001>
module attributes {stable_mosaic.version = 11 : i64} {
  func.func @kernel(%arg0: memref<2x16x48xf32, #tpu.memory_space<vmem>>, %arg1: memref<3x48x88xbf16, #tpu.memory_space<vmem>>, %arg2: memref<88x4xf32, #tpu.memory_space<vmem>>, %arg3: memref<4x88xf32, #tpu.memory_space<vmem>>, %arg4: memref<1x88xf32, #tpu.memory_space<vmem>>, %arg5: memref<1x88xf32, #tpu.memory_space<vmem>>, %arg6: memref<3x88x80xbf16, #tpu.memory_space<vmem>>, %arg7: memref<80x4xf32, #tpu.memory_space<vmem>>, %arg8: memref<4x80xf32, #tpu.memory_space<vmem>>, %arg9: memref<1x80xf32, #tpu.memory_space<vmem>>, %arg10: memref<1x80xf32, #tpu.memory_space<vmem>>, %arg11: memref<16x32xf32, #tpu.memory_space<vmem>>, %arg12: memref<16x32xf32, #tpu.memory_space<vmem>>, %arg13: memref<3x80x144xbf16, #tpu.memory_space<vmem>>, %arg14: memref<144x8xf32, #tpu.memory_space<vmem>>, %arg15: memref<8x144xf32, #tpu.memory_space<vmem>>, %arg16: memref<1x144xf32, #tpu.memory_space<vmem>>, %arg17: memref<1x144xf32, #tpu.memory_space<vmem>>, %arg18: memref<3x144x128xbf16, #tpu.memory_space<vmem>>, %arg19: memref<128x8xf32, #tpu.memory_space<vmem>>, %arg20: memref<8x128xf32, #tpu.memory_space<vmem>>, %arg21: memref<1x128xf32, #tpu.memory_space<vmem>>, %arg22: memref<1x128xf32, #tpu.memory_space<vmem>>, %arg23: memref<8x16xf32, #tpu.memory_space<vmem>>, %arg24: memref<8x16xf32, #tpu.memory_space<vmem>>, %arg25: memref<3x128x224xbf16, #tpu.memory_space<vmem>>, %arg26: memref<224x16xf32, #tpu.memory_space<vmem>>, %arg27: memref<16x224xf32, #tpu.memory_space<vmem>>, %arg28: memref<1x224xf32, #tpu.memory_space<vmem>>, %arg29: memref<1x224xf32, #tpu.memory_space<vmem>>, %arg30: memref<3x224x192xbf16, #tpu.memory_space<vmem>>, %arg31: memref<192x16xf32, #tpu.memory_space<vmem>>, %arg32: memref<16x192xf32, #tpu.memory_space<vmem>>, %arg33: memref<1x192xf32, #tpu.memory_space<vmem>>, %arg34: memref<1x192xf32, #tpu.memory_space<vmem>>, %arg35: memref<4x8xf32, #tpu.memory_space<vmem>>, %arg36: memref<4x8xf32, #tpu.memory_space<vmem>>, %arg37: memref<3x192x320xbf16, #tpu.memory_space<vmem>>, %arg38: memref<320x32xf32, #tpu.memory_space<vmem>>, %arg39: memref<32x320xf32, #tpu.memory_space<vmem>>, %arg40: memref<1x320xf32, #tpu.memory_space<vmem>>, %arg41: memref<1x320xf32, #tpu.memory_space<vmem>>, %arg42: memref<3x320x256xbf16, #tpu.memory_space<vmem>>, %arg43: memref<256x32xf32, #tpu.memory_space<vmem>>, %arg44: memref<32x256xf32, #tpu.memory_space<vmem>>, %arg45: memref<1x256xf32, #tpu.memory_space<vmem>>, %arg46: memref<1x256xf32, #tpu.memory_space<vmem>>, %arg47: memref<2x4xf32, #tpu.memory_space<vmem>>, %arg48: memref<2x4xf32, #tpu.memory_space<vmem>>, %arg49: memref<32x80xf32, #tpu.memory_space<vmem>>, %arg50: memref<16x128xf32, #tpu.memory_space<vmem>>, %arg51: memref<8x192xf32, #tpu.memory_space<vmem>>, %arg52: memref<4x256xf32, #tpu.memory_space<vmem>>, %arg53: memref<2x256xf32, #tpu.memory_space<vmem>>) attributes {dimension_semantics = [], scalar_prefetch = 0 : i64, scratch_operands = 0 : i64, tpu.core_type = #tpu.core_type<tc>} {
    %c0 = arith.constant 0 : index
    %c0_0 = arith.constant 0 : index
    %c0_1 = arith.constant 0 : index
    %0 = vector.load %arg0[%c0, %c0_0, %c0_1] : memref<2x16x48xf32, #tpu.memory_space<vmem>>, vector<2x16x48xf32>
    %1 = arith.truncf %0 : vector<2x16x48xf32> to vector<2x16x48xbf16>
    %cst = arith.constant 0.000000e+00 : bf16
    %2 = vector.broadcast %cst : bf16 to vector<2x1x48xbf16>
    %3 = tpu.concatenate %2, %1, %2 in 1 : vector<2x1x48xbf16>, vector<2x16x48xbf16>, vector<2x1x48xbf16> -> vector<2x18x48xbf16>
    %4 = vector.extract_strided_slice %3 {offsets = [0, 0, 0], sizes = [2, 16, 48], strides = [1, 1, 1]} : vector<2x18x48xbf16> to vector<2x16x48xbf16>
    %5 = vector.shape_cast %4 : vector<2x16x48xbf16> to vector<32x48xbf16>
    %c0_2 = arith.constant 0 : index
    %c0_3 = arith.constant 0 : index
    %c0_4 = arith.constant 0 : index
    %6 = vector.load %arg1[%c0_2, %c0_3, %c0_4] : memref<3x48x88xbf16, #tpu.memory_space<vmem>>, vector<1x48x88xbf16>
    %7 = vector.shape_cast %6 : vector<1x48x88xbf16> to vector<48x88xbf16>
    %cst_5 = arith.constant dense<0.000000e+00> : vector<32x88xf32>
    %8 = tpu.matmul %5, %7, %cst_5 {dimension_numbers = #tpu.dot_dimension_numbers<[1], [0], [0], [1], [0, 0, 1, 1], [], []>} : vector<32x48xbf16>, vector<48x88xbf16>, vector<32x88xf32> -> vector<32x88xf32>
    %9 = vector.extract_strided_slice %3 {offsets = [0, 1, 0], sizes = [2, 16, 48], strides = [1, 1, 1]} : vector<2x18x48xbf16> to vector<2x16x48xbf16>
    %10 = vector.shape_cast %9 : vector<2x16x48xbf16> to vector<32x48xbf16>
    %c1 = arith.constant 1 : index
    %c0_6 = arith.constant 0 : index
    %c0_7 = arith.constant 0 : index
    %11 = vector.load %arg1[%c1, %c0_6, %c0_7] : memref<3x48x88xbf16, #tpu.memory_space<vmem>>, vector<1x48x88xbf16>
    %12 = vector.shape_cast %11 : vector<1x48x88xbf16> to vector<48x88xbf16>
    %cst_8 = arith.constant dense<0.000000e+00> : vector<32x88xf32>
    %13 = tpu.matmul %10, %12, %cst_8 {dimension_numbers = #tpu.dot_dimension_numbers<[1], [0], [0], [1], [0, 0, 1, 1], [], []>} : vector<32x48xbf16>, vector<48x88xbf16>, vector<32x88xf32> -> vector<32x88xf32>
    %14 = arith.addf %8, %13 : vector<32x88xf32>
    %15 = vector.extract_strided_slice %3 {offsets = [0, 2, 0], sizes = [2, 16, 48], strides = [1, 1, 1]} : vector<2x18x48xbf16> to vector<2x16x48xbf16>
    %16 = vector.shape_cast %15 : vector<2x16x48xbf16> to vector<32x48xbf16>
    %c2 = arith.constant 2 : index
    %c0_9 = arith.constant 0 : index
    %c0_10 = arith.constant 0 : index
    %17 = vector.load %arg1[%c2, %c0_9, %c0_10] : memref<3x48x88xbf16, #tpu.memory_space<vmem>>, vector<1x48x88xbf16>
    %18 = vector.shape_cast %17 : vector<1x48x88xbf16> to vector<48x88xbf16>
    %cst_11 = arith.constant dense<0.000000e+00> : vector<32x88xf32>
    %19 = tpu.matmul %16, %18, %cst_11 {dimension_numbers = #tpu.dot_dimension_numbers<[1], [0], [0], [1], [0, 0, 1, 1], [], []>} : vector<32x48xbf16>, vector<48x88xbf16>, vector<32x88xf32> -> vector<32x88xf32>
    %20 = arith.addf %14, %19 : vector<32x88xf32>
    %cst_12 = arith.constant dense<0.000000e+00> : vector<88xf32>
    %21 = vector.multi_reduction <add>, %20, %cst_12 [0] : vector<32x88xf32> to vector<88xf32>
    %22 = vector.shape_cast %21 : vector<88xf32> to vector<1x88xf32>
    %cst_13 = arith.constant 3.200000e+01 : f32
    %23 = vector.broadcast %cst_13 : f32 to vector<1x88xf32>
    %24 = arith.divf %22, %23 : vector<1x88xf32>
    %25 = arith.mulf %20, %20 : vector<32x88xf32>
    %cst_14 = arith.constant dense<0.000000e+00> : vector<88xf32>
    %26 = vector.multi_reduction <add>, %25, %cst_14 [0] : vector<32x88xf32> to vector<88xf32>
    %27 = vector.shape_cast %26 : vector<88xf32> to vector<1x88xf32>
    %cst_15 = arith.constant 3.200000e+01 : f32
    %28 = vector.broadcast %cst_15 : f32 to vector<1x88xf32>
    %29 = arith.divf %27, %28 : vector<1x88xf32>
    %30 = tpu.concatenate %24, %29 in 0 : vector<1x88xf32>, vector<1x88xf32> -> vector<2x88xf32>
    %c0_16 = arith.constant 0 : index
    %c0_17 = arith.constant 0 : index
    %31 = vector.load %arg2[%c0_16, %c0_17] : memref<88x4xf32, #tpu.memory_space<vmem>>, vector<88x4xf32>
    %cst_18 = arith.constant dense<0.000000e+00> : vector<2x4xf32>
    %32 = tpu.matmul %30, %31, %cst_18 {dimension_numbers = #tpu.dot_dimension_numbers<[1], [0], [0], [1], [0, 0, 1, 1], [], []>, precision = #tpu.contract_precision<fp32>} : vector<2x88xf32>, vector<88x4xf32>, vector<2x4xf32> -> vector<2x4xf32>
    %c0_19 = arith.constant 0 : index
    %c0_20 = arith.constant 0 : index
    %33 = vector.load %arg3[%c0_19, %c0_20] : memref<4x88xf32, #tpu.memory_space<vmem>>, vector<4x88xf32>
    %cst_21 = arith.constant dense<0.000000e+00> : vector<2x88xf32>
    %34 = tpu.matmul %32, %33, %cst_21 {dimension_numbers = #tpu.dot_dimension_numbers<[1], [0], [0], [1], [0, 0, 1, 1], [], []>, precision = #tpu.contract_precision<fp32>} : vector<2x4xf32>, vector<4x88xf32>, vector<2x88xf32> -> vector<2x88xf32>
    %35 = vector.extract_strided_slice %34 {offsets = [0, 0], sizes = [1, 88], strides = [1, 1]} : vector<2x88xf32> to vector<1x88xf32>
    %36 = vector.extract_strided_slice %34 {offsets = [1, 0], sizes = [1, 88], strides = [1, 1]} : vector<2x88xf32> to vector<1x88xf32>
    %37 = arith.mulf %35, %35 : vector<1x88xf32>
    %38 = arith.subf %36, %37 : vector<1x88xf32>
    %c0_22 = arith.constant 0 : index
    %c0_23 = arith.constant 0 : index
    %39 = vector.load %arg4[%c0_22, %c0_23] : memref<1x88xf32, #tpu.memory_space<vmem>>, vector<1x88xf32>
    %cst_24 = arith.constant 9.99999974E-6 : f32
    %40 = vector.broadcast %cst_24 : f32 to vector<1x88xf32>
    %41 = arith.addf %38, %40 : vector<1x88xf32>
    %42 = math.rsqrt %41 : vector<1x88xf32>
    %43 = arith.mulf %39, %42 : vector<1x88xf32>
    %c0_25 = arith.constant 0 : index
    %c0_26 = arith.constant 0 : index
    %44 = vector.load %arg5[%c0_25, %c0_26] : memref<1x88xf32, #tpu.memory_space<vmem>>, vector<1x88xf32>
    %45 = arith.mulf %35, %43 : vector<1x88xf32>
    %46 = arith.subf %44, %45 : vector<1x88xf32>
    %47 = vector.broadcast %43 : vector<1x88xf32> to vector<32x88xf32>
    %48 = arith.mulf %20, %47 : vector<32x88xf32>
    %49 = vector.broadcast %46 : vector<1x88xf32> to vector<32x88xf32>
    %50 = arith.addf %48, %49 : vector<32x88xf32>
    %cst_27 = arith.constant 0.000000e+00 : f32
    %51 = vector.broadcast %cst_27 : f32 to vector<32x88xf32>
    %52 = arith.maximumf %50, %51 : vector<32x88xf32>
    %53 = vector.shape_cast %52 : vector<32x88xf32> to vector<2x16x88xf32>
    %54 = arith.truncf %53 : vector<2x16x88xf32> to vector<2x16x88xbf16>
    %cst_28 = arith.constant 0.000000e+00 : bf16
    %55 = vector.broadcast %cst_28 : bf16 to vector<2x1x88xbf16>
    %56 = tpu.concatenate %55, %54, %55 in 1 : vector<2x1x88xbf16>, vector<2x16x88xbf16>, vector<2x1x88xbf16> -> vector<2x18x88xbf16>
    %57 = vector.extract_strided_slice %56 {offsets = [0, 0, 0], sizes = [2, 16, 88], strides = [1, 1, 1]} : vector<2x18x88xbf16> to vector<2x16x88xbf16>
    %58 = vector.shape_cast %57 : vector<2x16x88xbf16> to vector<32x88xbf16>
    %c0_29 = arith.constant 0 : index
    %c0_30 = arith.constant 0 : index
    %c0_31 = arith.constant 0 : index
    %59 = vector.load %arg6[%c0_29, %c0_30, %c0_31] : memref<3x88x80xbf16, #tpu.memory_space<vmem>>, vector<1x88x80xbf16>
    %60 = vector.shape_cast %59 : vector<1x88x80xbf16> to vector<88x80xbf16>
    %cst_32 = arith.constant dense<0.000000e+00> : vector<32x80xf32>
    %61 = tpu.matmul %58, %60, %cst_32 {dimension_numbers = #tpu.dot_dimension_numbers<[1], [0], [0], [1], [0, 0, 1, 1], [], []>} : vector<32x88xbf16>, vector<88x80xbf16>, vector<32x80xf32> -> vector<32x80xf32>
    %62 = vector.extract_strided_slice %56 {offsets = [0, 1, 0], sizes = [2, 16, 88], strides = [1, 1, 1]} : vector<2x18x88xbf16> to vector<2x16x88xbf16>
    %63 = vector.shape_cast %62 : vector<2x16x88xbf16> to vector<32x88xbf16>
    %c1_33 = arith.constant 1 : index
    %c0_34 = arith.constant 0 : index
    %c0_35 = arith.constant 0 : index
    %64 = vector.load %arg6[%c1_33, %c0_34, %c0_35] : memref<3x88x80xbf16, #tpu.memory_space<vmem>>, vector<1x88x80xbf16>
    %65 = vector.shape_cast %64 : vector<1x88x80xbf16> to vector<88x80xbf16>
    %cst_36 = arith.constant dense<0.000000e+00> : vector<32x80xf32>
    %66 = tpu.matmul %63, %65, %cst_36 {dimension_numbers = #tpu.dot_dimension_numbers<[1], [0], [0], [1], [0, 0, 1, 1], [], []>} : vector<32x88xbf16>, vector<88x80xbf16>, vector<32x80xf32> -> vector<32x80xf32>
    %67 = arith.addf %61, %66 : vector<32x80xf32>
    %68 = vector.extract_strided_slice %56 {offsets = [0, 2, 0], sizes = [2, 16, 88], strides = [1, 1, 1]} : vector<2x18x88xbf16> to vector<2x16x88xbf16>
    %69 = vector.shape_cast %68 : vector<2x16x88xbf16> to vector<32x88xbf16>
    %c2_37 = arith.constant 2 : index
    %c0_38 = arith.constant 0 : index
    %c0_39 = arith.constant 0 : index
    %70 = vector.load %arg6[%c2_37, %c0_38, %c0_39] : memref<3x88x80xbf16, #tpu.memory_space<vmem>>, vector<1x88x80xbf16>
    %71 = vector.shape_cast %70 : vector<1x88x80xbf16> to vector<88x80xbf16>
    %cst_40 = arith.constant dense<0.000000e+00> : vector<32x80xf32>
    %72 = tpu.matmul %69, %71, %cst_40 {dimension_numbers = #tpu.dot_dimension_numbers<[1], [0], [0], [1], [0, 0, 1, 1], [], []>} : vector<32x88xbf16>, vector<88x80xbf16>, vector<32x80xf32> -> vector<32x80xf32>
    %73 = arith.addf %67, %72 : vector<32x80xf32>
    %cst_41 = arith.constant dense<0.000000e+00> : vector<80xf32>
    %74 = vector.multi_reduction <add>, %73, %cst_41 [0] : vector<32x80xf32> to vector<80xf32>
    %75 = vector.shape_cast %74 : vector<80xf32> to vector<1x80xf32>
    %cst_42 = arith.constant 3.200000e+01 : f32
    %76 = vector.broadcast %cst_42 : f32 to vector<1x80xf32>
    %77 = arith.divf %75, %76 : vector<1x80xf32>
    %78 = arith.mulf %73, %73 : vector<32x80xf32>
    %cst_43 = arith.constant dense<0.000000e+00> : vector<80xf32>
    %79 = vector.multi_reduction <add>, %78, %cst_43 [0] : vector<32x80xf32> to vector<80xf32>
    %80 = vector.shape_cast %79 : vector<80xf32> to vector<1x80xf32>
    %cst_44 = arith.constant 3.200000e+01 : f32
    %81 = vector.broadcast %cst_44 : f32 to vector<1x80xf32>
    %82 = arith.divf %80, %81 : vector<1x80xf32>
    %83 = tpu.concatenate %77, %82 in 0 : vector<1x80xf32>, vector<1x80xf32> -> vector<2x80xf32>
    %c0_45 = arith.constant 0 : index
    %c0_46 = arith.constant 0 : index
    %84 = vector.load %arg7[%c0_45, %c0_46] : memref<80x4xf32, #tpu.memory_space<vmem>>, vector<80x4xf32>
    %cst_47 = arith.constant dense<0.000000e+00> : vector<2x4xf32>
    %85 = tpu.matmul %83, %84, %cst_47 {dimension_numbers = #tpu.dot_dimension_numbers<[1], [0], [0], [1], [0, 0, 1, 1], [], []>, precision = #tpu.contract_precision<fp32>} : vector<2x80xf32>, vector<80x4xf32>, vector<2x4xf32> -> vector<2x4xf32>
    %c0_48 = arith.constant 0 : index
    %c0_49 = arith.constant 0 : index
    %86 = vector.load %arg8[%c0_48, %c0_49] : memref<4x80xf32, #tpu.memory_space<vmem>>, vector<4x80xf32>
    %cst_50 = arith.constant dense<0.000000e+00> : vector<2x80xf32>
    %87 = tpu.matmul %85, %86, %cst_50 {dimension_numbers = #tpu.dot_dimension_numbers<[1], [0], [0], [1], [0, 0, 1, 1], [], []>, precision = #tpu.contract_precision<fp32>} : vector<2x4xf32>, vector<4x80xf32>, vector<2x80xf32> -> vector<2x80xf32>
    %88 = vector.extract_strided_slice %87 {offsets = [0, 0], sizes = [1, 80], strides = [1, 1]} : vector<2x80xf32> to vector<1x80xf32>
    %89 = vector.extract_strided_slice %87 {offsets = [1, 0], sizes = [1, 80], strides = [1, 1]} : vector<2x80xf32> to vector<1x80xf32>
    %90 = arith.mulf %88, %88 : vector<1x80xf32>
    %91 = arith.subf %89, %90 : vector<1x80xf32>
    %c0_51 = arith.constant 0 : index
    %c0_52 = arith.constant 0 : index
    %92 = vector.load %arg9[%c0_51, %c0_52] : memref<1x80xf32, #tpu.memory_space<vmem>>, vector<1x80xf32>
    %cst_53 = arith.constant 9.99999974E-6 : f32
    %93 = vector.broadcast %cst_53 : f32 to vector<1x80xf32>
    %94 = arith.addf %91, %93 : vector<1x80xf32>
    %95 = math.rsqrt %94 : vector<1x80xf32>
    %96 = arith.mulf %92, %95 : vector<1x80xf32>
    %c0_54 = arith.constant 0 : index
    %c0_55 = arith.constant 0 : index
    %97 = vector.load %arg10[%c0_54, %c0_55] : memref<1x80xf32, #tpu.memory_space<vmem>>, vector<1x80xf32>
    %98 = arith.mulf %88, %96 : vector<1x80xf32>
    %99 = arith.subf %97, %98 : vector<1x80xf32>
    %100 = vector.broadcast %96 : vector<1x80xf32> to vector<32x80xf32>
    %101 = arith.mulf %73, %100 : vector<32x80xf32>
    %102 = vector.broadcast %99 : vector<1x80xf32> to vector<32x80xf32>
    %103 = arith.addf %101, %102 : vector<32x80xf32>
    %cst_56 = arith.constant 0.000000e+00 : f32
    %104 = vector.broadcast %cst_56 : f32 to vector<32x80xf32>
    %105 = arith.maximumf %103, %104 : vector<32x80xf32>
    %c0_57 = arith.constant 0 : index
    %c0_58 = arith.constant 0 : index
    %106 = vector.load %arg49[%c0_57, %c0_58] : memref<32x80xf32, #tpu.memory_space<vmem>>, vector<32x80xf32>
    tpu.vector_store %arg49[%c0_57, %c0_58], %105 {strides = array<i32>} : memref<32x80xf32, #tpu.memory_space<vmem>>, vector<32x80xf32>,
    %c0_59 = arith.constant 0 : index
    %c0_60 = arith.constant 0 : index
    %107 = vector.load %arg11[%c0_59, %c0_60] : memref<16x32xf32, #tpu.memory_space<vmem>>, vector<16x32xf32>
    %cst_61 = arith.constant dense<0.000000e+00> : vector<16x80xf32>
    %108 = tpu.matmul %107, %105, %cst_61 {dimension_numbers = #tpu.dot_dimension_numbers<[1], [0], [0], [1], [0, 0, 1, 1], [], []>, precision = #tpu.contract_precision<fp32>} : vector<16x32xf32>, vector<32x80xf32>, vector<16x80xf32> -> vector<16x80xf32>
    %c0_62 = arith.constant 0 : index
    %c0_63 = arith.constant 0 : index
    %109 = vector.load %arg12[%c0_62, %c0_63] : memref<16x32xf32, #tpu.memory_space<vmem>>, vector<16x32xf32>
    %cst_64 = arith.constant dense<0.000000e+00> : vector<16x80xf32>
    %110 = tpu.matmul %109, %105, %cst_64 {dimension_numbers = #tpu.dot_dimension_numbers<[1], [0], [0], [1], [0, 0, 1, 1], [], []>, precision = #tpu.contract_precision<fp32>} : vector<16x32xf32>, vector<32x80xf32>, vector<16x80xf32> -> vector<16x80xf32>
    %111 = arith.maximumf %108, %110 : vector<16x80xf32>
    %112 = vector.shape_cast %111 : vector<16x80xf32> to vector<2x8x80xf32>
    %113 = arith.truncf %112 : vector<2x8x80xf32> to vector<2x8x80xbf16>
    %cst_65 = arith.constant 0.000000e+00 : bf16
    %114 = vector.broadcast %cst_65 : bf16 to vector<2x1x80xbf16>
    %115 = tpu.concatenate %114, %113, %114 in 1 : vector<2x1x80xbf16>, vector<2x8x80xbf16>, vector<2x1x80xbf16> -> vector<2x10x80xbf16>
    %116 = vector.extract_strided_slice %115 {offsets = [0, 0, 0], sizes = [2, 8, 80], strides = [1, 1, 1]} : vector<2x10x80xbf16> to vector<2x8x80xbf16>
    %117 = vector.shape_cast %116 : vector<2x8x80xbf16> to vector<16x80xbf16>
    %c0_66 = arith.constant 0 : index
    %c0_67 = arith.constant 0 : index
    %c0_68 = arith.constant 0 : index
    %118 = vector.load %arg13[%c0_66, %c0_67, %c0_68] : memref<3x80x144xbf16, #tpu.memory_space<vmem>>, vector<1x80x144xbf16>
    %119 = vector.shape_cast %118 : vector<1x80x144xbf16> to vector<80x144xbf16>
    %cst_69 = arith.constant dense<0.000000e+00> : vector<16x144xf32>
    %120 = tpu.matmul %117, %119, %cst_69 {dimension_numbers = #tpu.dot_dimension_numbers<[1], [0], [0], [1], [0, 0, 1, 1], [], []>} : vector<16x80xbf16>, vector<80x144xbf16>, vector<16x144xf32> -> vector<16x144xf32>
    %121 = vector.extract_strided_slice %115 {offsets = [0, 1, 0], sizes = [2, 8, 80], strides = [1, 1, 1]} : vector<2x10x80xbf16> to vector<2x8x80xbf16>
    %122 = vector.shape_cast %121 : vector<2x8x80xbf16> to vector<16x80xbf16>
    %c1_70 = arith.constant 1 : index
    %c0_71 = arith.constant 0 : index
    %c0_72 = arith.constant 0 : index
    %123 = vector.load %arg13[%c1_70, %c0_71, %c0_72] : memref<3x80x144xbf16, #tpu.memory_space<vmem>>, vector<1x80x144xbf16>
    %124 = vector.shape_cast %123 : vector<1x80x144xbf16> to vector<80x144xbf16>
    %cst_73 = arith.constant dense<0.000000e+00> : vector<16x144xf32>
    %125 = tpu.matmul %122, %124, %cst_73 {dimension_numbers = #tpu.dot_dimension_numbers<[1], [0], [0], [1], [0, 0, 1, 1], [], []>} : vector<16x80xbf16>, vector<80x144xbf16>, vector<16x144xf32> -> vector<16x144xf32>
    %126 = arith.addf %120, %125 : vector<16x144xf32>
    %127 = vector.extract_strided_slice %115 {offsets = [0, 2, 0], sizes = [2, 8, 80], strides = [1, 1, 1]} : vector<2x10x80xbf16> to vector<2x8x80xbf16>
    %128 = vector.shape_cast %127 : vector<2x8x80xbf16> to vector<16x80xbf16>
    %c2_74 = arith.constant 2 : index
    %c0_75 = arith.constant 0 : index
    %c0_76 = arith.constant 0 : index
    %129 = vector.load %arg13[%c2_74, %c0_75, %c0_76] : memref<3x80x144xbf16, #tpu.memory_space<vmem>>, vector<1x80x144xbf16>
    %130 = vector.shape_cast %129 : vector<1x80x144xbf16> to vector<80x144xbf16>
    %cst_77 = arith.constant dense<0.000000e+00> : vector<16x144xf32>
    %131 = tpu.matmul %128, %130, %cst_77 {dimension_numbers = #tpu.dot_dimension_numbers<[1], [0], [0], [1], [0, 0, 1, 1], [], []>} : vector<16x80xbf16>, vector<80x144xbf16>, vector<16x144xf32> -> vector<16x144xf32>
    %132 = arith.addf %126, %131 : vector<16x144xf32>
    %cst_78 = arith.constant dense<0.000000e+00> : vector<144xf32>
    %133 = vector.multi_reduction <add>, %132, %cst_78 [0] : vector<16x144xf32> to vector<144xf32>
    %134 = vector.shape_cast %133 : vector<144xf32> to vector<1x144xf32>
    %cst_79 = arith.constant 1.600000e+01 : f32
    %135 = vector.broadcast %cst_79 : f32 to vector<1x144xf32>
    %136 = arith.divf %134, %135 : vector<1x144xf32>
    %137 = arith.mulf %132, %132 : vector<16x144xf32>
    %cst_80 = arith.constant dense<0.000000e+00> : vector<144xf32>
    %138 = vector.multi_reduction <add>, %137, %cst_80 [0] : vector<16x144xf32> to vector<144xf32>
    %139 = vector.shape_cast %138 : vector<144xf32> to vector<1x144xf32>
    %cst_81 = arith.constant 1.600000e+01 : f32
    %140 = vector.broadcast %cst_81 : f32 to vector<1x144xf32>
    %141 = arith.divf %139, %140 : vector<1x144xf32>
    %142 = tpu.concatenate %136, %141 in 0 : vector<1x144xf32>, vector<1x144xf32> -> vector<2x144xf32>
    %c0_82 = arith.constant 0 : index
    %c0_83 = arith.constant 0 : index
    %143 = vector.load %arg14[%c0_82, %c0_83] : memref<144x8xf32, #tpu.memory_space<vmem>>, vector<144x8xf32>
    %cst_84 = arith.constant dense<0.000000e+00> : vector<2x8xf32>
    %144 = tpu.matmul %142, %143, %cst_84 {dimension_numbers = #tpu.dot_dimension_numbers<[1], [0], [0], [1], [0, 0, 1, 1], [], []>, precision = #tpu.contract_precision<fp32>} : vector<2x144xf32>, vector<144x8xf32>, vector<2x8xf32> -> vector<2x8xf32>
    %c0_85 = arith.constant 0 : index
    %c0_86 = arith.constant 0 : index
    %145 = vector.load %arg15[%c0_85, %c0_86] : memref<8x144xf32, #tpu.memory_space<vmem>>, vector<8x144xf32>
    %cst_87 = arith.constant dense<0.000000e+00> : vector<2x144xf32>
    %146 = tpu.matmul %144, %145, %cst_87 {dimension_numbers = #tpu.dot_dimension_numbers<[1], [0], [0], [1], [0, 0, 1, 1], [], []>, precision = #tpu.contract_precision<fp32>} : vector<2x8xf32>, vector<8x144xf32>, vector<2x144xf32> -> vector<2x144xf32>
    %147 = vector.extract_strided_slice %146 {offsets = [0, 0], sizes = [1, 144], strides = [1, 1]} : vector<2x144xf32> to vector<1x144xf32>
    %148 = vector.extract_strided_slice %146 {offsets = [1, 0], sizes = [1, 144], strides = [1, 1]} : vector<2x144xf32> to vector<1x144xf32>
    %149 = arith.mulf %147, %147 : vector<1x144xf32>
    %150 = arith.subf %148, %149 : vector<1x144xf32>
    %c0_88 = arith.constant 0 : index
    %c0_89 = arith.constant 0 : index
    %151 = vector.load %arg16[%c0_88, %c0_89] : memref<1x144xf32, #tpu.memory_space<vmem>>, vector<1x144xf32>
    %cst_90 = arith.constant 9.99999974E-6 : f32
    %152 = vector.broadcast %cst_90 : f32 to vector<1x144xf32>
    %153 = arith.addf %150, %152 : vector<1x144xf32>
    %154 = math.rsqrt %153 : vector<1x144xf32>
    %155 = arith.mulf %151, %154 : vector<1x144xf32>
    %c0_91 = arith.constant 0 : index
    %c0_92 = arith.constant 0 : index
    %156 = vector.load %arg17[%c0_91, %c0_92] : memref<1x144xf32, #tpu.memory_space<vmem>>, vector<1x144xf32>
    %157 = arith.mulf %147, %155 : vector<1x144xf32>
    %158 = arith.subf %156, %157 : vector<1x144xf32>
    %159 = vector.broadcast %155 : vector<1x144xf32> to vector<16x144xf32>
    %160 = arith.mulf %132, %159 : vector<16x144xf32>
    %161 = vector.broadcast %158 : vector<1x144xf32> to vector<16x144xf32>
    %162 = arith.addf %160, %161 : vector<16x144xf32>
    %cst_93 = arith.constant 0.000000e+00 : f32
    %163 = vector.broadcast %cst_93 : f32 to vector<16x144xf32>
    %164 = arith.maximumf %162, %163 : vector<16x144xf32>
    %165 = vector.shape_cast %164 : vector<16x144xf32> to vector<2x8x144xf32>
    %166 = arith.truncf %165 : vector<2x8x144xf32> to vector<2x8x144xbf16>
    %cst_94 = arith.constant 0.000000e+00 : bf16
    %167 = vector.broadcast %cst_94 : bf16 to vector<2x1x144xbf16>
    %168 = tpu.concatenate %167, %166, %167 in 1 : vector<2x1x144xbf16>, vector<2x8x144xbf16>, vector<2x1x144xbf16> -> vector<2x10x144xbf16>
    %169 = vector.extract_strided_slice %168 {offsets = [0, 0, 0], sizes = [2, 8, 144], strides = [1, 1, 1]} : vector<2x10x144xbf16> to vector<2x8x144xbf16>
    %170 = vector.shape_cast %169 : vector<2x8x144xbf16> to vector<16x144xbf16>
    %c0_95 = arith.constant 0 : index
    %c0_96 = arith.constant 0 : index
    %c0_97 = arith.constant 0 : index
    %171 = vector.load %arg18[%c0_95, %c0_96, %c0_97] : memref<3x144x128xbf16, #tpu.memory_space<vmem>>, vector<1x144x128xbf16>
    %172 = vector.shape_cast %171 : vector<1x144x128xbf16> to vector<144x128xbf16>
    %cst_98 = arith.constant dense<0.000000e+00> : vector<16x128xf32>
    %173 = tpu.matmul %170, %172, %cst_98 {dimension_numbers = #tpu.dot_dimension_numbers<[1], [0], [0], [1], [0, 0, 1, 1], [], []>} : vector<16x144xbf16>, vector<144x128xbf16>, vector<16x128xf32> -> vector<16x128xf32>
    %174 = vector.extract_strided_slice %168 {offsets = [0, 1, 0], sizes = [2, 8, 144], strides = [1, 1, 1]} : vector<2x10x144xbf16> to vector<2x8x144xbf16>
    %175 = vector.shape_cast %174 : vector<2x8x144xbf16> to vector<16x144xbf16>
    %c1_99 = arith.constant 1 : index
    %c0_100 = arith.constant 0 : index
    %c0_101 = arith.constant 0 : index
    %176 = vector.load %arg18[%c1_99, %c0_100, %c0_101] : memref<3x144x128xbf16, #tpu.memory_space<vmem>>, vector<1x144x128xbf16>
    %177 = vector.shape_cast %176 : vector<1x144x128xbf16> to vector<144x128xbf16>
    %cst_102 = arith.constant dense<0.000000e+00> : vector<16x128xf32>
    %178 = tpu.matmul %175, %177, %cst_102 {dimension_numbers = #tpu.dot_dimension_numbers<[1], [0], [0], [1], [0, 0, 1, 1], [], []>} : vector<16x144xbf16>, vector<144x128xbf16>, vector<16x128xf32> -> vector<16x128xf32>
    %179 = arith.addf %173, %178 : vector<16x128xf32>
    %180 = vector.extract_strided_slice %168 {offsets = [0, 2, 0], sizes = [2, 8, 144], strides = [1, 1, 1]} : vector<2x10x144xbf16> to vector<2x8x144xbf16>
    %181 = vector.shape_cast %180 : vector<2x8x144xbf16> to vector<16x144xbf16>
    %c2_103 = arith.constant 2 : index
    %c0_104 = arith.constant 0 : index
    %c0_105 = arith.constant 0 : index
    %182 = vector.load %arg18[%c2_103, %c0_104, %c0_105] : memref<3x144x128xbf16, #tpu.memory_space<vmem>>, vector<1x144x128xbf16>
    %183 = vector.shape_cast %182 : vector<1x144x128xbf16> to vector<144x128xbf16>
    %cst_106 = arith.constant dense<0.000000e+00> : vector<16x128xf32>
    %184 = tpu.matmul %181, %183, %cst_106 {dimension_numbers = #tpu.dot_dimension_numbers<[1], [0], [0], [1], [0, 0, 1, 1], [], []>} : vector<16x144xbf16>, vector<144x128xbf16>, vector<16x128xf32> -> vector<16x128xf32>
    %185 = arith.addf %179, %184 : vector<16x128xf32>
    %cst_107 = arith.constant dense<0.000000e+00> : vector<128xf32>
    %186 = vector.multi_reduction <add>, %185, %cst_107 [0] : vector<16x128xf32> to vector<128xf32>
    %187 = vector.shape_cast %186 : vector<128xf32> to vector<1x128xf32>
    %cst_108 = arith.constant 1.600000e+01 : f32
    %188 = vector.broadcast %cst_108 : f32 to vector<1x128xf32>
    %189 = arith.divf %187, %188 : vector<1x128xf32>
    %190 = arith.mulf %185, %185 : vector<16x128xf32>
    %cst_109 = arith.constant dense<0.000000e+00> : vector<128xf32>
    %191 = vector.multi_reduction <add>, %190, %cst_109 [0] : vector<16x128xf32> to vector<128xf32>
    %192 = vector.shape_cast %191 : vector<128xf32> to vector<1x128xf32>
    %cst_110 = arith.constant 1.600000e+01 : f32
    %193 = vector.broadcast %cst_110 : f32 to vector<1x128xf32>
    %194 = arith.divf %192, %193 : vector<1x128xf32>
    %195 = tpu.concatenate %189, %194 in 0 : vector<1x128xf32>, vector<1x128xf32> -> vector<2x128xf32>
    %c0_111 = arith.constant 0 : index
    %c0_112 = arith.constant 0 : index
    %196 = vector.load %arg19[%c0_111, %c0_112] : memref<128x8xf32, #tpu.memory_space<vmem>>, vector<128x8xf32>
    %cst_113 = arith.constant dense<0.000000e+00> : vector<2x8xf32>
    %197 = tpu.matmul %195, %196, %cst_113 {dimension_numbers = #tpu.dot_dimension_numbers<[1], [0], [0], [1], [0, 0, 1, 1], [], []>, precision = #tpu.contract_precision<fp32>} : vector<2x128xf32>, vector<128x8xf32>, vector<2x8xf32> -> vector<2x8xf32>
    %c0_114 = arith.constant 0 : index
    %c0_115 = arith.constant 0 : index
    %198 = vector.load %arg20[%c0_114, %c0_115] : memref<8x128xf32, #tpu.memory_space<vmem>>, vector<8x128xf32>
    %cst_116 = arith.constant dense<0.000000e+00> : vector<2x128xf32>
    %199 = tpu.matmul %197, %198, %cst_116 {dimension_numbers = #tpu.dot_dimension_numbers<[1], [0], [0], [1], [0, 0, 1, 1], [], []>, precision = #tpu.contract_precision<fp32>} : vector<2x8xf32>, vector<8x128xf32>, vector<2x128xf32> -> vector<2x128xf32>
    %200 = vector.extract_strided_slice %199 {offsets = [0, 0], sizes = [1, 128], strides = [1, 1]} : vector<2x128xf32> to vector<1x128xf32>
    %201 = vector.extract_strided_slice %199 {offsets = [1, 0], sizes = [1, 128], strides = [1, 1]} : vector<2x128xf32> to vector<1x128xf32>
    %202 = arith.mulf %200, %200 : vector<1x128xf32>
    %203 = arith.subf %201, %202 : vector<1x128xf32>
    %c0_117 = arith.constant 0 : index
    %c0_118 = arith.constant 0 : index
    %204 = vector.load %arg21[%c0_117, %c0_118] : memref<1x128xf32, #tpu.memory_space<vmem>>, vector<1x128xf32>
    %cst_119 = arith.constant 9.99999974E-6 : f32
    %205 = vector.broadcast %cst_119 : f32 to vector<1x128xf32>
    %206 = arith.addf %203, %205 : vector<1x128xf32>
    %207 = math.rsqrt %206 : vector<1x128xf32>
    %208 = arith.mulf %204, %207 : vector<1x128xf32>
    %c0_120 = arith.constant 0 : index
    %c0_121 = arith.constant 0 : index
    %209 = vector.load %arg22[%c0_120, %c0_121] : memref<1x128xf32, #tpu.memory_space<vmem>>, vector<1x128xf32>
    %210 = arith.mulf %200, %208 : vector<1x128xf32>
    %211 = arith.subf %209, %210 : vector<1x128xf32>
    %212 = vector.broadcast %208 : vector<1x128xf32> to vector<16x128xf32>
    %213 = arith.mulf %185, %212 : vector<16x128xf32>
    %214 = vector.broadcast %211 : vector<1x128xf32> to vector<16x128xf32>
    %215 = arith.addf %213, %214 : vector<16x128xf32>
    %cst_122 = arith.constant 0.000000e+00 : f32
    %216 = vector.broadcast %cst_122 : f32 to vector<16x128xf32>
    %217 = arith.maximumf %215, %216 : vector<16x128xf32>
    %c0_123 = arith.constant 0 : index
    %c0_124 = arith.constant 0 : index
    %218 = vector.load %arg50[%c0_123, %c0_124] : memref<16x128xf32, #tpu.memory_space<vmem>>, vector<16x128xf32>
    tpu.vector_store %arg50[%c0_123, %c0_124], %217 {strides = array<i32>} : memref<16x128xf32, #tpu.memory_space<vmem>>, vector<16x128xf32>,
    %c0_125 = arith.constant 0 : index
    %c0_126 = arith.constant 0 : index
    %219 = vector.load %arg23[%c0_125, %c0_126] : memref<8x16xf32, #tpu.memory_space<vmem>>, vector<8x16xf32>
    %cst_127 = arith.constant dense<0.000000e+00> : vector<8x128xf32>
    %220 = tpu.matmul %219, %217, %cst_127 {dimension_numbers = #tpu.dot_dimension_numbers<[1], [0], [0], [1], [0, 0, 1, 1], [], []>, precision = #tpu.contract_precision<fp32>} : vector<8x16xf32>, vector<16x128xf32>, vector<8x128xf32> -> vector<8x128xf32>
    %c0_128 = arith.constant 0 : index
    %c0_129 = arith.constant 0 : index
    %221 = vector.load %arg24[%c0_128, %c0_129] : memref<8x16xf32, #tpu.memory_space<vmem>>, vector<8x16xf32>
    %cst_130 = arith.constant dense<0.000000e+00> : vector<8x128xf32>
    %222 = tpu.matmul %221, %217, %cst_130 {dimension_numbers = #tpu.dot_dimension_numbers<[1], [0], [0], [1], [0, 0, 1, 1], [], []>, precision = #tpu.contract_precision<fp32>} : vector<8x16xf32>, vector<16x128xf32>, vector<8x128xf32> -> vector<8x128xf32>
    %223 = arith.maximumf %220, %222 : vector<8x128xf32>
    %224 = vector.shape_cast %223 : vector<8x128xf32> to vector<2x4x128xf32>
    %225 = arith.truncf %224 : vector<2x4x128xf32> to vector<2x4x128xbf16>
    %cst_131 = arith.constant 0.000000e+00 : bf16
    %226 = vector.broadcast %cst_131 : bf16 to vector<2x1x128xbf16>
    %227 = tpu.concatenate %226, %225, %226 in 1 : vector<2x1x128xbf16>, vector<2x4x128xbf16>, vector<2x1x128xbf16> -> vector<2x6x128xbf16>
    %228 = vector.extract_strided_slice %227 {offsets = [0, 0, 0], sizes = [2, 4, 128], strides = [1, 1, 1]} : vector<2x6x128xbf16> to vector<2x4x128xbf16>
    %229 = vector.shape_cast %228 : vector<2x4x128xbf16> to vector<8x128xbf16>
    %c0_132 = arith.constant 0 : index
    %c0_133 = arith.constant 0 : index
    %c0_134 = arith.constant 0 : index
    %230 = vector.load %arg25[%c0_132, %c0_133, %c0_134] : memref<3x128x224xbf16, #tpu.memory_space<vmem>>, vector<1x128x224xbf16>
    %231 = vector.shape_cast %230 : vector<1x128x224xbf16> to vector<128x224xbf16>
    %cst_135 = arith.constant dense<0.000000e+00> : vector<8x224xf32>
    %232 = tpu.matmul %229, %231, %cst_135 {dimension_numbers = #tpu.dot_dimension_numbers<[1], [0], [0], [1], [0, 0, 1, 1], [], []>} : vector<8x128xbf16>, vector<128x224xbf16>, vector<8x224xf32> -> vector<8x224xf32>
    %233 = vector.extract_strided_slice %227 {offsets = [0, 1, 0], sizes = [2, 4, 128], strides = [1, 1, 1]} : vector<2x6x128xbf16> to vector<2x4x128xbf16>
    %234 = vector.shape_cast %233 : vector<2x4x128xbf16> to vector<8x128xbf16>
    %c1_136 = arith.constant 1 : index
    %c0_137 = arith.constant 0 : index
    %c0_138 = arith.constant 0 : index
    %235 = vector.load %arg25[%c1_136, %c0_137, %c0_138] : memref<3x128x224xbf16, #tpu.memory_space<vmem>>, vector<1x128x224xbf16>
    %236 = vector.shape_cast %235 : vector<1x128x224xbf16> to vector<128x224xbf16>
    %cst_139 = arith.constant dense<0.000000e+00> : vector<8x224xf32>
    %237 = tpu.matmul %234, %236, %cst_139 {dimension_numbers = #tpu.dot_dimension_numbers<[1], [0], [0], [1], [0, 0, 1, 1], [], []>} : vector<8x128xbf16>, vector<128x224xbf16>, vector<8x224xf32> -> vector<8x224xf32>
    %238 = arith.addf %232, %237 : vector<8x224xf32>
    %239 = vector.extract_strided_slice %227 {offsets = [0, 2, 0], sizes = [2, 4, 128], strides = [1, 1, 1]} : vector<2x6x128xbf16> to vector<2x4x128xbf16>
    %240 = vector.shape_cast %239 : vector<2x4x128xbf16> to vector<8x128xbf16>
    %c2_140 = arith.constant 2 : index
    %c0_141 = arith.constant 0 : index
    %c0_142 = arith.constant 0 : index
    %241 = vector.load %arg25[%c2_140, %c0_141, %c0_142] : memref<3x128x224xbf16, #tpu.memory_space<vmem>>, vector<1x128x224xbf16>
    %242 = vector.shape_cast %241 : vector<1x128x224xbf16> to vector<128x224xbf16>
    %cst_143 = arith.constant dense<0.000000e+00> : vector<8x224xf32>
    %243 = tpu.matmul %240, %242, %cst_143 {dimension_numbers = #tpu.dot_dimension_numbers<[1], [0], [0], [1], [0, 0, 1, 1], [], []>} : vector<8x128xbf16>, vector<128x224xbf16>, vector<8x224xf32> -> vector<8x224xf32>
    %244 = arith.addf %238, %243 : vector<8x224xf32>
    %cst_144 = arith.constant dense<0.000000e+00> : vector<224xf32>
    %245 = vector.multi_reduction <add>, %244, %cst_144 [0] : vector<8x224xf32> to vector<224xf32>
    %246 = vector.shape_cast %245 : vector<224xf32> to vector<1x224xf32>
    %cst_145 = arith.constant 8.000000e+00 : f32
    %247 = vector.broadcast %cst_145 : f32 to vector<1x224xf32>
    %248 = arith.divf %246, %247 : vector<1x224xf32>
    %249 = arith.mulf %244, %244 : vector<8x224xf32>
    %cst_146 = arith.constant dense<0.000000e+00> : vector<224xf32>
    %250 = vector.multi_reduction <add>, %249, %cst_146 [0] : vector<8x224xf32> to vector<224xf32>
    %251 = vector.shape_cast %250 : vector<224xf32> to vector<1x224xf32>
    %cst_147 = arith.constant 8.000000e+00 : f32
    %252 = vector.broadcast %cst_147 : f32 to vector<1x224xf32>
    %253 = arith.divf %251, %252 : vector<1x224xf32>
    %254 = tpu.concatenate %248, %253 in 0 : vector<1x224xf32>, vector<1x224xf32> -> vector<2x224xf32>
    %c0_148 = arith.constant 0 : index
    %c0_149 = arith.constant 0 : index
    %255 = vector.load %arg26[%c0_148, %c0_149] : memref<224x16xf32, #tpu.memory_space<vmem>>, vector<224x16xf32>
    %cst_150 = arith.constant dense<0.000000e+00> : vector<2x16xf32>
    %256 = tpu.matmul %254, %255, %cst_150 {dimension_numbers = #tpu.dot_dimension_numbers<[1], [0], [0], [1], [0, 0, 1, 1], [], []>, precision = #tpu.contract_precision<fp32>} : vector<2x224xf32>, vector<224x16xf32>, vector<2x16xf32> -> vector<2x16xf32>
    %c0_151 = arith.constant 0 : index
    %c0_152 = arith.constant 0 : index
    %257 = vector.load %arg27[%c0_151, %c0_152] : memref<16x224xf32, #tpu.memory_space<vmem>>, vector<16x224xf32>
    %cst_153 = arith.constant dense<0.000000e+00> : vector<2x224xf32>
    %258 = tpu.matmul %256, %257, %cst_153 {dimension_numbers = #tpu.dot_dimension_numbers<[1], [0], [0], [1], [0, 0, 1, 1], [], []>, precision = #tpu.contract_precision<fp32>} : vector<2x16xf32>, vector<16x224xf32>, vector<2x224xf32> -> vector<2x224xf32>
    %259 = vector.extract_strided_slice %258 {offsets = [0, 0], sizes = [1, 224], strides = [1, 1]} : vector<2x224xf32> to vector<1x224xf32>
    %260 = vector.extract_strided_slice %258 {offsets = [1, 0], sizes = [1, 224], strides = [1, 1]} : vector<2x224xf32> to vector<1x224xf32>
    %261 = arith.mulf %259, %259 : vector<1x224xf32>
    %262 = arith.subf %260, %261 : vector<1x224xf32>
    %c0_154 = arith.constant 0 : index
    %c0_155 = arith.constant 0 : index
    %263 = vector.load %arg28[%c0_154, %c0_155] : memref<1x224xf32, #tpu.memory_space<vmem>>, vector<1x224xf32>
    %cst_156 = arith.constant 9.99999974E-6 : f32
    %264 = vector.broadcast %cst_156 : f32 to vector<1x224xf32>
    %265 = arith.addf %262, %264 : vector<1x224xf32>
    %266 = math.rsqrt %265 : vector<1x224xf32>
    %267 = arith.mulf %263, %266 : vector<1x224xf32>
    %c0_157 = arith.constant 0 : index
    %c0_158 = arith.constant 0 : index
    %268 = vector.load %arg29[%c0_157, %c0_158] : memref<1x224xf32, #tpu.memory_space<vmem>>, vector<1x224xf32>
    %269 = arith.mulf %259, %267 : vector<1x224xf32>
    %270 = arith.subf %268, %269 : vector<1x224xf32>
    %271 = vector.broadcast %267 : vector<1x224xf32> to vector<8x224xf32>
    %272 = arith.mulf %244, %271 : vector<8x224xf32>
    %273 = vector.broadcast %270 : vector<1x224xf32> to vector<8x224xf32>
    %274 = arith.addf %272, %273 : vector<8x224xf32>
    %cst_159 = arith.constant 0.000000e+00 : f32
    %275 = vector.broadcast %cst_159 : f32 to vector<8x224xf32>
    %276 = arith.maximumf %274, %275 : vector<8x224xf32>
    %277 = vector.shape_cast %276 : vector<8x224xf32> to vector<2x4x224xf32>
    %278 = arith.truncf %277 : vector<2x4x224xf32> to vector<2x4x224xbf16>
    %cst_160 = arith.constant 0.000000e+00 : bf16
    %279 = vector.broadcast %cst_160 : bf16 to vector<2x1x224xbf16>
    %280 = tpu.concatenate %279, %278, %279 in 1 : vector<2x1x224xbf16>, vector<2x4x224xbf16>, vector<2x1x224xbf16> -> vector<2x6x224xbf16>
    %281 = vector.extract_strided_slice %280 {offsets = [0, 0, 0], sizes = [2, 4, 224], strides = [1, 1, 1]} : vector<2x6x224xbf16> to vector<2x4x224xbf16>
    %282 = vector.shape_cast %281 : vector<2x4x224xbf16> to vector<8x224xbf16>
    %c0_161 = arith.constant 0 : index
    %c0_162 = arith.constant 0 : index
    %c0_163 = arith.constant 0 : index
    %283 = vector.load %arg30[%c0_161, %c0_162, %c0_163] : memref<3x224x192xbf16, #tpu.memory_space<vmem>>, vector<1x224x192xbf16>
    %284 = vector.shape_cast %283 : vector<1x224x192xbf16> to vector<224x192xbf16>
    %cst_164 = arith.constant dense<0.000000e+00> : vector<8x192xf32>
    %285 = tpu.matmul %282, %284, %cst_164 {dimension_numbers = #tpu.dot_dimension_numbers<[1], [0], [0], [1], [0, 0, 1, 1], [], []>} : vector<8x224xbf16>, vector<224x192xbf16>, vector<8x192xf32> -> vector<8x192xf32>
    %286 = vector.extract_strided_slice %280 {offsets = [0, 1, 0], sizes = [2, 4, 224], strides = [1, 1, 1]} : vector<2x6x224xbf16> to vector<2x4x224xbf16>
    %287 = vector.shape_cast %286 : vector<2x4x224xbf16> to vector<8x224xbf16>
    %c1_165 = arith.constant 1 : index
    %c0_166 = arith.constant 0 : index
    %c0_167 = arith.constant 0 : index
    %288 = vector.load %arg30[%c1_165, %c0_166, %c0_167] : memref<3x224x192xbf16, #tpu.memory_space<vmem>>, vector<1x224x192xbf16>
    %289 = vector.shape_cast %288 : vector<1x224x192xbf16> to vector<224x192xbf16>
    %cst_168 = arith.constant dense<0.000000e+00> : vector<8x192xf32>
    %290 = tpu.matmul %287, %289, %cst_168 {dimension_numbers = #tpu.dot_dimension_numbers<[1], [0], [0], [1], [0, 0, 1, 1], [], []>} : vector<8x224xbf16>, vector<224x192xbf16>, vector<8x192xf32> -> vector<8x192xf32>
    %291 = arith.addf %285, %290 : vector<8x192xf32>
    %292 = vector.extract_strided_slice %280 {offsets = [0, 2, 0], sizes = [2, 4, 224], strides = [1, 1, 1]} : vector<2x6x224xbf16> to vector<2x4x224xbf16>
    %293 = vector.shape_cast %292 : vector<2x4x224xbf16> to vector<8x224xbf16>
    %c2_169 = arith.constant 2 : index
    %c0_170 = arith.constant 0 : index
    %c0_171 = arith.constant 0 : index
    %294 = vector.load %arg30[%c2_169, %c0_170, %c0_171] : memref<3x224x192xbf16, #tpu.memory_space<vmem>>, vector<1x224x192xbf16>
    %295 = vector.shape_cast %294 : vector<1x224x192xbf16> to vector<224x192xbf16>
    %cst_172 = arith.constant dense<0.000000e+00> : vector<8x192xf32>
    %296 = tpu.matmul %293, %295, %cst_172 {dimension_numbers = #tpu.dot_dimension_numbers<[1], [0], [0], [1], [0, 0, 1, 1], [], []>} : vector<8x224xbf16>, vector<224x192xbf16>, vector<8x192xf32> -> vector<8x192xf32>
    %297 = arith.addf %291, %296 : vector<8x192xf32>
    %cst_173 = arith.constant dense<0.000000e+00> : vector<192xf32>
    %298 = vector.multi_reduction <add>, %297, %cst_173 [0] : vector<8x192xf32> to vector<192xf32>
    %299 = vector.shape_cast %298 : vector<192xf32> to vector<1x192xf32>
    %cst_174 = arith.constant 8.000000e+00 : f32
    %300 = vector.broadcast %cst_174 : f32 to vector<1x192xf32>
    %301 = arith.divf %299, %300 : vector<1x192xf32>
    %302 = arith.mulf %297, %297 : vector<8x192xf32>
    %cst_175 = arith.constant dense<0.000000e+00> : vector<192xf32>
    %303 = vector.multi_reduction <add>, %302, %cst_175 [0] : vector<8x192xf32> to vector<192xf32>
    %304 = vector.shape_cast %303 : vector<192xf32> to vector<1x192xf32>
    %cst_176 = arith.constant 8.000000e+00 : f32
    %305 = vector.broadcast %cst_176 : f32 to vector<1x192xf32>
    %306 = arith.divf %304, %305 : vector<1x192xf32>
    %307 = tpu.concatenate %301, %306 in 0 : vector<1x192xf32>, vector<1x192xf32> -> vector<2x192xf32>
    %c0_177 = arith.constant 0 : index
    %c0_178 = arith.constant 0 : index
    %308 = vector.load %arg31[%c0_177, %c0_178] : memref<192x16xf32, #tpu.memory_space<vmem>>, vector<192x16xf32>
    %cst_179 = arith.constant dense<0.000000e+00> : vector<2x16xf32>
    %309 = tpu.matmul %307, %308, %cst_179 {dimension_numbers = #tpu.dot_dimension_numbers<[1], [0], [0], [1], [0, 0, 1, 1], [], []>, precision = #tpu.contract_precision<fp32>} : vector<2x192xf32>, vector<192x16xf32>, vector<2x16xf32> -> vector<2x16xf32>
    %c0_180 = arith.constant 0 : index
    %c0_181 = arith.constant 0 : index
    %310 = vector.load %arg32[%c0_180, %c0_181] : memref<16x192xf32, #tpu.memory_space<vmem>>, vector<16x192xf32>
    %cst_182 = arith.constant dense<0.000000e+00> : vector<2x192xf32>
    %311 = tpu.matmul %309, %310, %cst_182 {dimension_numbers = #tpu.dot_dimension_numbers<[1], [0], [0], [1], [0, 0, 1, 1], [], []>, precision = #tpu.contract_precision<fp32>} : vector<2x16xf32>, vector<16x192xf32>, vector<2x192xf32> -> vector<2x192xf32>
    %312 = vector.extract_strided_slice %311 {offsets = [0, 0], sizes = [1, 192], strides = [1, 1]} : vector<2x192xf32> to vector<1x192xf32>
    %313 = vector.extract_strided_slice %311 {offsets = [1, 0], sizes = [1, 192], strides = [1, 1]} : vector<2x192xf32> to vector<1x192xf32>
    %314 = arith.mulf %312, %312 : vector<1x192xf32>
    %315 = arith.subf %313, %314 : vector<1x192xf32>
    %c0_183 = arith.constant 0 : index
    %c0_184 = arith.constant 0 : index
    %316 = vector.load %arg33[%c0_183, %c0_184] : memref<1x192xf32, #tpu.memory_space<vmem>>, vector<1x192xf32>
    %cst_185 = arith.constant 9.99999974E-6 : f32
    %317 = vector.broadcast %cst_185 : f32 to vector<1x192xf32>
    %318 = arith.addf %315, %317 : vector<1x192xf32>
    %319 = math.rsqrt %318 : vector<1x192xf32>
    %320 = arith.mulf %316, %319 : vector<1x192xf32>
    %c0_186 = arith.constant 0 : index
    %c0_187 = arith.constant 0 : index
    %321 = vector.load %arg34[%c0_186, %c0_187] : memref<1x192xf32, #tpu.memory_space<vmem>>, vector<1x192xf32>
    %322 = arith.mulf %312, %320 : vector<1x192xf32>
    %323 = arith.subf %321, %322 : vector<1x192xf32>
    %324 = vector.broadcast %320 : vector<1x192xf32> to vector<8x192xf32>
    %325 = arith.mulf %297, %324 : vector<8x192xf32>
    %326 = vector.broadcast %323 : vector<1x192xf32> to vector<8x192xf32>
    %327 = arith.addf %325, %326 : vector<8x192xf32>
    %cst_188 = arith.constant 0.000000e+00 : f32
    %328 = vector.broadcast %cst_188 : f32 to vector<8x192xf32>
    %329 = arith.maximumf %327, %328 : vector<8x192xf32>
    %c0_189 = arith.constant 0 : index
    %c0_190 = arith.constant 0 : index
    %330 = vector.load %arg51[%c0_189, %c0_190] : memref<8x192xf32, #tpu.memory_space<vmem>>, vector<8x192xf32>
    tpu.vector_store %arg51[%c0_189, %c0_190], %329 {strides = array<i32>} : memref<8x192xf32, #tpu.memory_space<vmem>>, vector<8x192xf32>,
    %c0_191 = arith.constant 0 : index
    %c0_192 = arith.constant 0 : index
    %331 = vector.load %arg35[%c0_191, %c0_192] : memref<4x8xf32, #tpu.memory_space<vmem>>, vector<4x8xf32>
    %cst_193 = arith.constant dense<0.000000e+00> : vector<4x192xf32>
    %332 = tpu.matmul %331, %329, %cst_193 {dimension_numbers = #tpu.dot_dimension_numbers<[1], [0], [0], [1], [0, 0, 1, 1], [], []>, precision = #tpu.contract_precision<fp32>} : vector<4x8xf32>, vector<8x192xf32>, vector<4x192xf32> -> vector<4x192xf32>
    %c0_194 = arith.constant 0 : index
    %c0_195 = arith.constant 0 : index
    %333 = vector.load %arg36[%c0_194, %c0_195] : memref<4x8xf32, #tpu.memory_space<vmem>>, vector<4x8xf32>
    %cst_196 = arith.constant dense<0.000000e+00> : vector<4x192xf32>
    %334 = tpu.matmul %333, %329, %cst_196 {dimension_numbers = #tpu.dot_dimension_numbers<[1], [0], [0], [1], [0, 0, 1, 1], [], []>, precision = #tpu.contract_precision<fp32>} : vector<4x8xf32>, vector<8x192xf32>, vector<4x192xf32> -> vector<4x192xf32>
    %335 = arith.maximumf %332, %334 : vector<4x192xf32>
    %336 = vector.shape_cast %335 : vector<4x192xf32> to vector<2x2x192xf32>
    %337 = arith.truncf %336 : vector<2x2x192xf32> to vector<2x2x192xbf16>
    %cst_197 = arith.constant 0.000000e+00 : bf16
    %338 = vector.broadcast %cst_197 : bf16 to vector<2x1x192xbf16>
    %339 = tpu.concatenate %338, %337, %338 in 1 : vector<2x1x192xbf16>, vector<2x2x192xbf16>, vector<2x1x192xbf16> -> vector<2x4x192xbf16>
    %340 = vector.extract_strided_slice %339 {offsets = [0, 0, 0], sizes = [2, 2, 192], strides = [1, 1, 1]} : vector<2x4x192xbf16> to vector<2x2x192xbf16>
    %341 = vector.shape_cast %340 : vector<2x2x192xbf16> to vector<4x192xbf16>
    %c0_198 = arith.constant 0 : index
    %c0_199 = arith.constant 0 : index
    %c0_200 = arith.constant 0 : index
    %342 = vector.load %arg37[%c0_198, %c0_199, %c0_200] : memref<3x192x320xbf16, #tpu.memory_space<vmem>>, vector<1x192x320xbf16>
    %343 = vector.shape_cast %342 : vector<1x192x320xbf16> to vector<192x320xbf16>
    %cst_201 = arith.constant dense<0.000000e+00> : vector<4x320xf32>
    %344 = tpu.matmul %341, %343, %cst_201 {dimension_numbers = #tpu.dot_dimension_numbers<[1], [0], [0], [1], [0, 0, 1, 1], [], []>} : vector<4x192xbf16>, vector<192x320xbf16>, vector<4x320xf32> -> vector<4x320xf32>
    %345 = vector.extract_strided_slice %339 {offsets = [0, 1, 0], sizes = [2, 2, 192], strides = [1, 1, 1]} : vector<2x4x192xbf16> to vector<2x2x192xbf16>
    %346 = vector.shape_cast %345 : vector<2x2x192xbf16> to vector<4x192xbf16>
    %c1_202 = arith.constant 1 : index
    %c0_203 = arith.constant 0 : index
    %c0_204 = arith.constant 0 : index
    %347 = vector.load %arg37[%c1_202, %c0_203, %c0_204] : memref<3x192x320xbf16, #tpu.memory_space<vmem>>, vector<1x192x320xbf16>
    %348 = vector.shape_cast %347 : vector<1x192x320xbf16> to vector<192x320xbf16>
    %cst_205 = arith.constant dense<0.000000e+00> : vector<4x320xf32>
    %349 = tpu.matmul %346, %348, %cst_205 {dimension_numbers = #tpu.dot_dimension_numbers<[1], [0], [0], [1], [0, 0, 1, 1], [], []>} : vector<4x192xbf16>, vector<192x320xbf16>, vector<4x320xf32> -> vector<4x320xf32>
    %350 = arith.addf %344, %349 : vector<4x320xf32>
    %351 = vector.extract_strided_slice %339 {offsets = [0, 2, 0], sizes = [2, 2, 192], strides = [1, 1, 1]} : vector<2x4x192xbf16> to vector<2x2x192xbf16>
    %352 = vector.shape_cast %351 : vector<2x2x192xbf16> to vector<4x192xbf16>
    %c2_206 = arith.constant 2 : index
    %c0_207 = arith.constant 0 : index
    %c0_208 = arith.constant 0 : index
    %353 = vector.load %arg37[%c2_206, %c0_207, %c0_208] : memref<3x192x320xbf16, #tpu.memory_space<vmem>>, vector<1x192x320xbf16>
    %354 = vector.shape_cast %353 : vector<1x192x320xbf16> to vector<192x320xbf16>
    %cst_209 = arith.constant dense<0.000000e+00> : vector<4x320xf32>
    %355 = tpu.matmul %352, %354, %cst_209 {dimension_numbers = #tpu.dot_dimension_numbers<[1], [0], [0], [1], [0, 0, 1, 1], [], []>} : vector<4x192xbf16>, vector<192x320xbf16>, vector<4x320xf32> -> vector<4x320xf32>
    %356 = arith.addf %350, %355 : vector<4x320xf32>
    %cst_210 = arith.constant dense<0.000000e+00> : vector<320xf32>
    %357 = vector.multi_reduction <add>, %356, %cst_210 [0] : vector<4x320xf32> to vector<320xf32>
    %358 = vector.shape_cast %357 : vector<320xf32> to vector<1x320xf32>
    %cst_211 = arith.constant 4.000000e+00 : f32
    %359 = vector.broadcast %cst_211 : f32 to vector<1x320xf32>
    %360 = arith.divf %358, %359 : vector<1x320xf32>
    %361 = arith.mulf %356, %356 : vector<4x320xf32>
    %cst_212 = arith.constant dense<0.000000e+00> : vector<320xf32>
    %362 = vector.multi_reduction <add>, %361, %cst_212 [0] : vector<4x320xf32> to vector<320xf32>
    %363 = vector.shape_cast %362 : vector<320xf32> to vector<1x320xf32>
    %cst_213 = arith.constant 4.000000e+00 : f32
    %364 = vector.broadcast %cst_213 : f32 to vector<1x320xf32>
    %365 = arith.divf %363, %364 : vector<1x320xf32>
    %366 = tpu.concatenate %360, %365 in 0 : vector<1x320xf32>, vector<1x320xf32> -> vector<2x320xf32>
    %c0_214 = arith.constant 0 : index
    %c0_215 = arith.constant 0 : index
    %367 = vector.load %arg38[%c0_214, %c0_215] : memref<320x32xf32, #tpu.memory_space<vmem>>, vector<320x32xf32>
    %cst_216 = arith.constant dense<0.000000e+00> : vector<2x32xf32>
    %368 = tpu.matmul %366, %367, %cst_216 {dimension_numbers = #tpu.dot_dimension_numbers<[1], [0], [0], [1], [0, 0, 1, 1], [], []>, precision = #tpu.contract_precision<fp32>} : vector<2x320xf32>, vector<320x32xf32>, vector<2x32xf32> -> vector<2x32xf32>
    %c0_217 = arith.constant 0 : index
    %c0_218 = arith.constant 0 : index
    %369 = vector.load %arg39[%c0_217, %c0_218] : memref<32x320xf32, #tpu.memory_space<vmem>>, vector<32x320xf32>
    %cst_219 = arith.constant dense<0.000000e+00> : vector<2x320xf32>
    %370 = tpu.matmul %368, %369, %cst_219 {dimension_numbers = #tpu.dot_dimension_numbers<[1], [0], [0], [1], [0, 0, 1, 1], [], []>, precision = #tpu.contract_precision<fp32>} : vector<2x32xf32>, vector<32x320xf32>, vector<2x320xf32> -> vector<2x320xf32>
    %371 = vector.extract_strided_slice %370 {offsets = [0, 0], sizes = [1, 320], strides = [1, 1]} : vector<2x320xf32> to vector<1x320xf32>
    %372 = vector.extract_strided_slice %370 {offsets = [1, 0], sizes = [1, 320], strides = [1, 1]} : vector<2x320xf32> to vector<1x320xf32>
    %373 = arith.mulf %371, %371 : vector<1x320xf32>
    %374 = arith.subf %372, %373 : vector<1x320xf32>
    %c0_220 = arith.constant 0 : index
    %c0_221 = arith.constant 0 : index
    %375 = vector.load %arg40[%c0_220, %c0_221] : memref<1x320xf32, #tpu.memory_space<vmem>>, vector<1x320xf32>
    %cst_222 = arith.constant 9.99999974E-6 : f32
    %376 = vector.broadcast %cst_222 : f32 to vector<1x320xf32>
    %377 = arith.addf %374, %376 : vector<1x320xf32>
    %378 = math.rsqrt %377 : vector<1x320xf32>
    %379 = arith.mulf %375, %378 : vector<1x320xf32>
    %c0_223 = arith.constant 0 : index
    %c0_224 = arith.constant 0 : index
    %380 = vector.load %arg41[%c0_223, %c0_224] : memref<1x320xf32, #tpu.memory_space<vmem>>, vector<1x320xf32>
    %381 = arith.mulf %371, %379 : vector<1x320xf32>
    %382 = arith.subf %380, %381 : vector<1x320xf32>
    %383 = vector.broadcast %379 : vector<1x320xf32> to vector<4x320xf32>
    %384 = arith.mulf %356, %383 : vector<4x320xf32>
    %385 = vector.broadcast %382 : vector<1x320xf32> to vector<4x320xf32>
    %386 = arith.addf %384, %385 : vector<4x320xf32>
    %cst_225 = arith.constant 0.000000e+00 : f32
    %387 = vector.broadcast %cst_225 : f32 to vector<4x320xf32>
    %388 = arith.maximumf %386, %387 : vector<4x320xf32>
    %389 = vector.shape_cast %388 : vector<4x320xf32> to vector<2x2x320xf32>
    %390 = arith.truncf %389 : vector<2x2x320xf32> to vector<2x2x320xbf16>
    %cst_226 = arith.constant 0.000000e+00 : bf16
    %391 = vector.broadcast %cst_226 : bf16 to vector<2x1x320xbf16>
    %392 = tpu.concatenate %391, %390, %391 in 1 : vector<2x1x320xbf16>, vector<2x2x320xbf16>, vector<2x1x320xbf16> -> vector<2x4x320xbf16>
    %393 = vector.extract_strided_slice %392 {offsets = [0, 0, 0], sizes = [2, 2, 320], strides = [1, 1, 1]} : vector<2x4x320xbf16> to vector<2x2x320xbf16>
    %394 = vector.shape_cast %393 : vector<2x2x320xbf16> to vector<4x320xbf16>
    %c0_227 = arith.constant 0 : index
    %c0_228 = arith.constant 0 : index
    %c0_229 = arith.constant 0 : index
    %395 = vector.load %arg42[%c0_227, %c0_228, %c0_229] : memref<3x320x256xbf16, #tpu.memory_space<vmem>>, vector<1x320x256xbf16>
    %396 = vector.shape_cast %395 : vector<1x320x256xbf16> to vector<320x256xbf16>
    %cst_230 = arith.constant dense<0.000000e+00> : vector<4x256xf32>
    %397 = tpu.matmul %394, %396, %cst_230 {dimension_numbers = #tpu.dot_dimension_numbers<[1], [0], [0], [1], [0, 0, 1, 1], [], []>} : vector<4x320xbf16>, vector<320x256xbf16>, vector<4x256xf32> -> vector<4x256xf32>
    %398 = vector.extract_strided_slice %392 {offsets = [0, 1, 0], sizes = [2, 2, 320], strides = [1, 1, 1]} : vector<2x4x320xbf16> to vector<2x2x320xbf16>
    %399 = vector.shape_cast %398 : vector<2x2x320xbf16> to vector<4x320xbf16>
    %c1_231 = arith.constant 1 : index
    %c0_232 = arith.constant 0 : index
    %c0_233 = arith.constant 0 : index
    %400 = vector.load %arg42[%c1_231, %c0_232, %c0_233] : memref<3x320x256xbf16, #tpu.memory_space<vmem>>, vector<1x320x256xbf16>
    %401 = vector.shape_cast %400 : vector<1x320x256xbf16> to vector<320x256xbf16>
    %cst_234 = arith.constant dense<0.000000e+00> : vector<4x256xf32>
    %402 = tpu.matmul %399, %401, %cst_234 {dimension_numbers = #tpu.dot_dimension_numbers<[1], [0], [0], [1], [0, 0, 1, 1], [], []>} : vector<4x320xbf16>, vector<320x256xbf16>, vector<4x256xf32> -> vector<4x256xf32>
    %403 = arith.addf %397, %402 : vector<4x256xf32>
    %404 = vector.extract_strided_slice %392 {offsets = [0, 2, 0], sizes = [2, 2, 320], strides = [1, 1, 1]} : vector<2x4x320xbf16> to vector<2x2x320xbf16>
    %405 = vector.shape_cast %404 : vector<2x2x320xbf16> to vector<4x320xbf16>
    %c2_235 = arith.constant 2 : index
    %c0_236 = arith.constant 0 : index
    %c0_237 = arith.constant 0 : index
    %406 = vector.load %arg42[%c2_235, %c0_236, %c0_237] : memref<3x320x256xbf16, #tpu.memory_space<vmem>>, vector<1x320x256xbf16>
    %407 = vector.shape_cast %406 : vector<1x320x256xbf16> to vector<320x256xbf16>
    %cst_238 = arith.constant dense<0.000000e+00> : vector<4x256xf32>
    %408 = tpu.matmul %405, %407, %cst_238 {dimension_numbers = #tpu.dot_dimension_numbers<[1], [0], [0], [1], [0, 0, 1, 1], [], []>} : vector<4x320xbf16>, vector<320x256xbf16>, vector<4x256xf32> -> vector<4x256xf32>
    %409 = arith.addf %403, %408 : vector<4x256xf32>
    %cst_239 = arith.constant dense<0.000000e+00> : vector<256xf32>
    %410 = vector.multi_reduction <add>, %409, %cst_239 [0] : vector<4x256xf32> to vector<256xf32>
    %411 = vector.shape_cast %410 : vector<256xf32> to vector<1x256xf32>
    %cst_240 = arith.constant 4.000000e+00 : f32
    %412 = vector.broadcast %cst_240 : f32 to vector<1x256xf32>
    %413 = arith.divf %411, %412 : vector<1x256xf32>
    %414 = arith.mulf %409, %409 : vector<4x256xf32>
    %cst_241 = arith.constant dense<0.000000e+00> : vector<256xf32>
    %415 = vector.multi_reduction <add>, %414, %cst_241 [0] : vector<4x256xf32> to vector<256xf32>
    %416 = vector.shape_cast %415 : vector<256xf32> to vector<1x256xf32>
    %cst_242 = arith.constant 4.000000e+00 : f32
    %417 = vector.broadcast %cst_242 : f32 to vector<1x256xf32>
    %418 = arith.divf %416, %417 : vector<1x256xf32>
    %419 = tpu.concatenate %413, %418 in 0 : vector<1x256xf32>, vector<1x256xf32> -> vector<2x256xf32>
    %c0_243 = arith.constant 0 : index
    %c0_244 = arith.constant 0 : index
    %420 = vector.load %arg43[%c0_243, %c0_244] : memref<256x32xf32, #tpu.memory_space<vmem>>, vector<256x32xf32>
    %cst_245 = arith.constant dense<0.000000e+00> : vector<2x32xf32>
    %421 = tpu.matmul %419, %420, %cst_245 {dimension_numbers = #tpu.dot_dimension_numbers<[1], [0], [0], [1], [0, 0, 1, 1], [], []>, precision = #tpu.contract_precision<fp32>} : vector<2x256xf32>, vector<256x32xf32>, vector<2x32xf32> -> vector<2x32xf32>
    %c0_246 = arith.constant 0 : index
    %c0_247 = arith.constant 0 : index
    %422 = vector.load %arg44[%c0_246, %c0_247] : memref<32x256xf32, #tpu.memory_space<vmem>>, vector<32x256xf32>
    %cst_248 = arith.constant dense<0.000000e+00> : vector<2x256xf32>
    %423 = tpu.matmul %421, %422, %cst_248 {dimension_numbers = #tpu.dot_dimension_numbers<[1], [0], [0], [1], [0, 0, 1, 1], [], []>, precision = #tpu.contract_precision<fp32>} : vector<2x32xf32>, vector<32x256xf32>, vector<2x256xf32> -> vector<2x256xf32>
    %424 = vector.extract_strided_slice %423 {offsets = [0, 0], sizes = [1, 256], strides = [1, 1]} : vector<2x256xf32> to vector<1x256xf32>
    %425 = vector.extract_strided_slice %423 {offsets = [1, 0], sizes = [1, 256], strides = [1, 1]} : vector<2x256xf32> to vector<1x256xf32>
    %426 = arith.mulf %424, %424 : vector<1x256xf32>
    %427 = arith.subf %425, %426 : vector<1x256xf32>
    %c0_249 = arith.constant 0 : index
    %c0_250 = arith.constant 0 : index
    %428 = vector.load %arg45[%c0_249, %c0_250] : memref<1x256xf32, #tpu.memory_space<vmem>>, vector<1x256xf32>
    %cst_251 = arith.constant 9.99999974E-6 : f32
    %429 = vector.broadcast %cst_251 : f32 to vector<1x256xf32>
    %430 = arith.addf %427, %429 : vector<1x256xf32>
    %431 = math.rsqrt %430 : vector<1x256xf32>
    %432 = arith.mulf %428, %431 : vector<1x256xf32>
    %c0_252 = arith.constant 0 : index
    %c0_253 = arith.constant 0 : index
    %433 = vector.load %arg46[%c0_252, %c0_253] : memref<1x256xf32, #tpu.memory_space<vmem>>, vector<1x256xf32>
    %434 = arith.mulf %424, %432 : vector<1x256xf32>
    %435 = arith.subf %433, %434 : vector<1x256xf32>
    %436 = vector.broadcast %432 : vector<1x256xf32> to vector<4x256xf32>
    %437 = arith.mulf %409, %436 : vector<4x256xf32>
    %438 = vector.broadcast %435 : vector<1x256xf32> to vector<4x256xf32>
    %439 = arith.addf %437, %438 : vector<4x256xf32>
    %cst_254 = arith.constant 0.000000e+00 : f32
    %440 = vector.broadcast %cst_254 : f32 to vector<4x256xf32>
    %441 = arith.maximumf %439, %440 : vector<4x256xf32>
    %c0_255 = arith.constant 0 : index
    %c0_256 = arith.constant 0 : index
    %442 = vector.load %arg52[%c0_255, %c0_256] : memref<4x256xf32, #tpu.memory_space<vmem>>, vector<4x256xf32>
    tpu.vector_store %arg52[%c0_255, %c0_256], %441 {strides = array<i32>} : memref<4x256xf32, #tpu.memory_space<vmem>>, vector<4x256xf32>,
    %c0_257 = arith.constant 0 : index
    %c0_258 = arith.constant 0 : index
    %443 = vector.load %arg47[%c0_257, %c0_258] : memref<2x4xf32, #tpu.memory_space<vmem>>, vector<2x4xf32>
    %cst_259 = arith.constant dense<0.000000e+00> : vector<2x256xf32>
    %444 = tpu.matmul %443, %441, %cst_259 {dimension_numbers = #tpu.dot_dimension_numbers<[1], [0], [0], [1], [0, 0, 1, 1], [], []>, precision = #tpu.contract_precision<fp32>} : vector<2x4xf32>, vector<4x256xf32>, vector<2x256xf32> -> vector<2x256xf32>
    %c0_260 = arith.constant 0 : index
    %c0_261 = arith.constant 0 : index
    %445 = vector.load %arg48[%c0_260, %c0_261] : memref<2x4xf32, #tpu.memory_space<vmem>>, vector<2x4xf32>
    %cst_262 = arith.constant dense<0.000000e+00> : vector<2x256xf32>
    %446 = tpu.matmul %445, %441, %cst_262 {dimension_numbers = #tpu.dot_dimension_numbers<[1], [0], [0], [1], [0, 0, 1, 1], [], []>, precision = #tpu.contract_precision<fp32>} : vector<2x4xf32>, vector<4x256xf32>, vector<2x256xf32> -> vector<2x256xf32>
    %447 = arith.maximumf %444, %446 : vector<2x256xf32>
    %c0_263 = arith.constant 0 : index
    %c0_264 = arith.constant 0 : index
    %448 = vector.load %arg53[%c0_263, %c0_264] : memref<2x256xf32, #tpu.memory_space<vmem>>, vector<2x256xf32>
    tpu.vector_store %arg53[%c0_263, %c0_264], %447 {strides = array<i32>} : memref<2x256xf32, #tpu.memory_space<vmem>>, vector<2x256xf32>,
    return
  }
}

</mosaic_0001>

<bundles_post_ra>
// kernel: down_unet2d_encoder.1
= control target key start
LH: loop header
LB: loop body
LE: loop exit
PB: predicated region body
PF: predicated region fallthrough
CT: control target
= control target key end

     0   :  { %s27194_s6 = smov 1   ;;  %s27195_s10 = smov 2   ;;  %s32465_s0 = inlined_call_operand.smem [shape: u32[54], index: -1, kind: input, shape index: {}] }
   0x1   :  { %s27267_s5 = sld [smem:[%s32465_s0]]   ;;  %s27196_s14 = smov 3  }
   0x2   :  { %s27272_s9 = sld [smem:[%s32465_s0 + %s27194_s6]]   ;;  %s27197_s18 = smov 4  }
   0x3   :  { %s27277_s13 = sld [smem:[%s32465_s0 + %s27195_s10]]   ;;  %s27198_s22 = smov 5  }
   0x4   :  { %s27282_s17 = sld [smem:[%s32465_s0 + %s27196_s14]]   ;;  %s27199_s26 = smov 6  }
   0x5   :  { %s27287_s21 = sld [smem:[%s32465_s0 + %s27197_s18]]   ;;  %s27200_s30 = smov 7  }
   0x6   :  { %s27292_s25 = sld [smem:[%s32465_s0 + %s27198_s22]]   ;;  %s27201_s4 = smov 8  }
   0x7   :  { %s27297_s29 = sld [smem:[%s32465_s0 + %s27199_s26]]   ;;  %s27202_s10 = smov 9  }
   0x8   :  { %s27302_s3 = sld [smem:[%s32465_s0 + %s27200_s30]]   ;;  %s27203_s15 = smov 10  }
   0x9   :  { %s27307_s8 = sld [smem:[%s32465_s0 + %s27201_s4]]   ;;  %s27204_s20 = smov 11  }
   0xa   :  { %s27312_s14 = sld [smem:[%s32465_s0 + %s27202_s10]]   ;;  %s27205_s26 = smov 12  }
   0xb   :  { %s27317_s19 = sld [smem:[%s32465_s0 + %s27203_s15]]   ;;  %s27206_s1 = smov 13  }
   0xc   :  { %s27322_s24 = sld [smem:[%s32465_s0 + %s27204_s20]]   ;;  %s27207_s7 = smov 14  }
   0xd   :  { %s27327_s30 = sld [smem:[%s32465_s0 + %s27205_s26]]   ;;  %s27208_s15 = smov 15  }
   0xe   :  { %s27332_s6 = sld [smem:[%s32465_s0 + %s27206_s1]]   ;;  %s27209_s22 = smov 16  }
   0xf   :  { %s27337_s12 = sld [smem:[%s32465_s0 + %s27207_s7]]   ;;  %s27210_s28 = smov 17  }
  0x10   :  { %s27342_s20 = sld [smem:[%s32465_s0 + %s27208_s15]]   ;;  %s27211_s7 = smov 18  }
  0x11   :  { %s27347_s27 = sld [smem:[%s32465_s0 + %s27209_s22]]   ;;  %s27212_s15 = smov 19  }
  0x12   :  { %s27352_s4 = sld [smem:[%s32465_s0 + %s27210_s28]]   ;;  %s27213_s22 = smov 20  }
  0x13   :  { %32880 = sst [smem:[#allocation16_spill]] %s27327_s30  ;;  %s27214_s28 = smov 21  }
  0x14   :  { %32881 = sst [smem:[#allocation17_spill]] %s27332_s6 }
  0x15   :  { %32882 = sst [smem:[#allocation18_spill]] %s27337_s12 }
  0x16   :  { %32883 = sst [smem:[#allocation19_spill]] %s27342_s20 }
  0x17   :  { %32884 = sst [smem:[#allocation20_spill]] %s27347_s27 }
  0x18   :  { %32885 = sst [smem:[#allocation21_spill]] %s27352_s4 }
  0x19   :  { %s27357_s12 = sld [smem:[%s32465_s0 + %s27211_s7]]   ;;  %s27215_s7 = smov 22  }
  0x1a   :  { %s27362_s20 = sld [smem:[%s32465_s0 + %s27212_s15]]   ;;  %s27216_s15 = smov 23  }
  0x1b   :  { %s27367_s27 = sld [smem:[%s32465_s0 + %s27213_s22]]   ;;  %s27217_s22 = smov 24  }
  0x1c   :  { %s27372_s4 = sld [smem:[%s32465_s0 + %s27214_s28]]   ;;  %s27218_s28 = smov 25  }
  0x1d   :  { %s27392_s6 = sld [smem:[%s32465_s0 + %s27218_s28]]   ;;  %s27222_s28 = smov 29  }
  0x1f   :  { %32886 = sst [smem:[#allocation22_spill]] %s27357_s12 }
  0x20   :  { %32887 = sst [smem:[#allocation23_spill]] %s27362_s20 }
  0x21   :  { %32888 = sst [smem:[#allocation24_spill]] %s27367_s27 }
  0x22   :  { %s27377_s12 = sld [smem:[%s32465_s0 + %s27215_s7]]   ;;  %s27219_s7 = smov 26  }
  0x23   :  { %s27382_s20 = sld [smem:[%s32465_s0 + %s27216_s15]]   ;;  %s27220_s15 = smov 27  }
  0x24   :  { %s27387_s27 = sld [smem:[%s32465_s0 + %s27217_s22]]   ;;  %s27221_s22 = smov 28  }
  0x25   :  { %32891 = sst [smem:[#allocation27_spill]] %s27392_s6 }
  0x26   :  { %s27397_s30 = sld [smem:[%s32465_s0 + %s27219_s7]]   ;;  %s27223_s7 = smov 30  }
  0x27   :  { %s27412_s6 = sld [smem:[%s32465_s0 + %s27222_s28]]   ;;  %s27226_s28 = smov 33  }
  0x29   :  { %32889 = sst [smem:[#allocation25_spill]] %s27382_s20 }
  0x2a   :  { %32890 = sst [smem:[#allocation26_spill]] %s27387_s27 }
  0x2b   :  { %s27402_s20 = sld [smem:[%s32465_s0 + %s27220_s15]]   ;;  %s27224_s15 = smov 31  }
  0x2c   :  { %32892 = sst [smem:[#allocation28_spill]] %s27397_s30 }
  0x2d   :  { %s27407_s27 = sld [smem:[%s32465_s0 + %s27221_s22]]   ;;  %s27225_s22 = smov 32  }
  0x2e   :  { %32895 = sst [smem:[#allocation31_spill]] %s27412_s6 }
  0x2f   :  { %s27417_s30 = sld [smem:[%s32465_s0 + %s27223_s7]]   ;;  %s27227_s7 = smov 34  }
  0x30   :  { %s27432_s6 = sld [smem:[%s32465_s0 + %s27226_s28]]   ;;  %s27230_s28 = smov 37  }
  0x31   :  { %32893 = sst [smem:[#allocation29_spill]] %s27402_s20 }
  0x32   :  { %s27422_s20 = sld [smem:[%s32465_s0 + %s27224_s15]]   ;;  %s27228_s15 = smov 35  }
  0x33   :  { %32894 = sst [smem:[#allocation30_spill]] %s27407_s27 }
  0x34   :  { %s27427_s27 = sld [smem:[%s32465_s0 + %s27225_s22]]   ;;  %s27229_s22 = smov 36  }
  0x35   :  { %32896 = sst [smem:[#allocation32_spill]] %s27417_s30 }
  0x36   :  { %32899 = sst [smem:[#allocation35_spill]] %s27432_s6 }
  0x37   :  { %s27437_s30 = sld [smem:[%s32465_s0 + %s27227_s7]]   ;;  %s27231_s7 = smov 38  }
  0x38   :  { %32897 = sst [smem:[#allocation33_spill]] %s27422_s20 }
  0x39   :  { %s27442_s20 = sld [smem:[%s32465_s0 + %s27228_s15]]   ;;  %s27232_s15 = smov 39  }
  0x3a   :  { %32898 = sst [smem:[#allocation34_spill]] %s27427_s27 }
  0x3b   :  { %s27447_s27 = sld [smem:[%s32465_s0 + %s27229_s22]]   ;;  %s27233_s22 = smov 40  }
  0x3c   :  { %s27452_s6 = sld [smem:[%s32465_s0 + %s27230_s28]]   ;;  %s27234_s28 = smov 41  }
  0x3d   :  { %32900 = sst [smem:[#allocation36_spill]] %s27437_s30 }
  0x3e   :  { %s27457_s30 = sld [smem:[%s32465_s0 + %s27231_s7]]   ;;  %s27235_s7 = smov 42  }
  0x3f   :  { %32901 = sst [smem:[#allocation37_spill]] %s27442_s20 }
  0x40   :  { %s27462_s20 = sld [smem:[%s32465_s0 + %s27232_s15]]   ;;  %s27236_s15 = smov 43  }
  0x41   :  { %32902 = sst [smem:[#allocation38_spill]] %s27447_s27 }
  0x42   :  { %32903 = sst [smem:[#allocation39_spill]] %s27452_s6 }
  0x43   :  { %s27467_s27 = sld [smem:[%s32465_s0 + %s27233_s22]]   ;;  %s27237_s22 = smov 44  }
  0x44   :  { %32904 = sst [smem:[#allocation40_spill]] %s27457_s30 }
  0x45   :  { %s27472_s6 = sld [smem:[%s32465_s0 + %s27234_s28]]   ;;  %s27238_s28 = smov 45  }
  0x46   :  { %32905 = sst [smem:[#allocation41_spill]] %s27462_s20 }
  0x47   :  { %s27477_s30 = sld [smem:[%s32465_s0 + %s27235_s7]]   ;;  %s27239_s7 = smov 46  }
  0x48   :  { %s27482_s20 = sld [smem:[%s32465_s0 + %s27236_s15]]   ;;  %s27240_s15 = smov 47  }
  0x49   :  { %32906 = sst [smem:[#allocation42_spill]] %s27467_s27 }
  0x4a   :  { %s27487_s27 = sld [smem:[%s32465_s0 + %s27237_s22]]   ;;  %s27241_s22 = smov 48  }
  0x4b   :  { %32907 = sst [smem:[#allocation43_spill]] %s27472_s6 }
  0x4c   :  { %s27492_s6 = sld [smem:[%s32465_s0 + %s27238_s28]]   ;;  %s27242_s28 = smov 49  }
  0x4d   :  { %32908 = sst [smem:[#allocation44_spill]] %s27477_s30 }
  0x4e   :  { %32909 = sst [smem:[#allocation45_spill]] %s27482_s20 }
  0x4f   :  { %s27497_s30 = sld [smem:[%s32465_s0 + %s27239_s7]]   ;;  %s27243_s7 = smov 50  }
  0x50   :  { %32910 = sst [smem:[#allocation46_spill]] %s27487_s27 }
  0x51   :  { %s27502_s20 = sld [smem:[%s32465_s0 + %s27240_s15]]   ;;  %s27244_s15 = smov 51  }
  0x52   :  { %32911 = sst [smem:[#allocation47_spill]] %s27492_s6 }
  0x53   :  { %s27507_s27 = sld [smem:[%s32465_s0 + %s27241_s22]]   ;;  %s27245_s22 = smov 52  }
  0x54   :  { %s27512_s6 = sld [smem:[%s32465_s0 + %s27242_s28]]   ;;  %s27246_s28 = smov 53  }
  0x55   :  { %32912 = sst [smem:[#allocation48_spill]] %s27497_s30 }
  0x56   :  { %s27517_s30 = sld [smem:[%s32465_s0 + %s27243_s7]]  }
  0x57   :  { %32913 = sst [smem:[#allocation49_spill]] %s27502_s20 }
  0x58   :  { %s27522_s20 = sld [smem:[%s32465_s0 + %s27244_s15]]  }
  0x59   :  { %32914 = sst [smem:[#allocation50_spill]] %s27507_s27 }
  0x5a   :  { %32915 = sst [smem:[#allocation51_spill]] %s27512_s6 }
  0x5b   :  { %s27527_s27 = sld [smem:[%s32465_s0 + %s27245_s22]]  }
  0x5c   :  { %s27532_s6 = sld [smem:[%s32465_s0 + %s27246_s28]]  }
  0x5d   :  { %113 = vsyncpa [#allocation3], 0 }
  0x5e   :  { %114 = vsyncpa [#allocation5], 0 }
  0x5f   :  { %115 = vsyncpa [#allocation8], 0 }
  0x60   :  { %116 = vsyncpa [#allocation11], 0  ;;  %s27247_s7 = smov [#allocation4]   ;;  %s27248_s11 = smov [#allocation7]  }
  0x61   :  { %s141_s10 = sshll.u32 %s27247_s7, 4  ;;  %s167_s15 = sshll.u32 %s27248_s11, 4  ;;  %s142_s10 = int_to_ptr.vmem [resolvable:$true] %s141_s10  ;;  %s168_s15 = int_to_ptr.vmem [resolvable:$true] %s167_s15 }
  0x62   :  { %s27054_s16 = scalar_lea.hbm %s27292_s25, 16 }
  0x63   :  { %p27055_p0 = scmp.ne.s32.totalorder %s27292_s25, %s27054_s16  ;;  %p27058_p1 = scmp.lt.u32.totalorder %s27054_s16, %s27292_s25 }
  0x65   :  { %p27060_p2 = pnand %p27058_p1, %p27055_p0 }
  0x67   :  { %27063 = shalt.err (!%p27060_p2)
}
  0x68   :  { %s27064_s0 = scalar_lea.vmem %s142_s10, 16  ;;  %s27068_s18 = scalar_lea.vmem %s142_s10, 32 }
  0x69   :  { %p27065_p3 = scmp.ne.s32.totalorder %s142_s10, %s27064_s0  ;;  %p27069_p4 = scmp.lt.s32.totalorder %s142_s10, %s142_s10 }
  0x6a   :  { %p27070_p5 = scmp.lt.s32.totalorder %s27068_s18, %s27064_s0 }
  0x6c   :  { %p27071_p6 = por %p27070_p5, %p27069_p4 }
  0x6e   :  { %p27072_p7 = pnand %p27071_p6, %p27065_p3 }
  0x70   :  { %27075 = shalt.err (!%p27072_p7)
}
  0x71   :  { %144 = dma.hbm_to_vmem [thread:$0]  %s27292_s25, 16, %s142_s10, [#allocation5]  }
  0x72   :  { %s27076_s22 = scalar_lea.hbm %s27317_s19, 16 }
  0x73   :  { %p27077_p8 = scmp.ne.s32.totalorder %s27317_s19, %s27076_s22  ;;  %p27080_p9 = scmp.lt.u32.totalorder %s27076_s22, %s27317_s19 }
  0x75   :  { %p27082_p10 = pnand %p27080_p9, %p27077_p8 }
  0x77   :  { %27085 = shalt.err (!%p27082_p10)
}
  0x78   :  { %s27086_s23 = scalar_lea.vmem %s168_s15, 16  ;;  %s27090_s26 = scalar_lea.vmem %s168_s15, 32 }
  0x79   :  { %p27087_p11 = scmp.ne.s32.totalorder %s168_s15, %s27086_s23  ;;  %p27091_p12 = scmp.lt.s32.totalorder %s168_s15, %s168_s15 }
  0x7a   :  { %p27092_p13 = scmp.lt.s32.totalorder %s27090_s26, %s27086_s23 }
  0x7c   :  { %p27093_p0 = por %p27092_p13, %p27091_p12 }
  0x7e   :  { %p27094_p1 = pnand %p27093_p0, %p27087_p11 }
  0x80   :  { %27097 = shalt.err (!%p27094_p1)
}
  0x81   :  { %170 = dma.hbm_to_vmem [thread:$0]  %s27317_s19, 16, %s168_s15, [#allocation8]  }
  0x82   :  { %s27249_s28 = smov [#allocation2]   ;;  %s27250_s1 = smov [#allocation6]  }
  0x83   :  { %s131_s25 = sshll.u32 %s27249_s28, 4  ;;  %s157_s2 = sshll.u32 %s27250_s1, 4  ;;  %s132_s25 = int_to_ptr.vmem [resolvable:$true] %s131_s25  ;;  %s158_s2 = int_to_ptr.vmem [resolvable:$true] %s157_s2 }
  0x84   :  { %s27098_s7 = scalar_lea.hbm %s27287_s21, 16 }
  0x85   :  { %p27099_p2 = scmp.ne.s32.totalorder %s27287_s21, %s27098_s7  ;;  %p27102_p3 = scmp.lt.u32.totalorder %s27098_s7, %s27287_s21 }
  0x87   :  { %p27104_p4 = pnand %p27102_p3, %p27099_p2 }
  0x89   :  { %27107 = shalt.err (!%p27104_p4)
}
  0x8a   :  { %s27108_s10 = scalar_lea.vmem %s132_s25, 16  ;;  %s27112_s11 = scalar_lea.vmem %s132_s25, 32 }
  0x8b   :  { %p27109_p5 = scmp.ne.s32.totalorder %s132_s25, %s27108_s10  ;;  %p27113_p6 = scmp.lt.s32.totalorder %s132_s25, %s132_s25 }
  0x8c   :  { %p27114_p7 = scmp.lt.s32.totalorder %s27112_s11, %s27108_s10 }
  0x8e   :  { %p27115_p8 = por %p27114_p7, %p27113_p6 }
  0x90   :  { %p27116_p9 = pnand %p27115_p8, %p27109_p5 }
  0x92   :  { %27119 = shalt.err (!%p27116_p9)
}
  0x93   :  { %134 = dma.hbm_to_vmem [thread:$0]  %s27287_s21, 16, %s132_s25, [#allocation3]  }
  0x94   :  { %s27120_s19 = scalar_lea.hbm %s27312_s14, 16 }
  0x95   :  { %p27121_p10 = scmp.ne.s32.totalorder %s27312_s14, %s27120_s19  ;;  %p27124_p11 = scmp.lt.u32.totalorder %s27120_s19, %s27312_s14 }
  0x97   :  { %p27126_p12 = pnand %p27124_p11, %p27121_p10 }
  0x99   :  { %27129 = shalt.err (!%p27126_p12)
}
  0x9a   :  { %s27130_s15 = scalar_lea.vmem %s158_s2, 16  ;;  %s27134_s16 = scalar_lea.vmem %s158_s2, 32 }
  0x9b   :  { %p27131_p13 = scmp.ne.s32.totalorder %s158_s2, %s27130_s15  ;;  %p27135_p0 = scmp.lt.s32.totalorder %s158_s2, %s158_s2 }
  0x9c   :  { %p27136_p1 = scmp.lt.s32.totalorder %s27134_s16, %s27130_s15 }
  0x9e   :  { %p27137_p2 = por %p27136_p1, %p27135_p0 }
  0xa0   :  { %p27138_p3 = pnand %p27137_p2, %p27131_p13 }
  0xa2   :  { %27141 = shalt.err (!%p27138_p3)
}
  0xa3   :  { %160 = dma.hbm_to_vmem [thread:$0]  %s27312_s14, 16, %s158_s2, [#allocation5]  }
  0xa4   :  { %s27251_s0 = smov [#allocation9]   ;;  %s27252_s18 = smov [#allocation10]  }
  0xa5   :  { %s197_s21 = sshll.u32 %s27251_s0, 4  ;;  %s207_s22 = sshll.u32 %s27252_s18, 4  ;;  %s198_s21 = int_to_ptr.vmem [resolvable:$true] %s197_s21  ;;  %s208_s22 = int_to_ptr.vmem [resolvable:$true] %s207_s22 }
  0xa6   :  { %s27142_s23 = scalar_lea.hbm %s27372_s4, 16 }
  0xa7   :  { %p27143_p4 = scmp.ne.s32.totalorder %s27372_s4, %s27142_s23  ;;  %p27146_p5 = scmp.lt.u32.totalorder %s27142_s23, %s27372_s4 }
  0xa9   :  { %p27148_p6 = pnand %p27146_p5, %p27143_p4 }
  0xab   :  { %27151 = shalt.err (!%p27148_p6)
}
  0xac   :  { %s27152_s26 = scalar_lea.vmem %s198_s21, 16  ;;  %s27156_s28 = scalar_lea.vmem %s198_s21, 32 }
  0xad   :  { %p27153_p7 = scmp.ne.s32.totalorder %s198_s21, %s27152_s26  ;;  %p27157_p8 = scmp.lt.s32.totalorder %s198_s21, %s198_s21 }
  0xae   :  { %p27158_p9 = scmp.lt.s32.totalorder %s27156_s28, %s27152_s26 }
  0xb0   :  { %p27159_p10 = por %p27158_p9, %p27157_p8 }
  0xb2   :  { %p27160_p11 = pnand %p27159_p10, %p27153_p7 }
  0xb4   :  { %27163 = shalt.err (!%p27160_p11)
}
  0xb5   :  { %200 = dma.hbm_to_vmem [thread:$0]  %s27372_s4, 16, %s198_s21, [#allocation8]  }
  0xb6   :  { %s27164_s14 = scalar_lea.hbm %s27377_s12, 16 }
  0xb7   :  { %p27165_p12 = scmp.ne.s32.totalorder %s27377_s12, %s27164_s14  ;;  %p27168_p13 = scmp.lt.u32.totalorder %s27164_s14, %s27377_s12 }
  0xb9   :  { %p27170_p0 = pnand %p27168_p13, %p27165_p12 }
  0xbb   :  { %27173 = shalt.err (!%p27170_p0)
}
  0xbc   :  { %s27174_s25 = scalar_lea.vmem %s208_s22, 16  ;;  %s27178_s1 = scalar_lea.vmem %s208_s22, 32 }
  0xbd   :  { %p27175_p1 = scmp.ne.s32.totalorder %s208_s22, %s27174_s25  ;;  %p27179_p2 = scmp.lt.s32.totalorder %s208_s22, %s208_s22 }
  0xbe   :  { %p27180_p3 = scmp.lt.s32.totalorder %s27178_s1, %s27174_s25 }
  0xc0   :  { %p27181_p4 = por %p27180_p3, %p27179_p2 }
  0xc2   :  { %p27182_p5 = pnand %p27181_p4, %p27175_p1 }
  0xc4   :  { %27185 = shalt.err (!%p27182_p5)
}
  0xc5   :  { %210 = dma.hbm_to_vmem [thread:$0]  %s27377_s12, 16, %s208_s22, [#allocation11]  }
  0xc6   :  { %27186 = dma.done.wait [#allocation3], 16  }
  0xc7   :  { %27187 = vsyncadd [#allocation3], 4294967280 }
  0xc8   :  { %27188 = dma.done.wait [#allocation5], 32  }
  0xc9   :  { %27189 = vsyncadd [#allocation5], 4294967264 }
  0xca   :  { %27190 = dma.done.wait [#allocation8], 32  }
  0xcb   :  { %27191 = vsyncadd [#allocation8], 4294967264 }
  0xcc   :  { %27192 = dma.done.wait [#allocation11], 16  }
  0xcd   :  { %27193 = vsyncadd [#allocation11], 4294967280  ;;  %v26405_v0 = vld [vmem:[%s27272_s9 + $0x18] sm:$0xff]   ;;  %v26406_v1 = vld [vmem:[%s27272_s9 + $0x20] sm:$0xff]   ;;  %vm306_vm0 = vcmask 1040384   ;;  %v32916_v15 = vmov 0 }
  0xce   :  { %23228 = vmatprep.subr.bf16.mxu0 %v26405_v0  ;;  %v26407_v2 = vld [vmem:[%s27272_s9 + $0x28] sm:$0xff]   ;;  %v282_v3 = vld [vmem:[%s27267_s5] sm:$0xff]  ;;  %v284_v5 = vld [vmem:[%s27267_s5 + $0x10] sm:$0xff]  ;;  %vm307_vm1 = vsmask.f32 256  ;;  %vm369_vm4 = vcmask 392192  }
  0xcf   :  { %23229 = vmatpush3.bf16.msra.mxu0 %v26405_v0  ;;  %v283_v4 = vld [vmem:[%s27267_s5 + $0x8] sm:$0xff]  ;;  %v285_v7 = vld [vmem:[%s27267_s5 + $0x18] sm:$0xff]  ;;  %vm319_vm2 = vsmask.f32 7424  ;;  %v26408_v14 = vld [vmem:[%s27272_s9] sm:$0xff]   ;;  %vm500_vm5 = vcmask 1046528  }
  0xd0   :  { %23230 = vmatprep.subr.bf16.mxu0 %v26406_v1  ;;  %v286_v6 = vpack.c.bf16 %v283_v4, %v282_v3  ;;  %v287_v8 = vpack.c.bf16 %v285_v7, %v284_v5  ;;  %vm27568_vm3 = vmand %vm306_vm0, %vm307_vm1  ;;  %v26409_v34 = vld [vmem:[%s27272_s9 + $0x8] sm:$0xff]   ;;  %v26410_v38 = vld [vmem:[%s27272_s9 + $0x10] sm:$0xff]   ;;  %v32510_v53 = vmov 0.0|0.0   ;;  %vm32554_vm6 = vmmov 0   ;;  %s32925_s5 = sld [smem:[#allocation51_spill]]  ;;  %s32987_s12 = sld [smem:[#allocation23_spill]] }
  0xd1   :  { %v32917_v15 = vsel %vm27568_vm3, 4294967295, %v32916_v15  ;;  %v26411_v39 = vld [vmem:[%s27272_s9 + $0x30] sm:$0xff]   ;;  %v26412_v42 = vld [vmem:[%s27272_s9 + $0x38] sm:$0xff]   ;;  %v26413_v44 = vld [vmem:[%s27272_s9 + $0x40] sm:$0xff]   ;;  %24290 = vmatprep.subr.bf16.mxu1 %v32510_v53  ;;  %vm591_vm7 = vcmask 719872   ;;  %vm32556_vm8 = vcmask 1043456  }
  0xd2   :  { %v289_v9 = vshrl.u32 %v286_v6, 16  ;;  %v292_v10 = vshll.u32 %v286_v6, 16  ;;  %v296_v11 = vshrl.u32 %v287_v8, 16  ;;  %v299_v12 = vshll.u32 %v287_v8, 16  ;;  %32918 = vst [vmem:[#allocation52_spill] sm:$0xff] %v32917_v15  ;;  %v627_v48 = vld [vmem:[%s27277_s13] sm:$0xff] }
  0xd3   :  { %23231 = vmatpush3.bf16.msra.mxu0 %v26406_v1  ;;  %v628_v49 = vld [vmem:[%s27277_s13 + $0x8] sm:$0xff]  ;;  %v642_v50 = vand.u32 4294901760, %v627_v48  ;;  %v629_v54 = vld [vmem:[%s27277_s13 + $0x10] sm:$0xff]  ;;  %v630_v55 = vld [vmem:[%s27277_s13 + $0x18] sm:$0xff]  ;;  %vm32552_vm9 = vcmask 31744   ;;  %vm2093_vm10 = vcmask 654336  }
  0xd4   :  { %23232 = vmatprep.subr.bf16.mxu0 %v26407_v2  ;;  %v291_v13 = vrot.slane %v289_v9, 7  ;;  %v298_v16 = vrot.slane %v296_v11, 7  ;;  %v645_v51 = vand.u32 4294901760, %v628_v49  ;;  %v648_v56 = vand.u32 4294901760, %v629_v54  ;;  %v631_v59 = vld [vmem:[%s27277_s13 + $0x20] sm:$0xff]  ;;  %v632_v60 = vld [vmem:[%s27277_s13 + $0x28] sm:$0xff] }
  0xd5   :  { %v651_v57 = vand.u32 4294901760, %v630_v55  ;;  %v654_v61 = vand.u32 4294901760, %v631_v59  ;;  %v657_v62 = vand.u32 4294901760, %v632_v60  ;;  %v27610_v63 = vsub.f32 %v627_v48, %v642_v50  ;;  %v633_v3 = vld [vmem:[%s27277_s13 + $0x30] sm:$0xff]  ;;  %v634_v4 = vld [vmem:[%s27277_s13 + $0x38] sm:$0xff]  ;;  %v635_v5 = vld [vmem:[%s27277_s13 + $0x40] sm:$0xff] }
  0xd6   :  { %v294_v17 = vor.u32 %v292_v10, %v291_v13  ;;  %v311_v18 = vsel %vm27568_vm3, %v291_v13, 0  ;;  %v301_v20 = vor.u32 %v299_v12, %v298_v16  ;;  %v312_v21 = vsel %vm27568_vm3, %v298_v16, 0  ;;  %v636_v10 = vld [vmem:[%s27277_s13 + $0x48] sm:$0xff]  ;;  %s32926_s9 = sld [smem:[#allocation16_spill]]  ;;  %s33006_s2 = sld [smem:[#allocation25_spill]] }
  0xd7   :  { %23233 = vmatpush3.bf16.msra.mxu0 %v26407_v2  ;;  %v328_v19 = vshll.u32 %v311_v18, 16  ;;  %v340_v23 = vshll.u32 %v312_v21, 16  ;;  %v502_v40 = vrot.slane %v311_v18, 1  ;;  %v505_v46 = vrot.slane %v312_v21, 1  ;;  %v27646_v21 = vld [vmem:[%s27277_s13 + $0x50] sm:$0xff]  ;;  %s32927_s13 = sld [smem:[#allocation17_spill]] }
  0xd8   :  { %v309_v22 = vsel %vm27568_vm3, 0, %v294_v17  ;;  %23238 = vmatprep.subr.bf16.mxu0 %v26408_v14  ;;  %v310_v26 = vsel %vm27568_vm3, 0, %v301_v20  ;;  %v27597_v52 = vpack.c.bf16 %v645_v51, %v642_v50  ;;  %v27604_v58 = vpack.c.bf16 %v651_v57, %v648_v56  ;;  %s33005_s4 = sld [smem:[#allocation24_spill]]  ;;  %s33010_s7 = sld [smem:[#allocation26_spill]] }
  0xd9   :  { %v321_v24 = vshrl.u32 %v309_v22, 16  ;;  %v323_v25 = vshll.u32 %v309_v22, 16  ;;  %v330_v27 = vrot.slane %v328_v19, 1  ;;  %v333_v28 = vshrl.u32 %v310_v26, 16  ;;  %s33013_s10 = sld [smem:[#allocation28_spill]]  ;;  %s33107_s11 = sld [smem:[#allocation29_spill]] }
  0xda   :  { %v335_v29 = vshll.u32 %v310_v26, 16  ;;  %v342_v31 = vrot.slane %v340_v23, 1  ;;  %v501_v41 = vrot.slane %v309_v22, 1  ;;  %v504_v45 = vrot.slane %v310_v26, 1  ;;  %24292 = vmatpush3.bf16.msra.mxu1 %v27597_v52  ;;  %s33109_s19 = sld [smem:[#allocation32_spill]]  ;;  %s33110_s15 = sld [smem:[#allocation30_spill]] }
  0xdb   :  { %v325_v30 = vrot.slane %v323_v25, 1  ;;  %24293 = vmatprep.subr.bf16.mxu1 %v32510_v53  ;;  %v27612_v0 = vsub.f32 %v628_v49, %v645_v51  ;;  %v27614_v1 = vsub.f32 %v629_v54, %v648_v56  ;;  %v27616_v2 = vsub.f32 %v630_v55, %v651_v57  ;;  %s33111_s16 = sld [smem:[#allocation31_spill]]  ;;  %s33120_s0 = sld [smem:[#allocation33_spill]] }
  0xdc   :  { %v337_v32 = vrot.slane %v335_v29, 1  ;;  %v503_v43 = vsel %vm500_vm5, %v501_v41, %v502_v40  ;;  %v506_v47 = vsel %vm500_vm5, %v504_v45, %v505_v46  ;;  %v27621_v6 = vpack.c.bf16 %v657_v62, %v654_v61  ;;  %s33185_s21 = sld [smem:[#allocation34_spill]]  ;;  %s33187_s18 = sld [smem:[#allocation37_spill]] }
  0xdd   :  { %v326_v33 = vor.u32 %v325_v30, %v321_v24  ;;  %v27623_v7 = vsub.f32 %v631_v59, %v654_v61  ;;  %v27625_v8 = vsub.f32 %v632_v60, %v657_v62  ;;  %v660_v9 = vand.u32 4294901760, %v633_v3  ;;  %s33188_s22 = sld [smem:[#allocation35_spill]]  ;;  %s33190_s23 = sld [smem:[#allocation36_spill]] }
  0xde   :  { %v338_v35 = vor.u32 %v337_v32, %v333_v28  ;;  %24295 = vmatpush3.bf16.msra.mxu1 %v27604_v58  ;;  %v663_v11 = vand.u32 4294901760, %v634_v4  ;;  %v666_v12 = vand.u32 4294901760, %v635_v5  ;;  %v32490_v16 = vmov 0.0   ;;  %s33195_s26 = sld [smem:[#allocation38_spill]]  ;;  %s33206_s28 = sld [smem:[#allocation40_spill]] }
  0xdf   :  { %v331_v36 = vsel %vm319_vm2, %v326_v33, %v330_v27  ;;  %24296 = vmatprep.subr.bf16.mxu1 %v32510_v53  ;;  %v27629_v13 = vsub.f32 %v633_v3, %v660_v9  ;;  %23280 = vmatprep.mubr.msk.f32.mxu1 %vm32554_vm6, %v32490_v16  ;;  %v730_v23 = vand.u32 4294901760, %v27610_v63  ;;  %v737_v24 = vand.u32 4294901760, %v27612_v0  ;;  %s33316_s14 = sld [smem:[#allocation41_spill]]  ;;  %s33318_s25 = sld [smem:[#allocation44_spill]] }
  0xe0   :  { %23234 = vmatprep.mubr.msk.bf16.mxu0 %vm369_vm4, %v331_v36  ;;  %v343_v37 = vsel %vm319_vm2, %v338_v35, %v342_v31  ;;  %v27633_v17 = vpack.c.bf16 %v663_v11, %v660_v9  ;;  %v27635_v18 = vsub.f32 %v634_v4, %v663_v11  ;;  %v27637_v19 = vsub.f32 %v635_v5, %v666_v12  ;;  %s33319_s1 = sld [smem:[#allocation42_spill]] }
  0xe1   :  { %23235 = vmatmul.mubr.msk.bf16.vlgmr.msra.gmra.mrb[0].mxu0 %vm369_vm4, %v343_v37  ;;  %v731_v25 = vsub.f32 %v27610_v63, %v730_v23  ;;  %v27662_v27 = vand.u32 4294901760, %v27646_v21  ;;  %v744_v30 = vand.u32 4294901760, %v27614_v1  ;;  %v751_v31 = vand.u32 4294901760, %v27616_v2 }
  0xe2   :  { %23239 = vmatpush3.bf16.msra.mxu0 %v26408_v14  ;;  %23244 = vmatprep.mubr.msk.bf16.mxu0 %vm369_vm4, %v309_v22  ;;  %v669_v14 = vand.u32 4294901760, %v636_v10  ;;  %v758_v37 = vand.u32 4294901760, %v27623_v7  ;;  %v32487_v45 = vand.u32 4294901760, %v27635_v18  ;;  %v32486_v51 = vand.u32 4294901760, %v27637_v19 }
  0xe3   :  { %23240 = vmatprep.subr.bf16.mxu0 %v26409_v34  ;;  %24298 = vmatpush3.bf16.msra.mxu1 %v27621_v6  ;;  %v732_v28 = vand.u32 4294901760, %v731_v25  ;;  %v745_v33 = vsub.f32 %v27614_v1, %v744_v30  ;;  %v24321_v62 = vpack.c.bf16 %v27612_v0, %v27610_v63  ;;  %v24324_v3 = vpack.c.bf16 %v27616_v2, %v27614_v1 }
  0xe4   :  { %24299 = vmatprep.subr.bf16.mxu1 %v32510_v53  ;;  %v27639_v20 = vsub.f32 %v636_v10, %v669_v14  ;;  %v27649_v22 = vpack.c.bf16 %v669_v14, %v666_v12  ;;  %v759_v40 = vsub.f32 %v27623_v7, %v758_v37  ;;  %v780_v48 = vsub.f32 %v27635_v18, %v32487_v45 }
  0xe5   :  { %v746_v35 = vand.u32 4294901760, %v745_v33  ;;  %v787_v56 = vsub.f32 %v27637_v19, %v32486_v51  ;;  %v24327_v4 = vpack.c.bf16 %v27625_v8, %v27623_v7  ;;  %v24330_v5 = vpack.c.bf16 %v27635_v18, %v27629_v13 }
  0xe6   :  { %23241 = vmatpush3.bf16.msra.mxu0 %v26409_v34  ;;  %v752_v34 = vsub.f32 %v27616_v2, %v751_v31  ;;  %v781_v50 = vand.u32 4294901760, %v780_v48  ;;  %v32485_v54 = vand.u32 4294901760, %v27639_v20  ;;  %v24333_v9 = vpack.c.bf16 %v27639_v20, %v27637_v19 }
  0xe7   :  { %23242 = vmatprep.subr.bf16.mxu0 %v26410_v38  ;;  %24301 = vmatpush3.bf16.msra.mxu1 %v27633_v17  ;;  %v788_v59 = vand.u32 4294901760, %v787_v56  ;;  %v32920_v2 = vand.u32 4294901760, %v27637_v19  ;;  %vm32553_vm11 = vcmask 261120   ;;  %vm4308_vm12 = vcmask 1044480  }
  0xe8   :  { %24302 = vmatprep.subr.bf16.mxu1 %v32510_v53  ;;  %v753_v36 = vand.u32 4294901760, %v752_v34  ;;  %v794_v57 = vsub.f32 %v27639_v20, %v32485_v54  ;;  %vm4309_vm13 = vsmask.f32 4352  ;;  %vm4571_vm15 = vcmask 1042432  }
  0xe9   :  { %vm28279_vm14 = vmand %vm4308_vm12, %vm4309_vm13  ;;  %vm5443_vm13 = vcmask 64512  }
  0xea   :  { %23243 = vmatpush3.bf16.msra.mxu0 %v26410_v38  ;;  %v765_v38 = vand.u32 4294901760, %v27625_v8  ;;  %v795_v60 = vand.u32 4294901760, %v794_v57 }
  0xeb   :  { %23248 = vmatprep.subr.bf16.mxu0 %v26411_v39  ;;  %24304 = vmatpush3.bf16.msra.mxu1 %v27649_v22 }
  0xec   :  { %23278 = vmatprep.subr.mxu1 %v32490_v16  ;;  %v766_v41 = vsub.f32 %v27625_v8, %v765_v38  ;;  %v24318_v61 = vpack.c.bf16 %v795_v60, %v788_v59  ;;  %v24357_v63 = vpack.c.bf16 %v765_v38, %v758_v37  ;;  %v26414_v38 = vld [vmem:[%s27297_s29 + $0x2c] sm:$0xff]  }
  0xed   :  { %23245 = vmatmul.mubr.msk.bf16.vlgmr.msra.gmra.mrb[0].mxu0 %vm369_vm4, %v310_v26  ;;  %v738_v26 = vsub.f32 %v27612_v0, %v737_v24  ;;  %v32919_v0 = vand.u32 4294901760, %v27635_v18 }
  0xee   :  { %23249 = vmatpush3.bf16.msra.mxu0 %v26411_v39  ;;  %23254 = vmatprep.mubr.msk.bf16.mxu0 %vm369_vm4, %v503_v43  ;;  %v27679_v39 = vpack.c.bf16 %v753_v36, %v746_v35  ;;  %v767_v43 = vand.u32 4294901760, %v766_v41 }
  0xef   :  { %23250 = vmatprep.subr.bf16.mxu0 %v26412_v42  ;;  %v739_v29 = vand.u32 4294901760, %v738_v26  ;;  %23279 = vmatpush3.msra.mxu1 %v27662_v27 }
  0xf0   :  { %24305 = vmatprep.subr.bf16.mxu1 %v32510_v53 }
  0xf1   :  { %v27667_v32 = vpack.c.bf16 %v739_v29, %v732_v28 }
  0xf2   :  { %23251 = vmatpush3.bf16.msra.mxu0 %v26412_v42  ;;  %v760_v42 = vand.u32 4294901760, %v759_v40 }
  0xf3   :  { %23252 = vmatprep.subr.bf16.mxu0 %v26413_v44 }
  0xf4   :  { %v27689_v46 = vpack.c.bf16 %v767_v43, %v760_v42 }
  0xf6   :  { %23253 = vmatpush3.bf16.msra.mxu0 %v26413_v44  ;;  %v772_v44 = vand.u32 4294901760, %v27629_v13 }
  0xf7   :  { %23408 = vmatprep.subr.mxu0 %v32490_v16 }
  0xf8   :  { %v24360_v1 = vpack.c.bf16 %v32919_v0, %v772_v44 }
  0xf9   :  { %23255 = vmatmul.mubr.msk.bf16.vlgmr.msra.gmra.mrb[0].mxu0 %vm369_vm4, %v506_v47  ;;  %v773_v47 = vsub.f32 %v27629_v13, %v772_v44  ;;  %v26415_v44 = vld [vmem:[%s27297_s29 + $0x34] sm:$0xff]   ;;  %vm4333_vm4 = vsmask.f32 3328 }
  0xfa   :  { %23410 = vmatprep.mubr.msk.f32.mxu0 %vm32554_vm6, %v32490_v16 }
  0xfb   :  { %v774_v49 = vand.u32 4294901760, %v773_v47 }
  0xfd   :  { %v27699_v55 = vpack.c.bf16 %v781_v50, %v774_v49 }
 0x1cc   :  { %v27717_v10 = vpop.f32.mrb[0].mxu0 }
 0x1cd   :  { %v27719_v11 = vpop.f32.mrb[1].mxu0  ;;  %v609_v26 = vmul.f32 %v27717_v10, %v27717_v10  ;;  %v595_v35 = vsel %vm591_vm7, %v27717_v10, 0.0 }
 0x1ce   :  { %v607_v12 = vmul.f32 %v27719_v11, %v27719_v11  ;;  %v27723_v14 = vpop.f32.mrb[2].mxu0  ;;  %v592_v28 = vsel %vm591_vm7, %v27719_v11, 0.0 }
 0x1cf   :  { %v27725_v25 = vpop.f32.mrb[3].mxu0  ;;  %v610_v40 = vmul.f32 %v27723_v14, %v27723_v14  ;;  %v614_v47 = vsel %vm591_vm7, %v609_v26, 0.0  ;;  %v597_v48 = vsel %vm591_vm7, %v27723_v14, 0.0 }
 0x1d0   :  { %v593_v29 = vsel %vm591_vm7, %v27725_v25, 0.0  ;;  %v608_v33 = vmul.f32 %v27725_v25, %v27725_v25  ;;  %v611_v36 = vsel %vm591_vm7, %v607_v12, 0.0 }
 0x1d1   :  { %v594_v34 = vadd.f32 %v593_v29, %v592_v28  ;;  %v616_v56 = vsel %vm591_vm7, %v610_v40, 0.0 }
 0x1d2   :  { %v612_v41 = vsel %vm591_vm7, %v608_v33, 0.0 }
 0x1d3   :  { %v596_v42 = vadd.f32 %v595_v35, %v594_v34  ;;  %v613_v43 = vadd.f32 %v612_v41, %v611_v36 }
 0x1d5   :  { %v598_v49 = vadd.f32 %v597_v48, %v596_v42  ;;  %v615_v50 = vadd.f32 %v614_v47, %v613_v43 }
 0x1d7   :  { %v599_v57 = vrot.slane %v598_v49, 4  ;;  %v617_v59 = vadd.f32 %v616_v56, %v615_v50 }
 0x1d9   :  { %v600_v60 = vadd.f32 %v599_v57, %v598_v49  ;;  %v618_v12 = vrot.slane %v617_v59, 4 }
 0x1db   :  { %v601_v28 = vrot.slane %v600_v60, 2  ;;  %v619_v29 = vadd.f32 %v618_v12, %v617_v59  ;;  %v27256_v12 = vmov 1966171168  }
 0x1dd   :  { %v602_v54 = vadd.f32 %v601_v28, %v600_v60  ;;  %v620_v51 = vrot.slane %v619_v29, 2  ;;  %v1682_v28 = vunpack.c.l.s4 %v27256_v12  ;;  %v26423_v12 = vld [vmem:[%s27297_s29 + $0x18] sm:$0xff]  }
 0x1df   :  { %v603_v33 = vrot.slane %v602_v54, 1  ;;  %v621_v34 = vadd.f32 %v620_v51, %v619_v29  ;;  %v1684_v29 = vlaneseq }
 0x1e1   :  { %v604_v35 = vadd.f32 %v603_v33, %v602_v54  ;;  %v622_v36 = vrot.slane %v621_v34, 1  ;;  %v1683_v33 = vunpack.c.0.s8 %v1682_v28  ;;  %v26424_v28 = vld [vmem:[%s27297_s29 + $0x20] sm:$0xff]  }
 0x1e3   :  { %v623_v26 = vadd.f32 %v622_v36, %v621_v34  ;;  %v606_v41 = vmul.f32 0.03125, %v604_v35  ;;  %v27878_v34 = vshrl.u32 %v1684_v29, 7  ;;  %v26425_v29 = vld [vmem:[%s27297_s29 + $0x28] ss:$0 sps:$4 sm:$0xff]  }
 0x1e5   :  { %v624_v45 = vmul.f32 0.03125, %v623_v26  ;;  %32922 = vst [vmem:[#allocation53_spill] sm:$0xff] %v27878_v34  ;;  %v27881_v35 = vsub.s32 %v1683_v33, %v27878_v34  ;;  %v26426_v33 = vld [vmem:[%s27297_s29 + $0x58] sm:$0xff]  }
 0x1e7   :  { %v626_v42 = vsel %vm306_vm0, %v606_v41, %v624_v45  ;;  %v799_v45 = vsub.f32 %v27646_v21, %v27662_v27  ;;  %v24351_v21 = vpack.c.bf16 %v737_v24, %v730_v23  ;;  %v32921_v23 = vand.u32 4294901760, %v27639_v20  ;;  %32923 = vst [vmem:[#allocation54_spill] sm:$0xff] %v27881_v35 }
 0x1e8   :  { %v639_v43 = vsel %vm591_vm7, %v626_v42, 0  ;;  %v1677_v42 = vld [vmem:[#allocation2] sm:$0x1] }
 0x1e9   :  { %v27747_v40 = vand.u32 4294901760, %v639_v43  ;;  %v800_v51 = vand.u32 4294901760, %v799_v45  ;;  %v24363_v24 = vpack.c.bf16 %v32921_v23, %v32920_v2 }
 0x1eb   :  { %v718_v47 = vsub.f32 %v639_v43, %v27747_v40 }
 0x1ed   :  { %v719_v48 = vand.u32 4294901760, %v718_v47 }
 0x1ef   :  { %v720_v49 = vsub.f32 %v718_v47, %v719_v48 }
 0x1f1   :  { %v721_v50 = vand.u32 4294901760, %v720_v49 }
 0x1f3   :  { %23281 = vmatmul.mubr.f32.vlgmr.msra.gmra.mrb[0].mxu1 %v721_v50 }
 0x1f4   :  { %24307 = vmatpush3.bf16.msra.mxu1 %v27667_v32  ;;  %23305 = vmatprep.mubr.msk.f32.mxu1 %vm32554_vm6, %v32490_v16  ;;  %v801_v32 = vsub.f32 %v799_v45, %v800_v51 }
 0x1f5   :  { %24308 = vmatprep.subr.bf16.mxu1 %v32510_v53 }
 0x1f6   :  { %v802_v54 = vand.u32 4294901760, %v801_v32 }
 0x1f8   :  { %24310 = vmatpush3.bf16.msra.mxu1 %v27679_v39  ;;  %v24354_v39 = vpack.c.bf16 %v751_v31, %v744_v30 }
 0x1f9   :  { %24311 = vmatprep.subr.bf16.mxu1 %v32510_v53 }
 0x1fc   :  { %24313 = vmatpush3.bf16.msra.mxu1 %v27689_v46  ;;  %v26416_v46 = vld [vmem:[%s27297_s29 + $0x3c] sm:$0xff]  }
 0x1fd   :  { %24314 = vmatprep.subr.bf16.mxu1 %v32510_v53 }
 0x200   :  { %24316 = vmatpush3.bf16.msra.mxu1 %v27699_v55  ;;  %v26417_v55 = vld [vmem:[%s27297_s29 + $0x44] sm:$0xff]  }
 0x201   :  { %24317 = vmatprep.subr.bf16.mxu1 %v32510_v53 }
 0x204   :  { %24319 = vmatpush3.bf16.msra.mxu1 %v24318_v61  ;;  %v26418_v61 = vld [vmem:[%s27297_s29 + $0x4c] sm:$0xff]  }
 0x205   :  { %23303 = vmatprep.subr.mxu1 %v32490_v16 }
 0x208   :  { %23304 = vmatpush3.msra.mxu1 %v802_v54 }
 0x209   :  { %23306 = vmatmul.mubr.f32.vlgmr.msra.gmra.mrb[0].mxu1 %v27747_v40  ;;  %24320 = vmatprep.subr.bf16.mxu1 %v32510_v53 }
 0x20a   :  { %24322 = vmatpush3.bf16.msra.mxu1 %v24321_v62  ;;  %23330 = vmatprep.mubr.msk.f32.mxu1 %vm32554_vm6, %v32490_v16  ;;  %v26419_v62 = vld [vmem:[%s27297_s29 + $0x54] ss:$0 sps:$4 sm:$0xff]  }
 0x20b   :  { %24323 = vmatprep.subr.bf16.mxu1 %v32510_v53 }
 0x20e   :  { %24325 = vmatpush3.bf16.msra.mxu1 %v24324_v3  ;;  %v1836_v3 = vsel %vm32556_vm8, %v26419_v62, 0 }
 0x20f   :  { %24326 = vmatprep.subr.bf16.mxu1 %v32510_v53 }
 0x212   :  { %24328 = vmatpush3.bf16.msra.mxu1 %v24327_v4  ;;  %v27875_v4 = vld [vmem:[%s27297_s29] sm:$0xff]  }
 0x213   :  { %24329 = vmatprep.subr.bf16.mxu1 %v32510_v53 }
 0x216   :  { %24331 = vmatpush3.bf16.msra.mxu1 %v24330_v5 }
 0x217   :  { %24332 = vmatprep.subr.bf16.mxu1 %v32510_v53 }
 0x21a   :  { %24334 = vmatpush3.bf16.msra.mxu1 %v24333_v9 }
 0x21b   :  { %23328 = vmatprep.subr.mxu1 %v32490_v16 }
 0x21e   :  { %23329 = vmatpush3.msra.mxu1 %v799_v45 }
 0x21f   :  { %23331 = vmatmul.mubr.f32.vlgmr.msra.gmra.mrb[0].mxu1 %v718_v47  ;;  %24335 = vmatprep.subr.bf16.mxu1 %v32510_v53 }
 0x220   :  { %24337 = vmatpush3.bf16.msra.mxu1 %v27597_v52  ;;  %23355 = vmatprep.mubr.msk.f32.mxu1 %vm32554_vm6, %v32490_v16 }
 0x221   :  { %24338 = vmatprep.subr.bf16.mxu1 %v32510_v53 }
 0x224   :  { %24340 = vmatpush3.bf16.msra.mxu1 %v27604_v58 }
 0x225   :  { %24341 = vmatprep.subr.bf16.mxu1 %v32510_v53 }
 0x228   :  { %24343 = vmatpush3.bf16.msra.mxu1 %v27621_v6 }
 0x229   :  { %24344 = vmatprep.subr.bf16.mxu1 %v32510_v53 }
 0x22c   :  { %24346 = vmatpush3.bf16.msra.mxu1 %v27633_v17 }
 0x22d   :  { %24347 = vmatprep.subr.bf16.mxu1 %v32510_v53 }
 0x230   :  { %24349 = vmatpush3.bf16.msra.mxu1 %v27649_v22 }
 0x231   :  { %23353 = vmatprep.subr.mxu1 %v32490_v16 }
 0x234   :  { %23354 = vmatpush3.msra.mxu1 %v27662_v27 }
 0x235   :  { %23356 = vmatmul.mubr.f32.vlgmr.msra.gmra.mrb[0].mxu1 %v719_v48  ;;  %24350 = vmatprep.subr.bf16.mxu1 %v32510_v53  ;;  %v1698_v48 = vld [vmem:[#allocation4] sm:$0x1] }
 0x236   :  { %24352 = vmatpush3.bf16.msra.mxu1 %v24351_v21  ;;  %23380 = vmatprep.mubr.msk.f32.mxu1 %vm32554_vm6, %v32490_v16 }
 0x237   :  { %24353 = vmatprep.subr.bf16.mxu1 %v32510_v53 }
 0x23a   :  { %24355 = vmatpush3.bf16.msra.mxu1 %v24354_v39 }
 0x23b   :  { %24356 = vmatprep.subr.bf16.mxu1 %v32510_v53 }
 0x23e   :  { %24358 = vmatpush3.bf16.msra.mxu1 %v24357_v63 }
 0x23f   :  { %24359 = vmatprep.subr.bf16.mxu1 %v32510_v53 }
 0x242   :  { %24361 = vmatpush3.bf16.msra.mxu1 %v24360_v1 }
 0x243   :  { %24362 = vmatprep.subr.bf16.mxu1 %v32510_v53 }
 0x246   :  { %24364 = vmatpush3.bf16.msra.mxu1 %v24363_v24 }
 0x247   :  { %23378 = vmatprep.subr.mxu1 %v32490_v16 }
 0x24a   :  { %23379 = vmatpush3.msra.mxu1 %v800_v51 }
 0x24b   :  { %23381 = vmatmul.mubr.f32.vlgmr.msra.gmra.mrb[0].mxu1 %v27747_v40  ;;  %24365 = vmatprep.subr.bf16.mxu1 %v32510_v53 }
 0x24c   :  { %24367 = vmatpush3.bf16.msra.mxu1 %v27597_v52  ;;  %23405 = vmatprep.mubr.msk.f32.mxu1 %vm32554_vm6, %v32490_v16  ;;  %v1217_v52 = vld [vmem:[%s27282_s17] sm:$0xf]  ;;  %s32937_s17 = sld [smem:[#allocation18_spill]] }
 0x24d   :  { %24368 = vmatprep.subr.bf16.mxu1 %v32510_v53 }
 0x250   :  { %24370 = vmatpush3.bf16.msra.mxu1 %v27604_v58  ;;  %v1224_v58 = vsel %vm32556_vm8, %v1217_v52, 0 }
 0x251   :  { %24371 = vmatprep.subr.bf16.mxu1 %v32510_v53 }
 0x254   :  { %24373 = vmatpush3.bf16.msra.mxu1 %v27621_v6  ;;  %v1227_v6 = vand.u32 4294901760, %v1224_v58 }
 0x255   :  { %24374 = vmatprep.subr.bf16.mxu1 %v32510_v53 }
 0x256   :  { %23409 = vmatpush3.msra.mxu0 %v1227_v6  ;;  %v1304_v7 = vsub.f32 %v1224_v58, %v1227_v6 }
 0x257   :  { %23413 = vmatprep.subr.mxu0 %v32490_v16 }
 0x258   :  { %24376 = vmatpush3.bf16.msra.mxu1 %v27633_v17  ;;  %v1305_v18 = vand.u32 4294901760, %v1304_v7 }
 0x259   :  { %24377 = vmatprep.subr.bf16.mxu1 %v32510_v53 }
 0x25c   :  { %24379 = vmatpush3.bf16.msra.mxu1 %v27649_v22  ;;  %v1306_v22 = vsub.f32 %v1304_v7, %v1305_v18 }
 0x25d   :  { %23403 = vmatprep.subr.mxu1 %v32490_v16 }
 0x25e   :  { %v1307_v31 = vand.u32 4294901760, %v1306_v22 }
 0x260   :  { %23404 = vmatpush3.msra.mxu1 %v27662_v27 }
 0x261   :  { %23406 = vmatmul.mubr.f32.vlgmr.msra.gmra.mrb[0].mxu1 %v27747_v40  ;;  %24380 = vmatprep.subr.bf16.mxu1 %v32510_v53  ;;  %v27886_v40 = vsub.s32 0, %v27878_v34 }
 0x262   :  { %23506 = vmatprep.mubr.msk.f32.mxu1 %vm32554_vm6, %v32490_v16 }
 0x263   :  { %32924 = vst [vmem:[#allocation55_spill] sm:$0xff] %v27886_v40 }
 0x334   :  { %v1213_v8 = vpop.f32.mrb[0].mxu1 }
 0x335   :  { %v1220_v13 = vsel %vm32552_vm9, %v1213_v8, 0  ;;  %v23407_v17 = vpop.f32.mrb[1].mxu1 }
 0x336   :  { %v1292_v19 = vand.u32 4294901760, %v1220_v13 }
 0x338   :  { %v1293_v20 = vsub.f32 %v1220_v13, %v1292_v19 }
 0x33a   :  { %v1294_v27 = vand.u32 4294901760, %v1293_v20 }
 0x33c   :  { %v1295_v30 = vsub.f32 %v1293_v20, %v1294_v27 }
 0x33e   :  { %v1296_v37 = vand.u32 4294901760, %v1295_v30 }
 0x340   :  { %23411 = vmatmul.mubr.f32.vlgmr.msra.gmra.mrb[4].mxu0 %v1296_v37 }
 0x341   :  { %23414 = vmatpush3.msra.mxu0 %v1307_v31  ;;  %23415 = vmatprep.mubr.msk.f32.mxu0 %vm32554_vm6, %v32490_v16 }
 0x342   :  { %23418 = vmatprep.subr.mxu0 %v32490_v16 }
 0x348   :  { %23416 = vmatmul.mubr.f32.vlgmr.msra.gmra.mrb[4].mxu0 %v1292_v19 }
 0x349   :  { %23419 = vmatpush3.msra.mxu0 %v1304_v7  ;;  %23420 = vmatprep.mubr.msk.f32.mxu0 %vm32554_vm6, %v32490_v16 }
 0x34a   :  { %23423 = vmatprep.subr.mxu0 %v32490_v16 }
 0x350   :  { %23421 = vmatmul.mubr.f32.vlgmr.msra.gmra.mrb[4].mxu0 %v1293_v20 }
 0x351   :  { %23424 = vmatpush3.msra.mxu0 %v1227_v6  ;;  %23425 = vmatprep.mubr.msk.f32.mxu0 %vm32554_vm6, %v32490_v16 }
 0x352   :  { %23428 = vmatprep.subr.mxu0 %v32490_v16 }
 0x358   :  { %23426 = vmatmul.mubr.f32.vlgmr.msra.gmra.mrb[4].mxu0 %v1294_v27 }
 0x359   :  { %23429 = vmatpush3.msra.mxu0 %v1305_v18  ;;  %23430 = vmatprep.mubr.msk.f32.mxu0 %vm32554_vm6, %v32490_v16 }
 0x35a   :  { %23433 = vmatprep.subr.mxu0 %v32490_v16 }
 0x360   :  { %23431 = vmatmul.mubr.f32.vlgmr.msra.gmra.mrb[4].mxu0 %v1292_v19 }
 0x361   :  { %23434 = vmatpush3.msra.mxu0 %v1227_v6  ;;  %23435 = vmatprep.mubr.msk.f32.mxu0 %vm32554_vm6, %v32490_v16 }
 0x362   :  { %23438 = vmatprep.subr.bf16.mxu0 %v26414_v38 }
 0x368   :  { %23436 = vmatmul.mubr.f32.vlgmr.msra.gmra.mrb[4].mxu0 %v1292_v19 }
 0x369   :  { %23439 = vmatpush3.bf16.msra.mxu0 %v26414_v38 }
 0x36a   :  { %23440 = vmatprep.subr.bf16.mxu0 %v26415_v44 }
 0x36d   :  { %23441 = vmatpush3.bf16.msra.mxu0 %v26415_v44 }
 0x36e   :  { %23442 = vmatprep.subr.bf16.mxu0 %v26416_v46 }
 0x371   :  { %23443 = vmatpush3.bf16.msra.mxu0 %v26416_v46 }
 0x372   :  { %23444 = vmatprep.subr.bf16.mxu0 %v26417_v55 }
 0x375   :  { %23445 = vmatpush3.bf16.msra.mxu0 %v26417_v55 }
 0x376   :  { %23446 = vmatprep.subr.bf16.mxu0 %v26418_v61 }
 0x379   :  { %23447 = vmatpush3.bf16.msra.mxu0 %v26418_v61 }
 0x37a   :  { %26337 = vmatprep.subr.msk.bf16.mxu0 %vm32556_vm8, %v26419_v62 }
 0x37d   :  { %23449 = vmatpush3.bf16.msra.mxu0 %v1836_v3 }
 0x37e   :  { %23454 = vmatprep.subr.bf16.mxu0 %v27875_v4 }
 0x43b   :  { %v1668_v5 = vpop.f32.mrb[4].mxu0 }
 0x43c   :  { %v1672_v9 = vmul.f32 %v1668_v5, %v1668_v5  ;;  %v23437_v56 = vpop.f32.mrb[5].mxu0 }
 0x43e   :  { %v1674_v57 = vrot.slane %v1672_v9, 7 }
 0x440   :  { %v1676_v59 = vsub.f32 %v1668_v5, %v1674_v57  ;;  %v26421_v57 = vld [vmem:[%s27297_s29 + $0x8] sm:$0xff]  }
 0x442   :  { %v1678_v60 = vadd.f32 1e-05, %v1676_v59 }
 0x444   :  { %27026 = vrsqrt.f32 %v1678_v60  ;;  %v26422_v60 = vld [vmem:[%s27297_s29 + $0x10] sm:$0xff]  }
 0x44e   :  { %v27027_v36 = vpop.eup %27026 }
 0x44f   :  { %v1687_v26 = vrot.slane %v27027_v36, %v27881_v35 }
 0x451   :  { %v1688_v41 = vcombine.high %v1687_v26, %v1687_v26 }
 0x453   :  { %v1695_v43 = vrot.slane %v1688_v41, %v27881_v35  ;;  %v26427_v41 = vld [vmem:[%s27297_s29 + $0x60] sm:$0xff]  }
 0x455   :  { %v1697_v47 = vmul.f32 %v1695_v43, %v1677_v42  ;;  %v26428_v43 = vld [vmem:[%s27297_s29 + $0x68] sm:$0xff]  }
 0x457   :  { %v1699_v49 = vmul.f32 %v1697_v47, %v1668_v5  ;;  %v1705_v50 = vrot.slane %v1697_v47, %v27886_v40  ;;  %v26429_v47 = vld [vmem:[%s27297_s29 + $0x70] sm:$0xff]  }
 0x459   :  { %v1700_v45 = vsub.f32 %v1698_v48, %v1699_v49  ;;  %v1707_v51 = vmul.f32 %v1705_v50, %v27719_v11  ;;  %v1708_v32 = vmul.f32 %v1705_v50, %v27725_v25  ;;  %v1709_v54 = vmul.f32 %v27717_v10, %v1705_v50  ;;  %v26430_v48 = vld [vmem:[%s27297_s29 + $0x78] sm:$0xff]   ;;  %v26431_v49 = vld [vmem:[%s27297_s29 + $0x80] ss:$0 sps:$4 sm:$0xff]   ;;  %s32970_s29 = sld [smem:[#allocation19_spill]] }
 0x45a   :  { %v1710_v21 = vmul.f32 %v27723_v14, %v1705_v50  ;;  %v2038_v50 = vsel %vm32556_vm8, %v26431_v49, 0 }
 0x45b   :  { %v1715_v39 = vrot.slane %v1700_v45, %v27886_v40 }
 0x45d   :  { %v1717_v63 = vadd.f32 %v1715_v39, %v1707_v51  ;;  %v1718_v0 = vadd.f32 %v1715_v39, %v1708_v32  ;;  %v1719_v1 = vadd.f32 %v1715_v39, %v1709_v54  ;;  %v1720_v2 = vadd.f32 %v1715_v39, %v1710_v21  ;;  %v2127_v54 = vld [vmem:[%s27302_s3] sm:$0xff]  ;;  %v2128_v21 = vld [vmem:[%s27302_s3 + $0x8] sm:$0xff] }
 0x45e   :  { %v2141_v39 = vand.u32 4294901760, %v2127_v54 }
 0x45f   :  { %v1723_v23 = vmax.f32 %v1719_v1, 0.0  ;;  %v1724_v24 = vmax.f32 %v1720_v2, 0.0  ;;  %v1721_v52 = vmax.f32 %v1717_v63, 0.0  ;;  %v1722_v58 = vmax.f32 %v1718_v0, 0.0  ;;  %v2129_v1 = vld [vmem:[%s27302_s3 + $0x10] sm:$0xff]  ;;  %v2130_v2 = vld [vmem:[%s27302_s3 + $0x18] sm:$0xff] }
 0x460   :  { %v2144_v63 = vand.u32 4294901760, %v2128_v21 }
 0x461   :  { %v1725_v6 = vpack.c.bf16 %v1722_v58, %v1721_v52  ;;  %v1726_v7 = vpack.c.bf16 %v1724_v24, %v1723_v23  ;;  %v2147_v23 = vand.u32 4294901760, %v2129_v1  ;;  %v2150_v24 = vand.u32 4294901760, %v2130_v2  ;;  %v2131_v58 = vld [vmem:[%s27302_s3 + $0x20] sm:$0xff] }
 0x462   :  { %v27943_v0 = vpack.c.bf16 %v2144_v63, %v2141_v39 }
 0x463   :  { %v1728_v8 = vshrl.u32 %v1725_v6, 16  ;;  %v1735_v11 = vshrl.u32 %v1726_v7, 16  ;;  %v1731_v25 = vshll.u32 %v1725_v6, 16  ;;  %v1738_v10 = vshll.u32 %v1726_v7, 16  ;;  %v2132_v6 = vld [vmem:[%s27302_s3 + $0x28] sm:$0xff] }
 0x464   :  { %24382 = vmatpush3.bf16.msra.mxu1 %v27943_v0  ;;  %v27949_v52 = vpack.c.bf16 %v2150_v24, %v2147_v23  ;;  %v2153_v7 = vand.u32 4294901760, %v2131_v58 }
 0x465   :  { %v1730_v13 = vrot.slane %v1728_v8, 7  ;;  %v1737_v17 = vrot.slane %v1735_v11, 7  ;;  %24383 = vmatprep.subr.bf16.mxu1 %v32510_v53  ;;  %v2156_v8 = vand.u32 4294901760, %v2132_v6  ;;  %v27955_v11 = vsub.f32 %v2127_v54, %v2141_v39 }
 0x467   :  { %v1733_v18 = vor.u32 %v1731_v25, %v1730_v13  ;;  %v1747_v14 = vsel %vm27568_vm3, %v1730_v13, 0  ;;  %v1740_v19 = vor.u32 %v1738_v10, %v1737_v17  ;;  %v27898_v20 = vsel %vm27568_vm3, %v1737_v17, 0  ;;  %v2133_v10 = vld [vmem:[%s27302_s3 + $0x30] sm:$0xff] }
 0x468   :  { %v1768_v31 = vshll.u32 %v1747_v14, 16  ;;  %v1780_v38 = vshll.u32 %v27898_v20, 16  ;;  %v1981_v26 = vrot.slane %v1747_v14, 1  ;;  %v1984_v51 = vrot.slane %v27898_v20, 1  ;;  %24385 = vmatpush3.bf16.msra.mxu1 %v27949_v52  ;;  %v2135_v14 = vld [vmem:[%s27302_s3 + $0x40] sm:$0xff] }
 0x469   :  { %v1745_v22 = vsel %vm27568_vm3, 0, %v1733_v18  ;;  %v27904_v27 = vsel %vm27568_vm3, 0, %v1740_v19  ;;  %24386 = vmatprep.subr.bf16.mxu1 %v32510_v53  ;;  %v27957_v13 = vsub.f32 %v2128_v21, %v2144_v63  ;;  %v27959_v25 = vsub.f32 %v2129_v1, %v2147_v23  ;;  %v2134_v18 = vld [vmem:[%s27302_s3 + $0x38] sm:$0xff] }
 0x46a   :  { %v1763_v30 = vshll.u32 %v1745_v22, 16  ;;  %v1775_v37 = vshll.u32 %v27904_v27, 16  ;;  %v1761_v44 = vshrl.u32 %v1745_v22, 16  ;;  %v1773_v55 = vshrl.u32 %v27904_v27, 16 }
 0x46b   :  { %v1770_v3 = vrot.slane %v1768_v31, 1  ;;  %v1782_v9 = vrot.slane %v1780_v38, 1  ;;  %v1980_v36 = vrot.slane %v1745_v22, 1  ;;  %v1983_v45 = vrot.slane %v27904_v27, 1 }
 0x46c   :  { %v1765_v46 = vrot.slane %v1763_v30, 1  ;;  %v1777_v61 = vrot.slane %v1775_v37, 1  ;;  %v27961_v17 = vsub.f32 %v2130_v2, %v2150_v24  ;;  %v27966_v19 = vpack.c.bf16 %v2156_v8, %v2153_v7  ;;  %v2136_v30 = vld [vmem:[%s27302_s3 + $0x48] sm:$0xff]  ;;  %s32972_s3 = sld [smem:[#allocation22_spill]] }
 0x46d   :  { %v1982_v42 = vsel %vm500_vm5, %v1980_v36, %v1981_v26  ;;  %v1985_v32 = vsel %vm500_vm5, %v1983_v45, %v1984_v51  ;;  %v27968_v20 = vsub.f32 %v2131_v58, %v2153_v7  ;;  %v2162_v31 = vand.u32 4294901760, %v2134_v18 }
 0x46e   :  { %v1766_v62 = vor.u32 %v1765_v46, %v1761_v44  ;;  %v1778_v5 = vor.u32 %v1777_v61, %v1773_v55  ;;  %v2165_v37 = vand.u32 4294901760, %v2135_v14  ;;  %24388 = vmatpush3.bf16.msra.mxu1 %v27966_v19  ;;  %v2168_v44 = vand.u32 4294901760, %v2136_v30 }
 0x46f   :  { %24389 = vmatprep.subr.bf16.mxu1 %v32510_v53  ;;  %v27979_v55 = vsub.f32 %v2134_v18, %v2162_v31  ;;  %v24414_v18 = vpack.c.bf16 %v27961_v17, %v27959_v25  ;;  %vm4334_vm5 = vsmask.f32 7440 }
 0x470   :  { %v1771_v56 = vsel %vm319_vm2, %v1766_v62, %v1770_v3  ;;  %v1783_v59 = vsel %vm319_vm2, %v1778_v5, %v1782_v9  ;;  %v27981_v61 = vsub.f32 %v2135_v14, %v2165_v37  ;;  %v27983_v62 = vsub.f32 %v2136_v30, %v2168_v44  ;;  %vm28306_vm12 = vmor %vm4333_vm4, %vm4334_vm5 }
 0x471   :  { %23450 = vmatprep.mubr.msk.bf16.mxu0 %vm591_vm7, %v1771_v56  ;;  %v2228_v3 = vand.u32 4294901760, %v27955_v11  ;;  %v2235_v5 = vand.u32 4294901760, %v27957_v13  ;;  %v27988_v9 = vpack.c.bf16 %v2168_v44, %v2165_v37  ;;  %v2277_v51 = vand.u32 4294901760, %v27979_v55 }
 0x472   :  { %23451 = vmatmul.mubr.msk.bf16.vlgmr.msra.gmra.mrb[8].mxu0 %vm591_vm7, %v1783_v59  ;;  %v2284_v1 = vand.u32 4294901760, %v27981_v61  ;;  %v2291_v2 = vand.u32 4294901760, %v27983_v62  ;;  %v24423_v30 = vpack.c.bf16 %v27983_v62, %v27981_v61  ;;  %vm4572_vm2 = vcmask 1046532  }
 0x473   :  { %23455 = vmatpush3.bf16.msra.mxu0 %v27875_v4  ;;  %23466 = vmatprep.mubr.msk.bf16.mxu0 %vm591_vm7, %v1745_v22  ;;  %v1925_v4 = vsel %vm32556_vm8, %v26425_v29, 0  ;;  %v27970_v22 = vsub.f32 %v2132_v6, %v2156_v8  ;;  %v2229_v56 = vsub.f32 %v27955_v11, %v2228_v3  ;;  %v2278_v21 = vsub.f32 %v27979_v55, %v2277_v51 }
 0x474   :  { %23456 = vmatprep.subr.bf16.mxu0 %v26421_v57  ;;  %v2285_v24 = vsub.f32 %v27981_v61, %v2284_v1  ;;  %v2292_v58 = vsub.f32 %v27983_v62, %v2291_v2 }
 0x475   :  { %v2230_v59 = vand.u32 4294901760, %v2229_v56  ;;  %v2279_v63 = vand.u32 4294901760, %v2278_v21  ;;  %v24417_v14 = vpack.c.bf16 %v27970_v22, %v27968_v20 }
 0x476   :  { %v2286_v6 = vand.u32 4294901760, %v2285_v24  ;;  %v2293_v7 = vand.u32 4294901760, %v2292_v58 }
 0x477   :  { %23457 = vmatpush3.bf16.msra.mxu0 %v26421_v57  ;;  %v2236_v57 = vsub.f32 %v27957_v13, %v2235_v5 }
 0x478   :  { %23458 = vmatprep.subr.bf16.mxu0 %v26422_v60  ;;  %v28019_v8 = vpack.c.bf16 %v2293_v7, %v2286_v6 }
 0x47b   :  { %23459 = vmatpush3.bf16.msra.mxu0 %v26422_v60  ;;  %v2237_v60 = vand.u32 4294901760, %v2236_v57  ;;  %v28039_v57 = vpack.c.bf16 %v2291_v2, %v2284_v1 }
 0x47c   :  { %23460 = vmatprep.subr.bf16.mxu0 %v26423_v12 }
 0x47f   :  { %23461 = vmatpush3.bf16.msra.mxu0 %v26423_v12  ;;  %v2242_v12 = vand.u32 4294901760, %v27959_v25 }
 0x480   :  { %23462 = vmatprep.subr.bf16.mxu0 %v26424_v28 }
 0x483   :  { %23463 = vmatpush3.bf16.msra.mxu0 %v26424_v28  ;;  %v2249_v28 = vand.u32 4294901760, %v27961_v17 }
 0x484   :  { %26338 = vmatprep.subr.msk.bf16.mxu0 %vm32556_vm8, %v26425_v29  ;;  %v27997_v29 = vpack.c.bf16 %v2237_v60, %v2230_v59 }
 0x485   :  { %v28033_v37 = vpack.c.bf16 %v2249_v28, %v2242_v12 }
 0x487   :  { %23465 = vmatpush3.bf16.msra.mxu0 %v1925_v4  ;;  %v2243_v4 = vsub.f32 %v27959_v25, %v2242_v12 }
 0x488   :  { %23470 = vmatprep.subr.bf16.mxu0 %v26426_v33 }
 0x489   :  { %v2244_v36 = vand.u32 4294901760, %v2243_v4 }
 0x48a   :  { %23467 = vmatmul.mubr.msk.bf16.vlgmr.msra.gmra.mrb[8].mxu0 %vm591_vm7, %v27904_v27  ;;  %v2159_v27 = vand.u32 4294901760, %v2133_v10 }
 0x48b   :  { %23471 = vmatpush3.bf16.msra.mxu0 %v26426_v33  ;;  %23482 = vmatprep.mubr.msk.bf16.mxu0 %vm591_vm7, %v1982_v42  ;;  %v2250_v33 = vsub.f32 %v27961_v17, %v2249_v28  ;;  %v2263_v42 = vand.u32 4294901760, %v27970_v22 }
 0x48c   :  { %23472 = vmatprep.subr.bf16.mxu0 %v26427_v41  ;;  %v27974_v38 = vsub.f32 %v2133_v10, %v2159_v27  ;;  %v27977_v46 = vpack.c.bf16 %v2162_v31, %v2159_v27  ;;  %v24411_v10 = vpack.c.bf16 %v27957_v13, %v27955_v11  ;;  %v28031_v31 = vpack.c.bf16 %v2235_v5, %v2228_v3 }
 0x48d   :  { %v2251_v26 = vand.u32 4294901760, %v2250_v33 }
 0x48e   :  { %24391 = vmatpush3.bf16.msra.mxu1 %v27977_v46  ;;  %v2270_v45 = vand.u32 4294901760, %v27974_v38  ;;  %v24420_v27 = vpack.c.bf16 %v27979_v55, %v27974_v38 }
 0x48f   :  { %23473 = vmatpush3.bf16.msra.mxu0 %v26427_v41  ;;  %24392 = vmatprep.subr.bf16.mxu1 %v32510_v53  ;;  %v2256_v41 = vand.u32 4294901760, %v27968_v20 }
 0x490   :  { %23474 = vmatprep.subr.bf16.mxu0 %v26428_v43  ;;  %v2271_v54 = vsub.f32 %v27974_v38, %v2270_v45  ;;  %v28037_v56 = vpack.c.bf16 %v2277_v51, %v2270_v45 }
 0x491   :  { %v28035_v44 = vpack.c.bf16 %v2263_v42, %v2256_v41 }
 0x492   :  { %24394 = vmatpush3.bf16.msra.mxu1 %v27988_v9  ;;  %v2272_v39 = vand.u32 4294901760, %v2271_v54 }
 0x493   :  { %23475 = vmatpush3.bf16.msra.mxu0 %v26428_v43  ;;  %24395 = vmatprep.subr.bf16.mxu1 %v32510_v53  ;;  %v28003_v43 = vpack.c.bf16 %v2251_v26, %v2244_v36 }
 0x494   :  { %23476 = vmatprep.subr.bf16.mxu0 %v26429_v47  ;;  %v28015_v23 = vpack.c.bf16 %v2279_v63, %v2272_v39 }
 0x497   :  { %23477 = vmatpush3.bf16.msra.mxu0 %v26429_v47  ;;  %v2257_v47 = vsub.f32 %v27968_v20, %v2256_v41 }
 0x498   :  { %23478 = vmatprep.subr.bf16.mxu0 %v26430_v48 }
 0x49b   :  { %23479 = vmatpush3.bf16.msra.mxu0 %v26430_v48  ;;  %v2264_v48 = vsub.f32 %v27970_v22, %v2263_v42 }
 0x49c   :  { %26339 = vmatprep.subr.msk.bf16.mxu0 %vm32556_vm8, %v26431_v49  ;;  %v2258_v49 = vand.u32 4294901760, %v2257_v47 }
 0x49f   :  { %23481 = vmatpush3.bf16.msra.mxu0 %v2038_v50  ;;  %v2265_v50 = vand.u32 4294901760, %v2264_v48 }
 0x4a0   :  { %23624 = vmatprep.subr.mxu0 %v32490_v16 }
 0x4a2   :  { %23483 = vmatmul.mubr.msk.bf16.vlgmr.msra.gmra.mrb[8].mxu0 %vm591_vm7, %v1985_v32  ;;  %v28009_v32 = vpack.c.bf16 %v2265_v50, %v2258_v49  ;;  %vm28299_vm7 = vmor %vm4571_vm15, %vm4572_vm2  ;;  %vm8943_vm2 = vcmask 1042434  }
 0x4a3   :  { %23626 = vmatprep.mubr.msk.f32.mxu0 %vm32554_vm6, %v32490_v16  ;;  %vm8944_vm5 = vmor %vm306_vm0, %vm8943_vm2 }
 0x575   :  { %v28041_v59 = vpop.f32.mrb[8].mxu0 }
 0x576   :  { %v28043_v60 = vpop.f32.mrb[9].mxu0  ;;  %v2110_v5 = vmul.f32 %v28041_v59, %v28041_v59  ;;  %v2097_v41 = vsel %vm2093_vm10, %v28041_v59, 0.0 }
 0x577   :  { %v2108_v4 = vmul.f32 %v28043_v60, %v28043_v60  ;;  %v28047_v33 = vpop.f32.mrb[10].mxu0  ;;  %v2094_v12 = vsel %vm2093_vm10, %v28043_v60, 0.0 }
 0x578   :  { %v28049_v3 = vpop.f32.mrb[11].mxu0  ;;  %v2111_v47 = vmul.f32 %v28047_v33, %v28047_v33  ;;  %v2115_v45 = vsel %vm2093_vm10, %v2110_v5, 0.0  ;;  %v2099_v51 = vsel %vm2093_vm10, %v28047_v33, 0.0 }
 0x579   :  { %v2095_v28 = vsel %vm2093_vm10, %v28049_v3, 0.0  ;;  %v2109_v36 = vmul.f32 %v28049_v3, %v28049_v3  ;;  %v2112_v42 = vsel %vm2093_vm10, %v2108_v4, 0.0 }
 0x57a   :  { %v2096_v26 = vadd.f32 %v2095_v28, %v2094_v12  ;;  %v2117_v39 = vsel %vm2093_vm10, %v2111_v47, 0.0 }
 0x57b   :  { %v2113_v48 = vsel %vm2093_vm10, %v2109_v36, 0.0 }
 0x57c   :  { %v2098_v49 = vadd.f32 %v2097_v41, %v2096_v26  ;;  %v2114_v50 = vadd.f32 %v2113_v48, %v2112_v42 }
 0x57e   :  { %v2100_v54 = vadd.f32 %v2099_v51, %v2098_v49  ;;  %v2116_v21 = vadd.f32 %v2115_v45, %v2114_v50 }
 0x580   :  { %v2101_v63 = vrot.slane %v2100_v54, 4  ;;  %v2118_v1 = vadd.f32 %v2117_v39, %v2116_v21  ;;  %v3161_v39 = vld [vmem:[#allocation6] sm:$0x1] }
 0x582   :  { %v2102_v2 = vadd.f32 %v2101_v63, %v2100_v54  ;;  %v2119_v24 = vrot.slane %v2118_v1, 4  ;;  %v3214_v63 = vld [vmem:[%s27322_s24 + $0x8] sm:$0xff] }
 0x584   :  { %v2103_v58 = vrot.slane %v2102_v2, 2  ;;  %v2120_v6 = vadd.f32 %v2119_v24, %v2118_v1  ;;  %v3220_v24 = vsel %vm32553_vm11, %v3214_v63, 0 }
 0x586   :  { %v2104_v7 = vadd.f32 %v2103_v58, %v2102_v2  ;;  %v2121_v4 = vrot.slane %v2120_v6, 2  ;;  %v3182_v58 = vld [vmem:[#allocation7] sm:$0x1] }
 0x588   :  { %v2105_v12 = vrot.slane %v2104_v7, 1  ;;  %v2122_v28 = vadd.f32 %v2121_v4, %v2120_v6  ;;  %v28180_v4 = vand.u32 4294901760, %v3220_v24 }
 0x58a   :  { %v2106_v36 = vadd.f32 %v2105_v12, %v2104_v7  ;;  %v2123_v26 = vrot.slane %v2122_v28, 1 }
 0x58c   :  { %v2124_v5 = vadd.f32 %v2123_v26, %v2122_v28  ;;  %v2107_v41 = vmul.f32 0.03125, %v2106_v36 }
 0x58e   :  { %v2125_v42 = vmul.f32 0.03125, %v2124_v5 }
 0x590   :  { %v2126_v48 = vsel %vm306_vm0, %v2107_v41, %v2125_v42  ;;  %v28188_v42 = vsub.f32 %v3220_v24, %v28180_v4 }
 0x591   :  { %v2138_v49 = vsel %vm2093_vm10, %v2126_v48, 0 }
 0x592   :  { %v28071_v47 = vand.u32 4294901760, %v2138_v49 }
 0x594   :  { %v2216_v50 = vsub.f32 %v2138_v49, %v28071_v47 }
 0x596   :  { %v2217_v45 = vand.u32 4294901760, %v2216_v50 }
 0x598   :  { %v2218_v51 = vsub.f32 %v2216_v50, %v2217_v45 }
 0x59a   :  { %v2219_v54 = vand.u32 4294901760, %v2218_v51 }
 0x59c   :  { %23507 = vmatmul.mubr.f32.vlgmr.msra.gmra.mrb[2].mxu1 %v2219_v54 }
 0x59d   :  { %24397 = vmatpush3.bf16.msra.mxu1 %v27997_v29  ;;  %23529 = vmatprep.mubr.msk.f32.mxu1 %vm32554_vm6, %v32490_v16  ;;  %v3213_v29 = vld [vmem:[%s27322_s24] sm:$0xff]  ;;  %s32975_s24 = sld [smem:[#allocation21_spill]] }
 0x59e   :  { %24398 = vmatprep.subr.bf16.mxu1 %v32510_v53 }
 0x5a1   :  { %24400 = vmatpush3.bf16.msra.mxu1 %v28003_v43  ;;  %v3217_v43 = vsel %vm32553_vm11, %v3213_v29, 0 }
 0x5a2   :  { %24401 = vmatprep.subr.bf16.mxu1 %v32510_v53 }
 0x5a5   :  { %24403 = vmatpush3.bf16.msra.mxu1 %v28009_v32  ;;  %v28166_v32 = vand.u32 4294901760, %v3217_v43 }
 0x5a6   :  { %24404 = vmatprep.subr.bf16.mxu1 %v32510_v53 }
 0x5a9   :  { %24406 = vmatpush3.bf16.msra.mxu1 %v28015_v23  ;;  %v28169_v23 = vsub.f32 %v3217_v43, %v28166_v32 }
 0x5aa   :  { %24407 = vmatprep.subr.bf16.mxu1 %v32510_v53 }
 0x5ad   :  { %24409 = vmatpush3.bf16.msra.mxu1 %v28019_v8  ;;  %v3293_v8 = vand.u32 4294901760, %v28169_v23 }
 0x5ae   :  { %24410 = vmatprep.subr.bf16.mxu1 %v32510_v53 }
 0x5b0   :  { %23530 = vmatmul.mubr.f32.vlgmr.msra.gmra.mrb[2].mxu1 %v28071_v47 }
 0x5b1   :  { %24412 = vmatpush3.bf16.msra.mxu1 %v24411_v10  ;;  %23552 = vmatprep.mubr.msk.f32.mxu1 %vm32554_vm6, %v32490_v16  ;;  %v3294_v10 = vsub.f32 %v28169_v23, %v3293_v8 }
 0x5b2   :  { %24413 = vmatprep.subr.bf16.mxu1 %v32510_v53 }
 0x5b5   :  { %24415 = vmatpush3.bf16.msra.mxu1 %v24414_v18  ;;  %v3295_v18 = vand.u32 4294901760, %v3294_v10 }
 0x5b6   :  { %24416 = vmatprep.subr.bf16.mxu1 %v32510_v53 }
 0x5b9   :  { %24418 = vmatpush3.bf16.msra.mxu1 %v24417_v14 }
 0x5ba   :  { %24419 = vmatprep.subr.bf16.mxu1 %v32510_v53 }
 0x5bd   :  { %24421 = vmatpush3.bf16.msra.mxu1 %v24420_v27 }
 0x5be   :  { %24422 = vmatprep.subr.bf16.mxu1 %v32510_v53 }
 0x5c1   :  { %24424 = vmatpush3.bf16.msra.mxu1 %v24423_v30 }
 0x5c2   :  { %24425 = vmatprep.subr.bf16.mxu1 %v32510_v53 }
 0x5c4   :  { %23553 = vmatmul.mubr.f32.vlgmr.msra.gmra.mrb[2].mxu1 %v2216_v50 }
 0x5c5   :  { %24427 = vmatpush3.bf16.msra.mxu1 %v27943_v0  ;;  %23575 = vmatprep.mubr.msk.f32.mxu1 %vm32554_vm6, %v32490_v16 }
 0x5c6   :  { %24428 = vmatprep.subr.bf16.mxu1 %v32510_v53 }
 0x5c9   :  { %24430 = vmatpush3.bf16.msra.mxu1 %v27949_v52 }
 0x5ca   :  { %24431 = vmatprep.subr.bf16.mxu1 %v32510_v53 }
 0x5cd   :  { %24433 = vmatpush3.bf16.msra.mxu1 %v27966_v19 }
 0x5ce   :  { %24434 = vmatprep.subr.bf16.mxu1 %v32510_v53 }
 0x5d1   :  { %24436 = vmatpush3.bf16.msra.mxu1 %v27977_v46 }
 0x5d2   :  { %24437 = vmatprep.subr.bf16.mxu1 %v32510_v53 }
 0x5d5   :  { %24439 = vmatpush3.bf16.msra.mxu1 %v27988_v9 }
 0x5d6   :  { %24440 = vmatprep.subr.bf16.mxu1 %v32510_v53 }
 0x5d8   :  { %23576 = vmatmul.mubr.f32.vlgmr.msra.gmra.mrb[2].mxu1 %v2217_v45 }
 0x5d9   :  { %24442 = vmatpush3.bf16.msra.mxu1 %v28031_v31  ;;  %23598 = vmatprep.mubr.msk.f32.mxu1 %vm32554_vm6, %v32490_v16 }
 0x5da   :  { %24443 = vmatprep.subr.bf16.mxu1 %v32510_v53 }
 0x5dd   :  { %24445 = vmatpush3.bf16.msra.mxu1 %v28033_v37 }
 0x5de   :  { %24446 = vmatprep.subr.bf16.mxu1 %v32510_v53 }
 0x5e1   :  { %24448 = vmatpush3.bf16.msra.mxu1 %v28035_v44 }
 0x5e2   :  { %24449 = vmatprep.subr.bf16.mxu1 %v32510_v53 }
 0x5e5   :  { %24451 = vmatpush3.bf16.msra.mxu1 %v28037_v56 }
 0x5e6   :  { %24452 = vmatprep.subr.bf16.mxu1 %v32510_v53 }
 0x5e9   :  { %24454 = vmatpush3.bf16.msra.mxu1 %v28039_v57 }
 0x5ea   :  { %24455 = vmatprep.subr.bf16.mxu1 %v32510_v53 }
 0x5ec   :  { %23599 = vmatmul.mubr.f32.vlgmr.msra.gmra.mrb[2].mxu1 %v28071_v47 }
 0x5ed   :  { %24457 = vmatpush3.bf16.msra.mxu1 %v27943_v0  ;;  %23621 = vmatprep.mubr.msk.f32.mxu1 %vm32554_vm6, %v32490_v16  ;;  %v2703_v0 = vld [vmem:[%s27307_s8] sm:$0xf]  ;;  %s32974_s8 = sld [smem:[#allocation20_spill]] }
 0x5ee   :  { %24458 = vmatprep.subr.bf16.mxu1 %v32510_v53  ;;  %v2708_v11 = vsel %vm32556_vm8, %v2703_v0, 0 }
 0x5ef   :  { %v2711_v13 = vand.u32 4294901760, %v2708_v11 }
 0x5f1   :  { %24460 = vmatpush3.bf16.msra.mxu1 %v27949_v52  ;;  %23625 = vmatpush3.msra.mxu0 %v2711_v13  ;;  %v2788_v52 = vsub.f32 %v2708_v11, %v2711_v13 }
 0x5f2   :  { %24461 = vmatprep.subr.bf16.mxu1 %v32510_v53  ;;  %23629 = vmatprep.subr.mxu0 %v32490_v16 }
 0x5f3   :  { %v2789_v20 = vand.u32 4294901760, %v2788_v52 }
 0x5f5   :  { %24463 = vmatpush3.bf16.msra.mxu1 %v27966_v19 }
 0x5f6   :  { %24464 = vmatprep.subr.bf16.mxu1 %v32510_v53 }
 0x5f9   :  { %24466 = vmatpush3.bf16.msra.mxu1 %v27977_v46  ;;  %v2790_v46 = vsub.f32 %v2788_v52, %v2789_v20 }
 0x5fa   :  { %24467 = vmatprep.subr.bf16.mxu1 %v32510_v53 }
 0x5fb   :  { %v2791_v62 = vand.u32 4294901760, %v2790_v46 }
 0x5fd   :  { %24469 = vmatpush3.bf16.msra.mxu1 %v27988_v9 }
 0x600   :  { %23622 = vmatmul.mubr.f32.vlgmr.msra.gmra.mrb[2].mxu1 %v28071_v47 }
 0x6d3   :  { %v2699_v25 = vpop.f32.mrb[2].mxu1 }
 0x6d4   :  { %v2705_v17 = vsel %vm32552_vm9, %v2699_v25, 0  ;;  %v23623_v19 = vpop.f32.mrb[3].mxu1  ;;  %vm8947_vm9 = vcmask 1046534  }
 0x6d5   :  { %v2776_v22 = vand.u32 4294901760, %v2705_v17 }
 0x6d7   :  { %v2777_v38 = vsub.f32 %v2705_v17, %v2776_v22 }
 0x6d9   :  { %v2778_v55 = vand.u32 4294901760, %v2777_v38 }
 0x6db   :  { %v2779_v61 = vsub.f32 %v2777_v38, %v2778_v55 }
 0x6dd   :  { %v2780_v9 = vand.u32 4294901760, %v2779_v61 }
 0x6df   :  { %23627 = vmatmul.mubr.f32.vlgmr.msra.gmra.mrb[6].mxu0 %v2780_v9 }
 0x6e0   :  { %23630 = vmatpush3.msra.mxu0 %v2791_v62  ;;  %23631 = vmatprep.mubr.msk.f32.mxu0 %vm32554_vm6, %v32490_v16 }
 0x6e1   :  { %23634 = vmatprep.subr.mxu0 %v32490_v16 }
 0x6e7   :  { %23632 = vmatmul.mubr.f32.vlgmr.msra.gmra.mrb[6].mxu0 %v2776_v22 }
 0x6e8   :  { %23635 = vmatpush3.msra.mxu0 %v2788_v52  ;;  %23636 = vmatprep.mubr.msk.f32.mxu0 %vm32554_vm6, %v32490_v16 }
 0x6e9   :  { %23639 = vmatprep.subr.mxu0 %v32490_v16 }
 0x6ef   :  { %23637 = vmatmul.mubr.f32.vlgmr.msra.gmra.mrb[6].mxu0 %v2777_v38 }
 0x6f0   :  { %23640 = vmatpush3.msra.mxu0 %v2711_v13  ;;  %23641 = vmatprep.mubr.msk.f32.mxu0 %vm32554_vm6, %v32490_v16 }
 0x6f1   :  { %23644 = vmatprep.subr.mxu0 %v32490_v16 }
 0x6f7   :  { %23642 = vmatmul.mubr.f32.vlgmr.msra.gmra.mrb[6].mxu0 %v2778_v55 }
 0x6f8   :  { %23645 = vmatpush3.msra.mxu0 %v2789_v20  ;;  %23646 = vmatprep.mubr.msk.f32.mxu0 %vm32554_vm6, %v32490_v16 }
 0x6f9   :  { %23649 = vmatprep.subr.mxu0 %v32490_v16 }
 0x6ff   :  { %23647 = vmatmul.mubr.f32.vlgmr.msra.gmra.mrb[6].mxu0 %v2776_v22 }
 0x700   :  { %23650 = vmatpush3.msra.mxu0 %v2711_v13  ;;  %23651 = vmatprep.mubr.msk.f32.mxu0 %vm32554_vm6, %v32490_v16 }
 0x707   :  { %23652 = vmatmul.mubr.f32.vlgmr.msra.gmra.mrb[6].mxu0 %v2776_v22 }
 0x708   :  { %23662 = vmatprep.mubr.f32.mxu0 %v3295_v18 }
 0x7da   :  { %v3152_v14 = vpop.f32.mrb[6].mxu0 }
 0x7db   :  { %v3156_v27 = vmul.f32 %v3152_v14, %v3152_v14  ;;  %v23653_v30 = vpop.f32.mrb[7].mxu0 }
 0x7dd   :  { %v3158_v31 = vrot.slane %v3156_v27, 7 }
 0x7df   :  { %v3160_v37 = vsub.f32 %v3152_v14, %v3158_v31 }
 0x7e1   :  { %v3162_v44 = vadd.f32 1e-05, %v3160_v37 }
 0x7e3   :  { %27028 = vrsqrt.f32 %v3162_v44 }
 0x7ed   :  { %v27029_v56 = vpop.eup %27028 }
 0x7ee   :  { %v3171_v57 = vrot.slane %v27029_v56, %v27881_v35 }
 0x7f0   :  { %v3172_v21 = vcombine.high %v3171_v57, %v3171_v57 }
 0x7f2   :  { %v3179_v1 = vrot.slane %v3172_v21, %v27881_v35 }
 0x7f4   :  { %v3181_v2 = vmul.f32 %v3179_v1, %v3161_v39  ;;  %v3750_v39 = vld [vmem:[%s32926_s9] sm:$0xff] }
 0x7f5   :  { %v3753_v63 = vsel %vm32553_vm11, %v3750_v39, 0  ;;  %v32931_v39 = vmov 0 }
 0x7f6   :  { %v3183_v6 = vmul.f32 %v3181_v2, %v3152_v14  ;;  %v3189_v7 = vrot.slane %v3181_v2, %v27886_v40  ;;  %v3827_v1 = vand.u32 4294901760, %v3753_v63  ;;  %v3751_v2 = vld [vmem:[%s32926_s9 + $0x8] sm:$0xff]  ;;  %v32932_v39 = vsel %vm28299_vm7, 4294967295, %v32931_v39  ;;  %s33332_s9 = sld [smem:[#allocation45_spill]] }
 0x7f7   :  { %32933 = vst [vmem:[#allocation57_spill] sm:$0xff] %v32932_v39 }
 0x7f8   :  { %v3184_v12 = vsub.f32 %v3182_v58, %v3183_v6  ;;  %v3191_v28 = vmul.f32 %v3189_v7, %v28043_v60  ;;  %v3192_v36 = vmul.f32 %v3189_v7, %v28049_v3  ;;  %v3193_v26 = vmul.f32 %v28041_v59, %v3189_v7 }
 0x7f9   :  { %v3194_v5 = vmul.f32 %v28047_v33, %v3189_v7  ;;  %v3303_v3 = vand.u32 4294901760, %v28188_v42  ;;  %v3828_v24 = vsub.f32 %v3753_v63, %v3827_v1  ;;  %v3756_v58 = vsel %vm32553_vm11, %v3751_v2, 0 }
 0x7fa   :  { %v3199_v41 = vrot.slane %v3184_v12, %v27886_v40  ;;  %vm8634_vm11 = vsmask.f32 5392 }
 0x7fb   :  { %v3304_v22 = vsub.f32 %v28188_v42, %v3303_v3 }
 0x7fc   :  { %v3201_v48 = vadd.f32 %v3199_v41, %v3191_v28  ;;  %v3202_v49 = vadd.f32 %v3199_v41, %v3192_v36  ;;  %v3203_v47 = vadd.f32 %v3199_v41, %v3193_v26  ;;  %v3204_v50 = vadd.f32 %v3199_v41, %v3194_v5  ;;  %v26437_v5 = vld [vmem:[%s32927_s13 + $0x64] ss:$8 sps:$4 sm:$0xff]   ;;  %v26435_v41 = vld [vmem:[%s32927_s13 + $0x60] ss:$8 sps:$4 sm:$0xff]  }
 0x7fd   :  { %v3305_v30 = vand.u32 4294901760, %v3304_v22 }
 0x7fe   :  { %v3205_v45 = vmax.f32 %v3201_v48, 0.0  ;;  %v3206_v60 = vmax.f32 %v3202_v49, 0.0  ;;  %v3207_v51 = vmax.f32 %v3203_v47, 0.0  ;;  %v3208_v54 = vmax.f32 %v3204_v50, 0.0  ;;  %v26438_v48 = vld [vmem:[%s32927_s13 + $0x70] ss:$8 sps:$4 sm:$0xff]  }
 0x7ff   :  { %v26443_v49 = vld [vmem:[%s32927_s13 + $0x84] ss:$8 sps:$4 sm:$0xff]   ;;  %v26441_v47 = vld [vmem:[%s32927_s13 + $0x80] ss:$8 sps:$4 sm:$0xff]   ;;  %v26446_v50 = vld [vmem:[%s32927_s13 + $0x94] ss:$8 sps:$4 sm:$0xff]  }
 0x800   :  { %3209 = vst.msk [vmem:[%s32925_s5] sm:$0xff] %vm2093_vm10, %v3205_v45  ;;  %3210 = vst.msk [vmem:[%s32925_s5 + $0x8] sm:$0xff] %vm2093_vm10, %v3206_v60  ;;  %v3223_v59 = vand.u32 4294901760, %v3205_v45  ;;  %v3226_v33 = vand.u32 4294901760, %v3206_v60  ;;  %v3229_v0 = vand.u32 4294901760, %v3207_v51  ;;  %v3232_v11 = vand.u32 4294901760, %v3208_v54 }
 0x801   :  { %3211 = vst.msk [vmem:[%s32925_s5 + $0x10] sm:$0xff] %vm2093_vm10, %v3207_v51  ;;  %3212 = vst.msk [vmem:[%s32925_s5 + $0x18] sm:$0xff] %vm2093_vm10, %v3208_v54  ;;  %s33322_s5 = sld [smem:[#allocation43_spill]] }
 0x802   :  { %v28199_v13 = vpack.c.bf16 %v3226_v33, %v3223_v59  ;;  %v28201_v52 = vpack.c.bf16 %v3232_v11, %v3229_v0  ;;  %v3313_v25 = vsub.f32 %v3205_v45, %v3223_v59  ;;  %v3320_v17 = vsub.f32 %v3206_v60, %v3226_v33  ;;  %v26444_v45 = vld [vmem:[%s32927_s13 + $0x90] ss:$8 sps:$4 sm:$0xff]  }
 0x803   :  { %v3327_v19 = vsub.f32 %v3207_v51, %v3229_v0  ;;  %v3334_v20 = vsub.f32 %v3208_v54, %v3232_v11  ;;  %v32488_v60 = vmov 0   ;;  %v26449_v51 = vld [vmem:[%s32927_s13 + $0x4] ss:$8 sps:$4 sm:$0xff]  }
 0x804   :  { %24471 = vmatprep.subr.bf16.mxu0 %v28199_v13  ;;  %v3314_v38 = vand.u32 4294901760, %v3313_v25  ;;  %v3321_v46 = vand.u32 4294901760, %v3320_v17  ;;  %v28205_v55 = vpack.c.bf16 %v3320_v17, %v3313_v25  ;;  %4463 = vmatprep.mubr.bf16.mxu1 %v32488_v60 }
 0x805   :  { %24473 = vmatpush3.bf16.msra.mxu0 %v28199_v13  ;;  %v3328_v61 = vand.u32 4294901760, %v3327_v19  ;;  %v3335_v62 = vand.u32 4294901760, %v3334_v20  ;;  %v28208_v9 = vpack.c.bf16 %v3334_v20, %v3327_v19 }
 0x806   :  { %24475 = vmatprep.subr.bf16.mxu0 %v28201_v52  ;;  %v3315_v29 = vsub.f32 %v3313_v25, %v3314_v38  ;;  %v3322_v43 = vsub.f32 %v3320_v17, %v3321_v46  ;;  %v28211_v10 = vpack.c.bf16 %v3321_v46, %v3314_v38 }
 0x807   :  { %v3329_v18 = vsub.f32 %v3327_v19, %v3328_v61  ;;  %v3336_v14 = vsub.f32 %v3334_v20, %v3335_v62  ;;  %v28213_v27 = vpack.c.bf16 %v3335_v62, %v3328_v61 }
 0x808   :  { %v3316_v31 = vand.u32 4294901760, %v3315_v29  ;;  %v3323_v37 = vand.u32 4294901760, %v3322_v43 }
 0x809   :  { %24477 = vmatpush3.bf16.msra.mxu0 %v28201_v52  ;;  %v3330_v44 = vand.u32 4294901760, %v3329_v18  ;;  %v3337_v56 = vand.u32 4294901760, %v3336_v14 }
 0x80a   :  { %v24478_v57 = vpack.c.bf16 %v3323_v37, %v3316_v31 }
 0x80b   :  { %v24482_v21 = vpack.c.bf16 %v3337_v56, %v3330_v44 }
 0x80c   :  { %23663 = vmatmul.mubr.f32.vlgmr.msra.gmra.mrb[12].mxu0 %v3305_v30  ;;  %24479 = vmatprep.subr.bf16.mxu0 %v24478_v57 }
 0x80d   :  { %24481 = vmatpush3.bf16.msra.mxu0 %v24478_v57  ;;  %23673 = vmatprep.mubr.f32.mxu0 %v28166_v32 }
 0x80e   :  { %24483 = vmatprep.subr.bf16.mxu0 %v24482_v21 }
 0x811   :  { %24485 = vmatpush3.bf16.msra.mxu0 %v24482_v21 }
 0x812   :  { %24487 = vmatprep.subr.bf16.mxu0 %v28205_v55 }
 0x814   :  { %23674 = vmatmul.mubr.f32.vlgmr.msra.gmra.mrb[12].mxu0 %v28180_v4 }
 0x815   :  { %24489 = vmatpush3.bf16.msra.mxu0 %v28205_v55  ;;  %23684 = vmatprep.mubr.f32.mxu0 %v28169_v23  ;;  %v3837_v23 = vand.u32 4294901760, %v3756_v58 }
 0x816   :  { %24491 = vmatprep.subr.bf16.mxu0 %v28208_v9 }
 0x817   :  { %v3838_v6 = vsub.f32 %v3756_v58, %v3837_v23 }
 0x819   :  { %24493 = vmatpush3.bf16.msra.mxu0 %v28208_v9  ;;  %v3839_v12 = vand.u32 4294901760, %v3838_v6 }
 0x81a   :  { %24495 = vmatprep.subr.bf16.mxu0 %v28199_v13 }
 0x81b   :  { %v3840_v36 = vsub.f32 %v3838_v6, %v3839_v12 }
 0x81c   :  { %23685 = vmatmul.mubr.f32.vlgmr.msra.gmra.mrb[12].mxu0 %v28188_v42  ;;  %v26440_v42 = vld [vmem:[%s32927_s13 + $0x74] ss:$8 sps:$4 sm:$0xff]  }
 0x81d   :  { %24497 = vmatpush3.bf16.msra.mxu0 %v28199_v13  ;;  %23695 = vmatprep.mubr.f32.mxu0 %v3293_v8  ;;  %v3829_v8 = vand.u32 4294901760, %v3828_v24  ;;  %v3841_v26 = vand.u32 4294901760, %v3840_v36  ;;  %v32934_v36 = vmov 0 }
 0x81e   :  { %24499 = vmatprep.subr.bf16.mxu0 %v28201_v52  ;;  %v32935_v36 = vsel %vm28306_vm12, 4294967295, %v32934_v36 }
 0x81f   :  { %v3830_v7 = vsub.f32 %v3828_v24, %v3829_v8  ;;  %32936 = vst [vmem:[#allocation58_spill] sm:$0xff] %v32935_v36 }
 0x821   :  { %24501 = vmatpush3.bf16.msra.mxu0 %v28201_v52  ;;  %v3831_v28 = vand.u32 4294901760, %v3830_v7 }
 0x822   :  { %24503 = vmatprep.subr.bf16.mxu0 %v28211_v10 }
 0x824   :  { %23696 = vmatmul.mubr.f32.vlgmr.msra.gmra.mrb[12].mxu0 %v3303_v3 }
 0x825   :  { %24505 = vmatpush3.bf16.msra.mxu0 %v28211_v10  ;;  %23706 = vmatprep.mubr.f32.mxu0 %v28166_v32 }
 0x826   :  { %24507 = vmatprep.subr.bf16.mxu0 %v28213_v27 }
 0x829   :  { %24509 = vmatpush3.bf16.msra.mxu0 %v28213_v27 }
 0x82a   :  { %24511 = vmatprep.subr.bf16.mxu0 %v28199_v13 }
 0x82c   :  { %23707 = vmatmul.mubr.f32.vlgmr.msra.gmra.mrb[12].mxu0 %v28180_v4 }
 0x82d   :  { %24513 = vmatpush3.bf16.msra.mxu0 %v28199_v13  ;;  %23717 = vmatprep.mubr.f32.mxu0 %v28166_v32  ;;  %v26434_v32 = vld [vmem:[%s32927_s13 + $0x54] ss:$8 sps:$4 sm:$0xff]  }
 0x82e   :  { %24515 = vmatprep.subr.bf16.mxu0 %v28201_v52  ;;  %4431 = vmatprep.subr.bf16.mxu1 %v26434_v32 }
 0x831   :  { %24517 = vmatpush3.bf16.msra.mxu0 %v28201_v52 }
 0x832   :  { %24519 = vmatprep.subr.bf16.mxu0 %v28199_v13 }
 0x834   :  { %23718 = vmatmul.mubr.f32.vlgmr.msra.gmra.mrb[12].mxu0 %v28180_v4  ;;  %v26432_v4 = vld [vmem:[%s32927_s13 + $0x50] ss:$8 sps:$4 sm:$0xff]  }
 0x835   :  { %24521 = vmatpush3.bf16.msra.mxu0 %v28199_v13  ;;  %23728 = vmatprep.mubr.f32.mxu0 %v3831_v28 }
 0x836   :  { %24523 = vmatprep.subr.bf16.mxu0 %v28201_v52  ;;  %4432 = vmatpush1.bf16.msra.mxu1 %v26432_v4 }
 0x837   :  { %4433 = vmatprep.subr.bf16.mxu1 %v26437_v5 }
 0x839   :  { %24525 = vmatpush3.bf16.msra.mxu0 %v28201_v52 }
 0x83a   :  { %24527 = vmatprep.subr.bf16.mxu0 %v24478_v57  ;;  %4434 = vmatpush1.bf16.msra.mxu1 %v26435_v41 }
 0x83b   :  { %4435 = vmatprep.subr.bf16.mxu1 %v26440_v42 }
 0x83c   :  { %23729 = vmatmul.mubr.f32.vlgmr.msra.gmra.mrb[14].mxu0 %v3841_v26 }
 0x83d   :  { %24529 = vmatpush3.bf16.msra.mxu0 %v24478_v57  ;;  %23739 = vmatprep.mubr.f32.mxu0 %v3827_v1 }
 0x83e   :  { %24531 = vmatprep.subr.bf16.mxu0 %v24482_v21  ;;  %4436 = vmatpush1.bf16.msra.mxu1 %v26438_v48 }
 0x83f   :  { %4437 = vmatprep.subr.bf16.mxu1 %v26443_v49  ;;  %v26447_v49 = vld [vmem:[%s32927_s13] ss:$8 sps:$4 sm:$0xff]  }
 0x841   :  { %24533 = vmatpush3.bf16.msra.mxu0 %v24482_v21 }
 0x842   :  { %24535 = vmatprep.subr.bf16.mxu0 %v28205_v55  ;;  %4438 = vmatpush1.bf16.msra.mxu1 %v26441_v47 }
 0x843   :  { %4439 = vmatprep.subr.bf16.mxu1 %v26446_v50 }
 0x844   :  { %23740 = vmatmul.mubr.f32.vlgmr.msra.gmra.mrb[14].mxu0 %v3837_v23 }
 0x845   :  { %24537 = vmatpush3.bf16.msra.mxu0 %v28205_v55  ;;  %23750 = vmatprep.mubr.f32.mxu0 %v3828_v24  ;;  %v32928_v55 = vmov 0 }
 0x846   :  { %24539 = vmatprep.subr.bf16.mxu0 %v28208_v9  ;;  %4440 = vmatpush1.bf16.msra.mxu1 %v26444_v45  ;;  %v32929_v55 = vsel %vm28279_vm14, 4294967295, %v32928_v55  ;;  %v26452_v45 = vld [vmem:[%s32927_s13 + $0x14] ss:$8 sps:$4 sm:$0xff]  }
 0x847   :  { %4528 = vmatprep.subr.bf16.mxu1 %v26449_v51  ;;  %32930 = vst [vmem:[#allocation56_spill] sm:$0xff] %v32929_v55  ;;  %v26450_v51 = vld [vmem:[%s32927_s13 + $0x10] ss:$8 sps:$4 sm:$0xff]  }
 0x849   :  { %24541 = vmatpush3.bf16.msra.mxu0 %v28208_v9 }
 0x84a   :  { %24543 = vmatprep.subr.bf16.mxu0 %v28199_v13 }
 0x84c   :  { %23751 = vmatmul.mubr.f32.vlgmr.msra.gmra.mrb[14].mxu0 %v3838_v6 }
 0x84d   :  { %24545 = vmatpush3.bf16.msra.mxu0 %v28199_v13  ;;  %23761 = vmatprep.mubr.f32.mxu0 %v3829_v8 }
 0x84e   :  { %24547 = vmatprep.subr.bf16.mxu0 %v28201_v52 }
 0x851   :  { %24549 = vmatpush3.bf16.msra.mxu0 %v28201_v52 }
 0x852   :  { %24551 = vmatprep.subr.bf16.mxu0 %v28211_v10 }
 0x854   :  { %23762 = vmatmul.mubr.f32.vlgmr.msra.gmra.mrb[14].mxu0 %v3839_v12 }
 0x855   :  { %24553 = vmatpush3.bf16.msra.mxu0 %v28211_v10  ;;  %23772 = vmatprep.mubr.f32.mxu0 %v3827_v1 }
 0x856   :  { %24555 = vmatprep.subr.bf16.mxu0 %v28213_v27 }
 0x859   :  { %24557 = vmatpush3.bf16.msra.mxu0 %v28213_v27 }
 0x85a   :  { %24559 = vmatprep.subr.bf16.mxu0 %v28199_v13 }
 0x85c   :  { %23773 = vmatmul.mubr.f32.vlgmr.msra.gmra.mrb[14].mxu0 %v3837_v23 }
 0x85d   :  { %24561 = vmatpush3.bf16.msra.mxu0 %v28199_v13  ;;  %23783 = vmatprep.mubr.f32.mxu0 %v3827_v1 }
 0x85e   :  { %24563 = vmatprep.subr.bf16.mxu0 %v28201_v52 }
 0x861   :  { %24565 = vmatpush3.bf16.msra.mxu0 %v28201_v52 }
 0x862   :  { %24566 = vmatprep.subr.bf16.mxu0 %v32510_v53 }
 0x864   :  { %23784 = vmatmul.mubr.f32.vlgmr.msra.gmra.mrb[14].mxu0 %v3837_v23 }
 0x907   :  { %v23719_v54 = vpop.f32.mrb[12].mxu0 }
 0x908   :  { %v3740_v3 = vpop.f32.mrb[13].mxu0 }
 0x937   :  { %v23785_v59 = vpop.f32.mrb[14].mxu0 }
 0x938   :  { %v4287_v33 = vmax.f32 %v23719_v54, %v23785_v59  ;;  %v4276_v0 = vpop.f32.mrb[15].mxu0  ;;  %v26455_v54 = vld [vmem:[%s32927_s13 + $0x24] ss:$8 sps:$4 sm:$0xff]   ;;  %v26458_v59 = vld [vmem:[%s32927_s13 + $0x34] ss:$8 sps:$4 sm:$0xff]  }
 0x939   :  { %v4286_v11 = vmax.f32 %v3740_v3, %v4276_v0  ;;  %v26453_v3 = vld [vmem:[%s32927_s13 + $0x20] ss:$8 sps:$4 sm:$0xff]   ;;  %v26461_v0 = vld [vmem:[%s32927_s13 + $0x44] ss:$8 sps:$4 sm:$0xff]  }
 0x93a   :  { %v4289_v13 = vpack.c.bf16 %v4287_v33, %v4287_v33  ;;  %v26456_v33 = vld [vmem:[%s32927_s13 + $0x30] ss:$8 sps:$4 sm:$0xff]  }
 0x93b   :  { %v4288_v52 = vpack.c.bf16 %v4286_v11, %v4286_v11  ;;  %v26459_v11 = vld [vmem:[%s32927_s13 + $0x40] ss:$8 sps:$4 sm:$0xff]  }
 0x93c   :  { %v4298_v25 = vshrl.u32 %v4289_v13, 16  ;;  %v4301_v20 = vshll.u32 %v4289_v13, 16  ;;  %v26464_v13 = vld [vmem:[%s32927_s13 + $0xa4] ss:$8 sps:$4 sm:$0xff]  }
 0x93d   :  { %v4291_v17 = vshrl.u32 %v4288_v52, 16  ;;  %v4294_v38 = vshll.u32 %v4288_v52, 16  ;;  %v26462_v52 = vld [vmem:[%s32927_s13 + $0xa0] ss:$8 sps:$4 sm:$0xff]  }
 0x93e   :  { %v4300_v19 = vrot.slane %v4298_v25, 7  ;;  %v26467_v25 = vld [vmem:[%s32927_s13 + $0xb4] ss:$8 sps:$4 sm:$0xff]  }
 0x93f   :  { %v4293_v22 = vrot.slane %v4291_v17, 7  ;;  %v26465_v17 = vld [vmem:[%s32927_s13 + $0xb0] ss:$8 sps:$4 sm:$0xff]  }
 0x940   :  { %v4303_v46 = vor.u32 %v4301_v20, %v4300_v19  ;;  %v26470_v19 = vld [vmem:[%s32927_s13 + $0xc4] ss:$8 sps:$4 sm:$0xff]   ;;  %v26468_v20 = vld [vmem:[%s32927_s13 + $0xc0] ss:$8 sps:$4 sm:$0xff]  }
 0x941   :  { %v4296_v61 = vor.u32 %v4294_v38, %v4293_v22  ;;  %v26473_v22 = vld [vmem:[%s32927_s13 + $0xd4] ss:$8 sps:$4 sm:$0xff]   ;;  %v26471_v38 = vld [vmem:[%s32927_s13 + $0xd0] ss:$8 sps:$4 sm:$0xff]  }
 0x942   :  { %v4307_v62 = vsel %vm27568_vm3, 0, %v4303_v46  ;;  %v26476_v46 = vld [vmem:[%s32927_s13 + $0xe4] ss:$8 sps:$4 sm:$0xff]  }
 0x943   :  { %v28287_v9 = vsel %vm28279_vm14, %v4307_v62, 0  ;;  %v4306_v29 = vsel %vm27568_vm3, 0, %v4296_v61  ;;  %v26474_v61 = vld [vmem:[%s32927_s13 + $0xe0] ss:$8 sps:$4 sm:$0xff]   ;;  %s33439_s13 = sld [smem:[#allocation46_spill]] }
 0x944   :  { %v21514_v43 = vcombine.low %v28287_v9, %v28287_v9  ;;  %v21515_v10 = vcombine.high %v28287_v9, %v28287_v9  ;;  %v4311_v18 = vsel %vm28279_vm14, %v4306_v29, 0  ;;  %v4740_v62 = vld [vmem:[%s32937_s17] sm:$0xff] }
 0x945   :  { %v21512_v14 = vcombine.low %v4311_v18, %v4311_v18  ;;  %v21513_v27 = vcombine.high %v4311_v18, %v4311_v18  ;;  %v21538_v30 = vcombine.low %v4311_v18, %v28287_v9  ;;  %v4741_v9 = vld [vmem:[%s32937_s17 + $0x8] sm:$0xff]  ;;  %v4762_v29 = vand.u32 4294901760, %v4740_v62  ;;  %v4742_v18 = vld [vmem:[%s32937_s17 + $0x10] sm:$0xff] }
 0x946   :  { %v4351_v31 = vshrl.u32 %v21514_v43, 16  ;;  %v4354_v37 = vshll.u32 %v21514_v43, 16  ;;  %v21551_v44 = vrot.slane %v21514_v43, 9  ;;  %v4580_v56 = vrot.slane %v21515_v10, 5 }
 0x947   :  { %v4337_v57 = vshrl.u32 %v21512_v14, 16  ;;  %v4340_v21 = vshll.u32 %v21512_v14, 16  ;;  %v4360_v2 = vshll.u32 %v21515_v10, 16  ;;  %v21550_v24 = vrot.slane %v21512_v14, 9  ;;  %v4743_v14 = vld [vmem:[%s32937_s17 + $0x18] sm:$0xff] }
 0x948   :  { %v4353_v63 = vrot.slane %v4351_v31, 4  ;;  %v4356_v1 = vrot.slane %v4354_v37, 5  ;;  %v4346_v8 = vshll.u32 %v21513_v27, 16  ;;  %v4576_v6 = vrot.slane %v21513_v27, 5 }
 0x949   :  { %v4339_v58 = vrot.slane %v4337_v57, 4  ;;  %v4342_v23 = vrot.slane %v4340_v21, 5  ;;  %v4581_v12 = vsel %vm28299_vm7, %v21551_v44, %v4580_v56  ;;  %v4362_v32 = vrot.slane %v4360_v2, 5  ;;  %v4744_v56 = vld [vmem:[%s32937_s17 + $0x20] sm:$0xff]  ;;  %v4745_v57 = vld [vmem:[%s32937_s17 + $0x28] sm:$0xff]  ;;  %v4746_v2 = vld [vmem:[%s32937_s17 + $0x30] sm:$0xff] }
 0x94a   :  { %v4357_v7 = vor.u32 %v4356_v1, %v4353_v63  ;;  %v4577_v26 = vsel %vm28299_vm7, %v21550_v24, %v4576_v6  ;;  %v4348_v41 = vrot.slane %v4346_v8, 5  ;;  %v4765_v43 = vand.u32 4294901760, %v4741_v9  ;;  %v4747_v24 = vld [vmem:[%s32937_s17 + $0x38] sm:$0xff]  ;;  %v4748_v6 = vld [vmem:[%s32937_s17 + $0x40] sm:$0xff] }
 0x94b   :  { %v4343_v28 = vor.u32 %v4342_v23, %v4339_v58  ;;  %v21562_v5 = vcombine.low %v4577_v26, %v4581_v12  ;;  %v28348_v27 = vsub.f32 %v4740_v62, %v4762_v29  ;;  %v4768_v31 = vand.u32 4294901760, %v4742_v18 }
 0x94c   :  { %v4358_v4 = vrot.slane %v4357_v7, 4  ;;  %v28343_v10 = vpack.c.bf16 %v4765_v43, %v4762_v29  ;;  %v4771_v37 = vand.u32 4294901760, %v4743_v14  ;;  %v4774_v21 = vand.u32 4294901760, %v4744_v56  ;;  %v4749_v7 = vld [vmem:[%s32937_s17 + $0x48] sm:$0xff] }
 0x94d   :  { %v4344_v42 = vrot.slane %v4343_v28, 4  ;;  %v4777_v63 = vand.u32 4294901760, %v4745_v57  ;;  %v4780_v58 = vand.u32 4294901760, %v4746_v2  ;;  %v4783_v23 = vand.u32 4294901760, %v4747_v24 }
 0x94e   :  { %v4363_v48 = vsel %vm28306_vm12, %v4358_v4, %v4362_v32  ;;  %24568 = vmatpush1.bf16.msra.mxu0 %v28343_v10  ;;  %v28353_v44 = vpack.c.bf16 %v4771_v37, %v4768_v31  ;;  %v4786_v12 = vand.u32 4294901760, %v4748_v6  ;;  %v4789_v28 = vand.u32 4294901760, %v4749_v7  ;;  %v4750_v32 = vld [vmem:[%s32937_s17 + $0x50] sm:$0xff]  ;;  %v4751_v4 = vld [vmem:[%s32937_s17 + $0x58] sm:$0xff] }
 0x94f   :  { %v4349_v47 = vsel %vm28306_vm12, %v4344_v42, %v4348_v41  ;;  %24569 = vmatprep.subr.bf16.mxu0 %v32510_v53  ;;  %v28359_v1 = vpack.c.bf16 %v4777_v63, %v4774_v21  ;;  %v28365_v8 = vpack.c.bf16 %v4783_v23, %v4780_v58  ;;  %v4795_v41 = vand.u32 4294901760, %v4751_v4 }
 0x950   :  { %v21526_v50 = vcombine.low %v4349_v47, %v4363_v48  ;;  %v28371_v26 = vpack.c.bf16 %v4789_v28, %v4786_v12  ;;  %v4752_v48 = vld [vmem:[%s32937_s17 + $0x60] sm:$0xff]  ;;  %v28381_v47 = vsub.f32 %v4742_v18, %v4768_v31 }
 0x952   :  { %21537 = vmatmul.mubr.msk.bf16.vlgmr.msra.gmra.mrb[4].mxu1 %vm2093_vm10, %v21526_v50  ;;  %24571 = vmatpush1.bf16.msra.mxu0 %v28353_v44  ;;  %v28383_v50 = vsub.f32 %v4743_v14, %v4771_v37 }
 0x953   :  { %4529 = vmatpush1.bf16.msra.mxu1 %v26447_v49  ;;  %4560 = vmatprep.mubr.bf16.mxu1 %v32488_v60  ;;  %v4753_v49 = vld [vmem:[%s32937_s17 + $0x68] sm:$0xff] }
 0x954   :  { %4530 = vmatprep.subr.bf16.mxu1 %v26452_v45  ;;  %24572 = vmatprep.subr.bf16.mxu0 %v32510_v53  ;;  %v28385_v45 = vsub.f32 %v4744_v56, %v4774_v21  ;;  %v32509_v56 = vand.u32 4294901760, %v28348_v27 }
 0x956   :  { %24574 = vmatpush1.bf16.msra.mxu0 %v28359_v1 }
 0x957   :  { %4531 = vmatpush1.bf16.msra.mxu1 %v26450_v51  ;;  %24575 = vmatprep.subr.bf16.mxu0 %v32510_v53  ;;  %v28387_v51 = vsub.f32 %v4745_v57, %v4777_v63  ;;  %v4863_v63 = vsub.f32 %v28348_v27, %v32509_v56 }
 0x958   :  { %4532 = vmatprep.subr.bf16.mxu1 %v26455_v54  ;;  %v4754_v54 = vld [vmem:[%s32937_s17 + $0x70] sm:$0xff] }
 0x95a   :  { %24577 = vmatpush1.bf16.msra.mxu0 %v28365_v8 }
 0x95b   :  { %4533 = vmatpush1.bf16.msra.mxu1 %v26453_v3  ;;  %24578 = vmatprep.subr.bf16.mxu0 %v32510_v53  ;;  %v4755_v3 = vld [vmem:[%s32937_s17 + $0x78] sm:$0xff] }
 0x95c   :  { %4534 = vmatprep.subr.bf16.mxu1 %v26458_v59  ;;  %v4756_v59 = vld [vmem:[%s32937_s17 + $0x80] sm:$0xff] }
 0x95e   :  { %24580 = vmatpush1.bf16.msra.mxu0 %v28371_v26 }
 0x95f   :  { %4535 = vmatpush1.bf16.msra.mxu1 %v26456_v33  ;;  %24581 = vmatprep.subr.bf16.mxu0 %v32510_v53  ;;  %v28392_v33 = vsub.f32 %v4746_v2, %v4780_v58 }
 0x960   :  { %4536 = vmatprep.subr.bf16.mxu1 %v26461_v0  ;;  %v28394_v0 = vsub.f32 %v4747_v24, %v4783_v23  ;;  %v4864_v24 = vand.u32 4294901760, %v4863_v63  ;;  %v32507_v23 = vand.u32 4294901760, %v28381_v47 }
 0x963   :  { %4537 = vmatpush1.bf16.msra.mxu1 %v26459_v11  ;;  %v28396_v11 = vsub.f32 %v4748_v6, %v4786_v12  ;;  %v32506_v6 = vand.u32 4294901760, %v28383_v50  ;;  %v4877_v12 = vsub.f32 %v28381_v47, %v32507_v23 }
 0x964   :  { %4649 = vmatprep.subr.bf16.mxu1 %v26464_v13  ;;  %v28398_v13 = vsub.f32 %v4749_v7, %v4789_v28 }
 0x965   :  { %v4884_v28 = vsub.f32 %v28383_v50, %v32506_v6  ;;  %v32501_v63 = vand.u32 4294901760, %v28396_v11 }
 0x966   :  { %21549 = vmatmul.mubr.msk.bf16.vlgmr.msra.gmra.mrb[4].mxu1 %vm2093_vm10, %v21538_v30  ;;  %v28350_v30 = vsub.f32 %v4741_v9, %v4765_v43 }
 0x967   :  { %4650 = vmatpush1.bf16.msra.mxu1 %v26462_v52  ;;  %4681 = vmatprep.mubr.bf16.mxu1 %v32488_v60  ;;  %v4757_v52 = vld [vmem:[%s32937_s17 + $0x88] sm:$0xff]  ;;  %s33442_s17 = sld [smem:[#allocation47_spill]] }
 0x968   :  { %4651 = vmatprep.subr.bf16.mxu1 %v26467_v25  ;;  %v4813_v29 = vand.u32 4294901760, %v4757_v52  ;;  %v32508_v57 = vand.u32 4294901760, %v28350_v30 }
 0x96a   :  { %v28422_v37 = vsub.f32 %v4757_v52, %v4813_v29  ;;  %v4870_v2 = vsub.f32 %v28350_v30, %v32508_v57  ;;  %v32503_v52 = vand.u32 4294901760, %v28392_v33 }
 0x96b   :  { %4652 = vmatpush1.bf16.msra.mxu1 %v26465_v17  ;;  %v28404_v17 = vsub.f32 %v4751_v4, %v4795_v41  ;;  %v4885_v4 = vand.u32 4294901760, %v4884_v28 }
 0x96c   :  { %4653 = vmatprep.subr.bf16.mxu1 %v26470_v19  ;;  %v4798_v19 = vand.u32 4294901760, %v4752_v48  ;;  %v4871_v58 = vand.u32 4294901760, %v4870_v2  ;;  %v32497_v2 = vand.u32 4294901760, %v28398_v13 }
 0x96e   :  { %v28409_v62 = vsub.f32 %v4752_v48, %v4798_v19  ;;  %v28440_v7 = vpack.c.bf16 %v4871_v58, %v4864_v24  ;;  %v4919_v58 = vsub.f32 %v28396_v11, %v32501_v63 }
 0x96f   :  { %4654 = vmatpush1.bf16.msra.mxu1 %v26468_v20  ;;  %v4801_v20 = vand.u32 4294901760, %v4753_v49 }
 0x970   :  { %4655 = vmatprep.subr.bf16.mxu1 %v26473_v22  ;;  %v4804_v22 = vand.u32 4294901760, %v4754_v54  ;;  %v4920_v28 = vand.u32 4294901760, %v4919_v58 }
 0x971   :  { %v28411_v9 = vsub.f32 %v4753_v49, %v4801_v20 }
 0x972   :  { %v28413_v43 = vsub.f32 %v4754_v54, %v4804_v22 }
 0x973   :  { %4656 = vmatpush1.bf16.msra.mxu1 %v26471_v38  ;;  %v4807_v38 = vand.u32 4294901760, %v4755_v3 }
 0x974   :  { %4657 = vmatprep.subr.bf16.mxu1 %v26476_v46  ;;  %v4810_v46 = vand.u32 4294901760, %v4756_v59 }
 0x975   :  { %v28415_v18 = vsub.f32 %v4755_v3, %v4807_v38  ;;  %v28418_v14 = vpack.c.bf16 %v4807_v38, %v4804_v22  ;;  %v4905_v22 = vsub.f32 %v28392_v33, %v32503_v52 }
 0x976   :  { %v28420_v31 = vsub.f32 %v4756_v59, %v4810_v46  ;;  %v28428_v21 = vpack.c.bf16 %v4813_v29, %v4810_v46 }
 0x977   :  { %4658 = vmatpush1.bf16.msra.mxu1 %v26474_v61  ;;  %v28407_v61 = vpack.c.bf16 %v4801_v20, %v4798_v19  ;;  %v32502_v19 = vand.u32 4294901760, %v28394_v0  ;;  %v4906_v46 = vand.u32 4294901760, %v4905_v22 }
 0x979   :  { %v4912_v38 = vsub.f32 %v28394_v0, %v32502_v19 }
 0x97a   :  { %21573 = vmatmul.mubr.msk.bf16.vlgmr.msra.gmra.mrb[4].mxu1 %vm2093_vm10, %v21562_v5  ;;  %v4792_v5 = vand.u32 4294901760, %v4750_v32  ;;  %vm4703_vm10 = vcmask 130048  }
 0x97b   :  { %5513 = vmatprep.mubr.f32.mxu1 %v32490_v16  ;;  %v4913_v29 = vand.u32 4294901760, %v4912_v38  ;;  %v32495_v16 = vand.u32 4294901760, %v28413_v43 }
 0x97c   :  { %v28377_v42 = vpack.c.bf16 %v4795_v41, %v4792_v5  ;;  %v28402_v25 = vsub.f32 %v4750_v32, %v4792_v5  ;;  %v4878_v32 = vand.u32 4294901760, %v4877_v12  ;;  %v32505_v5 = vand.u32 4294901760, %v28385_v45 }
 0x97d   :  { %v32504_v41 = vand.u32 4294901760, %v28387_v51  ;;  %v28471_v24 = vpack.c.bf16 %v4913_v29, %v4906_v46  ;;  %v4926_v12 = vsub.f32 %v28398_v13, %v32497_v2  ;;  %v32492_v46 = vand.u32 4294901760, %v28409_v62 }
 0x97e   :  { %24583 = vmatpush1.bf16.msra.mxu0 %v28377_v42  ;;  %v28451_v48 = vpack.c.bf16 %v4885_v4, %v4878_v32  ;;  %v4891_v49 = vsub.f32 %v28385_v45, %v32505_v5  ;;  %v32496_v4 = vand.u32 4294901760, %v28402_v25  ;;  %v32494_v29 = vand.u32 4294901760, %v28411_v9 }
 0x97f   :  { %24584 = vmatprep.subr.bf16.mxu0 %v32510_v53  ;;  %v4898_v54 = vsub.f32 %v28387_v51, %v32504_v41  ;;  %v4927_v32 = vand.u32 4294901760, %v4926_v12  ;;  %v4947_v12 = vsub.f32 %v28409_v62, %v32492_v46 }
 0x980   :  { %v4892_v3 = vand.u32 4294901760, %v4891_v49  ;;  %v32493_v49 = vand.u32 4294901760, %v28404_v17 }
 0x981   :  { %v4899_v59 = vand.u32 4294901760, %v4898_v54  ;;  %v28481_v54 = vpack.c.bf16 %v4927_v32, %v4920_v28  ;;  %v4954_v28 = vsub.f32 %v28411_v9, %v32494_v29  ;;  %v4948_v32 = vand.u32 4294901760, %v4947_v12 }
 0x982   :  { %24586 = vmatpush1.bf16.msra.mxu0 %v28407_v61  ;;  %v32498_v29 = vand.u32 4294901760, %v28420_v31  ;;  %v32499_v12 = vand.u32 4294901760, %v28422_v37 }
 0x983   :  { %24587 = vmatprep.subr.bf16.mxu0 %v32510_v53  ;;  %v28461_v20 = vpack.c.bf16 %v4899_v59, %v4892_v3  ;;  %v4933_v3 = vsub.f32 %v28402_v25, %v32496_v4  ;;  %v4940_v59 = vsub.f32 %v28404_v17, %v32493_v49  ;;  %v4955_v60 = vand.u32 4294901760, %v4954_v28 }
 0x985   :  { %v4934_v22 = vand.u32 4294901760, %v4933_v3  ;;  %v4941_v38 = vand.u32 4294901760, %v4940_v59  ;;  %v32500_v3 = vand.u32 4294901760, %v28415_v18  ;;  %v28501_v59 = vpack.c.bf16 %v4955_v60, %v4948_v32 }
 0x986   :  { %24589 = vmatpush1.bf16.msra.mxu0 %v28418_v14  ;;  %v4975_v60 = vsub.f32 %v28420_v31, %v32498_v29  ;;  %v4982_v32 = vsub.f32 %v28422_v37, %v32499_v12 }
 0x987   :  { %24590 = vmatprep.subr.bf16.mxu0 %v32510_v53  ;;  %v28491_v58 = vpack.c.bf16 %v4941_v38, %v4934_v22  ;;  %v4961_v22 = vsub.f32 %v28413_v43, %v32495_v16  ;;  %v4968_v38 = vsub.f32 %v28415_v18, %v32500_v3 }
 0x988   :  { %v4976_v16 = vand.u32 4294901760, %v4975_v60  ;;  %v4983_v4 = vand.u32 4294901760, %v4982_v32 }
 0x989   :  { %v4962_v46 = vand.u32 4294901760, %v4961_v22  ;;  %v4969_v49 = vand.u32 4294901760, %v4968_v38 }
 0x98a   :  { %24592 = vmatpush1.bf16.msra.mxu0 %v28428_v21  ;;  %v28519_v2 = vpack.c.bf16 %v4983_v4, %v4976_v16 }
 0x98b   :  { %24593 = vmatprep.subr.bf16.mxu0 %v32510_v53  ;;  %v28511_v28 = vpack.c.bf16 %v4969_v49, %v4962_v46 }
 0xa4d   :  { %v28539_v12 = vpop.f32.mrb[4].mxu1 }
 0xa4e   :  { %32938 = vst [vmem:[#allocation59_spill] sm:$0xff] %v28539_v12  ;;  %v28541_v3 = vpop.f32.mrb[5].mxu1  ;;  %v4716_v52 = vmul.f32 %v28539_v12, %v28539_v12 }
 0xa4f   :  { %32939 = vst [vmem:[#allocation60_spill] sm:$0xff] %v28541_v3  ;;  %v4717_v63 = vmul.f32 %v28541_v3, %v28541_v3  ;;  %v28545_v19 = vpop.f32.mrb[6].mxu1  ;;  %v4704_v23 = vsel %vm4703_vm10, %v28541_v3, 0.0 }
 0xa50   :  { %32940 = vst [vmem:[#allocation61_spill] sm:$0xff] %v28545_v19  ;;  %v4696_v41 = vadd.f32 %v28545_v19, %v28539_v12  ;;  %v4718_v5 = vmul.f32 %v28545_v19, %v28545_v19  ;;  %v28553_v6 = vpop.f32.mrb[7].mxu1 }
 0xa51   :  { %32941 = vst [vmem:[#allocation62_spill] sm:$0xff] %v28553_v6  ;;  %v4705_v57 = vsel %vm4703_vm10, %v28553_v6, 0.0  ;;  %v4719_v56 = vmul.f32 %v28553_v6, %v28553_v6  ;;  %v4727_v60 = vsel %vm4703_vm10, %v4717_v63, 0.0 }
 0xa52   :  { %v4697_v32 = vrot.slane %v4696_v41, 4  ;;  %v4720_v4 = vadd.f32 %v4718_v5, %v4716_v52  ;;  %v4706_v16 = vadd.f32 %v4705_v57, %v4704_v23 }
 0xa53   :  { %v4728_v29 = vsel %vm4703_vm10, %v4719_v56, 0.0 }
 0xa54   :  { %v4698_v46 = vadd.f32 %v4697_v32, %v4696_v41  ;;  %v4721_v49 = vrot.slane %v4720_v4, 4  ;;  %v4707_v38 = vrot.slane %v4706_v16, 4  ;;  %v4729_v22 = vadd.f32 %v4728_v29, %v4727_v60 }
 0xa56   :  { %v4699_v53 = vrot.slane %v4698_v46, 2  ;;  %v4722_v36 = vadd.f32 %v4721_v49, %v4720_v4  ;;  %v4708_v39 = vadd.f32 %v4707_v38, %v4706_v16  ;;  %v4730_v55 = vrot.slane %v4729_v22, 4 }
 0xa57   :  { %v32942_v4 = vmov 0.0|0.0  }
 0xa58   :  { %v4700_v15 = vadd.f32 %v4699_v53, %v4698_v46  ;;  %v4723_v19 = vrot.slane %v4722_v36, 2  ;;  %v4709_v3 = vrot.slane %v4708_v39, 2  ;;  %v4731_v12 = vadd.f32 %v4730_v55, %v4729_v22 }
 0xa5a   :  { %v4701_v6 = vrot.slane %v4700_v15, 1  ;;  %v4724_v40 = vadd.f32 %v4723_v19, %v4722_v36  ;;  %v4710_v5 = vadd.f32 %v4709_v3, %v4708_v39  ;;  %v4732_v57 = vrot.slane %v4731_v12, 2 }
 0xa5c   :  { %v4702_v23 = vadd.f32 %v4701_v6, %v4700_v15  ;;  %v4725_v52 = vrot.slane %v4724_v40, 1  ;;  %v4711_v63 = vrot.slane %v4710_v5, 1  ;;  %v4733_v56 = vadd.f32 %v4732_v57, %v4731_v12 }
 0xa5d   :  { %v32953_v57 = vand.u32 4294901760, %v28350_v30 }
 0xa5e   :  { %v4726_v41 = vadd.f32 %v4725_v52, %v4724_v40  ;;  %v4712_v32 = vadd.f32 %v4711_v63, %v4710_v5  ;;  %v4734_v34 = vrot.slane %v4733_v56, 1  ;;  %v4714_v29 = vmul.f32 0.0625, %v4702_v23 }
 0xa5f   :  { %v32952_v5 = vand.u32 4294901760, %v28348_v27  ;;  %v32954_v52 = vand.u32 4294901760, %v28381_v47  ;;  %v32955_v63 = vand.u32 4294901760, %v28383_v50 }
 0xa60   :  { %v4736_v60 = vmul.f32 0.0625, %v4726_v41  ;;  %v4735_v49 = vadd.f32 %v4734_v34, %v4733_v56  ;;  %v4715_v38 = vmul.f32 0.0625, %v4712_v32  ;;  %v32958_v32 = vand.u32 4294901760, %v28392_v33 }
 0xa61   :  { %v24675_v23 = vpack.c.bf16 %v32953_v57, %v32952_v5  ;;  %v24678_v56 = vpack.c.bf16 %v32955_v63, %v32954_v52 }
 0xa62   :  { %v4737_v16 = vmul.f32 0.0625, %v4735_v49  ;;  %v4738_v53 = vsel %vm306_vm0, %v4714_v29, %v4736_v60  ;;  %v32959_v29 = vand.u32 4294901760, %v28394_v0 }
 0xa63   :  { %v28564_v46 = vand.u32 4294901760, %v4738_v53 }
 0xa64   :  { %v4739_v55 = vsel %vm306_vm0, %v4715_v38, %v4737_v16  ;;  %v24684_v60 = vpack.c.bf16 %v32959_v29, %v32958_v32 }
 0xa65   :  { %v4759_v39 = vsel %vm4703_vm10, %v4739_v55, 0  ;;  %v28569_v15 = vsub.f32 %v4738_v53, %v28564_v46 }
 0xa66   :  { %v28571_v36 = vand.u32 4294901760, %v4759_v39 }
 0xa67   :  { %v4851_v40 = vand.u32 4294901760, %v28569_v15 }
 0xa68   :  { %v4844_v6 = vsub.f32 %v4759_v39, %v28571_v36 }
 0xa69   :  { %v4852_v19 = vsub.f32 %v28569_v15, %v4851_v40 }
 0xa6a   :  { %v4845_v34 = vand.u32 4294901760, %v4844_v6 }
 0xa6b   :  { %v4853_v22 = vand.u32 4294901760, %v4852_v19  ;;  %v26477_v19 = vld [vmem:[%s32972_s3 + $0x48] sm:$0xff]  }
 0xa6c   :  { %v4846_v3 = vsub.f32 %v4844_v6, %v4845_v34 }
 0xa6e   :  { %v4847_v12 = vand.u32 4294901760, %v4846_v3  ;;  %v26478_v3 = vld [vmem:[%s32972_s3 + $0x50] sm:$0xff]  }
 0xa70   :  { %4848 = vmatprep.mubr.f32.mxu0 %v4847_v12  ;;  %v26479_v12 = vld [vmem:[%s32972_s3 + $0x58] sm:$0xff]  }
 0xa71   :  { %4854 = vmatmul.mubr.f32.vlgmr.msra.gmra.mrb[16].mxu0 %v4853_v22  ;;  %v26480_v22 = vld [vmem:[%s32972_s3 + $0x60] sm:$0xff]  }
 0xa72   :  { %24595 = vmatpush1.bf16.msra.mxu0 %v28440_v7  ;;  %5014 = vmatprep.mubr.f32.mxu0 %v28571_v36  ;;  %v32943_v7 = vpack.c.bf16 %v28350_v30, %v28348_v27  ;;  %v32956_v27 = vand.u32 4294901760, %v28385_v45  ;;  %v32957_v30 = vand.u32 4294901760, %v28387_v51 }
 0xa73   :  { %24596 = vmatprep.subr.bf16.mxu0 %v32942_v4 }
 0xa74   :  { %v24681_v41 = vpack.c.bf16 %v32957_v30, %v32956_v27 }
 0xa76   :  { %24598 = vmatpush1.bf16.msra.mxu0 %v28451_v48  ;;  %v32944_v48 = vpack.c.bf16 %v28383_v50, %v28381_v47  ;;  %v32960_v47 = vand.u32 4294901760, %v28396_v11  ;;  %v32961_v50 = vand.u32 4294901760, %v28398_v13 }
 0xa77   :  { %24599 = vmatprep.subr.bf16.mxu0 %v32942_v4 }
 0xa78   :  { %v24687_v49 = vpack.c.bf16 %v32961_v50, %v32960_v47  ;;  %v32976_v50 = vld [vmem:[#allocation53_spill] sm:$0xff] }
 0xa7a   :  { %24601 = vmatpush1.bf16.msra.mxu0 %v28461_v20  ;;  %v32945_v20 = vpack.c.bf16 %v28387_v51, %v28385_v45  ;;  %v32962_v45 = vand.u32 4294901760, %v28402_v25  ;;  %v32963_v51 = vand.u32 4294901760, %v28404_v17 }
 0xa7b   :  { %24602 = vmatprep.subr.bf16.mxu0 %v32942_v4 }
 0xa7c   :  { %v24690_v38 = vpack.c.bf16 %v32963_v51, %v32962_v45  ;;  %v32978_v51 = vld [vmem:[#allocation55_spill] sm:$0xff] }
 0xa7e   :  { %24604 = vmatpush1.bf16.msra.mxu0 %v28471_v24  ;;  %v32947_v24 = vpack.c.bf16 %v28398_v13, %v28396_v11  ;;  %v32966_v11 = vand.u32 4294901760, %v28413_v43  ;;  %v32967_v13 = vand.u32 4294901760, %v28415_v18 }
 0xa7f   :  { %24605 = vmatprep.subr.bf16.mxu0 %v32942_v4 }
 0xa80   :  { %v24696_v53 = vpack.c.bf16 %v32967_v13, %v32966_v11  ;;  %v32979_v11 = vld [vmem:[#allocation59_spill] sm:$0xff] }
 0xa82   :  { %24607 = vmatpush1.bf16.msra.mxu0 %v28481_v54  ;;  %v32948_v54 = vpack.c.bf16 %v28404_v17, %v28402_v25  ;;  %v32968_v25 = vand.u32 4294901760, %v28420_v31  ;;  %v32969_v17 = vand.u32 4294901760, %v28422_v37 }
 0xa83   :  { %24608 = vmatprep.subr.bf16.mxu0 %v32942_v4 }
 0xa84   :  { %v24699_v55 = vpack.c.bf16 %v32969_v17, %v32968_v25  ;;  %v32981_v17 = vld [vmem:[#allocation61_spill] sm:$0xff] }
 0xa86   :  { %24610 = vmatpush1.bf16.msra.mxu0 %v28491_v58  ;;  %v32949_v58 = vpack.c.bf16 %v28411_v9, %v28409_v62 }
 0xa87   :  { %24611 = vmatprep.subr.bf16.mxu0 %v32942_v4 }
 0xa8a   :  { %24613 = vmatpush1.bf16.msra.mxu0 %v28501_v59  ;;  %v32950_v59 = vpack.c.bf16 %v28415_v18, %v28413_v43 }
 0xa8b   :  { %24614 = vmatprep.subr.bf16.mxu0 %v32942_v4 }
 0xa8e   :  { %24616 = vmatpush1.bf16.msra.mxu0 %v28511_v28  ;;  %v32951_v28 = vpack.c.bf16 %v28422_v37, %v28420_v31 }
 0xa8f   :  { %24617 = vmatprep.subr.bf16.mxu0 %v32942_v4 }
 0xa92   :  { %24619 = vmatpush1.bf16.msra.mxu0 %v28519_v2  ;;  %v32946_v2 = vpack.c.bf16 %v28394_v0, %v28392_v33  ;;  %v32964_v33 = vand.u32 4294901760, %v28409_v62  ;;  %v32965_v0 = vand.u32 4294901760, %v28411_v9 }
 0xa93   :  { %24620 = vmatprep.subr.bf16.mxu0 %v32942_v4 }
 0xa94   :  { %v24693_v16 = vpack.c.bf16 %v32965_v0, %v32964_v33 }
 0xa95   :  { %5016 = vmatmul.mubr.f32.vlgmr.msra.gmra.mrb[16].mxu0 %v28564_v46 }
 0xa96   :  { %24622 = vmatpush1.bf16.msra.mxu0 %v32943_v7  ;;  %5123 = vmatprep.mubr.f32.mxu0 %v4844_v6  ;;  %v26481_v7 = vld [vmem:[%s32972_s3 + $0x68] sm:$0xff]  }
 0xa97   :  { %24623 = vmatprep.subr.bf16.mxu0 %v32942_v4 }
 0xa9a   :  { %24625 = vmatpush1.bf16.msra.mxu0 %v32944_v48  ;;  %v26482_v48 = vld [vmem:[%s32972_s3 + $0x70] sm:$0xff]  }
 0xa9b   :  { %24626 = vmatprep.subr.bf16.mxu0 %v32942_v4 }
 0xa9e   :  { %24628 = vmatpush1.bf16.msra.mxu0 %v32945_v20  ;;  %v26483_v20 = vld [vmem:[%s32972_s3 + $0x78] sm:$0xff]  }
 0xa9f   :  { %24629 = vmatprep.subr.bf16.mxu0 %v32942_v4 }
 0xaa2   :  { %24631 = vmatpush1.bf16.msra.mxu0 %v32946_v2  ;;  %v26484_v2 = vld [vmem:[%s32972_s3 + $0x80] sm:$0xff]  }
 0xaa3   :  { %24632 = vmatprep.subr.bf16.mxu0 %v32942_v4 }
 0xaa6   :  { %24634 = vmatpush1.bf16.msra.mxu0 %v32947_v24  ;;  %v26485_v24 = vld [vmem:[%s32972_s3 + $0x88] sm:$0xff]  }
 0xaa7   :  { %24635 = vmatprep.subr.bf16.mxu0 %v32942_v4 }
 0xaaa   :  { %24637 = vmatpush1.bf16.msra.mxu0 %v32948_v54 }
 0xaab   :  { %24638 = vmatprep.subr.bf16.mxu0 %v32942_v4 }
 0xaae   :  { %24640 = vmatpush1.bf16.msra.mxu0 %v32949_v58 }
 0xaaf   :  { %24641 = vmatprep.subr.bf16.mxu0 %v32942_v4 }
 0xab2   :  { %24643 = vmatpush1.bf16.msra.mxu0 %v32950_v59 }
 0xab3   :  { %24644 = vmatprep.subr.bf16.mxu0 %v32942_v4 }
 0xab6   :  { %24646 = vmatpush1.bf16.msra.mxu0 %v32951_v28 }
 0xab7   :  { %24647 = vmatprep.subr.bf16.mxu0 %v32942_v4 }
 0xab9   :  { %5126 = vmatmul.mubr.f32.vlgmr.msra.gmra.mrb[16].mxu0 %v28569_v15 }
 0xaba   :  { %24649 = vmatpush1.bf16.msra.mxu0 %v28343_v10  ;;  %5216 = vmatprep.mubr.f32.mxu0 %v4845_v34  ;;  %v32973_v34 = vmov 0  }
 0xabb   :  { %24650 = vmatprep.subr.bf16.mxu0 %v32942_v4 }
 0xabe   :  { %24652 = vmatpush1.bf16.msra.mxu0 %v28353_v44 }
 0xabf   :  { %24653 = vmatprep.subr.bf16.mxu0 %v32942_v4 }
 0xac2   :  { %24655 = vmatpush1.bf16.msra.mxu0 %v28359_v1 }
 0xac3   :  { %24656 = vmatprep.subr.bf16.mxu0 %v32942_v4 }
 0xac6   :  { %24658 = vmatpush1.bf16.msra.mxu0 %v28365_v8 }
 0xac7   :  { %24659 = vmatprep.subr.bf16.mxu0 %v32942_v4 }
 0xaca   :  { %24661 = vmatpush1.bf16.msra.mxu0 %v28371_v26 }
 0xacb   :  { %24662 = vmatprep.subr.bf16.mxu0 %v32942_v4 }
 0xace   :  { %24664 = vmatpush1.bf16.msra.mxu0 %v28377_v42 }
 0xacf   :  { %24665 = vmatprep.subr.bf16.mxu0 %v32942_v4 }
 0xad2   :  { %24667 = vmatpush1.bf16.msra.mxu0 %v28407_v61 }
 0xad3   :  { %24668 = vmatprep.subr.bf16.mxu0 %v32942_v4 }
 0xad6   :  { %24670 = vmatpush1.bf16.msra.mxu0 %v28418_v14 }
 0xad7   :  { %24671 = vmatprep.subr.bf16.mxu0 %v32942_v4 }
 0xada   :  { %24673 = vmatpush1.bf16.msra.mxu0 %v28428_v21 }
 0xadb   :  { %24674 = vmatprep.subr.bf16.mxu0 %v32942_v4 }
 0xadd   :  { %5220 = vmatmul.mubr.f32.vlgmr.msra.gmra.mrb[16].mxu0 %v4851_v40 }
 0xade   :  { %24676 = vmatpush1.bf16.msra.mxu0 %v24675_v23  ;;  %5344 = vmatprep.mubr.f32.mxu0 %v28571_v36 }
 0xadf   :  { %24677 = vmatprep.subr.bf16.mxu0 %v32942_v4 }
 0xae2   :  { %24679 = vmatpush1.bf16.msra.mxu0 %v24678_v56 }
 0xae3   :  { %24680 = vmatprep.subr.bf16.mxu0 %v32942_v4 }
 0xae6   :  { %24682 = vmatpush1.bf16.msra.mxu0 %v24681_v41 }
 0xae7   :  { %24683 = vmatprep.subr.bf16.mxu0 %v32942_v4 }
 0xaea   :  { %24685 = vmatpush1.bf16.msra.mxu0 %v24684_v60  ;;  %v5922_v60 = vld [vmem:[%s32974_s8] sm:$0x3]  ;;  %s33446_s8 = sld [smem:[#allocation48_spill]] }
 0xaeb   :  { %24686 = vmatprep.subr.bf16.mxu0 %v32942_v4 }
 0xaee   :  { %24688 = vmatpush1.bf16.msra.mxu0 %v24687_v49  ;;  %v28755_v49 = vsub.s32 1, %v32976_v50 }
 0xaef   :  { %24689 = vmatprep.subr.bf16.mxu0 %v32942_v4 }
 0xaf0   :  { %32977 = vst [vmem:[#allocation63_spill] sm:$0xff] %v28755_v49 }
 0xaf2   :  { %24691 = vmatpush1.bf16.msra.mxu0 %v24690_v38 }
 0xaf3   :  { %24692 = vmatprep.subr.bf16.mxu0 %v32942_v4 }
 0xaf6   :  { %24694 = vmatpush1.bf16.msra.mxu0 %v24693_v16 }
 0xaf7   :  { %24695 = vmatprep.subr.bf16.mxu0 %v32942_v4 }
 0xafa   :  { %24697 = vmatpush1.bf16.msra.mxu0 %v24696_v53  ;;  %v32980_v53 = vld [vmem:[#allocation60_spill] sm:$0xff] }
 0xafb   :  { %24698 = vmatprep.subr.bf16.mxu0 %v32942_v4 }
 0xafe   :  { %24700 = vmatpush1.bf16.msra.mxu0 %v24699_v55 }
 0xaff   :  { %24701 = vmatprep.subr.bf16.mxu0 %v32942_v4 }
 0xb01   :  { %5346 = vmatmul.mubr.f32.vlgmr.msra.gmra.mrb[16].mxu0 %v28564_v46 }
 0xb02   :  { %24703 = vmatpush1.bf16.msra.mxu0 %v28343_v10  ;;  %5434 = vmatprep.mubr.f32.mxu0 %v28571_v36  ;;  %v32971_v10 = vmov 0.0  }
 0xb03   :  { %24704 = vmatprep.subr.bf16.mxu0 %v32942_v4 }
 0xb06   :  { %24706 = vmatpush1.bf16.msra.mxu0 %v28353_v44  ;;  %v5442_v44 = vld [vmem:[%s32970_s29 + $0x8] sm:$0xff] }
 0xb07   :  { %24707 = vmatprep.subr.bf16.mxu0 %v32942_v4 }
 0xb0a   :  { %24709 = vmatpush1.bf16.msra.mxu0 %v28359_v1  ;;  %v5447_v1 = vand.u32 4294901760, %v5442_v44 }
 0xb0b   :  { %24710 = vmatprep.subr.bf16.mxu0 %v32942_v4 }
 0xb0c   :  { %5448 = vmatprep.subr.mxu1 %v5447_v1 }
 0xb0e   :  { %24712 = vmatpush1.bf16.msra.mxu0 %v28365_v8  ;;  %v5441_v8 = vld [vmem:[%s32970_s29] sm:$0xff]  ;;  %s33443_s29 = sld [smem:[#allocation49_spill]] }
 0xb0f   :  { %24713 = vmatprep.subr.bf16.mxu0 %v32942_v4 }
 0xb12   :  { %24715 = vmatpush1.bf16.msra.mxu0 %v28371_v26  ;;  %v5449_v26 = vand.u32 4294901760, %v5441_v8 }
 0xb13   :  { %24716 = vmatprep.subr.bf16.mxu0 %v32942_v4 }
 0xb14   :  { %5450 = vmatpush1.msra.mxu1 %v5449_v26  ;;  %v5532_v43 = vsub.f32 %v5441_v8, %v5449_v26 }
 0xb16   :  { %24718 = vmatpush1.bf16.msra.mxu0 %v28377_v42  ;;  %v5526_v42 = vsub.f32 %v5442_v44, %v5447_v1  ;;  %v5533_v37 = vand.u32 4294901760, %v5532_v43  ;;  %v32982_v44 = vld [vmem:[#allocation62_spill] sm:$0xff] }
 0xb17   :  { %24719 = vmatprep.subr.bf16.mxu0 %v32942_v4 }
 0xb18   :  { %v5534_v39 = vsub.f32 %v5532_v43, %v5533_v37 }
 0xb1a   :  { %24721 = vmatpush1.bf16.msra.mxu0 %v28407_v61  ;;  %v5527_v61 = vand.u32 4294901760, %v5526_v42  ;;  %v5535_v40 = vand.u32 4294901760, %v5534_v39 }
 0xb1b   :  { %24722 = vmatprep.subr.bf16.mxu0 %v32942_v4 }
 0xb1c   :  { %v5528_v62 = vsub.f32 %v5526_v42, %v5527_v61 }
 0xb1e   :  { %24724 = vmatpush1.bf16.msra.mxu0 %v28418_v14  ;;  %v5529_v9 = vand.u32 4294901760, %v5528_v62 }
 0xb1f   :  { %24725 = vmatprep.subr.bf16.mxu0 %v32942_v4 }
 0xb20   :  { %5530 = vmatprep.subr.mxu1 %v5529_v9 }
 0xb22   :  { %24727 = vmatpush1.bf16.msra.mxu0 %v28428_v21 }
 0xb23   :  { %23996 = vmatprep.subr.mxu0 %v32971_v10 }
 0xb25   :  { %5436 = vmatmul.mubr.f32.vlgmr.msra.gmra.mrb[16].mxu0 %v28564_v46 }
 0xb26   :  { %23998 = vmatprep.mubr.msk.f32.mxu0 %vm32554_vm6, %v32971_v10 }
 0xbf8   :  { %v5437_v18 = vpop.f32.mrb[16].mxu0 }
 0xbf9   :  { %v5445_v14 = vsel %vm5443_vm13, %v5437_v18, 0  ;;  %v5439_v31 = vpop.f32.mrb[17].mxu0 }
 0xbfa   :  { %v5514_v21 = vand.u32 4294901760, %v5445_v14 }
 0xbfc   :  { %v5515_v46 = vsub.f32 %v5445_v14, %v5514_v21 }
 0xbfe   :  { %v5516_v15 = vand.u32 4294901760, %v5515_v46 }
 0xc00   :  { %v5517_v36 = vsub.f32 %v5515_v46, %v5516_v15 }
 0xc02   :  { %v5518_v6 = vand.u32 4294901760, %v5517_v36 }
 0xc04   :  { %5519 = vmatmul.mubr.f32.vlgmr.msra.gmra.mrb[8].mxu1 %v5518_v6 }
 0xc05   :  { %5536 = vmatpush1.msra.mxu1 %v5535_v40  ;;  %5599 = vmatprep.mubr.f32.mxu1 %v32971_v10 }
 0xc06   :  { %5609 = vmatprep.subr.mxu1 %v5526_v42  ;;  %v5947_v42 = vld [vmem:[%s32975_s24] sm:$0x3] }
 0xc0c   :  { %5601 = vmatmul.mubr.f32.vlgmr.msra.gmra.mrb[8].mxu1 %v5514_v21 }
 0xc0d   :  { %5612 = vmatpush1.msra.mxu1 %v5532_v43  ;;  %5675 = vmatprep.mubr.f32.mxu1 %v32971_v10 }
 0xc0e   :  { %5685 = vmatprep.subr.mxu1 %v5447_v1 }
 0xc14   :  { %5678 = vmatmul.mubr.f32.vlgmr.msra.gmra.mrb[8].mxu1 %v5515_v46 }
 0xc15   :  { %5687 = vmatpush1.msra.mxu1 %v5449_v26  ;;  %5750 = vmatprep.mubr.f32.mxu1 %v32971_v10 }
 0xc16   :  { %5763 = vmatprep.subr.mxu1 %v5527_v61 }
 0xc1c   :  { %5754 = vmatmul.mubr.f32.vlgmr.msra.gmra.mrb[8].mxu1 %v5516_v15 }
 0xc1d   :  { %5767 = vmatpush1.msra.mxu1 %v5533_v37  ;;  %5830 = vmatprep.mubr.f32.mxu1 %v32971_v10 }
 0xc1e   :  { %5839 = vmatprep.subr.mxu1 %v5447_v1 }
 0xc24   :  { %5832 = vmatmul.mubr.f32.vlgmr.msra.gmra.mrb[8].mxu1 %v5514_v21 }
 0xc25   :  { %5841 = vmatpush1.msra.mxu1 %v5449_v26  ;;  %5904 = vmatprep.mubr.f32.mxu1 %v32971_v10 }
 0xc26   :  { %6192 = vmatprep.subr.bf16.mxu1 %v32973_v34 }
 0xc2c   :  { %5906 = vmatmul.mubr.f32.vlgmr.msra.gmra.mrb[8].mxu1 %v5514_v21 }
 0xc2d   :  { %6193 = vmatpush1.bf16.msra.mxu1 %v26477_v19 }
 0xc2e   :  { %6194 = vmatprep.subr.bf16.mxu1 %v32973_v34 }
 0xc31   :  { %6195 = vmatpush1.bf16.msra.mxu1 %v26478_v3 }
 0xc32   :  { %6196 = vmatprep.subr.bf16.mxu1 %v32973_v34 }
 0xc35   :  { %6197 = vmatpush1.bf16.msra.mxu1 %v26479_v12 }
 0xc36   :  { %6198 = vmatprep.subr.bf16.mxu1 %v32973_v34 }
 0xc39   :  { %6199 = vmatpush1.bf16.msra.mxu1 %v26480_v22 }
 0xc3a   :  { %6200 = vmatprep.subr.bf16.mxu1 %v32973_v34 }
 0xc3d   :  { %6201 = vmatpush1.bf16.msra.mxu1 %v26481_v7 }
 0xc3e   :  { %6202 = vmatprep.subr.bf16.mxu1 %v32973_v34 }
 0xc41   :  { %6203 = vmatpush1.bf16.msra.mxu1 %v26482_v48 }
 0xc42   :  { %6204 = vmatprep.subr.bf16.mxu1 %v32973_v34 }
 0xc45   :  { %6205 = vmatpush1.bf16.msra.mxu1 %v26483_v20 }
 0xc46   :  { %6206 = vmatprep.subr.bf16.mxu1 %v32973_v34 }
 0xc49   :  { %6207 = vmatpush1.bf16.msra.mxu1 %v26484_v2 }
 0xc4a   :  { %6208 = vmatprep.subr.bf16.mxu1 %v32973_v34 }
 0xc4d   :  { %6209 = vmatpush1.bf16.msra.mxu1 %v26485_v24 }
 0xc4e   :  { %6293 = vmatprep.subr.bf16.mxu1 %v32973_v34 }
 0xcff   :  { %v5907_v54 = vpop.f32.mrb[8].mxu1 }
 0xd00   :  { %v5912_v58 = vmul.f32 %v5907_v54, %v5907_v54  ;;  %v5909_v59 = vpop.f32.mrb[9].mxu1 }
 0xd01   :  { %v5913_v28 = vmul.f32 %v5909_v59, %v5909_v59 }
 0xd02   :  { %v5916_v5 = vrot.slane %v5912_v58, 7 }
 0xd03   :  { %v5917_v57 = vrot.slane %v5913_v28, 7 }
 0xd04   :  { %v5920_v23 = vsub.f32 %v5907_v54, %v5916_v5 }
 0xd05   :  { %v5921_v52 = vsub.f32 %v5909_v59, %v5917_v57 }
 0xd06   :  { %v5923_v63 = vadd.f32 1e-05, %v5920_v23 }
 0xd07   :  { %v5924_v56 = vadd.f32 1e-05, %v5921_v52 }
 0xd08   :  { %27030 = vrsqrt.f32 %v5923_v63 }
 0xd09   :  { %27032 = vrsqrt.f32 %v5924_v56 }
 0xd12   :  { %v27031_v27 = vpop.eup %27030 }
 0xd13   :  { %v27033_v30 = vpop.eup %27032 }
 0xd14   :  { %v5929_v41 = vcombine.low %v27031_v27, %v27033_v30 }
 0xd16   :  { %v5936_v32 = vrot.slane %v5929_v41, %v27881_v35 }
 0xd18   :  { %v5937_v29 = vcombine.high %v5936_v32, %v5936_v32  ;;  %v26501_v32 = vld [vmem:[%s32972_s3 + $0xc0] sm:$0xff]  }
 0xd1a   :  { %v5944_v47 = vrot.slane %v5937_v29, %v27881_v35 }
 0xd1c   :  { %v5946_v45 = vmul.f32 %v5944_v47, %v5922_v60 }
 0xd1e   :  { %v5952_v38 = vrot.slane %v5946_v45, %v32978_v51  ;;  %v5956_v33 = vrot.slane %v5946_v45, %v28755_v49 }
 0xd20   :  { %v5959_v0 = vmul.f32 %v5952_v38, %v5907_v54  ;;  %v5960_v16 = vmul.f32 %v5956_v33, %v5909_v59  ;;  %v5980_v13 = vmul.f32 %v5952_v38, %v32979_v11  ;;  %v5981_v25 = vmul.f32 %v5956_v33, %v32980_v53 }
 0xd21   :  { %v5982_v55 = vmul.f32 %v5952_v38, %v32981_v17  ;;  %v5983_v1 = vmul.f32 %v5956_v33, %v32982_v44 }
 0xd22   :  { %v5963_v8 = vcombine.low %v5959_v0, %v5960_v16 }
 0xd24   :  { %v5970_v26 = vrot.slane %v5963_v8, %v27881_v35 }
 0xd26   :  { %v5977_v61 = vrot.slane %v5970_v26, %v27881_v35 }
 0xd28   :  { %v5979_v62 = vsub.f32 %v5947_v42, %v5977_v61 }
 0xd2a   :  { %v5988_v9 = vrot.slane %v5979_v62, %v32978_v51  ;;  %v5992_v43 = vrot.slane %v5979_v62, %v28755_v49 }
 0xd2c   :  { %v5995_v18 = vadd.f32 %v5988_v9, %v5980_v13  ;;  %v5996_v14 = vadd.f32 %v5992_v43, %v5981_v25  ;;  %v5997_v31 = vadd.f32 %v5988_v9, %v5982_v55  ;;  %v5998_v37 = vadd.f32 %v5992_v43, %v5983_v1 }
 0xd2e   :  { %v5999_v21 = vmax.f32 %v5995_v18, 0.0  ;;  %v6000_v46 = vmax.f32 %v5996_v14, 0.0  ;;  %v6001_v39 = vmax.f32 %v5997_v31, 0.0  ;;  %v6002_v15 = vmax.f32 %v5998_v37, 0.0 }
 0xd30   :  { %v6003_v36 = vpack.c.bf16 %v5999_v21, %v5999_v21  ;;  %v6004_v40 = vpack.c.bf16 %v6000_v46, %v6000_v46  ;;  %v6005_v6 = vpack.c.bf16 %v6001_v39, %v6001_v39  ;;  %v6006_v19 = vpack.c.bf16 %v6002_v15, %v6002_v15 }
 0xd32   :  { %v6008_v3 = vshrl.u32 %v6003_v36, 16  ;;  %v6015_v12 = vshrl.u32 %v6004_v40, 16  ;;  %v6022_v22 = vshrl.u32 %v6005_v6, 16  ;;  %v6029_v7 = vshrl.u32 %v6006_v19, 16 }
 0xd33   :  { %v6011_v20 = vshll.u32 %v6003_v36, 16  ;;  %v6018_v24 = vshll.u32 %v6004_v40, 16  ;;  %v6025_v58 = vshll.u32 %v6005_v6, 16  ;;  %v6032_v28 = vshll.u32 %v6006_v19, 16 }
 0xd34   :  { %v6010_v48 = vrot.slane %v6008_v3, 7  ;;  %v6017_v2 = vrot.slane %v6015_v12, 7  ;;  %v6024_v54 = vrot.slane %v6022_v22, 7  ;;  %v6031_v59 = vrot.slane %v6029_v7, 7 }
 0xd36   :  { %v6013_v5 = vor.u32 %v6011_v20, %v6010_v48  ;;  %v6020_v57 = vor.u32 %v6018_v24, %v6017_v2  ;;  %v6027_v23 = vor.u32 %v6025_v58, %v6024_v54  ;;  %v6034_v52 = vor.u32 %v6032_v28, %v6031_v59  ;;  %v26486_v20 = vld [vmem:[%s32972_s3] sm:$0xff]   ;;  %v26487_v2 = vld [vmem:[%s32972_s3 + $0x8] sm:$0xff]   ;;  %v26488_v24 = vld [vmem:[%s32972_s3 + $0x10] sm:$0xff]  }
 0xd37   :  { %v26489_v54 = vld [vmem:[%s32972_s3 + $0x18] sm:$0xff]   ;;  %v26490_v58 = vld [vmem:[%s32972_s3 + $0x20] sm:$0xff]   ;;  %v26491_v59 = vld [vmem:[%s32972_s3 + $0x28] sm:$0xff]  }
 0xd38   :  { %v6039_v56 = vsel %vm27568_vm3, 0, %v6013_v5  ;;  %v6040_v27 = vsel %vm27568_vm3, 0, %v6020_v57  ;;  %v6041_v30 = vsel %vm27568_vm3, 0, %v6027_v23  ;;  %v6042_v41 = vsel %vm27568_vm3, 0, %v6034_v52  ;;  %v26492_v28 = vld [vmem:[%s32972_s3 + $0x30] sm:$0xff]   ;;  %v26493_v5 = vld [vmem:[%s32972_s3 + $0x38] sm:$0xff]  }
 0xd39   :  { %v28778_v29 = vsel %vm28279_vm14, %v6039_v56, 0  ;;  %v6044_v60 = vsel %vm28279_vm14, %v6040_v27, 0  ;;  %v28784_v47 = vsel %vm28279_vm14, %v6041_v30, 0  ;;  %v6046_v45 = vsel %vm28279_vm14, %v6042_v41, 0  ;;  %v26494_v57 = vld [vmem:[%s32972_s3 + $0x40] sm:$0xff]   ;;  %v26495_v23 = vld [vmem:[%s32972_s3 + $0x90] sm:$0xff]  }
 0xd3a   :  { %v21574_v38 = vcombine.low %v28778_v29, %v6044_v60  ;;  %v21575_v33 = vcombine.high %v28778_v29, %v6044_v60  ;;  %v21576_v0 = vcombine.low %v28784_v47, %v6046_v45  ;;  %v21577_v16 = vcombine.high %v28784_v47, %v6046_v45  ;;  %v26496_v52 = vld [vmem:[%s32972_s3 + $0x98] sm:$0xff]   ;;  %v26497_v56 = vld [vmem:[%s32972_s3 + $0xa0] sm:$0xff]   ;;  %v26498_v27 = vld [vmem:[%s32972_s3 + $0xa8] sm:$0xff]  }
 0xd3b   :  { %v21609_v11 = vcombine.low %v6044_v60, %v6046_v45  ;;  %v21608_v13 = vcombine.low %v28778_v29, %v28784_v47  ;;  %v26499_v30 = vld [vmem:[%s32972_s3 + $0xb0] sm:$0xff]   ;;  %v26500_v41 = vld [vmem:[%s32972_s3 + $0xb8] sm:$0xff]   ;;  %v26502_v29 = vld [vmem:[%s32972_s3 + $0xc8] sm:$0xff]   ;;  %vm8593_vm14 = vsmask.f32 2304 }
 0xd3c   :  { %v6082_v53 = vshrl.u32 %v21574_v38, 16  ;;  %v6085_v25 = vshll.u32 %v21574_v38, 16  ;;  %v21620_v17 = vrot.slane %v21574_v38, 9  ;;  %v6096_v55 = vshrl.u32 %v21576_v0, 16  ;;  %v26503_v60 = vld [vmem:[%s32972_s3 + $0xd0] sm:$0xff]   ;;  %v6487_v47 = vld [vmem:[%s32987_s12] sm:$0xff]  ;;  %vm29291_vm4 = vmand %vm4571_vm15, %vm8593_vm14 }
 0xd3d   :  { %v6099_v44 = vshll.u32 %v21576_v0, 16  ;;  %v6336_v1 = vrot.slane %v21575_v33, 5  ;;  %v6091_v42 = vshll.u32 %v21575_v33, 16  ;;  %v21621_v61 = vrot.slane %v21576_v0, 9  ;;  %v6488_v45 = vld [vmem:[%s32987_s12 + $0x8] sm:$0xff]  ;;  %s33444_s3 = sld [smem:[#allocation50_spill]] }
 0xd3e   :  { %v6084_v8 = vrot.slane %v6082_v53, 4  ;;  %v6087_v26 = vrot.slane %v6085_v25, 5  ;;  %v6098_v62 = vrot.slane %v6096_v55, 4  ;;  %v6105_v43 = vshll.u32 %v21577_v16, 16  ;;  %v6490_v53 = vld [vmem:[%s32987_s12 + $0x18] sm:$0xff] }
 0xd3f   :  { %v6101_v9 = vrot.slane %v6099_v44, 5  ;;  %v28796_v14 = vsel %vm28299_vm7, %v21620_v17, %v6336_v1  ;;  %v6340_v37 = vrot.slane %v21577_v16, 5  ;;  %v6093_v39 = vrot.slane %v6091_v42, 5  ;;  %v6491_v44 = vld [vmem:[%s32987_s12 + $0x20] sm:$0xff]  ;;  %v6492_v1 = vld [vmem:[%s32987_s12 + $0x28] sm:$0xff] }
 0xd40   :  { %v6088_v31 = vor.u32 %v6087_v26, %v6084_v8  ;;  %v6107_v40 = vrot.slane %v6105_v43, 5  ;;  %v6504_v38 = vand.u32 4294901760, %v6487_v47  ;;  %v6507_v33 = vand.u32 4294901760, %v6488_v45 }
 0xd41   :  { %v6102_v21 = vor.u32 %v6101_v9, %v6098_v62  ;;  %v28800_v15 = vsel %vm28299_vm7, %v21621_v61, %v6340_v37  ;;  %v6513_v17 = vand.u32 4294901760, %v6490_v53  ;;  %v6516_v8 = vand.u32 4294901760, %v6491_v44  ;;  %v6493_v61 = vld [vmem:[%s32987_s12 + $0x30] sm:$0xff]  ;;  %v6494_v62 = vld [vmem:[%s32987_s12 + $0x38] sm:$0xff] }
 0xd42   :  { %v6089_v46 = vrot.slane %v6088_v31, 4  ;;  %v21641_v6 = vcombine.high %v28796_v14, %v28800_v15  ;;  %v21640_v19 = vcombine.low %v28796_v14, %v28800_v15  ;;  %v28856_v0 = vpack.c.bf16 %v6507_v33, %v6504_v38  ;;  %v6495_v14 = vld [vmem:[%s32987_s12 + $0x40] sm:$0xff]  ;;  %v6496_v31 = vld [vmem:[%s32987_s12 + $0x48] sm:$0xff]  ;;  %v6498_v15 = vld [vmem:[%s32987_s12 + $0x58] sm:$0xff] }
 0xd43   :  { %v6103_v36 = vrot.slane %v6102_v21, 4  ;;  %v28858_v16 = vsub.f32 %v6487_v47, %v6504_v38  ;;  %v6519_v26 = vand.u32 4294901760, %v6492_v1  ;;  %v6522_v9 = vand.u32 4294901760, %v6493_v61 }
 0xd44   :  { %v6094_v12 = vsel %vm28306_vm12, %v6089_v46, %v6093_v39  ;;  %v6525_v43 = vand.u32 4294901760, %v6494_v62  ;;  %v6528_v37 = vand.u32 4294901760, %v6495_v14  ;;  %v6531_v21 = vand.u32 4294901760, %v6496_v31  ;;  %v6497_v39 = vld [vmem:[%s32987_s12 + $0x50] sm:$0xff] }
 0xd45   :  { %v6108_v22 = vsel %vm28306_vm12, %v6103_v36, %v6107_v40  ;;  %v28872_v42 = vpack.c.bf16 %v6519_v26, %v6516_v8  ;;  %v6534_v36 = vand.u32 4294901760, %v6497_v39  ;;  %v6537_v40 = vand.u32 4294901760, %v6498_v15 }
 0xd46   :  { %v21597_v7 = vcombine.high %v6094_v12, %v6108_v22  ;;  %v21596_v48 = vcombine.low %v6094_v12, %v6108_v22  ;;  %v28878_v18 = vpack.c.bf16 %v6525_v43, %v6522_v9  ;;  %v28884_v46 = vpack.c.bf16 %v6531_v21, %v6528_v37  ;;  %v6499_v22 = vld [vmem:[%s32987_s12 + $0x60] sm:$0xff] }
 0xd47   :  { %v28893_v3 = vsub.f32 %v6491_v44, %v6516_v8  ;;  %v28895_v12 = vsub.f32 %v6492_v1, %v6519_v26  ;;  %vm8945_vm7 = vcmask 1044484   ;;  %vm8631_vm15 = vsmask.f32 1280 }
 0xd48   :  { %21607 = vmatprep.mubr.msk.bf16.mxu1 %vm4703_vm10, %v21597_v7  ;;  %v6500_v7 = vld [vmem:[%s32987_s12 + $0x68] sm:$0xff]  ;;  %vm8632_vm12 = vsmask.f32 3336  ;;  %vm8946_vm14 = vmor %vm8944_vm5, %vm8945_vm7  ;;  %vm13872_vm7 = vsmask.f32 3340 }
 0xd49   :  { %6225 = vmatmul.mubr.bf16.vlgmr.msra.gmra.mrb[12].mxu1 %v21596_v48  ;;  %v6501_v48 = vld [vmem:[%s32987_s12 + $0x70] sm:$0xff]  ;;  %vm29313_vm2 = vmor %vm8631_vm15, %vm8632_vm12 }
 0xd4a   :  { %6294 = vmatpush1.bf16.msra.mxu1 %v26486_v20  ;;  %21619 = vmatprep.mubr.msk.bf16.mxu1 %vm4703_vm10, %v21609_v11  ;;  %v28860_v11 = vsub.f32 %v6488_v45, %v6507_v33  ;;  %v28901_v20 = vsub.f32 %v6493_v61, %v6522_v9  ;;  %v32538_v9 = vand.u32 4294901760, %v28895_v12  ;;  %vm29317_vm8 = vmor %vm8946_vm14, %vm8947_vm9 }
 0xd4b   :  { %6295 = vmatprep.subr.bf16.mxu1 %v32973_v34  ;;  %vm8635_vm5 = vmor %vm29313_vm2, %vm8634_vm11  ;;  %vm13868_vm11 = vsmask.f32 1284  ;;  %vm13874_vm2 = vsmask.f32 4368 }
 0xd4c   :  { %v32542_v47 = vand.u32 4294901760, %v28860_v11 }
 0xd4e   :  { %6296 = vmatpush1.bf16.msra.mxu1 %v26487_v2  ;;  %v28903_v2 = vsub.f32 %v6494_v62, %v6525_v43  ;;  %v6605_v33 = vsub.f32 %v28860_v11, %v32542_v47  ;;  %v32539_v62 = vand.u32 4294901760, %v28893_v3 }
 0xd4f   :  { %6297 = vmatprep.subr.bf16.mxu1 %v32973_v34 }
 0xd52   :  { %6298 = vmatpush1.bf16.msra.mxu1 %v26488_v24  ;;  %v28905_v24 = vsub.f32 %v6495_v14, %v6528_v37  ;;  %v6626_v14 = vsub.f32 %v28893_v3, %v32539_v62 }
 0xd53   :  { %6299 = vmatprep.subr.bf16.mxu1 %v32973_v34 }
 0xd54   :  { %v6627_v37 = vand.u32 4294901760, %v6626_v14 }
 0xd56   :  { %6300 = vmatpush1.bf16.msra.mxu1 %v26489_v54  ;;  %v28907_v54 = vsub.f32 %v6496_v31, %v6531_v21  ;;  %v6633_v31 = vsub.f32 %v28895_v12, %v32538_v9 }
 0xd57   :  { %6301 = vmatprep.subr.bf16.mxu1 %v32973_v34 }
 0xd58   :  { %v6634_v21 = vand.u32 4294901760, %v6633_v31 }
 0xd5a   :  { %6302 = vmatpush1.bf16.msra.mxu1 %v26490_v58  ;;  %v6502_v58 = vld [vmem:[%s32987_s12 + $0x78] sm:$0xff] }
 0xd5b   :  { %6303 = vmatprep.subr.bf16.mxu1 %v32973_v34 }
 0xd5e   :  { %6304 = vmatpush1.bf16.msra.mxu1 %v26491_v59  ;;  %v28910_v59 = vpack.c.bf16 %v6537_v40, %v6534_v36 }
 0xd5f   :  { %6305 = vmatprep.subr.bf16.mxu1 %v32973_v34 }
 0xd62   :  { %6306 = vmatpush1.bf16.msra.mxu1 %v26492_v28  ;;  %v28912_v28 = vsub.f32 %v6497_v39, %v6534_v36  ;;  %v32537_v39 = vand.u32 4294901760, %v28901_v20  ;;  %v28964_v36 = vpack.c.bf16 %v6634_v21, %v6627_v37 }
 0xd63   :  { %6307 = vmatprep.subr.bf16.mxu1 %v32973_v34 }
 0xd66   :  { %6308 = vmatpush1.bf16.msra.mxu1 %v26493_v5  ;;  %v28914_v5 = vsub.f32 %v6498_v15, %v6537_v40  ;;  %v32536_v15 = vand.u32 4294901760, %v28903_v2  ;;  %v6640_v40 = vsub.f32 %v28901_v20, %v32537_v39 }
 0xd67   :  { %6309 = vmatprep.subr.bf16.mxu1 %v32973_v34 }
 0xd6a   :  { %6310 = vmatpush1.bf16.msra.mxu1 %v26494_v57  ;;  %v6540_v57 = vand.u32 4294901760, %v6499_v22 }
 0xd6b   :  { %6425 = vmatprep.subr.bf16.mxu1 %v32973_v34 }
 0xd6d   :  { %6326 = vmatmul.mubr.bf16.vlgmr.msra.gmra.mrb[12].mxu1 %v21608_v13  ;;  %v6489_v13 = vld [vmem:[%s32987_s12 + $0x10] sm:$0xff] }
 0xd6e   :  { %6426 = vmatpush1.bf16.msra.mxu1 %v26495_v23  ;;  %21651 = vmatprep.mubr.msk.bf16.mxu1 %vm4703_vm10, %v21641_v6  ;;  %v6510_v25 = vand.u32 4294901760, %v6489_v13  ;;  %v6543_v23 = vand.u32 4294901760, %v6500_v7 }
 0xd6f   :  { %6427 = vmatprep.subr.bf16.mxu1 %v32973_v34 }
 0xd70   :  { %v28866_v55 = vpack.c.bf16 %v6513_v17, %v6510_v25  ;;  %v28889_v6 = vsub.f32 %v6489_v13, %v6510_v25 }
 0xd72   :  { %6428 = vmatpush1.bf16.msra.mxu1 %v26496_v52  ;;  %v6546_v52 = vand.u32 4294901760, %v6501_v48  ;;  %v32541_v25 = vand.u32 4294901760, %v28889_v6 }
 0xd73   :  { %6429 = vmatprep.subr.bf16.mxu1 %v32973_v34 }
 0xd74   :  { %v6612_v1 = vsub.f32 %v28889_v6, %v32541_v25 }
 0xd76   :  { %6430 = vmatpush1.bf16.msra.mxu1 %v26497_v56  ;;  %v28917_v56 = vsub.f32 %v6499_v22, %v6540_v57  ;;  %v6613_v26 = vand.u32 4294901760, %v6612_v1  ;;  %v6647_v22 = vsub.f32 %v28903_v2, %v32536_v15 }
 0xd77   :  { %6431 = vmatprep.subr.bf16.mxu1 %v32973_v34 }
 0xd78   :  { %v32531_v31 = vand.u32 4294901760, %v28917_v56 }
 0xd7a   :  { %6432 = vmatpush1.bf16.msra.mxu1 %v26498_v27  ;;  %v6549_v27 = vand.u32 4294901760, %v6502_v58 }
 0xd7b   :  { %6433 = vmatprep.subr.bf16.mxu1 %v32973_v34 }
 0xd7c   :  { %v28931_v45 = vpack.c.bf16 %v6549_v27, %v6546_v52 }
 0xd7e   :  { %6434 = vmatpush1.bf16.msra.mxu1 %v26499_v30  ;;  %v28920_v30 = vpack.c.bf16 %v6543_v23, %v6540_v57  ;;  %v32534_v57 = vand.u32 4294901760, %v28907_v54 }
 0xd7f   :  { %6435 = vmatprep.subr.bf16.mxu1 %v32973_v34 }
 0xd82   :  { %6436 = vmatpush1.bf16.msra.mxu1 %v26500_v41  ;;  %v28922_v41 = vsub.f32 %v6500_v7, %v6543_v23  ;;  %v6641_v7 = vand.u32 4294901760, %v6640_v40  ;;  %v6682_v40 = vsub.f32 %v28917_v56, %v32531_v31 }
 0xd83   :  { %6437 = vmatprep.subr.bf16.mxu1 %v32973_v34 }
 0xd84   :  { %v32530_v37 = vand.u32 4294901760, %v28922_v41 }
 0xd86   :  { %6438 = vmatpush1.bf16.msra.mxu1 %v26501_v32  ;;  %v28924_v32 = vsub.f32 %v6501_v48, %v6546_v52  ;;  %v6648_v48 = vand.u32 4294901760, %v6647_v22  ;;  %v6689_v22 = vsub.f32 %v28922_v41, %v32530_v37 }
 0xd87   :  { %6439 = vmatprep.subr.bf16.mxu1 %v32973_v34 }
 0xd88   :  { %v28974_v23 = vpack.c.bf16 %v6648_v48, %v6641_v7  ;;  %v6683_v7 = vand.u32 4294901760, %v6682_v40  ;;  %v6690_v48 = vand.u32 4294901760, %v6689_v22  ;;  %v24777_v40 = vpack.c.bf16 %v28860_v11, %v28858_v16 }
 0xd8a   :  { %6440 = vmatpush1.bf16.msra.mxu1 %v26502_v29  ;;  %v28926_v29 = vsub.f32 %v6502_v58, %v6549_v27  ;;  %v32535_v58 = vand.u32 4294901760, %v28905_v24  ;;  %v6661_v27 = vsub.f32 %v28907_v54, %v32534_v57 }
 0xd8b   :  { %6441 = vmatprep.subr.bf16.mxu1 %v32973_v34 }
 0xd8c   :  { %v6654_v52 = vsub.f32 %v28905_v24, %v32535_v58 }
 0xd8e   :  { %6442 = vmatpush1.bf16.msra.mxu1 %v26503_v60  ;;  %v32543_v60 = vand.u32 4294901760, %v28858_v16 }
 0xd8f   :  { %24728 = vmatprep.subr.bf16.mxu1 %v32942_v4 }
 0xd90   :  { %v6598_v38 = vsub.f32 %v28858_v16, %v32543_v60 }
 0xd91   :  { %6458 = vmatmul.mubr.bf16.vlgmr.msra.gmra.mrb[12].mxu1 %v21640_v19  ;;  %v28891_v19 = vsub.f32 %v6490_v53, %v6513_v17  ;;  %v6606_v53 = vand.u32 4294901760, %v6605_v33  ;;  %v6662_v33 = vand.u32 4294901760, %v6661_v27  ;;  %v32529_v27 = vand.u32 4294901760, %v28926_v29 }
 0xd92   :  { %23818 = vmatprep.mubr.msk.f32.mxu1 %vm32554_vm6, %v32971_v10  ;;  %24730 = vmatpush3.bf16.msra.mxu1 %v28856_v0  ;;  %v6599_v13 = vand.u32 4294901760, %v6598_v38  ;;  %v6655_v38 = vand.u32 4294901760, %v6654_v52  ;;  %v32528_v52 = vand.u32 4294901760, %v28924_v32 }
 0xd93   :  { %24731 = vmatprep.subr.bf16.mxu1 %v32942_v4  ;;  %v32540_v17 = vand.u32 4294901760, %v28891_v19  ;;  %v24780_v22 = vpack.c.bf16 %v28891_v19, %v28889_v6 }
 0xd94   :  { %v28944_v44 = vpack.c.bf16 %v6606_v53, %v6599_v13  ;;  %v32533_v13 = vand.u32 4294901760, %v28912_v28  ;;  %v32532_v53 = vand.u32 4294901760, %v28914_v5  ;;  %v28984_v1 = vpack.c.bf16 %v6662_v33, %v6655_v38 }
 0xd95   :  { %v6619_v8 = vsub.f32 %v28891_v19, %v32540_v17  ;;  %v24771_v38 = vpack.c.bf16 %v6690_v48, %v6683_v7  ;;  %v6696_v33 = vsub.f32 %v28924_v32, %v32528_v52  ;;  %v24783_v7 = vpack.c.bf16 %v28895_v12, %v28893_v3 }
 0xd96   :  { %24733 = vmatpush3.bf16.msra.mxu1 %v28866_v55  ;;  %v24786_v48 = vpack.c.bf16 %v28903_v2, %v28901_v20  ;;  %v24789_v52 = vpack.c.bf16 %v28907_v54, %v28905_v24 }
 0xd97   :  { %24734 = vmatprep.subr.bf16.mxu1 %v32942_v4  ;;  %v6620_v61 = vand.u32 4294901760, %v6619_v8  ;;  %v6668_v8 = vsub.f32 %v28912_v28, %v32533_v13 }
 0xd99   :  { %v28954_v43 = vpack.c.bf16 %v6620_v61, %v6613_v26  ;;  %v6675_v26 = vsub.f32 %v28914_v5, %v32532_v53  ;;  %v6669_v61 = vand.u32 4294901760, %v6668_v8  ;;  %v6703_v8 = vsub.f32 %v28926_v29, %v32529_v27 }
 0xd9a   :  { %24736 = vmatpush3.bf16.msra.mxu1 %v28872_v42 }
 0xd9b   :  { %24737 = vmatprep.subr.bf16.mxu1 %v32942_v4  ;;  %v6676_v14 = vand.u32 4294901760, %v6675_v26  ;;  %v6697_v26 = vand.u32 4294901760, %v6696_v33  ;;  %v24792_v33 = vpack.c.bf16 %v28914_v5, %v28912_v28 }
 0xd9d   :  { %v24768_v21 = vpack.c.bf16 %v6676_v14, %v6669_v61  ;;  %v6704_v61 = vand.u32 4294901760, %v6703_v8  ;;  %v24795_v8 = vpack.c.bf16 %v28922_v41, %v28917_v56 }
 0xd9e   :  { %24739 = vmatpush3.bf16.msra.mxu1 %v28878_v18 }
 0xd9f   :  { %24740 = vmatprep.subr.bf16.mxu1 %v32942_v4  ;;  %v24774_v14 = vpack.c.bf16 %v6704_v61, %v6697_v26  ;;  %v24798_v26 = vpack.c.bf16 %v28926_v29, %v28924_v32 }
 0xda2   :  { %24742 = vmatpush3.bf16.msra.mxu1 %v28884_v46 }
 0xda3   :  { %24743 = vmatprep.subr.bf16.mxu1 %v32942_v4 }
 0xda6   :  { %24745 = vmatpush3.bf16.msra.mxu1 %v28910_v59 }
 0xda7   :  { %24746 = vmatprep.subr.bf16.mxu1 %v32942_v4 }
 0xdaa   :  { %24748 = vmatpush3.bf16.msra.mxu1 %v28920_v30 }
 0xdab   :  { %24749 = vmatprep.subr.bf16.mxu1 %v32942_v4 }
 0xdae   :  { %24751 = vmatpush3.bf16.msra.mxu1 %v28931_v45 }
 0xdaf   :  { %24752 = vmatprep.subr.bf16.mxu1 %v32942_v4 }
 0xe64   :  { %v29024_v61 = vpop.f32.mrb[12].mxu1 }
 0xe65   :  { %32988 = vst [vmem:[#allocation59_spill] sm:$0xff] %v29024_v61  ;;  %v6461_v27 = vpop.f32.mrb[13].mxu1  ;;  %v6476_v31 = vmul.f32 %v29024_v61, %v29024_v61 }
 0xe66   :  { %v29026_v37 = vpop.f32.mrb[14].mxu1 }
 0xe67   :  { %v6468_v53 = vadd.f32 %v29026_v37, %v29024_v61  ;;  %v6477_v13 = vmul.f32 %v29026_v37, %v29026_v37  ;;  %v6464_v57 = vpop.f32.mrb[15].mxu1 }
 0xe69   :  { %v6469_v58 = vrot.slane %v6468_v53, 4  ;;  %v6478_v15 = vadd.f32 %v6477_v13, %v6476_v31 }
 0xe6b   :  { %v6470_v39 = vadd.f32 %v6469_v58, %v6468_v53  ;;  %v6479_v9 = vrot.slane %v6478_v15, 4 }
 0xe6d   :  { %v6471_v62 = vrot.slane %v6470_v39, 2  ;;  %v6480_v17 = vadd.f32 %v6479_v9, %v6478_v15 }
 0xe6f   :  { %v6472_v25 = vadd.f32 %v6471_v62, %v6470_v39  ;;  %v6481_v27 = vrot.slane %v6480_v17, 2 }
 0xe71   :  { %v6473_v47 = vrot.slane %v6472_v25, 1  ;;  %v6482_v60 = vadd.f32 %v6481_v27, %v6480_v17  ;;  %v32997_v17 = vand.u32 4294901760, %v28905_v24  ;;  %v33003_v24 = vand.u32 4294901760, %v28924_v32  ;;  %v33008_v27 = vld [vmem:[#allocation55_spill] sm:$0xff] }
 0xe73   :  { %v6474_v49 = vadd.f32 %v6473_v47, %v6472_v25  ;;  %v6483_v63 = vrot.slane %v6482_v60, 1  ;;  %v32995_v25 = vand.u32 4294901760, %v28901_v20  ;;  %v33001_v20 = vand.u32 4294901760, %v28917_v56 }
 0xe75   :  { %v6484_v50 = vadd.f32 %v6483_v63, %v6482_v60  ;;  %v6475_v34 = vmul.f32 0.0625, %v6474_v49  ;;  %v32992_v63 = vand.u32 4294901760, %v28891_v19 }
 0xe77   :  { %v6485_v51 = vmul.f32 0.0625, %v6484_v50  ;;  %v32990_v50 = vand.u32 4294901760, %v28860_v11  ;;  %v32994_v11 = vand.u32 4294901760, %v28895_v12  ;;  %v33000_v12 = vand.u32 4294901760, %v28914_v5 }
 0xe79   :  { %v6486_v61 = vsel %vm306_vm0, %v6475_v34, %v6485_v51  ;;  %v32989_v34 = vand.u32 4294901760, %v28858_v16  ;;  %v32991_v51 = vand.u32 4294901760, %v28889_v6  ;;  %v32993_v16 = vand.u32 4294901760, %v28893_v3 }
 0xe7a   :  { %v29035_v35 = vand.u32 4294901760, %v6486_v61  ;;  %v32996_v6 = vand.u32 4294901760, %v28903_v2  ;;  %v32999_v3 = vand.u32 4294901760, %v28912_v28  ;;  %v33002_v2 = vand.u32 4294901760, %v28922_v41 }
 0xe7b   :  { %v24825_v49 = vpack.c.bf16 %v32990_v50, %v32989_v34  ;;  %v24828_v60 = vpack.c.bf16 %v32992_v63, %v32991_v51  ;;  %v24831_v47 = vpack.c.bf16 %v32994_v11, %v32993_v16 }
 0xe7c   :  { %v6585_v57 = vsub.f32 %v6486_v61, %v29035_v35  ;;  %v24834_v19 = vpack.c.bf16 %v32996_v6, %v32995_v25  ;;  %v24840_v9 = vpack.c.bf16 %v33000_v12, %v32999_v3 }
 0xe7e   :  { %v6586_v13 = vand.u32 4294901760, %v6585_v57 }
 0xe80   :  { %v6587_v58 = vsub.f32 %v6585_v57, %v6586_v13 }
 0xe82   :  { %v6588_v53 = vand.u32 4294901760, %v6587_v58 }
 0xe84   :  { %23819 = vmatmul.mubr.f32.vlgmr.msra.gmra.mrb[10].mxu1 %v6588_v53  ;;  %v33009_v53 = vld [vmem:[#allocation59_spill] sm:$0xff] }
 0xe85   :  { %24754 = vmatpush3.bf16.msra.mxu1 %v28944_v44  ;;  %23853 = vmatprep.mubr.msk.f32.mxu1 %vm32554_vm6, %v32971_v10  ;;  %v32998_v44 = vand.u32 4294901760, %v28907_v54  ;;  %v33004_v54 = vand.u32 4294901760, %v28926_v29 }
 0xe86   :  { %24755 = vmatprep.subr.bf16.mxu1 %v32942_v4 }
 0xe87   :  { %v24837_v62 = vpack.c.bf16 %v32998_v44, %v32997_v17  ;;  %v24846_v39 = vpack.c.bf16 %v33004_v54, %v33003_v24 }
 0xe89   :  { %24757 = vmatpush3.bf16.msra.mxu1 %v28954_v43  ;;  %v24843_v43 = vpack.c.bf16 %v33002_v2, %v33001_v20 }
 0xe8a   :  { %24758 = vmatprep.subr.bf16.mxu1 %v32942_v4 }
 0xe8d   :  { %24760 = vmatpush3.bf16.msra.mxu1 %v28964_v36 }
 0xe8e   :  { %24761 = vmatprep.subr.bf16.mxu1 %v32942_v4 }
 0xe91   :  { %24763 = vmatpush3.bf16.msra.mxu1 %v28974_v23 }
 0xe92   :  { %24764 = vmatprep.subr.bf16.mxu1 %v32942_v4 }
 0xe95   :  { %24766 = vmatpush3.bf16.msra.mxu1 %v28984_v1 }
 0xe96   :  { %24767 = vmatprep.subr.bf16.mxu1 %v32942_v4 }
 0xe99   :  { %24769 = vmatpush3.bf16.msra.mxu1 %v24768_v21 }
 0xe9a   :  { %24770 = vmatprep.subr.bf16.mxu1 %v32942_v4 }
 0xe9d   :  { %24772 = vmatpush3.bf16.msra.mxu1 %v24771_v38  ;;  %v33007_v38 = vld [vmem:[#allocation54_spill] sm:$0xff] }
 0xe9e   :  { %24773 = vmatprep.subr.bf16.mxu1 %v32942_v4 }
 0xea1   :  { %24775 = vmatpush3.bf16.msra.mxu1 %v24774_v14 }
 0xea2   :  { %24776 = vmatprep.subr.bf16.mxu1 %v32942_v4 }
 0xea4   :  { %23854 = vmatmul.mubr.f32.vlgmr.msra.gmra.mrb[10].mxu1 %v29035_v35 }
 0xea5   :  { %24778 = vmatpush3.bf16.msra.mxu1 %v24777_v40  ;;  %23888 = vmatprep.mubr.msk.f32.mxu1 %vm32554_vm6, %v32971_v10 }
 0xea6   :  { %24779 = vmatprep.subr.bf16.mxu1 %v32942_v4 }
 0xea9   :  { %24781 = vmatpush3.bf16.msra.mxu1 %v24780_v22 }
 0xeaa   :  { %24782 = vmatprep.subr.bf16.mxu1 %v32942_v4 }
 0xead   :  { %24784 = vmatpush3.bf16.msra.mxu1 %v24783_v7  ;;  %v7599_v7 = vld [vmem:[#allocation9] sm:$0x1] }
 0xeae   :  { %24785 = vmatprep.subr.bf16.mxu1 %v32942_v4 }
 0xeb1   :  { %24787 = vmatpush3.bf16.msra.mxu1 %v24786_v48 }
 0xeb2   :  { %24788 = vmatprep.subr.bf16.mxu1 %v32942_v4 }
 0xeb5   :  { %24790 = vmatpush3.bf16.msra.mxu1 %v24789_v52  ;;  %v7643_v52 = vld [vmem:[%s33006_s2] sm:$0xff] }
 0xeb6   :  { %24791 = vmatprep.subr.bf16.mxu1 %v32942_v4  ;;  %v7645_v22 = vsel %vm4703_vm10, %v7643_v52, 0 }
 0xeb9   :  { %24793 = vmatpush3.bf16.msra.mxu1 %v24792_v33  ;;  %v7714_v33 = vand.u32 4294901760, %v7645_v22 }
 0xeba   :  { %24794 = vmatprep.subr.bf16.mxu1 %v32942_v4 }
 0xebd   :  { %24796 = vmatpush3.bf16.msra.mxu1 %v24795_v8 }
 0xebe   :  { %24797 = vmatprep.subr.bf16.mxu1 %v32942_v4 }
 0xec1   :  { %24799 = vmatpush3.bf16.msra.mxu1 %v24798_v26  ;;  %v7620_v26 = vld [vmem:[#allocation10] sm:$0x1] }
 0xec2   :  { %24800 = vmatprep.subr.bf16.mxu1 %v32942_v4 }
 0xec4   :  { %23889 = vmatmul.mubr.f32.vlgmr.msra.gmra.mrb[10].mxu1 %v6585_v57 }
 0xec5   :  { %24802 = vmatpush3.bf16.msra.mxu1 %v28856_v0  ;;  %23923 = vmatprep.mubr.msk.f32.mxu1 %vm32554_vm6, %v32971_v10 }
 0xec6   :  { %24803 = vmatprep.subr.bf16.mxu1 %v32942_v4 }
 0xec9   :  { %24805 = vmatpush3.bf16.msra.mxu1 %v28866_v55 }
 0xeca   :  { %24806 = vmatprep.subr.bf16.mxu1 %v32942_v4 }
 0xecd   :  { %24808 = vmatpush3.bf16.msra.mxu1 %v28872_v42 }
 0xece   :  { %24809 = vmatprep.subr.bf16.mxu1 %v32942_v4 }
 0xed1   :  { %24811 = vmatpush3.bf16.msra.mxu1 %v28878_v18 }
 0xed2   :  { %24812 = vmatprep.subr.bf16.mxu1 %v32942_v4 }
 0xed5   :  { %24814 = vmatpush3.bf16.msra.mxu1 %v28884_v46 }
 0xed6   :  { %24815 = vmatprep.subr.bf16.mxu1 %v32942_v4 }
 0xed9   :  { %24817 = vmatpush3.bf16.msra.mxu1 %v28910_v59 }
 0xeda   :  { %24818 = vmatprep.subr.bf16.mxu1 %v32942_v4 }
 0xedd   :  { %24820 = vmatpush3.bf16.msra.mxu1 %v28920_v30 }
 0xede   :  { %24821 = vmatprep.subr.bf16.mxu1 %v32942_v4 }
 0xee1   :  { %24823 = vmatpush3.bf16.msra.mxu1 %v28931_v45 }
 0xee2   :  { %24824 = vmatprep.subr.bf16.mxu1 %v32942_v4 }
 0xee4   :  { %23924 = vmatmul.mubr.f32.vlgmr.msra.gmra.mrb[10].mxu1 %v6586_v13  ;;  %v7715_v13 = vsub.f32 %v7645_v22, %v7714_v33 }
 0xee5   :  { %24826 = vmatpush3.bf16.msra.mxu1 %v24825_v49  ;;  %23958 = vmatprep.mubr.msk.f32.mxu1 %vm32554_vm6, %v32971_v10 }
 0xee6   :  { %24827 = vmatprep.subr.bf16.mxu1 %v32942_v4  ;;  %v7716_v51 = vand.u32 4294901760, %v7715_v13 }
 0xee9   :  { %24829 = vmatpush3.bf16.msra.mxu1 %v24828_v60 }
 0xeea   :  { %24830 = vmatprep.subr.bf16.mxu1 %v32942_v4 }
 0xeed   :  { %24832 = vmatpush3.bf16.msra.mxu1 %v24831_v47  ;;  %v7717_v47 = vsub.f32 %v7715_v13, %v7716_v51 }
 0xeee   :  { %24833 = vmatprep.subr.bf16.mxu1 %v32942_v4 }
 0xef1   :  { %24835 = vmatpush3.bf16.msra.mxu1 %v24834_v19 }
 0xef2   :  { %24836 = vmatprep.subr.bf16.mxu1 %v32942_v4 }
 0xef5   :  { %24838 = vmatpush3.bf16.msra.mxu1 %v24837_v62  ;;  %v7718_v62 = vand.u32 4294901760, %v7717_v47 }
 0xef6   :  { %24839 = vmatprep.subr.bf16.mxu1 %v32942_v4 }
 0xef9   :  { %24841 = vmatpush3.bf16.msra.mxu1 %v24840_v9 }
 0xefa   :  { %24842 = vmatprep.subr.bf16.mxu1 %v32942_v4 }
 0xefd   :  { %24844 = vmatpush3.bf16.msra.mxu1 %v24843_v43 }
 0xefe   :  { %24845 = vmatprep.subr.bf16.mxu1 %v32942_v4 }
 0xf01   :  { %24847 = vmatpush3.bf16.msra.mxu1 %v24846_v39  ;;  %v8106_v39 = vld [vmem:[%s33010_s7] sm:$0xff] }
 0xf02   :  { %24848 = vmatprep.subr.bf16.mxu1 %v32942_v4 }
 0xf04   :  { %23959 = vmatmul.mubr.f32.vlgmr.msra.gmra.mrb[10].mxu1 %v29035_v35 }
 0xf05   :  { %24850 = vmatpush3.bf16.msra.mxu1 %v28856_v0  ;;  %23993 = vmatprep.mubr.msk.f32.mxu1 %vm32554_vm6, %v32971_v10  ;;  %v7144_v0 = vld [vmem:[%s33005_s4] sm:$0xff] }
 0xf06   :  { %24851 = vmatprep.subr.bf16.mxu1 %v32942_v4 }
 0xf09   :  { %24853 = vmatpush3.bf16.msra.mxu1 %v28866_v55  ;;  %v7149_v55 = vand.u32 4294901760, %v7144_v0 }
 0xf0a   :  { %24854 = vmatprep.subr.bf16.mxu1 %v32942_v4 }
 0xf0b   :  { %23997 = vmatpush3.msra.mxu0 %v7149_v55 }
 0xf0c   :  { %24001 = vmatprep.subr.mxu0 %v32971_v10 }
 0xf0d   :  { %24856 = vmatpush3.bf16.msra.mxu1 %v28872_v42  ;;  %v7226_v42 = vsub.f32 %v7144_v0, %v7149_v55  ;;  %v8108_v0 = vsel %vm4703_vm10, %v8106_v39, 0 }
 0xf0e   :  { %24857 = vmatprep.subr.bf16.mxu1 %v32942_v4 }
 0xf0f   :  { %v7227_v28 = vand.u32 4294901760, %v7226_v42 }
 0xf11   :  { %24859 = vmatpush3.bf16.msra.mxu1 %v28878_v18 }
 0xf12   :  { %24860 = vmatprep.subr.bf16.mxu1 %v32942_v4 }
 0xf15   :  { %24862 = vmatpush3.bf16.msra.mxu1 %v28884_v46 }
 0xf16   :  { %24863 = vmatprep.subr.bf16.mxu1 %v32942_v4 }
 0xf19   :  { %24865 = vmatpush3.bf16.msra.mxu1 %v28910_v59 }
 0xf1a   :  { %24866 = vmatprep.subr.bf16.mxu1 %v32942_v4 }
 0xf1d   :  { %24868 = vmatpush3.bf16.msra.mxu1 %v28920_v30  ;;  %v7228_v30 = vsub.f32 %v7226_v42, %v7227_v28 }
 0xf1e   :  { %24869 = vmatprep.subr.bf16.mxu1 %v32942_v4 }
 0xf1f   :  { %v7229_v29 = vand.u32 4294901760, %v7228_v30 }
 0xf21   :  { %24871 = vmatpush3.bf16.msra.mxu1 %v28931_v45 }
 0xf22   :  { %24908 = vmatprep.subr.bf16.mxu1 %v32942_v4 }
 0xf24   :  { %23994 = vmatmul.mubr.f32.vlgmr.msra.gmra.mrb[10].mxu1 %v29035_v35 }
 0xff7   :  { %v7140_v18 = vpop.f32.mrb[10].mxu1 }
 0xff8   :  { %v7146_v46 = vsel %vm5443_vm13, %v7140_v18, 0  ;;  %v23995_v59 = vpop.f32.mrb[11].mxu1 }
 0xff9   :  { %v7214_v5 = vand.u32 4294901760, %v7146_v46 }
 0xffb   :  { %v7215_v56 = vsub.f32 %v7146_v46, %v7214_v5 }
 0xffd   :  { %v7216_v41 = vand.u32 4294901760, %v7215_v56 }
 0xfff   :  { %v7217_v32 = vsub.f32 %v7215_v56, %v7216_v41 }
0x1001   :  { %v7218_v45 = vand.u32 4294901760, %v7217_v32 }
0x1003   :  { %23999 = vmatmul.mubr.f32.vlgmr.msra.gmra.mrb[18].mxu0 %v7218_v45 }
0x1004   :  { %24002 = vmatpush3.msra.mxu0 %v7229_v29  ;;  %24003 = vmatprep.mubr.msk.f32.mxu0 %vm32554_vm6, %v32971_v10 }
0x1005   :  { %24006 = vmatprep.subr.mxu0 %v32971_v10 }
0x100b   :  { %24004 = vmatmul.mubr.f32.vlgmr.msra.gmra.mrb[18].mxu0 %v7214_v5 }
0x100c   :  { %24007 = vmatpush3.msra.mxu0 %v7226_v42  ;;  %24008 = vmatprep.mubr.msk.f32.mxu0 %vm32554_vm6, %v32971_v10 }
0x100d   :  { %24011 = vmatprep.subr.mxu0 %v32971_v10 }
0x1013   :  { %24009 = vmatmul.mubr.f32.vlgmr.msra.gmra.mrb[18].mxu0 %v7215_v56 }
0x1014   :  { %24012 = vmatpush3.msra.mxu0 %v7149_v55  ;;  %24013 = vmatprep.mubr.msk.f32.mxu0 %vm32554_vm6, %v32971_v10 }
0x1015   :  { %24016 = vmatprep.subr.mxu0 %v32971_v10 }
0x101b   :  { %24014 = vmatmul.mubr.f32.vlgmr.msra.gmra.mrb[18].mxu0 %v7216_v41 }
0x101c   :  { %24017 = vmatpush3.msra.mxu0 %v7227_v28  ;;  %24018 = vmatprep.mubr.msk.f32.mxu0 %vm32554_vm6, %v32971_v10  ;;  %v33012_v28 = vmov 0  }
0x101d   :  { %24021 = vmatprep.subr.mxu0 %v32971_v10 }
0x1023   :  { %24019 = vmatmul.mubr.f32.vlgmr.msra.gmra.mrb[18].mxu0 %v7214_v5 }
0x1024   :  { %24022 = vmatpush3.msra.mxu0 %v7149_v55  ;;  %24023 = vmatprep.mubr.msk.f32.mxu0 %vm32554_vm6, %v32971_v10  ;;  %v8177_v55 = vand.u32 4294901760, %v8108_v0 }
0x1025   :  { %24872 = vmatprep.subr.bf16.mxu0 %v32942_v4 }
0x1026   :  { %v8178_v42 = vsub.f32 %v8108_v0, %v8177_v55 }
0x1028   :  { %v8179_v18 = vand.u32 4294901760, %v8178_v42 }
0x102a   :  { %v8180_v46 = vsub.f32 %v8178_v42, %v8179_v18 }
0x102b   :  { %24024 = vmatmul.mubr.f32.vlgmr.msra.gmra.mrb[18].mxu0 %v7214_v5 }
0x102c   :  { %24030 = vmatprep.mubr.msk.f32.mxu0 %vm32554_vm6, %v32971_v10  ;;  %v8181_v59 = vand.u32 4294901760, %v8180_v46 }
0x10fe   :  { %v7590_v35 = vpop.f32.mrb[18].mxu0 }
0x10ff   :  { %v7594_v15 = vmul.f32 %v7590_v35, %v7590_v35  ;;  %v24025_v36 = vpop.f32.mrb[19].mxu0 }
0x1101   :  { %v7596_v23 = vrot.slane %v7594_v15, 7 }
0x1103   :  { %v7598_v1 = vsub.f32 %v7590_v35, %v7596_v23 }
0x1105   :  { %v7600_v31 = vadd.f32 1e-05, %v7598_v1 }
0x1107   :  { %27034 = vrsqrt.f32 %v7600_v31 }
0x1111   :  { %v27035_v21 = vpop.eup %27034 }
0x1112   :  { %v7609_v14 = vrot.slane %v27035_v21, %v33007_v38 }
0x1114   :  { %v7610_v40 = vcombine.high %v7609_v14, %v7609_v14 }
0x1116   :  { %v7617_v48 = vrot.slane %v7610_v40, %v33007_v38 }
0x1118   :  { %v7619_v8 = vmul.f32 %v7617_v48, %v7599_v7  ;;  %v9142_v48 = vld [vmem:[%s33013_s10] sm:$0xff] }
0x111a   :  { %v7621_v61 = vmul.f32 %v7619_v8, %v7590_v35  ;;  %v7627_v57 = vrot.slane %v7619_v8, %v33008_v27  ;;  %v9144_v8 = vld [vmem:[%s33013_s10 + $0x10] sm:$0xff] }
0x111c   :  { %v7622_v58 = vsub.f32 %v7620_v26, %v7621_v61  ;;  %v7629_v34 = vmul.f32 %v7627_v57, %v33009_v53  ;;  %v7630_v50 = vmul.f32 %v7627_v57, %v29026_v37  ;;  %v9174_v26 = vand.u32 4294901760, %v9142_v48  ;;  %v9145_v57 = vld [vmem:[%s33013_s10 + $0x18] sm:$0xff]  ;;  %v9147_v53 = vld [vmem:[%s33013_s10 + $0x28] sm:$0xff] }
0x111e   :  { %v7635_v49 = vrot.slane %v7622_v58, %v33008_v27  ;;  %v9146_v58 = vld [vmem:[%s33013_s10 + $0x20] sm:$0xff] }
0x1120   :  { %v7637_v63 = vadd.f32 %v7635_v49, %v7629_v34  ;;  %v7638_v60 = vadd.f32 %v7635_v49, %v7630_v50  ;;  %v9183_v34 = vand.u32 4294901760, %v9145_v57  ;;  %v9186_v50 = vand.u32 4294901760, %v9146_v58 }
0x1121   :  { %v9189_v49 = vand.u32 4294901760, %v9147_v53 }
0x1122   :  { %v7639_v16 = vmax.f32 %v7637_v63, 0.0  ;;  %v7640_v11 = vmax.f32 %v7638_v60, 0.0  ;;  %v9149_v63 = vld [vmem:[%s33013_s10 + $0x38] sm:$0xff]  ;;  %v9150_v60 = vld [vmem:[%s33013_s10 + $0x40] sm:$0xff] }
0x1124   :  { %7641 = vst [vmem:[%s27517_s30] sm:$0xff] %v7639_v16  ;;  %7642 = vst [vmem:[%s27517_s30 + $0x8] sm:$0xff] %v7640_v11  ;;  %v7648_v25 = vand.u32 4294901760, %v7639_v16  ;;  %v7651_v6 = vand.u32 4294901760, %v7640_v11  ;;  %s33011_s30 = sld [smem:[#allocation27_spill]] }
0x1126   :  { %v24873_v19 = vpack.c.bf16 %v7651_v6, %v7648_v25  ;;  %v7726_v17 = vsub.f32 %v7639_v16, %v7648_v25  ;;  %v7733_v44 = vsub.f32 %v7640_v11, %v7651_v6  ;;  %v29238_v11 = vsub.f32 %v9142_v48, %v9174_v26  ;;  %v9151_v6 = vld [vmem:[%s33013_s10 + $0x48] sm:$0xff] }
0x1128   :  { %24874 = vmatpush3.bf16.msra.mxu0 %v24873_v19  ;;  %v7727_v3 = vand.u32 4294901760, %v7726_v17  ;;  %v7734_v12 = vand.u32 4294901760, %v7733_v44  ;;  %v24879_v37 = vpack.c.bf16 %v7733_v44, %v7726_v17 }
0x1129   :  { %24875 = vmatprep.subr.bf16.mxu0 %v32942_v4 }
0x112a   :  { %v7728_v9 = vsub.f32 %v7726_v17, %v7727_v3  ;;  %v7735_v20 = vsub.f32 %v7733_v44, %v7734_v12  ;;  %v24885_v2 = vpack.c.bf16 %v7734_v12, %v7727_v3  ;;  %v26504_v5 = vld [vmem:[%s33011_s30 + $0x80] ss:$8 sps:$4 sm:$0xff]   ;;  %v26506_v56 = vld [vmem:[%s33011_s30 + $0x84] ss:$8 sps:$4 sm:$0xff]   ;;  %v26509_v30 = vld [vmem:[%s33011_s30 + $0x94] ss:$8 sps:$4 sm:$0xff]   ;;  %v29248_v44 = vsub.f32 %v9145_v57, %v9183_v34 }
0x112b   :  { %24031 = vmatmul.mubr.f32.vlgmr.msra.gmra.mrb[20].mxu0 %v7718_v62  ;;  %v26507_v41 = vld [vmem:[%s33011_s30 + $0x90] ss:$8 sps:$4 sm:$0xff]   ;;  %v26512_v32 = vld [vmem:[%s33011_s30 + $0xa4] ss:$8 sps:$4 sm:$0xff]   ;;  %v26510_v29 = vld [vmem:[%s33011_s30 + $0xa0] ss:$8 sps:$4 sm:$0xff]   ;;  %v29250_v62 = vsub.f32 %v9146_v58, %v9186_v50  ;;  %v29254_v12 = vsub.f32 %v9147_v53, %v9189_v49 }
0x112c   :  { %v7729_v43 = vand.u32 4294901760, %v7728_v9  ;;  %v7736_v24 = vand.u32 4294901760, %v7735_v20  ;;  %24037 = vmatprep.mubr.msk.f32.mxu0 %vm32554_vm6, %v32971_v10  ;;  %v26515_v45 = vld [vmem:[%s33011_s30 + $0xb4] ss:$8 sps:$4 sm:$0xff]   ;;  %v26513_v35 = vld [vmem:[%s33011_s30 + $0xb0] ss:$8 sps:$4 sm:$0xff]  }
0x112d   :  { %v26518_v15 = vld [vmem:[%s33011_s30 + $0xc4] ss:$8 sps:$4 sm:$0xff]   ;;  %v26516_v36 = vld [vmem:[%s33011_s30 + $0xc0] ss:$8 sps:$4 sm:$0xff]   ;;  %v26519_v23 = vld [vmem:[%s33011_s30 + $0xd0] ss:$8 sps:$4 sm:$0xff]  }
0x112e   :  { %v24876_v54 = vpack.c.bf16 %v7736_v24, %v7729_v43  ;;  %v26521_v1 = vld [vmem:[%s33011_s30 + $0xd4] ss:$8 sps:$4 sm:$0xff]   ;;  %v26524_v31 = vld [vmem:[%s33011_s30 + $0xe4] ss:$8 sps:$4 sm:$0xff]   ;;  %v26522_v21 = vld [vmem:[%s33011_s30 + $0xe0] ss:$8 sps:$4 sm:$0xff]  }
0x112f   :  { %v26527_v52 = vld [vmem:[%s33011_s30 + $0xf4] ss:$8 sps:$4 sm:$0xff]   ;;  %v26525_v14 = vld [vmem:[%s33011_s30 + $0xf0] ss:$8 sps:$4 sm:$0xff]   ;;  %v26530_v40 = vld [vmem:[%s33011_s30 + $0x4] ss:$8 sps:$4 sm:$0xff]  }
0x1130   :  { %24877 = vmatpush3.bf16.msra.mxu0 %v24876_v54  ;;  %v9153_v3 = vld [vmem:[%s33013_s10 + $0x58] sm:$0xff]  ;;  %v9195_v9 = vand.u32 4294901760, %v9149_v63  ;;  %v9198_v20 = vand.u32 4294901760, %v9150_v60 }
0x1131   :  { %24878 = vmatprep.subr.bf16.mxu0 %v32942_v4  ;;  %v9207_v0 = vand.u32 4294901760, %v9153_v3 }
0x1132   :  { %v29261_v39 = vsub.f32 %v9150_v60, %v9198_v20 }
0x1133   :  { %24038 = vmatmul.mubr.f32.vlgmr.msra.gmra.mrb[20].mxu0 %v7714_v33  ;;  %v29270_v46 = vsub.f32 %v9153_v3, %v9207_v0  ;;  %v33028_v3 = vmov 0 }
0x1134   :  { %24880 = vmatpush3.bf16.msra.mxu0 %v24879_v37  ;;  %24044 = vmatprep.mubr.msk.f32.mxu0 %vm32554_vm6, %v32971_v10  ;;  %v33029_v3 = vsel %vm29317_vm8, 4294967295, %v33028_v3 }
0x1135   :  { %24881 = vmatprep.subr.bf16.mxu0 %v32942_v4  ;;  %33030 = vst [vmem:[#allocation65_spill] sm:$0xff] %v33029_v3 }
0x113b   :  { %24045 = vmatmul.mubr.f32.vlgmr.msra.gmra.mrb[20].mxu0 %v7715_v13  ;;  %v9180_v13 = vand.u32 4294901760, %v9144_v8 }
0x113c   :  { %24883 = vmatpush3.bf16.msra.mxu0 %v24873_v19  ;;  %24051 = vmatprep.mubr.msk.f32.mxu0 %vm32554_vm6, %v32971_v10 }
0x113d   :  { %24884 = vmatprep.subr.bf16.mxu0 %v32942_v4  ;;  %v29242_v25 = vsub.f32 %v9144_v8, %v9180_v13  ;;  %v29246_v17 = vpack.c.bf16 %v9183_v34, %v9180_v13 }
0x113f   :  { %33015 = vst [vmem:[#allocation61_spill] sm:$0xff] %v29246_v17 }
0x1143   :  { %24052 = vmatmul.mubr.f32.vlgmr.msra.gmra.mrb[20].mxu0 %v7716_v51  ;;  %v9148_v51 = vld [vmem:[%s33013_s10 + $0x30] sm:$0xff] }
0x1144   :  { %24886 = vmatpush3.bf16.msra.mxu0 %v24885_v2  ;;  %24058 = vmatprep.mubr.msk.f32.mxu0 %vm32554_vm6, %v32971_v10 }
0x1145   :  { %24887 = vmatprep.subr.bf16.mxu0 %v32942_v4 }
0x114b   :  { %24059 = vmatmul.mubr.f32.vlgmr.msra.gmra.mrb[20].mxu0 %v7714_v33 }
0x114c   :  { %24889 = vmatpush3.bf16.msra.mxu0 %v24873_v19  ;;  %24065 = vmatprep.mubr.msk.f32.mxu0 %vm32554_vm6, %v32971_v10 }
0x114d   :  { %24890 = vmatprep.subr.bf16.mxu0 %v32942_v4 }
0x1153   :  { %24066 = vmatmul.mubr.f32.vlgmr.msra.gmra.mrb[20].mxu0 %v7714_v33  ;;  %v9143_v33 = vld [vmem:[%s33013_s10 + $0x8] sm:$0xff] }
0x1154   :  { %24892 = vmatpush3.bf16.msra.mxu0 %v24873_v19  ;;  %24072 = vmatprep.mubr.msk.f32.mxu0 %vm32554_vm6, %v32971_v10  ;;  %v9177_v61 = vand.u32 4294901760, %v9143_v33 }
0x1155   :  { %24893 = vmatprep.subr.bf16.mxu0 %v32942_v4 }
0x1156   :  { %v29236_v16 = vpack.c.bf16 %v9177_v61, %v9174_v26  ;;  %v29240_v47 = vsub.f32 %v9143_v33, %v9177_v61 }
0x1157   :  { %24073 = vmatmul.mubr.f32.vlgmr.msra.gmra.mrb[22].mxu0 %v8181_v59 }
0x1158   :  { %24895 = vmatpush3.bf16.msra.mxu0 %v24876_v54  ;;  %24079 = vmatprep.mubr.msk.f32.mxu0 %vm32554_vm6, %v32971_v10  ;;  %33014 = vst [vmem:[#allocation60_spill] sm:$0xff] %v29236_v16  ;;  %v29259_v54 = vsub.f32 %v9149_v63, %v9195_v9  ;;  %v26537_v63 = vld [vmem:[%s33011_s30 + $0x30] ss:$8 sps:$4 sm:$0xff]  }
0x1159   :  { %24896 = vmatprep.subr.bf16.mxu0 %v32942_v4  ;;  %24910 = vmatpush1.bf16.msra.mxu1 %v29236_v16 }
0x115a   :  { %24911 = vmatprep.subr.bf16.mxu1 %v32942_v4 }
0x115d   :  { %24913 = vmatpush1.bf16.msra.mxu1 %v29246_v17 }
0x115e   :  { %24914 = vmatprep.subr.bf16.mxu1 %v32942_v4 }
0x115f   :  { %24080 = vmatmul.mubr.f32.vlgmr.msra.gmra.mrb[22].mxu0 %v8177_v55 }
0x1160   :  { %24898 = vmatpush3.bf16.msra.mxu0 %v24879_v37  ;;  %24086 = vmatprep.mubr.msk.f32.mxu0 %vm32554_vm6, %v32971_v10  ;;  %v9192_v37 = vand.u32 4294901760, %v9148_v51 }
0x1161   :  { %24899 = vmatprep.subr.bf16.mxu0 %v32942_v4 }
0x1162   :  { %v29257_v24 = vsub.f32 %v9148_v51, %v9192_v37  ;;  %v29274_v59 = vpack.c.bf16 %v9195_v9, %v9192_v37 }
0x1164   :  { %33017 = vst [vmem:[#allocation56_spill] sm:$0xff] %v29274_v59 }
0x1167   :  { %24087 = vmatmul.mubr.f32.vlgmr.msra.gmra.mrb[22].mxu0 %v8178_v42 }
0x1168   :  { %24901 = vmatpush3.bf16.msra.mxu0 %v24873_v19  ;;  %24093 = vmatprep.mubr.msk.f32.mxu0 %vm32554_vm6, %v32971_v10 }
0x1169   :  { %24902 = vmatprep.subr.bf16.mxu0 %v32942_v4 }
0x116f   :  { %24094 = vmatmul.mubr.f32.vlgmr.msra.gmra.mrb[22].mxu0 %v8179_v18  ;;  %v29268_v18 = vpack.c.bf16 %v9189_v49, %v9186_v50 }
0x1170   :  { %24904 = vmatpush3.bf16.msra.mxu0 %v24885_v2  ;;  %24100 = vmatprep.mubr.msk.f32.mxu0 %vm32554_vm6, %v32971_v10  ;;  %v9201_v2 = vand.u32 4294901760, %v9151_v6 }
0x1171   :  { %24905 = vmatprep.subr.bf16.mxu0 %v32942_v4  ;;  %33016 = vst [vmem:[#allocation62_spill] sm:$0xff] %v29268_v18  ;;  %24916 = vmatpush1.bf16.msra.mxu1 %v29268_v18 }
0x1172   :  { %24917 = vmatprep.subr.bf16.mxu1 %v32942_v4 }
0x1175   :  { %24919 = vmatpush1.bf16.msra.mxu1 %v29274_v59 }
0x1176   :  { %24920 = vmatprep.subr.bf16.mxu1 %v32942_v4 }
0x1177   :  { %24101 = vmatmul.mubr.f32.vlgmr.msra.gmra.mrb[22].mxu0 %v8177_v55 }
0x1178   :  { %24907 = vmatpush3.bf16.msra.mxu0 %v24873_v19  ;;  %24107 = vmatprep.mubr.msk.f32.mxu0 %vm32554_vm6, %v32971_v10  ;;  %v9152_v19 = vld [vmem:[%s33013_s10 + $0x50] sm:$0xff]  ;;  %vm8636_vm6 = vsmask.f32 7448 }
0x1179   :  { %8772 = vmatprep.subr.bf16.mxu0 %v26506_v56  ;;  %v9204_v43 = vand.u32 4294901760, %v9152_v19  ;;  %vm29332_vm9 = vmor %vm8635_vm5, %vm8636_vm6  ;;  %vm9112_vm6 = vcmask 785408   ;;  %vm13876_vm5 = vsmask.f32 5396 }
0x117b   :  { %v29265_v42 = vsub.f32 %v9152_v19, %v9204_v43  ;;  %v29282_v56 = vpack.c.bf16 %v9207_v0, %v9204_v43 }
0x117d   :  { %33019 = vst [vmem:[#allocation58_spill] sm:$0xff] %v29282_v56 }
0x117f   :  { %24108 = vmatmul.mubr.f32.vlgmr.msra.gmra.mrb[22].mxu0 %v8177_v55  ;;  %v29263_v55 = vsub.f32 %v9151_v6, %v9201_v2 }
0x1180   :  { %8804 = vmatprep.mubr.bf16.mxu0 %v33012_v28  ;;  %8773 = vmatpush1.bf16.msra.mxu0 %v26504_v5  ;;  %v29278_v5 = vpack.c.bf16 %v9201_v2, %v9198_v20 }
0x1181   :  { %8774 = vmatprep.subr.bf16.mxu0 %v26509_v30 }
0x1182   :  { %33018 = vst [vmem:[#allocation57_spill] sm:$0xff] %v29278_v5  ;;  %24922 = vmatpush1.bf16.msra.mxu1 %v29278_v5 }
0x1183   :  { %24923 = vmatprep.subr.bf16.mxu1 %v32942_v4 }
0x1184   :  { %8775 = vmatpush1.bf16.msra.mxu0 %v26507_v41  ;;  %v27258_v41 = vmov 1983009808  }
0x1185   :  { %8776 = vmatprep.subr.bf16.mxu0 %v26512_v32  ;;  %v8616_v32 = vunpack.c.l.s4 %v27258_v41 }
0x1186   :  { %24925 = vmatpush1.bf16.msra.mxu1 %v29282_v56 }
0x1187   :  { %24926 = vmatprep.subr.bf16.mxu1 %v32942_v4 }
0x1188   :  { %8777 = vmatpush1.bf16.msra.mxu0 %v26510_v29 }
0x1189   :  { %8778 = vmatprep.subr.bf16.mxu0 %v26515_v45 }
0x118c   :  { %8779 = vmatpush1.bf16.msra.mxu0 %v26513_v35 }
0x118d   :  { %8780 = vmatprep.subr.bf16.mxu0 %v26518_v15 }
0x1190   :  { %8781 = vmatpush1.bf16.msra.mxu0 %v26516_v36  ;;  %v8617_v36 = vunpack.c.0.s8 %v8616_v32 }
0x1191   :  { %8782 = vmatprep.subr.bf16.mxu0 %v26521_v1 }
0x1194   :  { %8783 = vmatpush1.bf16.msra.mxu0 %v26519_v23 }
0x1195   :  { %8784 = vmatprep.subr.bf16.mxu0 %v26524_v31 }
0x1198   :  { %8785 = vmatpush1.bf16.msra.mxu0 %v26522_v21 }
0x1199   :  { %8786 = vmatprep.subr.bf16.mxu0 %v26527_v52 }
0x119c   :  { %8787 = vmatpush1.bf16.msra.mxu0 %v26525_v14  ;;  %v33020_v14 = vld [vmem:[#allocation53_spill] sm:$0xff] }
0x119d   :  { %8902 = vmatprep.subr.bf16.mxu0 %v26530_v40  ;;  %v29288_v40 = vsub.s32 %v8617_v36, %v33020_v14 }
0x119f   :  { %33021 = vst [vmem:[#allocation59_spill] sm:$0xff] %v29288_v40 }
0x1226   :  { %v8102_v22 = vpop.f32.mrb[20].mxu0 }
0x1227   :  { %v24067_v7 = vpop.f32.mrb[21].mxu0 }
0x1252   :  { %v8565_v30 = vpop.f32.mrb[22].mxu0 }
0x1253   :  { %v8569_v29 = vmax.f32 %v8102_v22, %v8565_v30  ;;  %v24109_v45 = vpop.f32.mrb[23].mxu0  ;;  %v33022_v22 = vmov 0 }
0x1254   :  { %v33023_v22 = vsel %vm29291_vm4, 4294967295, %v33022_v22 }
0x1255   :  { %v8571_v35 = vcombine.high %v8569_v29, %v8569_v29  ;;  %v8573_v15 = vpack.c.bf16 %v8569_v29, %v8569_v29  ;;  %33024 = vst [vmem:[#allocation64_spill] sm:$0xff] %v33023_v22 }
0x1257   :  { %v8574_v23 = vpack.c.bf16 %v8571_v35, %v8571_v35  ;;  %v8576_v1 = vshrl.u32 %v8573_v15, 16  ;;  %v8579_v21 = vshll.u32 %v8573_v15, 16 }
0x1259   :  { %v8578_v31 = vrot.slane %v8576_v1, 7  ;;  %v8583_v52 = vshrl.u32 %v8574_v23, 16  ;;  %v8586_v33 = vshll.u32 %v8574_v23, 16  ;;  %v33031_v1 = vmov 0 }
0x125a   :  { %v33032_v1 = vsel %vm29332_vm9, 4294967295, %v33031_v1 }
0x125b   :  { %v8581_v7 = vor.u32 %v8579_v21, %v8578_v31  ;;  %v8585_v48 = vrot.slane %v8583_v52, 7  ;;  %33033 = vst [vmem:[#allocation66_spill] sm:$0xff] %v33032_v1 }
0x125d   :  { %v8588_v8 = vor.u32 %v8586_v33, %v8585_v48  ;;  %v8591_v61 = vsel %vm27568_vm3, 0, %v8581_v7 }
0x125e   :  { %v29300_v57 = vsel %vm29291_vm4, %v8591_v61, 0  ;;  %v26528_v61 = vld [vmem:[%s33011_s30] ss:$8 sps:$4 sm:$0xff]  }
0x125f   :  { %v8592_v13 = vsel %vm27568_vm3, 0, %v8588_v8  ;;  %v8621_v58 = vrot.slane %v29300_v57, %v29288_v40 }
0x1260   :  { %v29308_v53 = vsel %vm29291_vm4, %v8592_v13, 0 }
0x1261   :  { %v8629_v34 = vrot.slane %v29308_v53, %v29288_v40  ;;  %v8622_v50 = vcombine.high %v8621_v58, %v8621_v58  ;;  %v8639_v49 = vshrl.u32 %v8621_v58, 16  ;;  %v8642_v51 = vshll.u32 %v8621_v58, 16 }
0x1262   :  { %v21700_v20 = vrot.slane %v8621_v58, 9  ;;  %v26533_v58 = vld [vmem:[%s33011_s30 + $0x14] ss:$8 sps:$4 sm:$0xff]  }
0x1263   :  { %v8630_v60 = vcombine.high %v8629_v34, %v8629_v34  ;;  %v8641_v6 = vrot.slane %v8639_v49, 6  ;;  %v8644_v19 = vrot.slane %v8642_v51, 7  ;;  %v8653_v37 = vshrl.u32 %v8629_v34, 16  ;;  %v26534_v49 = vld [vmem:[%s33011_s30 + $0x20] ss:$8 sps:$4 sm:$0xff]  }
0x1264   :  { %v8656_v9 = vshll.u32 %v8629_v34, 16  ;;  %v8951_v2 = vrot.slane %v8622_v50, 7  ;;  %v8648_v0 = vshll.u32 %v8622_v50, 16  ;;  %v21701_v41 = vrot.slane %v8629_v34, 9  ;;  %v26531_v34 = vld [vmem:[%s33011_s30 + $0x10] ss:$8 sps:$4 sm:$0xff]  }
0x1265   :  { %v8645_v43 = vor.u32 %v8644_v19, %v8641_v6  ;;  %v8662_v30 = vshll.u32 %v8630_v60, 16  ;;  %v8655_v32 = vrot.slane %v8653_v37, 6  ;;  %v8955_v35 = vrot.slane %v8630_v60, 7  ;;  %v26536_v50 = vld [vmem:[%s33011_s30 + $0x24] ss:$8 sps:$4 sm:$0xff]  }
0x1266   :  { %v8658_v29 = vrot.slane %v8656_v9, 7  ;;  %v29325_v45 = vsel %vm29317_vm8, %v21700_v20, %v8951_v2  ;;  %v8650_v21 = vrot.slane %v8648_v0, 7  ;;  %v26539_v51 = vld [vmem:[%s33011_s30 + $0x34] ss:$8 sps:$4 sm:$0xff]   ;;  %v26542_v60 = vld [vmem:[%s33011_s30 + $0x44] ss:$8 sps:$4 sm:$0xff]   ;;  %v8813_v0 = vcombine.low %v29300_v57, %v29308_v53 }
0x1267   :  { %v8646_v15 = vrot.slane %v8645_v43, 2  ;;  %v29329_v23 = vsel %vm29317_vm8, %v21701_v41, %v8955_v35  ;;  %v8664_v7 = vrot.slane %v8662_v30, 7  ;;  %v26540_v6 = vld [vmem:[%s33011_s30 + $0x40] ss:$8 sps:$4 sm:$0xff]   ;;  %v26545_v19 = vld [vmem:[%s33011_s30 + $0x54] ss:$8 sps:$4 sm:$0xff]  }
0x1268   :  { %v8659_v36 = vor.u32 %v8658_v29, %v8655_v32  ;;  %v8974_v31 = vcombine.low %v29325_v45, %v29329_v23  ;;  %v26543_v37 = vld [vmem:[%s33011_s30 + $0x50] ss:$8 sps:$4 sm:$0xff]   ;;  %v26548_v9 = vld [vmem:[%s33011_s30 + $0x64] ss:$8 sps:$4 sm:$0xff]   ;;  %v26546_v20 = vld [vmem:[%s33011_s30 + $0x60] ss:$8 sps:$4 sm:$0xff]   ;;  %v8820_v32 = vrot.slane %v8813_v0, %v29288_v40 }
0x1269   :  { %v8651_v48 = vsel %vm29332_vm9, %v8646_v15, %v8650_v21  ;;  %v26551_v2 = vld [vmem:[%s33011_s30 + $0x74] ss:$8 sps:$4 sm:$0xff]   ;;  %v26549_v43 = vld [vmem:[%s33011_s30 + $0x70] ss:$8 sps:$4 sm:$0xff]   ;;  %v26554_v30 = vld [vmem:[%s33011_s30 + $0x104] ss:$8 sps:$4 sm:$0xff]  }
0x126a   :  { %v8660_v52 = vrot.slane %v8659_v36, 2  ;;  %v26552_v41 = vld [vmem:[%s33011_s30 + $0x100] ss:$8 sps:$4 sm:$0xff]   ;;  %v26557_v29 = vld [vmem:[%s33011_s30 + $0x114] ss:$8 sps:$4 sm:$0xff]  }
0x126b   :  { %v26555_v35 = vld [vmem:[%s33011_s30 + $0x110] ss:$8 sps:$4 sm:$0xff]   ;;  %v26560_v57 = vld [vmem:[%s33011_s30 + $0x124] ss:$8 sps:$4 sm:$0xff]   ;;  %v26558_v53 = vld [vmem:[%s33011_s30 + $0x120] ss:$8 sps:$4 sm:$0xff]  }
0x126c   :  { %v8665_v33 = vsel %vm29332_vm9, %v8660_v52, %v8664_v7  ;;  %v26563_v15 = vld [vmem:[%s33011_s30 + $0x134] ss:$8 sps:$4 sm:$0xff]   ;;  %v26561_v36 = vld [vmem:[%s33011_s30 + $0x130] ss:$8 sps:$4 sm:$0xff]   ;;  %v26566_v21 = vld [vmem:[%s33011_s30 + $0x144] ss:$8 sps:$4 sm:$0xff]  }
0x126d   :  { %v8683_v8 = vcombine.low %v8651_v48, %v8665_v33  ;;  %v26564_v52 = vld [vmem:[%s33011_s30 + $0x140] ss:$8 sps:$4 sm:$0xff]   ;;  %v26569_v7 = vld [vmem:[%s33011_s30 + $0x154] ss:$8 sps:$4 sm:$0xff]   ;;  %v26567_v48 = vld [vmem:[%s33011_s30 + $0x150] ss:$8 sps:$4 sm:$0xff]  }
0x126e   :  { %v26572_v33 = vld [vmem:[%s33011_s30 + $0x164] ss:$8 sps:$4 sm:$0xff]   ;;  %v9161_v0 = vld [vmem:[%s33013_s10 + $0x98] sm:$0xff] }
0x126f   :  { %v8690_v13 = vrot.slane %v8683_v8, %v29288_v40  ;;  %v26570_v8 = vld [vmem:[%s33011_s30 + $0x160] ss:$8 sps:$4 sm:$0xff]  }
0x1271   :  { %8805 = vmatmul.mubr.bf16.vlgmr.msra.gmra.mrb[24].mxu0 %v8690_v13  ;;  %v26573_v13 = vld [vmem:[%s33011_s30 + $0x170] ss:$8 sps:$4 sm:$0xff]  }
0x1272   :  { %8903 = vmatpush1.bf16.msra.mxu0 %v26528_v61  ;;  %8934 = vmatprep.mubr.bf16.mxu0 %v33012_v28  ;;  %v26575_v61 = vld [vmem:[%s33011_s30 + $0x174] ss:$8 sps:$4 sm:$0xff]  }
0x1273   :  { %8904 = vmatprep.subr.bf16.mxu0 %v26533_v58  ;;  %v8981_v58 = vrot.slane %v8974_v31, %v29288_v40  ;;  %v9158_v31 = vld [vmem:[%s33013_s10 + $0x80] sm:$0xff] }
0x1276   :  { %8905 = vmatpush1.bf16.msra.mxu0 %v26531_v34  ;;  %v9154_v34 = vld [vmem:[%s33013_s10 + $0x60] sm:$0xff] }
0x1277   :  { %8906 = vmatprep.subr.bf16.mxu0 %v26536_v50  ;;  %v9155_v50 = vld [vmem:[%s33013_s10 + $0x68] sm:$0xff] }
0x127a   :  { %8907 = vmatpush1.bf16.msra.mxu0 %v26534_v49  ;;  %v9210_v49 = vand.u32 4294901760, %v9154_v34 }
0x127b   :  { %8908 = vmatprep.subr.bf16.mxu0 %v26539_v51  ;;  %v9213_v51 = vand.u32 4294901760, %v9155_v50 }
0x127e   :  { %8909 = vmatpush1.bf16.msra.mxu0 %v26537_v63  ;;  %v29386_v63 = vpack.c.bf16 %v9213_v51, %v9210_v49 }
0x127f   :  { %8910 = vmatprep.subr.bf16.mxu0 %v26542_v60  ;;  %v9156_v60 = vld [vmem:[%s33013_s10 + $0x70] sm:$0xff] }
0x1280   :  { %33034 = vst [vmem:[#allocation67_spill] sm:$0xff] %v29386_v63  ;;  %24928 = vmatpush1.bf16.msra.mxu1 %v29386_v63 }
0x1281   :  { %24929 = vmatprep.subr.bf16.mxu1 %v32942_v4 }
0x1282   :  { %8911 = vmatpush1.bf16.msra.mxu0 %v26540_v6  ;;  %v9157_v6 = vld [vmem:[%s33013_s10 + $0x78] sm:$0xff] }
0x1283   :  { %8912 = vmatprep.subr.bf16.mxu0 %v26545_v19  ;;  %v9216_v19 = vand.u32 4294901760, %v9156_v60  ;;  %v9219_v45 = vand.u32 4294901760, %v9157_v6 }
0x1285   :  { %v29392_v23 = vpack.c.bf16 %v9219_v45, %v9216_v19 }
0x1286   :  { %8913 = vmatpush1.bf16.msra.mxu0 %v26543_v37  ;;  %v9159_v37 = vld [vmem:[%s33013_s10 + $0x88] sm:$0xff] }
0x1287   :  { %8914 = vmatprep.subr.bf16.mxu0 %v26548_v9  ;;  %33035 = vst [vmem:[#allocation68_spill] sm:$0xff] %v29392_v23  ;;  %24931 = vmatpush1.bf16.msra.mxu1 %v29392_v23  ;;  %v9222_v9 = vand.u32 4294901760, %v9158_v31 }
0x1288   :  { %24932 = vmatprep.subr.bf16.mxu1 %v32942_v4 }
0x128a   :  { %8915 = vmatpush1.bf16.msra.mxu0 %v26546_v20  ;;  %v9225_v20 = vand.u32 4294901760, %v9159_v37 }
0x128b   :  { %8916 = vmatprep.subr.bf16.mxu0 %v26551_v2 }
0x128c   :  { %v29398_v2 = vpack.c.bf16 %v9225_v20, %v9222_v9 }
0x128e   :  { %8917 = vmatpush1.bf16.msra.mxu0 %v26549_v43  ;;  %33036 = vst [vmem:[#allocation69_spill] sm:$0xff] %v29398_v2  ;;  %v9160_v43 = vld [vmem:[%s33013_s10 + $0x90] sm:$0xff]  ;;  %24934 = vmatpush1.bf16.msra.mxu1 %v29398_v2 }
0x128f   :  { %9063 = vmatprep.subr.bf16.mxu0 %v26554_v30  ;;  %v9228_v30 = vand.u32 4294901760, %v9160_v43  ;;  %24935 = vmatprep.subr.bf16.mxu1 %v32942_v4 }
0x1291   :  { %8935 = vmatmul.mubr.bf16.vlgmr.msra.gmra.mrb[24].mxu0 %v8820_v32 }
0x1292   :  { %9064 = vmatpush1.bf16.msra.mxu0 %v26552_v41  ;;  %9095 = vmatprep.mubr.bf16.mxu0 %v33012_v28  ;;  %v9231_v41 = vand.u32 4294901760, %v9161_v0 }
0x1293   :  { %9065 = vmatprep.subr.bf16.mxu0 %v26557_v29  ;;  %v9162_v29 = vld [vmem:[%s33013_s10 + $0xa0] sm:$0xff] }
0x1294   :  { %v29404_v32 = vpack.c.bf16 %v9231_v41, %v9228_v30  ;;  %v29433_v14 = vsub.f32 %v9161_v0, %v9231_v41 }
0x1296   :  { %9066 = vmatpush1.bf16.msra.mxu0 %v26555_v35  ;;  %33037 = vst [vmem:[#allocation70_spill] sm:$0xff] %v29404_v32  ;;  %v9163_v35 = vld [vmem:[%s33013_s10 + $0xa8] sm:$0xff]  ;;  %24937 = vmatpush1.bf16.msra.mxu1 %v29404_v32 }
0x1297   :  { %9067 = vmatprep.subr.bf16.mxu0 %v26560_v57  ;;  %v9234_v57 = vand.u32 4294901760, %v9162_v29  ;;  %24938 = vmatprep.subr.bf16.mxu1 %v32942_v4 }
0x1299   :  { %v29435_v28 = vsub.f32 %v9162_v29, %v9234_v57 }
0x129a   :  { %9068 = vmatpush1.bf16.msra.mxu0 %v26558_v53  ;;  %v9237_v53 = vand.u32 4294901760, %v9163_v35 }
0x129b   :  { %9069 = vmatprep.subr.bf16.mxu0 %v26563_v15  ;;  %33039 = vst [vmem:[#allocation72_spill] sm:$0xff] %v29435_v28 }
0x129c   :  { %v29410_v15 = vpack.c.bf16 %v9237_v53, %v9234_v57  ;;  %v29437_v1 = vsub.f32 %v9163_v35, %v9237_v53  ;;  %v32564_v35 = vand.u32 4294901760, %v29238_v11  ;;  %v32561_v57 = vand.u32 4294901760, %v29240_v47 }
0x129e   :  { %9070 = vmatpush1.bf16.msra.mxu0 %v26561_v36  ;;  %33038 = vst [vmem:[#allocation71_spill] sm:$0xff] %v29410_v15  ;;  %v29412_v36 = vsub.f32 %v9154_v34, %v9210_v49  ;;  %24940 = vmatpush1.bf16.msra.mxu1 %v29410_v15  ;;  %v9166_v34 = vld [vmem:[%s33013_s10 + $0xc0] sm:$0xff]  ;;  %v9168_v49 = vld [vmem:[%s33013_s10 + $0xd0] sm:$0xff] }
0x129f   :  { %9071 = vmatprep.subr.bf16.mxu0 %v26566_v21  ;;  %v29414_v21 = vsub.f32 %v9155_v50, %v9213_v51  ;;  %24941 = vmatprep.subr.bf16.mxu1 %v32942_v4  ;;  %v9167_v50 = vld [vmem:[%s33013_s10 + $0xc8] sm:$0xff]  ;;  %v29431_v51 = vsub.f32 %v9160_v43, %v9228_v30 }
0x12a2   :  { %9072 = vmatpush1.bf16.msra.mxu0 %v26564_v52  ;;  %v9164_v52 = vld [vmem:[%s33013_s10 + $0xb0] sm:$0xff] }
0x12a3   :  { %9073 = vmatprep.subr.bf16.mxu0 %v26569_v7  ;;  %v9165_v7 = vld [vmem:[%s33013_s10 + $0xb8] sm:$0xff] }
0x12a6   :  { %9074 = vmatpush1.bf16.msra.mxu0 %v26567_v48  ;;  %v9240_v48 = vand.u32 4294901760, %v9164_v52 }
0x12a7   :  { %9075 = vmatprep.subr.bf16.mxu0 %v26572_v33  ;;  %v9243_v33 = vand.u32 4294901760, %v9165_v7 }
0x12aa   :  { %9076 = vmatpush1.bf16.msra.mxu0 %v26570_v8  ;;  %v29419_v8 = vsub.f32 %v9156_v60, %v9216_v19  ;;  %v9169_v60 = vld [vmem:[%s33013_s10 + $0xd8] sm:$0xff]  ;;  %v29442_v19 = vsub.f32 %v9164_v52, %v9240_v48  ;;  %v9285_v52 = vsub.f32 %v29238_v11, %v32564_v35 }
0x12ab   :  { %9077 = vmatprep.subr.bf16.mxu0 %v26575_v61  ;;  %v29421_v61 = vsub.f32 %v9157_v6, %v9219_v45  ;;  %v29440_v6 = vpack.c.bf16 %v9243_v33, %v9240_v48  ;;  %v29444_v45 = vsub.f32 %v9165_v7, %v9243_v33  ;;  %v9255_v43 = vand.u32 4294901760, %v9169_v60 }
0x12ac   :  { %33041 = vst [vmem:[#allocation74_spill] sm:$0xff] %v29442_v19  ;;  %v9292_v7 = vsub.f32 %v29240_v47, %v32561_v57  ;;  %v9286_v48 = vand.u32 4294901760, %v9285_v52  ;;  %v32565_v52 = vand.u32 4294901760, %v29254_v12 }
0x12ad   :  { %33040 = vst [vmem:[#allocation73_spill] sm:$0xff] %v29440_v6  ;;  %33042 = vst [vmem:[#allocation75_spill] sm:$0xff] %v29444_v45  ;;  %24943 = vmatpush1.bf16.msra.mxu1 %v29440_v6  ;;  %v29456_v29 = vsub.f32 %v9169_v60, %v9255_v43 }
0x12ae   :  { %9078 = vmatpush1.bf16.msra.mxu0 %v26573_v13  ;;  %v29423_v13 = vsub.f32 %v9158_v31, %v9222_v9  ;;  %v9246_v31 = vand.u32 4294901760, %v9166_v34  ;;  %v9252_v9 = vand.u32 4294901760, %v9168_v49  ;;  %24944 = vmatprep.subr.bf16.mxu1 %v32942_v4  ;;  %v9293_v33 = vand.u32 4294901760, %v9292_v7 }
0x12b0   :  { %v29454_v41 = vsub.f32 %v9168_v49, %v9252_v9  ;;  %v29461_v53 = vpack.c.bf16 %v9255_v43, %v9252_v9  ;;  %v29474_v49 = vpack.c.bf16 %v9293_v33, %v9286_v48  ;;  %v32563_v43 = vand.u32 4294901760, %v29250_v62 }
0x12b1   :  { %9096 = vmatmul.mubr.bf16.vlgmr.msra.gmra.mrb[24].mxu0 %v8981_v58  ;;  %v29425_v58 = vsub.f32 %v9159_v37, %v9225_v20  ;;  %v9249_v37 = vand.u32 4294901760, %v9167_v50  ;;  %v29447_v20 = vsub.f32 %v9166_v34, %v9246_v31  ;;  %v32560_v34 = vand.u32 4294901760, %v29242_v25 }
0x12b2   :  { %10058 = vmatprep.mubr.f32.mxu0 %v32971_v10  ;;  %33045 = vst [vmem:[#allocation78_spill] sm:$0xff] %v29461_v53  ;;  %v9313_v48 = vsub.f32 %v29250_v62, %v32563_v43  ;;  %v9320_v33 = vsub.f32 %v29254_v12, %v32565_v52  ;;  %v32570_v52 = vand.u32 4294901760, %v29261_v39 }
0x12b3   :  { %33043 = vst [vmem:[#allocation76_spill] sm:$0xff] %v29447_v20  ;;  %v29450_v0 = vpack.c.bf16 %v9249_v37, %v9246_v31  ;;  %v29452_v30 = vsub.f32 %v9167_v50, %v9249_v37  ;;  %v32562_v50 = vand.u32 4294901760, %v29248_v44  ;;  %v9299_v60 = vsub.f32 %v29242_v25, %v32560_v34 }
0x12b4   :  { %v9314_v34 = vand.u32 4294901760, %v9313_v48  ;;  %v9321_v57 = vand.u32 4294901760, %v9320_v33  ;;  %v32573_v48 = vand.u32 4294901760, %v29263_v55 }
0x12b5   :  { %33044 = vst [vmem:[#allocation77_spill] sm:$0xff] %v29450_v0  ;;  %24946 = vmatpush1.bf16.msra.mxu1 %v29450_v0  ;;  %v9306_v31 = vsub.f32 %v29248_v44, %v32562_v50  ;;  %v9300_v37 = vand.u32 4294901760, %v9299_v60  ;;  %v32566_v50 = vand.u32 4294901760, %v29257_v24  ;;  %v32569_v60 = vand.u32 4294901760, %v29259_v54 }
0x12b6   :  { %24947 = vmatprep.subr.bf16.mxu1 %v32942_v4 }
0x12b7   :  { %v9307_v9 = vand.u32 4294901760, %v9306_v31  ;;  %v29494_v31 = vpack.c.bf16 %v9321_v57, %v9314_v34  ;;  %v9341_v57 = vsub.f32 %v29261_v39, %v32570_v52  ;;  %v9348_v34 = vsub.f32 %v29263_v55, %v32573_v48 }
0x12b8   :  { %v32578_v48 = vand.u32 4294901760, %v29412_v36 }
0x12b9   :  { %24949 = vmatpush1.bf16.msra.mxu1 %v29461_v53  ;;  %v29484_v7 = vpack.c.bf16 %v9307_v9, %v9300_v37  ;;  %v9327_v37 = vsub.f32 %v29257_v24, %v32566_v50  ;;  %v9334_v9 = vsub.f32 %v29259_v54, %v32569_v60  ;;  %v9342_v50 = vand.u32 4294901760, %v9341_v57 }
0x12ba   :  { %24950 = vmatprep.subr.bf16.mxu1 %v32942_v4  ;;  %v9349_v3 = vand.u32 4294901760, %v9348_v34  ;;  %v32574_v60 = vand.u32 4294901760, %v29265_v42  ;;  %v32580_v57 = vand.u32 4294901760, %v29414_v21 }
0x12bb   :  { %v9328_v43 = vand.u32 4294901760, %v9327_v37  ;;  %v9335_v35 = vand.u32 4294901760, %v9334_v9  ;;  %v32577_v37 = vand.u32 4294901760, %v29270_v46 }
0x12bc   :  { %v29514_v9 = vpack.c.bf16 %v9349_v3, %v9342_v50  ;;  %v9369_v3 = vsub.f32 %v29412_v36, %v32578_v48  ;;  %v9376_v50 = vsub.f32 %v29414_v21, %v32580_v57  ;;  %v32584_v57 = vand.u32 4294901760, %v29423_v13 }
0x12bd   :  { %v29504_v33 = vpack.c.bf16 %v9335_v35, %v9328_v43  ;;  %v9355_v35 = vsub.f32 %v29265_v42, %v32574_v60  ;;  %v9362_v43 = vsub.f32 %v29270_v46, %v32577_v37  ;;  %v32581_v37 = vand.u32 4294901760, %v29419_v8 }
0x12be   :  { %v9370_v60 = vand.u32 4294901760, %v9369_v3  ;;  %v9377_v22 = vand.u32 4294901760, %v9376_v50  ;;  %v32586_v3 = vand.u32 4294901760, %v29425_v58 }
0x12bf   :  { %v9356_v52 = vand.u32 4294901760, %v9355_v35  ;;  %v9363_v40 = vand.u32 4294901760, %v9362_v43  ;;  %v32583_v35 = vand.u32 4294901760, %v29421_v61 }
0x12c0   :  { %v29534_v43 = vpack.c.bf16 %v9377_v22, %v9370_v60  ;;  %v9397_v22 = vsub.f32 %v29423_v13, %v32584_v57  ;;  %v9404_v60 = vsub.f32 %v29425_v58, %v32586_v3  ;;  %v32590_v3 = vand.u32 4294901760, %v29435_v28 }
0x12c1   :  { %v29524_v34 = vpack.c.bf16 %v9363_v40, %v9356_v52  ;;  %v9383_v40 = vsub.f32 %v29419_v8, %v32581_v37  ;;  %v9390_v52 = vsub.f32 %v29421_v61, %v32583_v35  ;;  %v32587_v35 = vand.u32 4294901760, %v29431_v51 }
0x12c2   :  { %v9398_v37 = vand.u32 4294901760, %v9397_v22  ;;  %v9405_v27 = vand.u32 4294901760, %v9404_v60  ;;  %v32593_v22 = vand.u32 4294901760, %v29437_v1 }
0x12c3   :  { %v9384_v48 = vand.u32 4294901760, %v9383_v40  ;;  %v9391_v26 = vand.u32 4294901760, %v9390_v52  ;;  %v32589_v40 = vand.u32 4294901760, %v29433_v14 }
0x12c4   :  { %v29554_v52 = vpack.c.bf16 %v9405_v27, %v9398_v37  ;;  %v9425_v27 = vsub.f32 %v29435_v28, %v32590_v3  ;;  %v9432_v37 = vsub.f32 %v29437_v1, %v32593_v22  ;;  %v32598_v22 = vand.u32 4294901760, %v29447_v20 }
0x12c5   :  { %v29544_v50 = vpack.c.bf16 %v9391_v26, %v9384_v48  ;;  %v9411_v26 = vsub.f32 %v29431_v51, %v32587_v35  ;;  %v9418_v48 = vsub.f32 %v29433_v14, %v32589_v40  ;;  %v32594_v40 = vand.u32 4294901760, %v29442_v19 }
0x12c6   :  { %v9426_v35 = vand.u32 4294901760, %v9425_v27  ;;  %v9433_v10 = vand.u32 4294901760, %v9432_v37  ;;  %v32605_v27 = vand.u32 4294901760, %v29452_v30 }
0x12c7   :  { %v9412_v57 = vand.u32 4294901760, %v9411_v26  ;;  %v9419_v38 = vand.u32 4294901760, %v9418_v48  ;;  %v32597_v26 = vand.u32 4294901760, %v29444_v45 }
0x12c8   :  { %v29574_v48 = vpack.c.bf16 %v9433_v10, %v9426_v35  ;;  %v9453_v10 = vsub.f32 %v29447_v20, %v32598_v22  ;;  %v9460_v35 = vsub.f32 %v29452_v30, %v32605_v27 }
0x12c9   :  { %v29564_v60 = vpack.c.bf16 %v9419_v38, %v9412_v57  ;;  %v9439_v38 = vsub.f32 %v29442_v19, %v32594_v40  ;;  %v9446_v57 = vsub.f32 %v29444_v45, %v32597_v26  ;;  %v32603_v26 = vand.u32 4294901760, %v29454_v41 }
0x12ca   :  { %v9454_v40 = vand.u32 4294901760, %v9453_v10  ;;  %v9461_v0 = vand.u32 4294901760, %v9460_v35 }
0x12cb   :  { %v9440_v3 = vand.u32 4294901760, %v9439_v38  ;;  %v9447_v53 = vand.u32 4294901760, %v9446_v57  ;;  %v32604_v38 = vand.u32 4294901760, %v29456_v29 }
0x12cc   :  { %v29594_v57 = vpack.c.bf16 %v9461_v0, %v9454_v40 }
0x12cd   :  { %v29584_v37 = vpack.c.bf16 %v9447_v53, %v9440_v3  ;;  %v9467_v53 = vsub.f32 %v29454_v41, %v32603_v26  ;;  %v9474_v3 = vsub.f32 %v29456_v29, %v32604_v38 }
0x12cf   :  { %v9468_v22 = vand.u32 4294901760, %v9467_v53  ;;  %v9475_v6 = vand.u32 4294901760, %v9474_v3 }
0x12d1   :  { %v29602_v15 = vpack.c.bf16 %v9475_v6, %v9468_v22 }
0x1384   :  { %v29626_v26 = vpop.f32.mrb[24].mxu0 }
0x1385   :  { %33046 = vst [vmem:[#allocation79_spill] sm:$0xff] %v29626_v26  ;;  %v9106_v53 = vrot.slane %v29626_v26, 4  ;;  %v9123_v6 = vmul.f32 %v29626_v26, %v29626_v26  ;;  %v29631_v40 = vpop.f32.mrb[25].mxu0 }
0x1386   :  { %33047 = vst [vmem:[#allocation80_spill] sm:$0xff] %v29631_v40  ;;  %v9113_v22 = vsel %vm9112_vm6, %v29631_v40, 0.0  ;;  %v9124_v3 = vmul.f32 %v29631_v40, %v29631_v40  ;;  %v9101_v38 = vpop.f32.mrb[26].mxu0 }
0x1387   :  { %v9107_v0 = vadd.f32 %v9106_v53, %v29626_v26  ;;  %v9125_v35 = vrot.slane %v9123_v6, 4  ;;  %v9114_v10 = vrot.slane %v9113_v22, 4  ;;  %v9102_v32 = vpop.f32.mrb[27].mxu0 }
0x1388   :  { %v9131_v2 = vsel %vm9112_vm6, %v9124_v3, 0.0  ;;  %v25032_v32 = vpack.c.bf16 %v29456_v29, %v29454_v41 }
0x1389   :  { %v9108_v23 = vrot.slane %v9107_v0, 2  ;;  %v9126_v63 = vadd.f32 %v9125_v35, %v9123_v6  ;;  %v9115_v56 = vadd.f32 %v9114_v10, %v9113_v22  ;;  %v9132_v5 = vrot.slane %v9131_v2, 4 }
0x138b   :  { %v9109_v18 = vadd.f32 %v9108_v23, %v9107_v0  ;;  %v9127_v40 = vrot.slane %v9126_v63, 2  ;;  %v9116_v38 = vrot.slane %v9115_v56, 2  ;;  %v9133_v17 = vadd.f32 %v9132_v5, %v9131_v2 }
0x138d   :  { %v9110_v16 = vrot.slane %v9109_v18, 1  ;;  %v9128_v27 = vadd.f32 %v9127_v40, %v9126_v63  ;;  %v9117_v19 = vadd.f32 %v9116_v38, %v9115_v56  ;;  %v9134_v53 = vrot.slane %v9133_v17, 2  ;;  %v33063_v40 = vld [vmem:[#allocation76_spill] sm:$0xff] }
0x138e   :  { %v33064_v38 = vpack.c.bf16 %v29452_v30, %v33063_v40 }
0x138f   :  { %v9111_v26 = vadd.f32 %v9110_v16, %v9109_v18  ;;  %v9129_v3 = vrot.slane %v9128_v27, 1  ;;  %v9118_v45 = vrot.slane %v9117_v19, 1  ;;  %v9135_v35 = vadd.f32 %v9134_v53, %v9133_v17  ;;  %v33065_v53 = vld [vmem:[#allocation60_spill] sm:$0xff] }
0x1391   :  { %v9130_v10 = vadd.f32 %v9129_v3, %v9128_v27  ;;  %v9119_v6 = vadd.f32 %v9118_v45, %v9117_v19  ;;  %v9136_v22 = vrot.slane %v9135_v35, 1  ;;  %v9121_v28 = vmul.f32 0.125, %v9111_v26  ;;  %v33060_v27 = vld [vmem:[#allocation75_spill] sm:$0xff]  ;;  %v33066_v3 = vld [vmem:[#allocation61_spill] sm:$0xff] }
0x1393   :  { %v9138_v59 = vmul.f32 0.125, %v9130_v10  ;;  %v9137_v23 = vadd.f32 %v9136_v22, %v9135_v35  ;;  %v9122_v0 = vmul.f32 0.125, %v9119_v6  ;;  %v33067_v35 = vld [vmem:[#allocation62_spill] sm:$0xff]  ;;  %v33069_v10 = vld [vmem:[#allocation57_spill] sm:$0xff]  ;;  %v33071_v22 = vld [vmem:[#allocation67_spill] sm:$0xff] }
0x1394   :  { %v33070_v6 = vld [vmem:[#allocation58_spill] sm:$0xff] }
0x1395   :  { %v9139_v20 = vmul.f32 0.125, %v9137_v23  ;;  %v9140_v5 = vsel %vm306_vm0, %v9121_v28, %v9138_v59  ;;  %v33072_v23 = vld [vmem:[#allocation68_spill] sm:$0xff] }
0x1396   :  { %v29646_v63 = vand.u32 4294901760, %v9140_v5 }
0x1397   :  { %v9141_v56 = vsel %vm306_vm0, %v9122_v0, %v9139_v20  ;;  %v33073_v0 = vld [vmem:[#allocation69_spill] sm:$0xff] }
0x1398   :  { %v9171_v2 = vsel %vm9112_vm6, %v9141_v56, 0  ;;  %v29651_v16 = vsub.f32 %v9140_v5, %v29646_v63  ;;  %v33074_v5 = vld [vmem:[#allocation70_spill] sm:$0xff]  ;;  %v33075_v56 = vld [vmem:[#allocation71_spill] sm:$0xff] }
0x1399   :  { %v29653_v17 = vand.u32 4294901760, %v9171_v2 }
0x139a   :  { %v9273_v18 = vand.u32 4294901760, %v29651_v16 }
0x139b   :  { %v29657_v19 = vsub.f32 %v9171_v2, %v29653_v17  ;;  %v33076_v2 = vld [vmem:[#allocation73_spill] sm:$0xff] }
0x139c   :  { %v9274_v28 = vsub.f32 %v29651_v16, %v9273_v18 }
0x139d   :  { %v9267_v45 = vand.u32 4294901760, %v29657_v19 }
0x139e   :  { %v9275_v26 = vand.u32 4294901760, %v9274_v28  ;;  %v33079_v28 = vand.u32 4294901760, %v29238_v11 }
0x139f   :  { %v9268_v59 = vsub.f32 %v29657_v19, %v9267_v45 }
0x13a1   :  { %v9269_v20 = vand.u32 4294901760, %v9268_v59  ;;  %v33080_v59 = vand.u32 4294901760, %v29240_v47 }
0x13a3   :  { %9270 = vmatprep.mubr.f32.mxu1 %v9269_v20  ;;  %v25077_v20 = vpack.c.bf16 %v33080_v59, %v33079_v28 }
0x13a4   :  { %9276 = vmatmul.mubr.f32.vlgmr.msra.gmra.mrb[16].mxu1 %v9275_v26  ;;  %v33081_v26 = vand.u32 4294901760, %v29242_v25 }
0x13a5   :  { %24952 = vmatpush1.bf16.msra.mxu1 %v29474_v49  ;;  %9486 = vmatprep.mubr.f32.mxu1 %v29653_v17  ;;  %v33048_v49 = vpack.c.bf16 %v29240_v47, %v29238_v11  ;;  %v33083_v11 = vand.u32 4294901760, %v29250_v62  ;;  %v33084_v47 = vand.u32 4294901760, %v29254_v12 }
0x13a6   :  { %24953 = vmatprep.subr.bf16.mxu1 %v32942_v4 }
0x13a9   :  { %24955 = vmatpush1.bf16.msra.mxu1 %v29484_v7  ;;  %v33049_v7 = vpack.c.bf16 %v29248_v44, %v29242_v25  ;;  %v33087_v25 = vand.u32 4294901760, %v29261_v39 }
0x13aa   :  { %24956 = vmatprep.subr.bf16.mxu1 %v32942_v4 }
0x13ad   :  { %24958 = vmatpush1.bf16.msra.mxu1 %v29494_v31  ;;  %v33051_v31 = vpack.c.bf16 %v29259_v54, %v29257_v24 }
0x13ae   :  { %24959 = vmatprep.subr.bf16.mxu1 %v32942_v4 }
0x13b1   :  { %24961 = vmatpush1.bf16.msra.mxu1 %v29504_v33  ;;  %v33052_v33 = vpack.c.bf16 %v29263_v55, %v29261_v39  ;;  %v33093_v39 = vand.u32 4294901760, %v29419_v8 }
0x13b2   :  { %24962 = vmatprep.subr.bf16.mxu1 %v32942_v4 }
0x13b5   :  { %24964 = vmatpush1.bf16.msra.mxu1 %v29514_v9  ;;  %v33053_v9 = vpack.c.bf16 %v29270_v46, %v29265_v42 }
0x13b6   :  { %24965 = vmatprep.subr.bf16.mxu1 %v32942_v4 }
0x13b9   :  { %24967 = vmatpush1.bf16.msra.mxu1 %v29524_v34  ;;  %v33054_v34 = vpack.c.bf16 %v29414_v21, %v29412_v36 }
0x13ba   :  { %24968 = vmatprep.subr.bf16.mxu1 %v32942_v4 }
0x13bd   :  { %24970 = vmatpush1.bf16.msra.mxu1 %v29534_v43  ;;  %v33055_v43 = vpack.c.bf16 %v29421_v61, %v29419_v8 }
0x13be   :  { %24971 = vmatprep.subr.bf16.mxu1 %v32942_v4 }
0x13c1   :  { %24973 = vmatpush1.bf16.msra.mxu1 %v29544_v50  ;;  %v33056_v50 = vpack.c.bf16 %v29425_v58, %v29423_v13 }
0x13c2   :  { %24974 = vmatprep.subr.bf16.mxu1 %v32942_v4 }
0x13c5   :  { %24976 = vmatpush1.bf16.msra.mxu1 %v29554_v52  ;;  %v33057_v52 = vpack.c.bf16 %v29433_v14, %v29431_v51 }
0x13c6   :  { %24977 = vmatprep.subr.bf16.mxu1 %v32942_v4 }
0x13c9   :  { %24979 = vmatpush1.bf16.msra.mxu1 %v29564_v60  ;;  %v33058_v60 = vld [vmem:[#allocation72_spill] sm:$0xff] }
0x13ca   :  { %24980 = vmatprep.subr.bf16.mxu1 %v32942_v4  ;;  %v33099_v8 = vand.u32 4294901760, %v33058_v60 }
0x13cd   :  { %24982 = vmatpush1.bf16.msra.mxu1 %v29574_v48  ;;  %v33059_v48 = vpack.c.bf16 %v29437_v1, %v33058_v60  ;;  %v33106_v60 = vand.u32 4294901760, %v29456_v29  ;;  %v9986_v29 = vld [vmem:[%s33107_s11 + $0x18] sm:$0xff] }
0x13ce   :  { %24983 = vmatprep.subr.bf16.mxu1 %v32942_v4 }
0x13d1   :  { %24985 = vmatpush1.bf16.msra.mxu1 %v29584_v37  ;;  %v33061_v37 = vld [vmem:[#allocation74_spill] sm:$0xff] }
0x13d2   :  { %24986 = vmatprep.subr.bf16.mxu1 %v32942_v4 }
0x13d5   :  { %24988 = vmatpush1.bf16.msra.mxu1 %v29594_v57  ;;  %v33062_v57 = vpack.c.bf16 %v33060_v27, %v33061_v37 }
0x13d6   :  { %24989 = vmatprep.subr.bf16.mxu1 %v32942_v4 }
0x13d9   :  { %24991 = vmatpush1.bf16.msra.mxu1 %v29602_v15  ;;  %v33050_v15 = vpack.c.bf16 %v29254_v12, %v29250_v62  ;;  %v33089_v62 = vand.u32 4294901760, %v29265_v42  ;;  %v33090_v12 = vand.u32 4294901760, %v29270_v46  ;;  %v33095_v42 = vand.u32 4294901760, %v29423_v13 }
0x13da   :  { %24992 = vmatprep.subr.bf16.mxu1 %v32942_v4  ;;  %v33096_v46 = vand.u32 4294901760, %v29425_v58  ;;  %v33101_v13 = vand.u32 4294901760, %v33061_v37  ;;  %v33102_v58 = vand.u32 4294901760, %v33060_v27  ;;  %v9994_v27 = vand.u32 4294901760, %v9986_v29  ;;  %v9983_v37 = vld [vmem:[%s33107_s11] sm:$0xff] }
0x13dc   :  { %9488 = vmatmul.mubr.f32.vlgmr.msra.gmra.mrb[16].mxu1 %v29646_v63 }
0x13dd   :  { %24994 = vmatpush1.bf16.msra.mxu1 %v33048_v49  ;;  %9615 = vmatprep.mubr.f32.mxu1 %v29657_v19  ;;  %v33077_v19 = vld [vmem:[#allocation77_spill] sm:$0xff]  ;;  %v33082_v49 = vand.u32 4294901760, %v29248_v44  ;;  %v33088_v44 = vand.u32 4294901760, %v29263_v55  ;;  %v33094_v55 = vand.u32 4294901760, %v29421_v61  ;;  %v33100_v61 = vand.u32 4294901760, %v29437_v1 }
0x13de   :  { %24995 = vmatprep.subr.bf16.mxu1 %v32942_v4  ;;  %v33105_v1 = vand.u32 4294901760, %v29454_v41  ;;  %v9984_v41 = vld [vmem:[%s33107_s11 + $0x8] sm:$0xff] }
0x13e0   :  { %v25116_v28 = vpack.c.bf16 %v33106_v60, %v33105_v1  ;;  %v26603_v1 = vld [vmem:[%s33109_s19 + $0x170] ss:$8 sps:$4 sm:$0xff]   ;;  %v26608_v60 = vld [vmem:[%s33109_s19 + $0x184] ss:$8 sps:$4 sm:$0xff]  }
0x13e1   :  { %24997 = vmatpush1.bf16.msra.mxu1 %v33049_v7  ;;  %v25080_v7 = vpack.c.bf16 %v33082_v49, %v33081_v26 }
0x13e2   :  { %24998 = vmatprep.subr.bf16.mxu1 %v32942_v4 }
0x13e5   :  { %25000 = vmatpush1.bf16.msra.mxu1 %v33050_v15  ;;  %v25083_v15 = vpack.c.bf16 %v33084_v47, %v33083_v11 }
0x13e6   :  { %25001 = vmatprep.subr.bf16.mxu1 %v32942_v4 }
0x13e9   :  { %25003 = vmatpush1.bf16.msra.mxu1 %v33051_v31 }
0x13ea   :  { %25004 = vmatprep.subr.bf16.mxu1 %v32942_v4 }
0x13ed   :  { %25006 = vmatpush1.bf16.msra.mxu1 %v33052_v33  ;;  %v25089_v33 = vpack.c.bf16 %v33088_v44, %v33087_v25 }
0x13ee   :  { %25007 = vmatprep.subr.bf16.mxu1 %v32942_v4 }
0x13f1   :  { %25009 = vmatpush1.bf16.msra.mxu1 %v33053_v9  ;;  %v25092_v9 = vpack.c.bf16 %v33090_v12, %v33089_v62 }
0x13f2   :  { %25010 = vmatprep.subr.bf16.mxu1 %v32942_v4 }
0x13f5   :  { %25012 = vmatpush1.bf16.msra.mxu1 %v33054_v34 }
0x13f6   :  { %25013 = vmatprep.subr.bf16.mxu1 %v32942_v4 }
0x13f9   :  { %25015 = vmatpush1.bf16.msra.mxu1 %v33055_v43  ;;  %v25098_v43 = vpack.c.bf16 %v33094_v55, %v33093_v39  ;;  %v26576_v39 = vld [vmem:[%s33109_s19 + $0xe0] ss:$8 sps:$4 sm:$0xff]   ;;  %v26581_v55 = vld [vmem:[%s33109_s19 + $0xf4] ss:$8 sps:$4 sm:$0xff]  }
0x13fa   :  { %25016 = vmatprep.subr.bf16.mxu1 %v32942_v4 }
0x13fd   :  { %25018 = vmatpush1.bf16.msra.mxu1 %v33056_v50  ;;  %v25101_v50 = vpack.c.bf16 %v33096_v46, %v33095_v42  ;;  %v26584_v42 = vld [vmem:[%s33109_s19 + $0x104] ss:$8 sps:$4 sm:$0xff]   ;;  %v26582_v46 = vld [vmem:[%s33109_s19 + $0x100] ss:$8 sps:$4 sm:$0xff]  }
0x13fe   :  { %25019 = vmatprep.subr.bf16.mxu1 %v32942_v4 }
0x1401   :  { %25021 = vmatpush1.bf16.msra.mxu1 %v33057_v52 }
0x1402   :  { %25022 = vmatprep.subr.bf16.mxu1 %v32942_v4 }
0x1405   :  { %25024 = vmatpush1.bf16.msra.mxu1 %v33059_v48  ;;  %v25107_v48 = vpack.c.bf16 %v33100_v61, %v33099_v8  ;;  %v26593_v8 = vld [vmem:[%s33109_s19 + $0x134] ss:$8 sps:$4 sm:$0xff]   ;;  %v26591_v61 = vld [vmem:[%s33109_s19 + $0x130] ss:$8 sps:$4 sm:$0xff]  }
0x1406   :  { %25025 = vmatprep.subr.bf16.mxu1 %v32942_v4 }
0x1409   :  { %25027 = vmatpush1.bf16.msra.mxu1 %v33062_v57  ;;  %v25110_v57 = vpack.c.bf16 %v33102_v58, %v33101_v13  ;;  %v26594_v13 = vld [vmem:[%s33109_s19 + $0x140] ss:$8 sps:$4 sm:$0xff]   ;;  %v26599_v58 = vld [vmem:[%s33109_s19 + $0x154] ss:$8 sps:$4 sm:$0xff]  }
0x140a   :  { %25028 = vmatprep.subr.bf16.mxu1 %v32942_v4 }
0x140d   :  { %25030 = vmatpush1.bf16.msra.mxu1 %v33064_v38 }
0x140e   :  { %25031 = vmatprep.subr.bf16.mxu1 %v32942_v4 }
0x1411   :  { %25033 = vmatpush1.bf16.msra.mxu1 %v25032_v32  ;;  %v33068_v32 = vld [vmem:[#allocation56_spill] sm:$0xff] }
0x1412   :  { %25034 = vmatprep.subr.bf16.mxu1 %v32942_v4 }
0x1414   :  { %9618 = vmatmul.mubr.f32.vlgmr.msra.gmra.mrb[16].mxu1 %v29651_v16  ;;  %v33085_v16 = vand.u32 4294901760, %v29257_v24  ;;  %v33091_v24 = vand.u32 4294901760, %v29412_v36  ;;  %v33097_v36 = vand.u32 4294901760, %v29431_v51  ;;  %v33104_v51 = vand.u32 4294901760, %v29452_v30 }
0x1415   :  { %25036 = vmatpush1.bf16.msra.mxu1 %v33065_v53  ;;  %9718 = vmatprep.mubr.f32.mxu1 %v9267_v45  ;;  %v33078_v45 = vld [vmem:[#allocation78_spill] sm:$0xff]  ;;  %v33108_v30 = vmov 0.0  }
0x1416   :  { %25037 = vmatprep.subr.bf16.mxu1 %v32942_v4 }
0x1419   :  { %25039 = vmatpush1.bf16.msra.mxu1 %v33066_v3 }
0x141a   :  { %25040 = vmatprep.subr.bf16.mxu1 %v32942_v4 }
0x141d   :  { %25042 = vmatpush1.bf16.msra.mxu1 %v33067_v35 }
0x141e   :  { %25043 = vmatprep.subr.bf16.mxu1 %v32942_v4 }
0x1421   :  { %25045 = vmatpush1.bf16.msra.mxu1 %v33068_v32 }
0x1422   :  { %25046 = vmatprep.subr.bf16.mxu1 %v32942_v4 }
0x1425   :  { %25048 = vmatpush1.bf16.msra.mxu1 %v33069_v10 }
0x1426   :  { %25049 = vmatprep.subr.bf16.mxu1 %v32942_v4 }
0x1429   :  { %25051 = vmatpush1.bf16.msra.mxu1 %v33070_v6 }
0x142a   :  { %25052 = vmatprep.subr.bf16.mxu1 %v32942_v4 }
0x142d   :  { %25054 = vmatpush1.bf16.msra.mxu1 %v33071_v22 }
0x142e   :  { %25055 = vmatprep.subr.bf16.mxu1 %v32942_v4 }
0x1431   :  { %25057 = vmatpush1.bf16.msra.mxu1 %v33072_v23 }
0x1432   :  { %25058 = vmatprep.subr.bf16.mxu1 %v32942_v4 }
0x1435   :  { %25060 = vmatpush1.bf16.msra.mxu1 %v33073_v0 }
0x1436   :  { %25061 = vmatprep.subr.bf16.mxu1 %v32942_v4 }
0x1439   :  { %25063 = vmatpush1.bf16.msra.mxu1 %v33074_v5 }
0x143a   :  { %25064 = vmatprep.subr.bf16.mxu1 %v32942_v4 }
0x143d   :  { %25066 = vmatpush1.bf16.msra.mxu1 %v33075_v56 }
0x143e   :  { %25067 = vmatprep.subr.bf16.mxu1 %v32942_v4 }
0x1441   :  { %25069 = vmatpush1.bf16.msra.mxu1 %v33076_v2 }
0x1442   :  { %25070 = vmatprep.subr.bf16.mxu1 %v32942_v4 }
0x1445   :  { %25072 = vmatpush1.bf16.msra.mxu1 %v33077_v19 }
0x1446   :  { %25073 = vmatprep.subr.bf16.mxu1 %v32942_v4 }
0x1449   :  { %25075 = vmatpush1.bf16.msra.mxu1 %v33078_v45 }
0x144a   :  { %25076 = vmatprep.subr.bf16.mxu1 %v32942_v4 }
0x144c   :  { %9722 = vmatmul.mubr.f32.vlgmr.msra.gmra.mrb[16].mxu1 %v9273_v18  ;;  %v33086_v18 = vand.u32 4294901760, %v29259_v54  ;;  %v33092_v54 = vand.u32 4294901760, %v29414_v21  ;;  %v33098_v21 = vand.u32 4294901760, %v29433_v14  ;;  %v33103_v14 = vand.u32 4294901760, %v33063_v40  ;;  %v9985_v40 = vld [vmem:[%s33107_s11 + $0x10] sm:$0xff] }
0x144d   :  { %25078 = vmatpush1.bf16.msra.mxu1 %v25077_v20  ;;  %9876 = vmatprep.mubr.f32.mxu1 %v29653_v17 }
0x144e   :  { %25079 = vmatprep.subr.bf16.mxu1 %v32942_v4  ;;  %v25086_v31 = vpack.c.bf16 %v33086_v18, %v33085_v16  ;;  %v25095_v34 = vpack.c.bf16 %v33092_v54, %v33091_v24  ;;  %v25104_v52 = vpack.c.bf16 %v33098_v21, %v33097_v36  ;;  %v25113_v38 = vpack.c.bf16 %v33104_v51, %v33103_v14  ;;  %v26585_v36 = vld [vmem:[%s33109_s19 + $0x110] ss:$8 sps:$4 sm:$0xff]   ;;  %v26590_v21 = vld [vmem:[%s33109_s19 + $0x124] ss:$8 sps:$4 sm:$0xff]   ;;  %v26600_v51 = vld [vmem:[%s33109_s19 + $0x160] ss:$8 sps:$4 sm:$0xff]  }
0x144f   :  { %v26602_v14 = vld [vmem:[%s33109_s19 + $0x164] ss:$8 sps:$4 sm:$0xff]  }
0x1451   :  { %25081 = vmatpush1.bf16.msra.mxu1 %v25080_v7 }
0x1452   :  { %25082 = vmatprep.subr.bf16.mxu1 %v32942_v4 }
0x1455   :  { %25084 = vmatpush1.bf16.msra.mxu1 %v25083_v15 }
0x1456   :  { %25085 = vmatprep.subr.bf16.mxu1 %v32942_v4 }
0x1459   :  { %25087 = vmatpush1.bf16.msra.mxu1 %v25086_v31 }
0x145a   :  { %25088 = vmatprep.subr.bf16.mxu1 %v32942_v4 }
0x145d   :  { %25090 = vmatpush1.bf16.msra.mxu1 %v25089_v33 }
0x145e   :  { %25091 = vmatprep.subr.bf16.mxu1 %v32942_v4 }
0x1461   :  { %25093 = vmatpush1.bf16.msra.mxu1 %v25092_v9 }
0x1462   :  { %25094 = vmatprep.subr.bf16.mxu1 %v32942_v4 }
0x1465   :  { %25096 = vmatpush1.bf16.msra.mxu1 %v25095_v34  ;;  %v26578_v34 = vld [vmem:[%s33109_s19 + $0xe4] ss:$8 sps:$4 sm:$0xff]  }
0x1466   :  { %25097 = vmatprep.subr.bf16.mxu1 %v32942_v4 }
0x1469   :  { %25099 = vmatpush1.bf16.msra.mxu1 %v25098_v43  ;;  %v26579_v43 = vld [vmem:[%s33109_s19 + $0xf0] ss:$8 sps:$4 sm:$0xff]  }
0x146a   :  { %25100 = vmatprep.subr.bf16.mxu1 %v32942_v4 }
0x146d   :  { %25102 = vmatpush1.bf16.msra.mxu1 %v25101_v50  ;;  %v26587_v50 = vld [vmem:[%s33109_s19 + $0x114] ss:$8 sps:$4 sm:$0xff]  }
0x146e   :  { %25103 = vmatprep.subr.bf16.mxu1 %v32942_v4 }
0x1471   :  { %25105 = vmatpush1.bf16.msra.mxu1 %v25104_v52  ;;  %v26588_v52 = vld [vmem:[%s33109_s19 + $0x120] ss:$8 sps:$4 sm:$0xff]  }
0x1472   :  { %25106 = vmatprep.subr.bf16.mxu1 %v32942_v4 }
0x1475   :  { %25108 = vmatpush1.bf16.msra.mxu1 %v25107_v48  ;;  %v26596_v48 = vld [vmem:[%s33109_s19 + $0x144] ss:$8 sps:$4 sm:$0xff]  }
0x1476   :  { %25109 = vmatprep.subr.bf16.mxu1 %v32942_v4 }
0x1479   :  { %25111 = vmatpush1.bf16.msra.mxu1 %v25110_v57  ;;  %v26597_v57 = vld [vmem:[%s33109_s19 + $0x150] ss:$8 sps:$4 sm:$0xff]  }
0x147a   :  { %25112 = vmatprep.subr.bf16.mxu1 %v32942_v4 }
0x147d   :  { %25114 = vmatpush1.bf16.msra.mxu1 %v25113_v38  ;;  %v26605_v38 = vld [vmem:[%s33109_s19 + $0x174] ss:$8 sps:$4 sm:$0xff]  }
0x147e   :  { %25115 = vmatprep.subr.bf16.mxu1 %v32942_v4 }
0x1481   :  { %25117 = vmatpush1.bf16.msra.mxu1 %v25116_v28  ;;  %v26606_v28 = vld [vmem:[%s33109_s19 + $0x180] ss:$8 sps:$4 sm:$0xff]  }
0x1482   :  { %25118 = vmatprep.subr.bf16.mxu1 %v32942_v4 }
0x1484   :  { %9878 = vmatmul.mubr.f32.vlgmr.msra.gmra.mrb[16].mxu1 %v29646_v63 }
0x1485   :  { %25120 = vmatpush1.bf16.msra.mxu1 %v33065_v53  ;;  %9976 = vmatprep.mubr.f32.mxu1 %v29653_v17  ;;  %v9990_v17 = vand.u32 4294901760, %v9984_v41  ;;  %v9992_v53 = vand.u32 4294901760, %v9983_v37 }
0x1486   :  { %25121 = vmatprep.subr.bf16.mxu1 %v32942_v4 }
0x1489   :  { %25123 = vmatpush1.bf16.msra.mxu1 %v33066_v3  ;;  %v9996_v3 = vand.u32 4294901760, %v9985_v40 }
0x148a   :  { %25124 = vmatprep.subr.bf16.mxu1 %v32942_v4 }
0x148d   :  { %25126 = vmatpush1.bf16.msra.mxu1 %v33067_v35  ;;  %v25160_v35 = vpack.c.bf16 %v9994_v27, %v9990_v17 }
0x148e   :  { %25127 = vmatprep.subr.bf16.mxu1 %v32942_v4 }
0x148f   :  { %25161 = vmatprep.subr.bf16.mxu0 %v25160_v35 }
0x1491   :  { %25129 = vmatpush1.bf16.msra.mxu1 %v33068_v32  ;;  %v10071_v32 = vsub.f32 %v9984_v41, %v9990_v17  ;;  %v26611_v41 = vld [vmem:[%s33109_s19 + $0x194] ss:$8 sps:$4 sm:$0xff]   ;;  %v26614_v17 = vld [vmem:[%s33109_s19 + $0x1a4] ss:$8 sps:$4 sm:$0xff]  }
0x1492   :  { %25130 = vmatprep.subr.bf16.mxu1 %v32942_v4 }
0x1495   :  { %25132 = vmatpush1.bf16.msra.mxu1 %v33069_v10  ;;  %v10083_v10 = vsub.f32 %v9986_v29, %v9994_v27  ;;  %v26609_v29 = vld [vmem:[%s33109_s19 + $0x190] ss:$8 sps:$4 sm:$0xff]   ;;  %v26612_v27 = vld [vmem:[%s33109_s19 + $0x1a0] ss:$8 sps:$4 sm:$0xff]  }
0x1496   :  { %25133 = vmatprep.subr.bf16.mxu1 %v32942_v4 }
0x1497   :  { %v25168_v15 = vpack.c.bf16 %v10083_v10, %v10071_v32 }
0x1499   :  { %25135 = vmatpush1.bf16.msra.mxu1 %v33070_v6  ;;  %v25162_v6 = vpack.c.bf16 %v9996_v3, %v9992_v53 }
0x149a   :  { %25136 = vmatprep.subr.bf16.mxu1 %v32942_v4 }
0x149b   :  { %25163 = vmatpush1.bf16.msra.mxu0 %v25162_v6 }
0x149d   :  { %25138 = vmatpush1.bf16.msra.mxu1 %v33071_v22  ;;  %v10077_v22 = vsub.f32 %v9983_v37, %v9992_v53  ;;  %v26617_v37 = vld [vmem:[%s33109_s19 + $0x1b4] ss:$8 sps:$4 sm:$0xff]   ;;  %v26620_v53 = vld [vmem:[%s33109_s19 + $0x4] ss:$8 sps:$4 sm:$0xff]  }
0x149e   :  { %25139 = vmatprep.subr.bf16.mxu1 %v32942_v4 }
0x14a1   :  { %25141 = vmatpush1.bf16.msra.mxu1 %v33072_v23  ;;  %v10089_v23 = vsub.f32 %v9985_v40, %v9996_v3  ;;  %v26615_v40 = vld [vmem:[%s33109_s19 + $0x1b0] ss:$8 sps:$4 sm:$0xff]  }
0x14a2   :  { %25142 = vmatprep.subr.bf16.mxu1 %v32942_v4 }
0x14a3   :  { %v25170_v16 = vpack.c.bf16 %v10089_v23, %v10077_v22 }
0x14a5   :  { %25144 = vmatpush1.bf16.msra.mxu1 %v33073_v0  ;;  %v10072_v0 = vand.u32 4294901760, %v10071_v32 }
0x14a6   :  { %25145 = vmatprep.subr.bf16.mxu1 %v32942_v4 }
0x14a9   :  { %25147 = vmatpush1.bf16.msra.mxu1 %v33074_v5  ;;  %v10084_v5 = vand.u32 4294901760, %v10083_v10 }
0x14aa   :  { %25148 = vmatprep.subr.bf16.mxu1 %v32942_v4 }
0x14ab   :  { %v25176_v18 = vpack.c.bf16 %v10084_v5, %v10072_v0 }
0x14ad   :  { %25150 = vmatpush1.bf16.msra.mxu1 %v33075_v56  ;;  %v10090_v56 = vand.u32 4294901760, %v10089_v23 }
0x14ae   :  { %25151 = vmatprep.subr.bf16.mxu1 %v32942_v4 }
0x14af   :  { %v10091_v59 = vsub.f32 %v10089_v23, %v10090_v56 }
0x14b1   :  { %25153 = vmatpush1.bf16.msra.mxu1 %v33076_v2  ;;  %v10073_v2 = vsub.f32 %v10071_v32, %v10072_v0  ;;  %v10092_v7 = vand.u32 4294901760, %v10091_v59 }
0x14b2   :  { %25154 = vmatprep.subr.bf16.mxu1 %v32942_v4 }
0x14b3   :  { %v10074_v20 = vand.u32 4294901760, %v10073_v2 }
0x14b5   :  { %25156 = vmatpush1.bf16.msra.mxu1 %v33077_v19  ;;  %v10085_v19 = vsub.f32 %v10083_v10, %v10084_v5 }
0x14b6   :  { %25157 = vmatprep.subr.bf16.mxu1 %v32942_v4 }
0x14b7   :  { %v10086_v26 = vand.u32 4294901760, %v10085_v19 }
0x14b9   :  { %25159 = vmatpush1.bf16.msra.mxu1 %v33078_v45  ;;  %v25164_v11 = vpack.c.bf16 %v10086_v26, %v10074_v20  ;;  %v10491_v26 = vld [vmem:[%s33110_s15] sm:$0x3] }
0x14bb   :  { %25165 = vmatprep.subr.bf16.mxu0 %v25164_v11  ;;  %v33113_v11 = vld [vmem:[#allocation55_spill] sm:$0xff] }
0x14bc   :  { %9978 = vmatmul.mubr.f32.vlgmr.msra.gmra.mrb[16].mxu1 %v29646_v63  ;;  %v10078_v63 = vand.u32 4294901760, %v10077_v22 }
0x14bd   :  { %12243 = vmatprep.mubr.f32.mxu1 %v33108_v30 }
0x14be   :  { %v10079_v45 = vsub.f32 %v10077_v22, %v10078_v63  ;;  %v25178_v31 = vpack.c.bf16 %v10090_v56, %v10078_v63 }
0x14c0   :  { %v10080_v49 = vand.u32 4294901760, %v10079_v45  ;;  %v33112_v45 = vld [vmem:[#allocation54_spill] sm:$0xff] }
0x14c2   :  { %v25166_v47 = vpack.c.bf16 %v10092_v7, %v10080_v49 }
0x158f   :  { %v9979_v25 = vpop.f32.mrb[16].mxu1 }
0x1590   :  { %v9988_v44 = vsel %vm4703_vm10, %v9979_v25, 0  ;;  %v9981_v33 = vpop.f32.mrb[17].mxu1  ;;  %v33115_v25 = vld [vmem:[#allocation79_spill] sm:$0xff] }
0x1591   :  { %v10059_v62 = vand.u32 4294901760, %v9988_v44  ;;  %v33116_v33 = vld [vmem:[#allocation80_spill] sm:$0xff] }
0x1593   :  { %v10060_v12 = vsub.f32 %v9988_v44, %v10059_v62 }
0x1595   :  { %v10061_v9 = vand.u32 4294901760, %v10060_v12 }
0x1597   :  { %v10062_v24 = vsub.f32 %v10060_v12, %v10061_v9 }
0x1599   :  { %v10063_v54 = vand.u32 4294901760, %v10062_v24  ;;  %v10516_v24 = vld [vmem:[%s33111_s16] sm:$0x3] }
0x159b   :  { %10064 = vmatmul.mubr.f32.vlgmr.msra.gmra.mrb[28].mxu0 %v10063_v54 }
0x159c   :  { %25167 = vmatpush1.bf16.msra.mxu0 %v25166_v47  ;;  %10154 = vmatprep.mubr.f32.mxu0 %v33108_v30 }
0x159d   :  { %25169 = vmatprep.subr.bf16.mxu0 %v25168_v15  ;;  %v33114_v15 = vld [vmem:[#allocation63_spill] sm:$0xff] }
0x15a3   :  { %10156 = vmatmul.mubr.f32.vlgmr.msra.gmra.mrb[28].mxu0 %v10059_v62 }
0x15a4   :  { %25171 = vmatpush1.bf16.msra.mxu0 %v25170_v16  ;;  %10234 = vmatprep.mubr.f32.mxu0 %v33108_v30 }
0x15a5   :  { %25173 = vmatprep.subr.bf16.mxu0 %v25160_v35 }
0x15ab   :  { %10237 = vmatmul.mubr.f32.vlgmr.msra.gmra.mrb[28].mxu0 %v10060_v12 }
0x15ac   :  { %25175 = vmatpush1.bf16.msra.mxu0 %v25162_v6  ;;  %10311 = vmatprep.mubr.f32.mxu0 %v33108_v30 }
0x15ad   :  { %25177 = vmatprep.subr.bf16.mxu0 %v25176_v18 }
0x15b3   :  { %10315 = vmatmul.mubr.f32.vlgmr.msra.gmra.mrb[28].mxu0 %v10061_v9 }
0x15b4   :  { %25179 = vmatpush1.bf16.msra.mxu0 %v25178_v31  ;;  %10397 = vmatprep.mubr.f32.mxu0 %v33108_v30 }
0x15b5   :  { %25181 = vmatprep.subr.bf16.mxu0 %v25160_v35 }
0x15bb   :  { %10399 = vmatmul.mubr.f32.vlgmr.msra.gmra.mrb[28].mxu0 %v10059_v62 }
0x15bc   :  { %25183 = vmatpush1.bf16.msra.mxu0 %v25162_v6  ;;  %10473 = vmatprep.mubr.f32.mxu0 %v33108_v30 }
0x15bd   :  { %10880 = vmatprep.subr.bf16.mxu0 %v26578_v34 }
0x15c3   :  { %10475 = vmatmul.mubr.f32.vlgmr.msra.gmra.mrb[28].mxu0 %v10059_v62 }
0x15c4   :  { %10881 = vmatpush1.bf16.msra.mxu0 %v26576_v39 }
0x15c5   :  { %10882 = vmatprep.subr.bf16.mxu0 %v26581_v55 }
0x15c8   :  { %10883 = vmatpush1.bf16.msra.mxu0 %v26579_v43 }
0x15c9   :  { %10884 = vmatprep.subr.bf16.mxu0 %v26584_v42 }
0x15cc   :  { %10885 = vmatpush1.bf16.msra.mxu0 %v26582_v46 }
0x15cd   :  { %10886 = vmatprep.subr.bf16.mxu0 %v26587_v50 }
0x15d0   :  { %10887 = vmatpush1.bf16.msra.mxu0 %v26585_v36 }
0x15d1   :  { %10888 = vmatprep.subr.bf16.mxu0 %v26590_v21 }
0x15d4   :  { %10889 = vmatpush1.bf16.msra.mxu0 %v26588_v52 }
0x15d5   :  { %10890 = vmatprep.subr.bf16.mxu0 %v26593_v8 }
0x15d8   :  { %10891 = vmatpush1.bf16.msra.mxu0 %v26591_v61 }
0x15d9   :  { %10892 = vmatprep.subr.bf16.mxu0 %v26596_v48 }
0x15dc   :  { %10893 = vmatpush1.bf16.msra.mxu0 %v26594_v13 }
0x15dd   :  { %10894 = vmatprep.subr.bf16.mxu0 %v26599_v58 }
0x15e0   :  { %10895 = vmatpush1.bf16.msra.mxu0 %v26597_v57 }
0x15e1   :  { %10896 = vmatprep.subr.bf16.mxu0 %v26602_v14 }
0x15e4   :  { %10897 = vmatpush1.bf16.msra.mxu0 %v26600_v51 }
0x15e5   :  { %10898 = vmatprep.subr.bf16.mxu0 %v26605_v38 }
0x15e8   :  { %10899 = vmatpush1.bf16.msra.mxu0 %v26603_v1 }
0x15e9   :  { %10900 = vmatprep.subr.bf16.mxu0 %v26608_v60 }
0x15ec   :  { %10901 = vmatpush1.bf16.msra.mxu0 %v26606_v28 }
0x15ed   :  { %10902 = vmatprep.subr.bf16.mxu0 %v26611_v41 }
0x15f0   :  { %10903 = vmatpush1.bf16.msra.mxu0 %v26609_v29 }
0x15f1   :  { %10904 = vmatprep.subr.bf16.mxu0 %v26614_v17 }
0x15f4   :  { %10905 = vmatpush1.bf16.msra.mxu0 %v26612_v27 }
0x15f5   :  { %10906 = vmatprep.subr.bf16.mxu0 %v26617_v37 }
0x15f8   :  { %10907 = vmatpush1.bf16.msra.mxu0 %v26615_v40 }
0x15f9   :  { %11074 = vmatprep.subr.bf16.mxu0 %v26620_v53 }
0x1696   :  { %v10476_v3 = vpop.f32.mrb[28].mxu0 }
0x1697   :  { %v10481_v35 = vmul.f32 %v10476_v3, %v10476_v3  ;;  %v10478_v32 = vpop.f32.mrb[29].mxu0 }
0x1698   :  { %v10482_v10 = vmul.f32 %v10478_v32, %v10478_v32 }
0x1699   :  { %v10485_v6 = vrot.slane %v10481_v35, 7 }
0x169a   :  { %v10486_v22 = vrot.slane %v10482_v10, 7 }
0x169b   :  { %v10489_v23 = vsub.f32 %v10476_v3, %v10485_v6 }
0x169c   :  { %v10490_v0 = vsub.f32 %v10478_v32, %v10486_v22 }
0x169d   :  { %v10492_v5 = vadd.f32 1e-05, %v10489_v23 }
0x169e   :  { %v10493_v63 = vadd.f32 1e-05, %v10490_v0  ;;  %v30019_v0 = vld [vmem:[%s33120_s0 + $0x38] sm:$0xff] }
0x169f   :  { %27036 = vrsqrt.f32 %v10492_v5 }
0x16a0   :  { %27038 = vrsqrt.f32 %v10493_v63 }
0x16a9   :  { %v27037_v56 = vpop.eup %27036 }
0x16aa   :  { %v27039_v2 = vpop.eup %27038 }
0x16ab   :  { %v10498_v19 = vcombine.low %v27037_v56, %v27039_v2 }
0x16ad   :  { %v10505_v59 = vrot.slane %v10498_v19, %v33112_v45 }
0x16af   :  { %v10506_v20 = vcombine.high %v10505_v59, %v10505_v59 }
0x16b1   :  { %v10513_v49 = vrot.slane %v10506_v20, %v33112_v45  ;;  %v33119_v20 = vld [vmem:[#allocation59_spill] sm:$0xff] }
0x16b3   :  { %v10515_v7 = vmul.f32 %v10513_v49, %v10491_v26 }
0x16b5   :  { %v10521_v47 = vrot.slane %v10515_v7, %v33113_v11  ;;  %v10525_v16 = vrot.slane %v10515_v7, %v33114_v15 }
0x16b7   :  { %v10528_v18 = vmul.f32 %v10521_v47, %v10476_v3  ;;  %v10529_v31 = vmul.f32 %v10525_v16, %v10478_v32  ;;  %v10549_v44 = vmul.f32 %v10521_v47, %v33115_v25  ;;  %v10550_v62 = vmul.f32 %v10525_v16, %v33116_v33 }
0x16b9   :  { %v10532_v12 = vcombine.low %v10528_v18, %v10529_v31 }
0x16bb   :  { %v10539_v9 = vrot.slane %v10532_v12, %v33112_v45 }
0x16bd   :  { %v10546_v54 = vrot.slane %v10539_v9, %v33112_v45 }
0x16bf   :  { %v10548_v34 = vsub.f32 %v10516_v24, %v10546_v54 }
0x16c1   :  { %v10555_v39 = vrot.slane %v10548_v34, %v33113_v11  ;;  %v10559_v55 = vrot.slane %v10548_v34, %v33114_v15 }
0x16c3   :  { %v10562_v43 = vadd.f32 %v10555_v39, %v10549_v44  ;;  %v10563_v42 = vadd.f32 %v10559_v55, %v10550_v62  ;;  %v29958_v55 = vld [vmem:[%s33120_s0] sm:$0xff] }
0x16c5   :  { %v10564_v46 = vmax.f32 %v10562_v43, 0.0  ;;  %v10565_v50 = vmax.f32 %v10563_v42, 0.0  ;;  %v26639_v42 = vld [vmem:[%s33109_s19 + $0x70] ss:$8 sps:$4 sm:$0xff]  }
0x16c7   :  { %v10568_v36 = vcombine.low %v10564_v46, %v10565_v50  ;;  %v10569_v21 = vcombine.high %v10564_v46, %v10565_v50  ;;  %v21734_v52 = vcombine.low %v10565_v50, %v10565_v50  ;;  %v21735_v8 = vcombine.high %v10565_v50, %v10565_v50  ;;  %v29965_v50 = vld [vmem:[%s33120_s0 + $0x8] sm:$0xff] }
0x16c9   :  { %v10576_v61 = vpack.c.bf16 %v10568_v36, %v10568_v36  ;;  %v10577_v48 = vpack.c.bf16 %v21734_v52, %v21734_v52  ;;  %v10578_v13 = vpack.c.bf16 %v10569_v21, %v10569_v21  ;;  %v10579_v58 = vpack.c.bf16 %v21735_v8, %v21735_v8  ;;  %v29968_v36 = vld [vmem:[%s33120_s0 + $0x10] sm:$0xff] }
0x16cb   :  { %v10581_v57 = vshrl.u32 %v10576_v61, 16  ;;  %v10588_v14 = vshrl.u32 %v10577_v48, 16  ;;  %v10595_v51 = vshrl.u32 %v10578_v13, 16  ;;  %v10602_v38 = vshrl.u32 %v10579_v58, 16 }
0x16cc   :  { %v10584_v60 = vshll.u32 %v10576_v61, 16  ;;  %v10591_v41 = vshll.u32 %v10577_v48, 16  ;;  %v10598_v17 = vshll.u32 %v10578_v13, 16  ;;  %v10605_v37 = vshll.u32 %v10579_v58, 16  ;;  %v29971_v61 = vld [vmem:[%s33120_s0 + $0x18] sm:$0xff] }
0x16cd   :  { %v10583_v1 = vrot.slane %v10581_v57, 7  ;;  %v10590_v28 = vrot.slane %v10588_v14, 7  ;;  %v10597_v29 = vrot.slane %v10595_v51, 7  ;;  %v10604_v27 = vrot.slane %v10602_v38, 7 }
0x16ce   :  { %v11411_v57 = vand.u32 4294901760, %v29958_v55  ;;  %v11414_v38 = vand.u32 4294901760, %v29965_v50 }
0x16cf   :  { %v10586_v40 = vor.u32 %v10584_v60, %v10583_v1  ;;  %v10593_v53 = vor.u32 %v10591_v41, %v10590_v28  ;;  %v10600_v3 = vor.u32 %v10598_v17, %v10597_v29  ;;  %v10607_v35 = vor.u32 %v10605_v37, %v10604_v27  ;;  %v29981_v60 = vld [vmem:[%s33120_s0 + $0x20] sm:$0xff]  ;;  %v29994_v37 = vld [vmem:[%s33120_s0 + $0x28] sm:$0xff]  ;;  %v26651_v28 = vld [vmem:[%s33109_s19 + $0xb0] ss:$8 sps:$4 sm:$0xff]  }
0x16d0   :  { %v11417_v1 = vand.u32 4294901760, %v29968_v36  ;;  %v29990_v17 = vsub.f32 %v29958_v55, %v11411_v57  ;;  %v11420_v27 = vand.u32 4294901760, %v29971_v61 }
0x16d1   :  { %v10612_v10 = vsel %vm27568_vm3, 0, %v10586_v40  ;;  %v10613_v6 = vsel %vm27568_vm3, 0, %v10593_v53  ;;  %v10614_v22 = vsel %vm27568_vm3, 0, %v10600_v3  ;;  %v10615_v23 = vsel %vm27568_vm3, 0, %v10607_v35 }
0x16d2   :  { %v10616_v5 = vsel %vm29291_vm4, %v10612_v10, 0  ;;  %v10617_v63 = vsel %vm29291_vm4, %v10613_v6, 0  ;;  %v10618_v56 = vsel %vm29291_vm4, %v10614_v22, 0  ;;  %v10619_v2 = vsel %vm29291_vm4, %v10615_v23, 0  ;;  %v30016_v23 = vld [vmem:[%s33120_s0 + $0x30] sm:$0xff] }
0x16d3   :  { %v10624_v19 = vcombine.low %v10616_v5, %v10617_v63  ;;  %v10632_v59 = vcombine.low %v10618_v56, %v10619_v2  ;;  %v30001_v53 = vsub.f32 %v29965_v50, %v11414_v38  ;;  %v30006_v3 = vsub.f32 %v29968_v36, %v11417_v1  ;;  %v11391_v36 = vld [vmem:[%s33120_s0 + $0x40] sm:$0xff] }
0x16d4   :  { %v30011_v10 = vsub.f32 %v29971_v61, %v11420_v27  ;;  %v11423_v6 = vand.u32 4294901760, %v29981_v60  ;;  %v11426_v22 = vand.u32 4294901760, %v29994_v37  ;;  %v11429_v2 = vand.u32 4294901760, %v30016_v23  ;;  %v11392_v61 = vld [vmem:[%s33120_s0 + $0x48] sm:$0xff] }
0x16d5   :  { %v10631_v26 = vrot.slane %v10624_v19, %v33119_v20  ;;  %v10639_v49 = vrot.slane %v10632_v59, %v33119_v20  ;;  %v11432_v59 = vand.u32 4294901760, %v30019_v0  ;;  %vm13764_vm4 = vcmask 1041408  }
0x16d6   :  { %v30028_v56 = vsub.f32 %v29981_v60, %v11423_v6  ;;  %v30034_v19 = vsub.f32 %v29994_v37, %v11426_v22  ;;  %v30132_v55 = vpack.c.bf16 %v11426_v22, %v11423_v6  ;;  %v11393_v60 = vld [vmem:[%s33120_s0 + $0x50] sm:$0xff]  ;;  %vm30656_vm14 = vmand %vm13764_vm4, %vm8631_vm15  ;;  %vm33234_vm4 = vcmask 1043456  }
0x16d7   :  { %v10668_v7 = vcombine.high %v10631_v26, %v10631_v26  ;;  %v10671_v47 = vshrl.u32 %v10631_v26, 16  ;;  %v10674_v16 = vshll.u32 %v10631_v26, 16  ;;  %v21822_v18 = vrot.slane %v10631_v26, 9 }
0x16d8   :  { %v10669_v31 = vcombine.high %v10639_v49, %v10639_v49  ;;  %v10685_v25 = vshrl.u32 %v10639_v49, 16  ;;  %v10688_v44 = vshll.u32 %v10639_v49, 16  ;;  %v10921_v33 = vcombine.low %v10631_v26, %v10639_v49  ;;  %33125 = vst [vmem:[#allocation74_spill] sm:$0xff] %v30132_v55 }
0x16d9   :  { %v10673_v62 = vrot.slane %v10671_v47, 6  ;;  %v10676_v12 = vrot.slane %v10674_v16, 7  ;;  %v10680_v9 = vshll.u32 %v10668_v7, 16  ;;  %v11117_v24 = vrot.slane %v10668_v7, 7  ;;  %v26623_v47 = vld [vmem:[%s33109_s19 + $0x14] ss:$8 sps:$4 sm:$0xff]  }
0x16da   :  { %v10687_v54 = vrot.slane %v10685_v25, 6  ;;  %v10690_v34 = vrot.slane %v10688_v44, 7  ;;  %v10694_v39 = vshll.u32 %v10669_v31, 16  ;;  %v21823_v52 = vrot.slane %v10639_v49, 9  ;;  %v26618_v49 = vld [vmem:[%s33109_s19] ss:$8 sps:$4 sm:$0xff]  }
0x16db   :  { %v10677_v43 = vor.u32 %v10676_v12, %v10673_v62  ;;  %v29962_v46 = vsel %vm29317_vm8, %v21822_v18, %v11117_v24  ;;  %v11121_v8 = vrot.slane %v10669_v31, 7  ;;  %v10682_v13 = vrot.slane %v10680_v9, 7  ;;  %v26621_v31 = vld [vmem:[%s33109_s19 + $0x10] ss:$8 sps:$4 sm:$0xff]   ;;  %v26626_v25 = vld [vmem:[%s33109_s19 + $0x24] ss:$8 sps:$4 sm:$0xff]  }
0x16dc   :  { %v10691_v21 = vor.u32 %v10690_v34, %v10687_v54  ;;  %v10696_v58 = vrot.slane %v10694_v39, 7  ;;  %v30023_v63 = vrot.slane %v10921_v33, %v33119_v20  ;;  %v30041_v7 = vsub.f32 %v30016_v23, %v11429_v2  ;;  %v26624_v44 = vld [vmem:[%s33109_s19 + $0x20] ss:$8 sps:$4 sm:$0xff]   ;;  %v26629_v33 = vld [vmem:[%s33109_s19 + $0x34] ss:$8 sps:$4 sm:$0xff]  }
0x16dd   :  { %v10678_v48 = vrot.slane %v10677_v43, 2  ;;  %v29976_v51 = vsel %vm29317_vm8, %v21823_v52, %v11121_v8  ;;  %v30047_v16 = vsub.f32 %v30019_v0, %v11432_v59  ;;  %v26627_v62 = vld [vmem:[%s33109_s19 + $0x30] ss:$8 sps:$4 sm:$0xff]   ;;  %v26632_v12 = vld [vmem:[%s33109_s19 + $0x44] ss:$8 sps:$4 sm:$0xff]   ;;  %v30140_v50 = vpack.c.bf16 %v11432_v59, %v11429_v2 }
0x16de   :  { %v10692_v14 = vrot.slane %v10691_v21, 2  ;;  %v11152_v29 = vcombine.low %v29962_v46, %v29976_v51  ;;  %v10929_v18 = vcombine.high %v30023_v63, %v30023_v63  ;;  %v26630_v9 = vld [vmem:[%s33109_s19 + $0x40] ss:$8 sps:$4 sm:$0xff]   ;;  %v26635_v24 = vld [vmem:[%s33109_s19 + $0x54] ss:$8 sps:$4 sm:$0xff]   ;;  %v11441_v37 = vand.u32 4294901760, %v11393_v60 }
0x16df   :  { %v10683_v41 = vsel %vm29332_vm9, %v10678_v48, %v10682_v13  ;;  %v26633_v54 = vld [vmem:[%s33109_s19 + $0x50] ss:$8 sps:$4 sm:$0xff]   ;;  %v26638_v34 = vld [vmem:[%s33109_s19 + $0x64] ss:$8 sps:$4 sm:$0xff]   ;;  %v26636_v39 = vld [vmem:[%s33109_s19 + $0x60] ss:$8 sps:$4 sm:$0xff]  }
0x16e0   :  { %v10697_v40 = vsel %vm29332_vm9, %v10692_v14, %v10696_v58  ;;  %v26641_v43 = vld [vmem:[%s33109_s19 + $0x74] ss:$8 sps:$4 sm:$0xff]   ;;  %v26644_v21 = vld [vmem:[%s33109_s19 + $0x84] ss:$8 sps:$4 sm:$0xff]   ;;  %v26642_v52 = vld [vmem:[%s33109_s19 + $0x80] ss:$8 sps:$4 sm:$0xff]  }
0x16e1   :  { %v10727_v35 = vcombine.low %v10683_v41, %v10697_v40  ;;  %v26647_v8 = vld [vmem:[%s33109_s19 + $0x94] ss:$8 sps:$4 sm:$0xff]   ;;  %v26645_v48 = vld [vmem:[%s33109_s19 + $0x90] ss:$8 sps:$4 sm:$0xff]   ;;  %v26650_v13 = vld [vmem:[%s33109_s19 + $0xa4] ss:$8 sps:$4 sm:$0xff]  }
0x16e2   :  { %v26648_v58 = vld [vmem:[%s33109_s19 + $0xa0] ss:$8 sps:$4 sm:$0xff]   ;;  %v26653_v14 = vld [vmem:[%s33109_s19 + $0xb4] ss:$8 sps:$4 sm:$0xff]   ;;  %v26656_v41 = vld [vmem:[%s33109_s19 + $0xc4] ss:$8 sps:$4 sm:$0xff]  }
0x16e3   :  { %v10734_v5 = vrot.slane %v10727_v35, %v33119_v20  ;;  %v26654_v40 = vld [vmem:[%s33109_s19 + $0xc0] ss:$8 sps:$4 sm:$0xff]   ;;  %v26659_v35 = vld [vmem:[%s33109_s19 + $0xd4] ss:$8 sps:$4 sm:$0xff]   ;;  %v26668_v46 = vld [vmem:[%s33109_s19 + $0x1e4] ss:$8 sps:$4 sm:$0xff]  }
0x16e4   :  { %v26666_v51 = vld [vmem:[%s33109_s19 + $0x1e0] ss:$8 sps:$4 sm:$0xff]   ;;  %33126 = vst [vmem:[#allocation76_spill] sm:$0xff] %v30140_v50  ;;  %vm11354_vm8 = vcmask 523264  }
0x16e5   :  { %v10735_v26 = vcombine.high %v10734_v5, %v10734_v5  ;;  %v11395_v23 = vld [vmem:[%s33120_s0 + $0x60] sm:$0xff]  ;;  %v11396_v0 = vld [vmem:[%s33120_s0 + $0x68] sm:$0xff] }
0x16e6   :  { %v11447_v2 = vand.u32 4294901760, %v11395_v23  ;;  %v11450_v59 = vand.u32 4294901760, %v11396_v0 }
0x16e7   :  { %21792 = vmatprep.mubr.msk.bf16.mxu0 %vm9112_vm6, %v10735_v26  ;;  %v26662_v26 = vld [vmem:[%s33109_s19 + $0x1c4] ss:$8 sps:$4 sm:$0xff]  }
0x16e8   :  { %10913 = vmatmul.mubr.bf16.vlgmr.msra.gmra.mrb[32].mxu0 %v10734_v5  ;;  %v26657_v5 = vld [vmem:[%s33109_s19 + $0xd0] ss:$8 sps:$4 sm:$0xff]  }
0x16e9   :  { %11075 = vmatpush1.bf16.msra.mxu0 %v26618_v49  ;;  %21821 = vmatprep.mubr.msk.bf16.mxu0 %vm9112_vm6, %v10929_v18  ;;  %v11159_v49 = vrot.slane %v11152_v29, %v33119_v20  ;;  %v26665_v18 = vld [vmem:[%s33109_s19 + $0x1d4] ss:$8 sps:$4 sm:$0xff]  }
0x16ea   :  { %11076 = vmatprep.subr.bf16.mxu0 %v26623_v47  ;;  %v26660_v47 = vld [vmem:[%s33109_s19 + $0x1c0] ss:$8 sps:$4 sm:$0xff]   ;;  %v26671_v29 = vld [vmem:[%s33109_s19 + $0x1f4] ss:$8 sps:$4 sm:$0xff]  }
0x16ed   :  { %11077 = vmatpush1.bf16.msra.mxu0 %v26621_v31  ;;  %v11160_v31 = vcombine.high %v11159_v49, %v11159_v49 }
0x16ee   :  { %11078 = vmatprep.subr.bf16.mxu0 %v26626_v25  ;;  %v26663_v25 = vld [vmem:[%s33109_s19 + $0x1d0] ss:$8 sps:$4 sm:$0xff]  }
0x16f1   :  { %11079 = vmatpush1.bf16.msra.mxu0 %v26624_v44  ;;  %v26669_v44 = vld [vmem:[%s33109_s19 + $0x1f0] ss:$8 sps:$4 sm:$0xff]  }
0x16f2   :  { %11080 = vmatprep.subr.bf16.mxu0 %v26629_v33  ;;  %v26672_v33 = vld [vmem:[%s33109_s19 + $0x200] ss:$8 sps:$4 sm:$0xff]  }
0x16f5   :  { %11081 = vmatpush1.bf16.msra.mxu0 %v26627_v62  ;;  %v26677_v62 = vld [vmem:[%s33109_s19 + $0x214] ss:$8 sps:$4 sm:$0xff]  }
0x16f6   :  { %11082 = vmatprep.subr.bf16.mxu0 %v26632_v12  ;;  %v26675_v12 = vld [vmem:[%s33109_s19 + $0x210] ss:$8 sps:$4 sm:$0xff]  }
0x16f9   :  { %11083 = vmatpush1.bf16.msra.mxu0 %v26630_v9  ;;  %v26680_v9 = vld [vmem:[%s33109_s19 + $0x224] ss:$8 sps:$4 sm:$0xff]  }
0x16fa   :  { %11084 = vmatprep.subr.bf16.mxu0 %v26635_v24  ;;  %v26678_v24 = vld [vmem:[%s33109_s19 + $0x220] ss:$8 sps:$4 sm:$0xff]  }
0x16fd   :  { %11085 = vmatpush1.bf16.msra.mxu0 %v26633_v54  ;;  %v26683_v54 = vld [vmem:[%s33109_s19 + $0x234] ss:$8 sps:$4 sm:$0xff]  }
0x16fe   :  { %11086 = vmatprep.subr.bf16.mxu0 %v26638_v34  ;;  %v26681_v34 = vld [vmem:[%s33109_s19 + $0x230] ss:$8 sps:$4 sm:$0xff]  }
0x1701   :  { %11087 = vmatpush1.bf16.msra.mxu0 %v26636_v39  ;;  %v26686_v39 = vld [vmem:[%s33109_s19 + $0x244] ss:$8 sps:$4 sm:$0xff]  }
0x1702   :  { %11088 = vmatprep.subr.bf16.mxu0 %v26641_v43  ;;  %v26684_v43 = vld [vmem:[%s33109_s19 + $0x240] ss:$8 sps:$4 sm:$0xff]  }
0x1705   :  { %11089 = vmatpush1.bf16.msra.mxu0 %v26639_v42  ;;  %v26689_v42 = vld [vmem:[%s33109_s19 + $0x254] ss:$8 sps:$4 sm:$0xff]  }
0x1706   :  { %11090 = vmatprep.subr.bf16.mxu0 %v26644_v21  ;;  %v26687_v21 = vld [vmem:[%s33109_s19 + $0x250] ss:$8 sps:$4 sm:$0xff]  }
0x1709   :  { %11091 = vmatpush1.bf16.msra.mxu0 %v26642_v52  ;;  %v26692_v52 = vld [vmem:[%s33109_s19 + $0x264] ss:$8 sps:$4 sm:$0xff]  }
0x170a   :  { %11092 = vmatprep.subr.bf16.mxu0 %v26647_v8  ;;  %v26690_v8 = vld [vmem:[%s33109_s19 + $0x260] ss:$8 sps:$4 sm:$0xff]  }
0x170d   :  { %11093 = vmatpush1.bf16.msra.mxu0 %v26645_v48  ;;  %v26695_v48 = vld [vmem:[%s33109_s19 + $0x274] ss:$8 sps:$4 sm:$0xff]  }
0x170e   :  { %11094 = vmatprep.subr.bf16.mxu0 %v26650_v13  ;;  %v26693_v13 = vld [vmem:[%s33109_s19 + $0x270] ss:$8 sps:$4 sm:$0xff]  }
0x1711   :  { %11095 = vmatpush1.bf16.msra.mxu0 %v26648_v58  ;;  %v26698_v58 = vld [vmem:[%s33109_s19 + $0x284] ss:$8 sps:$4 sm:$0xff]  }
0x1712   :  { %11096 = vmatprep.subr.bf16.mxu0 %v26653_v14  ;;  %v26696_v14 = vld [vmem:[%s33109_s19 + $0x280] ss:$8 sps:$4 sm:$0xff]  }
0x1715   :  { %11097 = vmatpush1.bf16.msra.mxu0 %v26651_v28  ;;  %v26701_v28 = vld [vmem:[%s33109_s19 + $0x294] ss:$8 sps:$4 sm:$0xff]  }
0x1716   :  { %11098 = vmatprep.subr.bf16.mxu0 %v26656_v41  ;;  %v26699_v41 = vld [vmem:[%s33109_s19 + $0x290] ss:$8 sps:$4 sm:$0xff]  }
0x1719   :  { %11099 = vmatpush1.bf16.msra.mxu0 %v26654_v40  ;;  %v30116_v40 = vpack.c.bf16 %v11414_v38, %v11411_v57  ;;  %v11435_v57 = vand.u32 4294901760, %v11391_v36  ;;  %v11438_v38 = vand.u32 4294901760, %v11392_v61 }
0x171a   :  { %11100 = vmatprep.subr.bf16.mxu0 %v26659_v35  ;;  %v30124_v35 = vpack.c.bf16 %v11420_v27, %v11417_v1  ;;  %v11394_v27 = vld [vmem:[%s33120_s0 + $0x58] sm:$0xff] }
0x171b   :  { %33123 = vst [vmem:[#allocation72_spill] sm:$0xff] %v30116_v40  ;;  %v30147_v1 = vpack.c.bf16 %v11438_v38, %v11435_v57  ;;  %v11444_v6 = vand.u32 4294901760, %v11394_v27 }
0x171c   :  { %33124 = vst [vmem:[#allocation75_spill] sm:$0xff] %v30124_v35 }
0x171d   :  { %11101 = vmatpush1.bf16.msra.mxu0 %v26657_v5  ;;  %33127 = vst [vmem:[#allocation60_spill] sm:$0xff] %v30147_v1  ;;  %v30153_v22 = vpack.c.bf16 %v11444_v6, %v11441_v37  ;;  %v30159_v5 = vpack.c.bf16 %v11450_v59, %v11447_v2 }
0x171e   :  { %11305 = vmatprep.subr.bf16.mxu0 %v26662_v26  ;;  %v11397_v26 = vld [vmem:[%s33120_s0 + $0x70] sm:$0xff] }
0x171f   :  { %33128 = vst [vmem:[#allocation61_spill] sm:$0xff] %v30153_v22  ;;  %33129 = vst [vmem:[#allocation62_spill] sm:$0xff] %v30159_v5 }
0x1720   :  { %11107 = vmatmul.mubr.bf16.vlgmr.msra.gmra.mrb[32].mxu0 %v30023_v63  ;;  %v26674_v63 = vld [vmem:[%s33109_s19 + $0x204] ss:$8 sps:$4 sm:$0xff]  }
0x1721   :  { %11306 = vmatpush1.bf16.msra.mxu0 %v26660_v47  ;;  %21880 = vmatprep.mubr.msk.bf16.mxu0 %vm9112_vm6, %v11160_v31  ;;  %v11453_v47 = vand.u32 4294901760, %v11397_v26  ;;  %vm13878_vm6 = vsmask.f32 6424 }
0x1722   :  { %11307 = vmatprep.subr.bf16.mxu0 %v26665_v18 }
0x1725   :  { %11308 = vmatpush1.bf16.msra.mxu0 %v26663_v25  ;;  %v11399_v25 = vld [vmem:[%s33120_s0 + $0x80] sm:$0xff] }
0x1726   :  { %11309 = vmatprep.subr.bf16.mxu0 %v26668_v46  ;;  %v11400_v46 = vld [vmem:[%s33120_s0 + $0x88] sm:$0xff] }
0x1729   :  { %11310 = vmatpush1.bf16.msra.mxu0 %v26666_v51  ;;  %v11459_v51 = vand.u32 4294901760, %v11399_v25 }
0x172a   :  { %11311 = vmatprep.subr.bf16.mxu0 %v26671_v29  ;;  %v11462_v29 = vand.u32 4294901760, %v11400_v46 }
0x172d   :  { %11312 = vmatpush1.bf16.msra.mxu0 %v26669_v44  ;;  %v30170_v44 = vsub.f32 %v11391_v36, %v11435_v57 }
0x172e   :  { %11313 = vmatprep.subr.bf16.mxu0 %v26674_v63  ;;  %v30172_v63 = vsub.f32 %v11392_v61, %v11438_v38 }
0x1731   :  { %11314 = vmatpush1.bf16.msra.mxu0 %v26672_v33  ;;  %v30175_v33 = vpack.c.bf16 %v11462_v29, %v11459_v51 }
0x1732   :  { %11315 = vmatprep.subr.bf16.mxu0 %v26677_v62  ;;  %v30177_v62 = vsub.f32 %v11393_v60, %v11441_v37 }
0x1733   :  { %33131 = vst [vmem:[#allocation57_spill] sm:$0xff] %v30175_v33 }
0x1735   :  { %11316 = vmatpush1.bf16.msra.mxu0 %v26675_v12  ;;  %v30179_v12 = vsub.f32 %v11394_v27, %v11444_v6 }
0x1736   :  { %11317 = vmatprep.subr.bf16.mxu0 %v26680_v9  ;;  %v30181_v9 = vsub.f32 %v11395_v23, %v11447_v2  ;;  %v32654_v2 = vand.u32 4294901760, %v29990_v17 }
0x1739   :  { %11318 = vmatpush1.bf16.msra.mxu0 %v26678_v24  ;;  %v30183_v24 = vsub.f32 %v11396_v0, %v11450_v59  ;;  %v32651_v59 = vand.u32 4294901760, %v30001_v53 }
0x173a   :  { %11319 = vmatprep.subr.bf16.mxu0 %v26683_v54  ;;  %v11401_v54 = vld [vmem:[%s33120_s0 + $0x90] sm:$0xff] }
0x173d   :  { %11320 = vmatpush1.bf16.msra.mxu0 %v26681_v34  ;;  %v11402_v34 = vld [vmem:[%s33120_s0 + $0x98] sm:$0xff] }
0x173e   :  { %11321 = vmatprep.subr.bf16.mxu0 %v26686_v39  ;;  %v11403_v39 = vld [vmem:[%s33120_s0 + $0xa0] sm:$0xff] }
0x1741   :  { %11322 = vmatpush1.bf16.msra.mxu0 %v26684_v43  ;;  %v30188_v43 = vsub.f32 %v11397_v26, %v11453_v47 }
0x1742   :  { %11323 = vmatprep.subr.bf16.mxu0 %v26689_v42 }
0x1745   :  { %11324 = vmatpush1.bf16.msra.mxu0 %v26687_v21  ;;  %v30193_v21 = vsub.f32 %v11399_v25, %v11459_v51  ;;  %v32645_v51 = vand.u32 4294901760, %v30011_v10 }
0x1746   :  { %11325 = vmatprep.subr.bf16.mxu0 %v26692_v52  ;;  %v30195_v52 = vsub.f32 %v11400_v46, %v11462_v29  ;;  %v32648_v46 = vand.u32 4294901760, %v30006_v3 }
0x1749   :  { %11326 = vmatpush1.bf16.msra.mxu0 %v26690_v8  ;;  %v11404_v8 = vld [vmem:[%s33120_s0 + $0xa8] sm:$0xff] }
0x174a   :  { %11327 = vmatprep.subr.bf16.mxu0 %v26695_v48  ;;  %v11405_v48 = vld [vmem:[%s33120_s0 + $0xb0] sm:$0xff] }
0x174b   :  { %v11477_v36 = vand.u32 4294901760, %v11405_v48 }
0x174d   :  { %11328 = vmatpush1.bf16.msra.mxu0 %v26693_v13  ;;  %v11406_v13 = vld [vmem:[%s33120_s0 + $0xb8] sm:$0xff]  ;;  %v30211_v6 = vsub.f32 %v11405_v48, %v11477_v36  ;;  %v32642_v48 = vand.u32 4294901760, %v30028_v56 }
0x174e   :  { %11329 = vmatprep.subr.bf16.mxu0 %v26698_v58  ;;  %v11465_v58 = vand.u32 4294901760, %v11401_v54  ;;  %v11480_v60 = vand.u32 4294901760, %v11406_v13 }
0x1750   :  { %v30203_v57 = vsub.f32 %v11401_v54, %v11465_v58  ;;  %v30216_v0 = vsub.f32 %v11406_v13, %v11480_v60  ;;  %v30222_v26 = vpack.c.bf16 %v11480_v60, %v11477_v36  ;;  %v11532_v54 = vsub.f32 %v30006_v3, %v32648_v46 }
0x1751   :  { %11330 = vmatpush1.bf16.msra.mxu0 %v26696_v14  ;;  %v11468_v14 = vand.u32 4294901760, %v11402_v34  ;;  %v32639_v13 = vand.u32 4294901760, %v30034_v19  ;;  %v32636_v60 = vand.u32 4294901760, %v30041_v7 }
0x1752   :  { %11331 = vmatprep.subr.bf16.mxu0 %v26701_v28  ;;  %v11471_v28 = vand.u32 4294901760, %v11403_v39  ;;  %33134 = vst [vmem:[#allocation68_spill] sm:$0xff] %v30222_v26 }
0x1753   :  { %v30201_v61 = vpack.c.bf16 %v11468_v14, %v11465_v58  ;;  %v30205_v38 = vsub.f32 %v11402_v34, %v11468_v14  ;;  %v11539_v34 = vsub.f32 %v30011_v10, %v32645_v51  ;;  %v11546_v14 = vsub.f32 %v30028_v56, %v32642_v48 }
0x1754   :  { %v30207_v27 = vsub.f32 %v11403_v39, %v11471_v28  ;;  %v11533_v39 = vand.u32 4294901760, %v11532_v54 }
0x1755   :  { %11332 = vmatpush1.bf16.msra.mxu0 %v26699_v41  ;;  %v11474_v41 = vand.u32 4294901760, %v11404_v8  ;;  %33132 = vst [vmem:[#allocation58_spill] sm:$0xff] %v30201_v61 }
0x1756   :  { %25184 = vmatprep.subr.bf16.mxu0 %v32942_v4 }
0x1757   :  { %v30209_v37 = vsub.f32 %v11404_v8, %v11474_v41  ;;  %v30214_v23 = vpack.c.bf16 %v11474_v41, %v11471_v28  ;;  %v11540_v8 = vand.u32 4294901760, %v11539_v34  ;;  %v11553_v28 = vsub.f32 %v30034_v19, %v32639_v13 }
0x1758   :  { %11338 = vmatmul.mubr.bf16.vlgmr.msra.gmra.mrb[32].mxu0 %v11159_v49  ;;  %v11398_v49 = vld [vmem:[%s33120_s0 + $0x78] sm:$0xff]  ;;  %v11547_v41 = vand.u32 4294901760, %v11546_v14 }
0x1759   :  { %25186 = vmatpush1.bf16.msra.mxu0 %v30116_v40  ;;  %v11456_v18 = vand.u32 4294901760, %v11398_v49  ;;  %33133 = vst [vmem:[#allocation67_spill] sm:$0xff] %v30214_v23  ;;  %v30245_v58 = vpack.c.bf16 %v11540_v8, %v11533_v39  ;;  %v11554_v36 = vand.u32 4294901760, %v11553_v28  ;;  %v32638_v39 = vand.u32 4294901760, %v30170_v44 }
0x175a   :  { %25187 = vmatprep.subr.bf16.mxu0 %v32942_v4  ;;  %v32640_v8 = vand.u32 4294901760, %v30172_v63 }
0x175b   :  { %v30165_v31 = vpack.c.bf16 %v11456_v18, %v11453_v47  ;;  %v30190_v42 = vsub.f32 %v11398_v49, %v11456_v18  ;;  %v11518_v49 = vsub.f32 %v29990_v17, %v32654_v2  ;;  %v11525_v47 = vsub.f32 %v30001_v53, %v32651_v59 }
0x175c   :  { %v11574_v28 = vsub.f32 %v30170_v44, %v32638_v39 }
0x175d   :  { %25189 = vmatpush1.bf16.msra.mxu0 %v30124_v35  ;;  %33130 = vst [vmem:[#allocation56_spill] sm:$0xff] %v30165_v31  ;;  %v11519_v18 = vand.u32 4294901760, %v11518_v49  ;;  %v11526_v25 = vand.u32 4294901760, %v11525_v47  ;;  %v32637_v49 = vand.u32 4294901760, %v30047_v16  ;;  %v30255_v47 = vpack.c.bf16 %v11554_v36, %v11547_v41 }
0x175e   :  { %25190 = vmatprep.subr.bf16.mxu0 %v32942_v4  ;;  %v11581_v41 = vsub.f32 %v30172_v63, %v32640_v8  ;;  %v11575_v36 = vand.u32 4294901760, %v11574_v28  ;;  %v32644_v8 = vand.u32 4294901760, %v30181_v9  ;;  %v32646_v28 = vand.u32 4294901760, %v30183_v24 }
0x175f   :  { %v30235_v29 = vpack.c.bf16 %v11526_v25, %v11519_v18  ;;  %v11560_v18 = vsub.f32 %v30041_v7, %v32636_v60  ;;  %v11567_v25 = vsub.f32 %v30047_v16, %v32637_v49  ;;  %v32641_v49 = vand.u32 4294901760, %v30177_v62 }
0x1760   :  { %v11582_v60 = vand.u32 4294901760, %v11581_v41 }
0x1761   :  { %25192 = vmatpush1.bf16.msra.mxu0 %v30132_v55  ;;  %v11561_v54 = vand.u32 4294901760, %v11560_v18  ;;  %v11568_v34 = vand.u32 4294901760, %v11567_v25  ;;  %v32643_v18 = vand.u32 4294901760, %v30179_v12 }
0x1762   :  { %25193 = vmatprep.subr.bf16.mxu0 %v32942_v4  ;;  %v30275_v25 = vpack.c.bf16 %v11582_v60, %v11575_v36  ;;  %v11602_v60 = vsub.f32 %v30181_v9, %v32644_v8  ;;  %v11609_v36 = vsub.f32 %v30183_v24, %v32646_v28  ;;  %v32650_v28 = vand.u32 4294901760, %v30193_v21 }
0x1763   :  { %v30265_v14 = vpack.c.bf16 %v11568_v34, %v11561_v54  ;;  %v11588_v54 = vsub.f32 %v30177_v62, %v32641_v49  ;;  %v11595_v34 = vsub.f32 %v30179_v12, %v32643_v18  ;;  %v32647_v18 = vand.u32 4294901760, %v30188_v43 }
0x1764   :  { %v11603_v49 = vand.u32 4294901760, %v11602_v60  ;;  %v11610_v48 = vand.u32 4294901760, %v11609_v36  ;;  %v32652_v60 = vand.u32 4294901760, %v30195_v52 }
0x1765   :  { %25195 = vmatpush1.bf16.msra.mxu0 %v30140_v50  ;;  %v11589_v39 = vand.u32 4294901760, %v11588_v54  ;;  %v11596_v13 = vand.u32 4294901760, %v11595_v34  ;;  %v32649_v54 = vand.u32 4294901760, %v30190_v42 }
0x1766   :  { %25196 = vmatprep.subr.bf16.mxu0 %v32942_v4  ;;  %v30295_v34 = vpack.c.bf16 %v11610_v48, %v11603_v49  ;;  %v11630_v48 = vsub.f32 %v30193_v21, %v32650_v28  ;;  %v11637_v49 = vsub.f32 %v30195_v52, %v32652_v60  ;;  %v32656_v60 = vand.u32 4294901760, %v30207_v27 }
0x1767   :  { %v30285_v41 = vpack.c.bf16 %v11596_v13, %v11589_v39  ;;  %v11616_v13 = vsub.f32 %v30188_v43, %v32647_v18  ;;  %v11623_v39 = vsub.f32 %v30190_v42, %v32649_v54  ;;  %v32653_v54 = vand.u32 4294901760, %v30203_v57 }
0x1768   :  { %v11631_v18 = vand.u32 4294901760, %v11630_v48  ;;  %v11638_v46 = vand.u32 4294901760, %v11637_v49  ;;  %v32661_v48 = vand.u32 4294901760, %v30209_v37 }
0x1769   :  { %25198 = vmatpush1.bf16.msra.mxu0 %v30147_v1  ;;  %v11617_v8 = vand.u32 4294901760, %v11616_v13  ;;  %v11624_v51 = vand.u32 4294901760, %v11623_v39  ;;  %v32655_v13 = vand.u32 4294901760, %v30205_v38 }
0x176a   :  { %25199 = vmatprep.subr.bf16.mxu0 %v32942_v4  ;;  %v30315_v39 = vpack.c.bf16 %v11638_v46, %v11631_v18  ;;  %v11658_v46 = vsub.f32 %v30207_v27, %v32656_v60  ;;  %v11665_v18 = vsub.f32 %v30209_v37, %v32661_v48 }
0x176b   :  { %v30305_v36 = vpack.c.bf16 %v11624_v51, %v11617_v8  ;;  %v11644_v51 = vsub.f32 %v30203_v57, %v32653_v54  ;;  %v11651_v8 = vsub.f32 %v30205_v38, %v32655_v13  ;;  %v32659_v13 = vand.u32 4294901760, %v30211_v6 }
0x176c   :  { %v11659_v54 = vand.u32 4294901760, %v11658_v46  ;;  %v11666_v2 = vand.u32 4294901760, %v11665_v18 }
0x176d   :  { %25201 = vmatpush1.bf16.msra.mxu0 %v30153_v22  ;;  %v11645_v28 = vand.u32 4294901760, %v11644_v51  ;;  %v11652_v59 = vand.u32 4294901760, %v11651_v8  ;;  %v32660_v51 = vand.u32 4294901760, %v30216_v0 }
0x176e   :  { %25202 = vmatprep.subr.bf16.mxu0 %v32942_v4  ;;  %v30335_v8 = vpack.c.bf16 %v11666_v2, %v11659_v54 }
0x176f   :  { %v30325_v49 = vpack.c.bf16 %v11652_v59, %v11645_v28  ;;  %v11672_v59 = vsub.f32 %v30211_v6, %v32659_v13  ;;  %v11679_v28 = vsub.f32 %v30216_v0, %v32660_v51 }
0x1771   :  { %25204 = vmatpush1.bf16.msra.mxu0 %v30159_v5  ;;  %v11673_v60 = vand.u32 4294901760, %v11672_v59  ;;  %v11680_v32 = vand.u32 4294901760, %v11679_v28 }
0x1772   :  { %25205 = vmatprep.subr.bf16.mxu0 %v32942_v4 }
0x1773   :  { %v30343_v20 = vpack.c.bf16 %v11680_v32, %v11673_v60 }
0x1775   :  { %25207 = vmatpush1.bf16.msra.mxu0 %v30165_v31 }
0x1776   :  { %25208 = vmatprep.subr.bf16.mxu0 %v32942_v4 }
0x1779   :  { %25210 = vmatpush1.bf16.msra.mxu0 %v30175_v33 }
0x177a   :  { %25211 = vmatprep.subr.bf16.mxu0 %v32942_v4 }
0x177d   :  { %25213 = vmatpush1.bf16.msra.mxu0 %v30201_v61 }
0x177e   :  { %25214 = vmatprep.subr.bf16.mxu0 %v32942_v4 }
0x1781   :  { %25216 = vmatpush1.bf16.msra.mxu0 %v30214_v23 }
0x1782   :  { %25217 = vmatprep.subr.bf16.mxu0 %v32942_v4 }
0x1785   :  { %25219 = vmatpush1.bf16.msra.mxu0 %v30222_v26 }
0x1786   :  { %25220 = vmatprep.subr.bf16.mxu0 %v32942_v4 }
0x182b   :  { %v30369_v59 = vpop.f32.mrb[32].mxu0 }
0x182c   :  { %33135 = vst [vmem:[#allocation69_spill] sm:$0xff] %v30369_v59  ;;  %v11348_v32 = vrot.slane %v30369_v59, 4  ;;  %v11364_v60 = vmul.f32 %v30369_v59, %v30369_v59  ;;  %v30374_v54 = vpop.f32.mrb[33].mxu0 }
0x182d   :  { %33136 = vst [vmem:[#allocation70_spill] sm:$0xff] %v30374_v54  ;;  %v11355_v28 = vsel %vm11354_vm8, %v30374_v54, 0.0  ;;  %v11365_v51 = vmul.f32 %v30374_v54, %v30374_v54  ;;  %v11343_v48 = vpop.f32.mrb[34].mxu0 }
0x182e   :  { %v11349_v2 = vadd.f32 %v11348_v32, %v30369_v59  ;;  %v11366_v13 = vrot.slane %v11364_v60, 4  ;;  %v11356_v18 = vrot.slane %v11355_v28, 4  ;;  %v11344_v46 = vpop.f32.mrb[35].mxu0 }
0x182f   :  { %v11372_v15 = vsel %vm11354_vm8, %v11365_v51, 0.0 }
0x1830   :  { %v11350_v11 = vrot.slane %v11349_v2, 2  ;;  %v11367_v45 = vadd.f32 %v11366_v13, %v11364_v60  ;;  %v11357_v30 = vadd.f32 %v11356_v18, %v11355_v28  ;;  %v11373_v26 = vrot.slane %v11372_v15, 4  ;;  %v33155_v28 = vld [vmem:[#allocation62_spill] sm:$0xff] }
0x1832   :  { %v11351_v23 = vadd.f32 %v11350_v11, %v11349_v2  ;;  %v11368_v61 = vrot.slane %v11367_v45, 2  ;;  %v11358_v33 = vrot.slane %v11357_v30, 2  ;;  %v11374_v31 = vadd.f32 %v11373_v26, %v11372_v15 }
0x1833   :  { %v33141_v26 = vpack.c.bf16 %v30172_v63, %v30170_v44 }
0x1834   :  { %v11352_v5 = vrot.slane %v11351_v23, 1  ;;  %v11369_v22 = vadd.f32 %v11368_v61, %v11367_v45  ;;  %v11359_v1 = vadd.f32 %v11358_v33, %v11357_v30  ;;  %v11375_v54 = vrot.slane %v11374_v31, 2 }
0x1835   :  { %v33137_v33 = vpack.c.bf16 %v30001_v53, %v29990_v17  ;;  %v33138_v61 = vpack.c.bf16 %v30011_v10, %v30006_v3 }
0x1836   :  { %v11353_v48 = vadd.f32 %v11352_v5, %v11351_v23  ;;  %v11370_v50 = vrot.slane %v11369_v22, 1  ;;  %v11360_v32 = vrot.slane %v11359_v1, 1  ;;  %v11376_v59 = vadd.f32 %v11375_v54, %v11374_v31  ;;  %v33153_v54 = vld [vmem:[#allocation60_spill] sm:$0xff] }
0x1837   :  { %v33140_v23 = vpack.c.bf16 %v30047_v16, %v30041_v7 }
0x1838   :  { %v11371_v55 = vadd.f32 %v11370_v50, %v11369_v22  ;;  %v11361_v46 = vadd.f32 %v11360_v32, %v11359_v1  ;;  %v11377_v35 = vrot.slane %v11376_v59, 1  ;;  %v11362_v51 = vmul.f32 0.125, %v11353_v48  ;;  %v33156_v48 = vld [vmem:[#allocation56_spill] sm:$0xff]  ;;  %v33157_v32 = vld [vmem:[#allocation57_spill] sm:$0xff] }
0x183a   :  { %v11379_v40 = vmul.f32 0.125, %v11371_v55  ;;  %v11378_v13 = vadd.f32 %v11377_v35, %v11376_v59  ;;  %v11363_v18 = vmul.f32 0.125, %v11361_v46  ;;  %v33154_v59 = vld [vmem:[#allocation61_spill] sm:$0xff]  ;;  %v33158_v46 = vld [vmem:[#allocation58_spill] sm:$0xff] }
0x183c   :  { %v11380_v60 = vmul.f32 0.125, %v11378_v13  ;;  %v11381_v11 = vsel %vm306_vm0, %v11362_v51, %v11379_v40  ;;  %v33159_v51 = vld [vmem:[#allocation67_spill] sm:$0xff]  ;;  %v33160_v13 = vld [vmem:[#allocation68_spill] sm:$0xff] }
0x183d   :  { %v30383_v2 = vand.u32 4294901760, %v11381_v11 }
0x183e   :  { %v11382_v45 = vsel %vm306_vm0, %v11363_v18, %v11380_v60  ;;  %v33161_v18 = vand.u32 4294901760, %v29990_v17  ;;  %v33162_v60 = vand.u32 4294901760, %v30001_v53  ;;  %v33165_v17 = vand.u32 4294901760, %v30028_v56 }
0x183f   :  { %v11408_v30 = vsel %vm11354_vm8, %v11382_v45, 0  ;;  %v30388_v15 = vsub.f32 %v11381_v11, %v30383_v2  ;;  %v33163_v45 = vand.u32 4294901760, %v30006_v3  ;;  %v33166_v53 = vand.u32 4294901760, %v30034_v19 }
0x1840   :  { %v30390_v5 = vand.u32 4294901760, %v11408_v30  ;;  %v25329_v11 = vpack.c.bf16 %v33162_v60, %v33161_v18  ;;  %v33169_v3 = vand.u32 4294901760, %v30170_v44  ;;  %v33175_v44 = vand.u32 4294901760, %v30188_v43 }
0x1841   :  { %v11506_v50 = vand.u32 4294901760, %v30388_v15 }
0x1842   :  { %v11499_v55 = vsub.f32 %v11408_v30, %v30390_v5  ;;  %v33164_v30 = vand.u32 4294901760, %v30011_v10  ;;  %v33170_v10 = vand.u32 4294901760, %v30172_v63  ;;  %v33176_v63 = vand.u32 4294901760, %v30190_v42 }
0x1843   :  { %v11507_v40 = vsub.f32 %v30388_v15, %v11506_v50 }
0x1844   :  { %v11500_v35 = vand.u32 4294901760, %v11499_v55 }
0x1845   :  { %v11508_v31 = vand.u32 4294901760, %v11507_v40 }
0x1846   :  { %v11501_v1 = vsub.f32 %v11499_v55, %v11500_v35 }
0x1848   :  { %v11502_v22 = vand.u32 4294901760, %v11501_v1  ;;  %v25341_v1 = vpack.c.bf16 %v33170_v10, %v33169_v3  ;;  %v33186_v10 = vmov 0.0  }
0x184a   :  { %11503 = vmatprep.mubr.f32.mxu0 %v11502_v22 }
0x184b   :  { %11509 = vmatmul.mubr.f32.vlgmr.msra.gmra.mrb[30].mxu0 %v11508_v31 }
0x184c   :  { %25222 = vmatpush1.bf16.msra.mxu0 %v30235_v29  ;;  %11699 = vmatprep.mubr.f32.mxu0 %v30390_v5  ;;  %v33142_v29 = vpack.c.bf16 %v30179_v12, %v30177_v62 }
0x184d   :  { %25223 = vmatprep.subr.bf16.mxu0 %v32942_v4 }
0x1850   :  { %25225 = vmatpush1.bf16.msra.mxu0 %v30245_v58  ;;  %v33143_v58 = vpack.c.bf16 %v30183_v24, %v30181_v9 }
0x1851   :  { %25226 = vmatprep.subr.bf16.mxu0 %v32942_v4 }
0x1854   :  { %25228 = vmatpush1.bf16.msra.mxu0 %v30255_v47  ;;  %v33144_v47 = vpack.c.bf16 %v30190_v42, %v30188_v43  ;;  %v33181_v43 = vand.u32 4294901760, %v30207_v27  ;;  %v33182_v42 = vand.u32 4294901760, %v30209_v37 }
0x1855   :  { %25229 = vmatprep.subr.bf16.mxu0 %v32942_v4 }
0x1858   :  { %25231 = vmatpush1.bf16.msra.mxu0 %v30265_v14  ;;  %v33145_v14 = vpack.c.bf16 %v30195_v52, %v30193_v21 }
0x1859   :  { %25232 = vmatprep.subr.bf16.mxu0 %v32942_v4 }
0x185c   :  { %25234 = vmatpush1.bf16.msra.mxu0 %v30275_v25  ;;  %v33146_v25 = vpack.c.bf16 %v30205_v38, %v30203_v57 }
0x185d   :  { %25235 = vmatprep.subr.bf16.mxu0 %v32942_v4 }
0x1860   :  { %25237 = vmatpush1.bf16.msra.mxu0 %v30285_v41  ;;  %v33147_v41 = vpack.c.bf16 %v30209_v37, %v30207_v27 }
0x1861   :  { %25238 = vmatprep.subr.bf16.mxu0 %v32942_v4 }
0x1864   :  { %25240 = vmatpush1.bf16.msra.mxu0 %v30295_v34  ;;  %v33148_v34 = vpack.c.bf16 %v30216_v0, %v30211_v6 }
0x1865   :  { %25241 = vmatprep.subr.bf16.mxu0 %v32942_v4 }
0x1868   :  { %25243 = vmatpush1.bf16.msra.mxu0 %v30305_v36  ;;  %v33149_v36 = vld [vmem:[#allocation72_spill] sm:$0xff] }
0x1869   :  { %25244 = vmatprep.subr.bf16.mxu0 %v32942_v4 }
0x186c   :  { %25246 = vmatpush1.bf16.msra.mxu0 %v30315_v39  ;;  %v33150_v39 = vld [vmem:[#allocation75_spill] sm:$0xff] }
0x186d   :  { %25247 = vmatprep.subr.bf16.mxu0 %v32942_v4 }
0x1870   :  { %25249 = vmatpush1.bf16.msra.mxu0 %v30325_v49  ;;  %v33151_v49 = vld [vmem:[#allocation74_spill] sm:$0xff] }
0x1871   :  { %25250 = vmatprep.subr.bf16.mxu0 %v32942_v4 }
0x1874   :  { %25252 = vmatpush1.bf16.msra.mxu0 %v30335_v8  ;;  %v33152_v8 = vld [vmem:[#allocation76_spill] sm:$0xff] }
0x1875   :  { %25253 = vmatprep.subr.bf16.mxu0 %v32942_v4 }
0x1878   :  { %25255 = vmatpush1.bf16.msra.mxu0 %v30343_v20  ;;  %v33139_v20 = vpack.c.bf16 %v30034_v19, %v30028_v56  ;;  %v33171_v56 = vand.u32 4294901760, %v30177_v62  ;;  %v33172_v19 = vand.u32 4294901760, %v30179_v12  ;;  %v33177_v62 = vand.u32 4294901760, %v30193_v21 }
0x1879   :  { %25256 = vmatprep.subr.bf16.mxu0 %v32942_v4  ;;  %v33178_v12 = vand.u32 4294901760, %v30195_v52  ;;  %v33183_v21 = vand.u32 4294901760, %v30211_v6  ;;  %v33184_v52 = vand.u32 4294901760, %v30216_v0  ;;  %v12168_v6 = vld [vmem:[%s33185_s21] sm:$0xff]  ;;  %v12170_v0 = vld [vmem:[%s33185_s21 + $0x10] sm:$0xff] }
0x187a   :  { %v25344_v22 = vpack.c.bf16 %v33172_v19, %v33171_v56 }
0x187b   :  { %11701 = vmatmul.mubr.f32.vlgmr.msra.gmra.mrb[30].mxu0 %v30383_v2 }
0x187c   :  { %25258 = vmatpush1.bf16.msra.mxu0 %v33137_v33  ;;  %11820 = vmatprep.mubr.f32.mxu0 %v11499_v55  ;;  %v25332_v55 = vpack.c.bf16 %v33164_v30, %v33163_v45  ;;  %v25350_v33 = vpack.c.bf16 %v33176_v63, %v33175_v44 }
0x187d   :  { %25259 = vmatprep.subr.bf16.mxu0 %v32942_v4 }
0x1880   :  { %25261 = vmatpush1.bf16.msra.mxu0 %v33138_v61  ;;  %v25353_v61 = vpack.c.bf16 %v33178_v12, %v33177_v62 }
0x1881   :  { %25262 = vmatprep.subr.bf16.mxu0 %v32942_v4 }
0x1884   :  { %25264 = vmatpush1.bf16.msra.mxu0 %v33139_v20 }
0x1885   :  { %25265 = vmatprep.subr.bf16.mxu0 %v32942_v4 }
0x1888   :  { %25267 = vmatpush1.bf16.msra.mxu0 %v33140_v23  ;;  %v25359_v23 = vpack.c.bf16 %v33182_v42, %v33181_v43  ;;  %v12753_v43 = vld [vmem:[%s33187_s18] sm:$0xf] }
0x1889   :  { %25268 = vmatprep.subr.bf16.mxu0 %v32942_v4  ;;  %v12676_v42 = vld [vmem:[%s33188_s22] sm:$0x3] }
0x188c   :  { %25270 = vmatpush1.bf16.msra.mxu0 %v33141_v26  ;;  %v25362_v26 = vpack.c.bf16 %v33184_v52, %v33183_v21  ;;  %v12755_v21 = vsel %vm5443_vm13, %v12753_v43, 0 }
0x188d   :  { %25271 = vmatprep.subr.bf16.mxu0 %v32942_v4 }
0x1890   :  { %25273 = vmatpush1.bf16.msra.mxu0 %v33142_v29  ;;  %v12181_v29 = vand.u32 4294901760, %v12170_v0 }
0x1891   :  { %25274 = vmatprep.subr.bf16.mxu0 %v32942_v4 }
0x1894   :  { %25276 = vmatpush1.bf16.msra.mxu0 %v33143_v58 }
0x1895   :  { %25277 = vmatprep.subr.bf16.mxu0 %v32942_v4 }
0x1898   :  { %25279 = vmatpush1.bf16.msra.mxu0 %v33144_v47 }
0x1899   :  { %25280 = vmatprep.subr.bf16.mxu0 %v32942_v4 }
0x189c   :  { %25282 = vmatpush1.bf16.msra.mxu0 %v33145_v14 }
0x189d   :  { %25283 = vmatprep.subr.bf16.mxu0 %v32942_v4 }
0x18a0   :  { %25285 = vmatpush1.bf16.msra.mxu0 %v33146_v25 }
0x18a1   :  { %25286 = vmatprep.subr.bf16.mxu0 %v32942_v4 }
0x18a4   :  { %25288 = vmatpush1.bf16.msra.mxu0 %v33147_v41 }
0x18a5   :  { %25289 = vmatprep.subr.bf16.mxu0 %v32942_v4 }
0x18a8   :  { %25291 = vmatpush1.bf16.msra.mxu0 %v33148_v34  ;;  %v12274_v34 = vsub.f32 %v12170_v0, %v12181_v29 }
0x18a9   :  { %25292 = vmatprep.subr.bf16.mxu0 %v32942_v4 }
0x18ab   :  { %11823 = vmatmul.mubr.f32.vlgmr.msra.gmra.mrb[30].mxu0 %v30388_v15  ;;  %v33167_v15 = vand.u32 4294901760, %v30041_v7  ;;  %v33173_v7 = vand.u32 4294901760, %v30181_v9  ;;  %v33179_v9 = vand.u32 4294901760, %v30203_v57  ;;  %v12169_v57 = vld [vmem:[%s33185_s21 + $0x8] sm:$0xff] }
0x18ac   :  { %25294 = vmatpush1.bf16.msra.mxu0 %v33149_v36  ;;  %11919 = vmatprep.mubr.f32.mxu0 %v11500_v35  ;;  %v25335_v35 = vpack.c.bf16 %v33166_v53, %v33165_v17  ;;  %v12175_v27 = vand.u32 4294901760, %v12169_v57 }
0x18ad   :  { %25295 = vmatprep.subr.bf16.mxu0 %v32942_v4 }
0x18ae   :  { %v12256_v47 = vsub.f32 %v12169_v57, %v12175_v27 }
0x18b0   :  { %25297 = vmatpush1.bf16.msra.mxu0 %v33150_v39 }
0x18b1   :  { %25298 = vmatprep.subr.bf16.mxu0 %v32942_v4 }
0x18b4   :  { %25300 = vmatpush1.bf16.msra.mxu0 %v33151_v49 }
0x18b5   :  { %25301 = vmatprep.subr.bf16.mxu0 %v32942_v4 }
0x18b8   :  { %25303 = vmatpush1.bf16.msra.mxu0 %v33152_v8 }
0x18b9   :  { %25304 = vmatprep.subr.bf16.mxu0 %v32942_v4 }
0x18bc   :  { %25306 = vmatpush1.bf16.msra.mxu0 %v33153_v54 }
0x18bd   :  { %25307 = vmatprep.subr.bf16.mxu0 %v32942_v4 }
0x18c0   :  { %25309 = vmatpush1.bf16.msra.mxu0 %v33154_v59 }
0x18c1   :  { %25310 = vmatprep.subr.bf16.mxu0 %v32942_v4 }
0x18c4   :  { %25312 = vmatpush1.bf16.msra.mxu0 %v33155_v28 }
0x18c5   :  { %25313 = vmatprep.subr.bf16.mxu0 %v32942_v4 }
0x18c8   :  { %25315 = vmatpush1.bf16.msra.mxu0 %v33156_v48 }
0x18c9   :  { %25316 = vmatprep.subr.bf16.mxu0 %v32942_v4 }
0x18cc   :  { %25318 = vmatpush1.bf16.msra.mxu0 %v33157_v32 }
0x18cd   :  { %25319 = vmatprep.subr.bf16.mxu0 %v32942_v4 }
0x18d0   :  { %25321 = vmatpush1.bf16.msra.mxu0 %v33158_v46 }
0x18d1   :  { %25322 = vmatprep.subr.bf16.mxu0 %v32942_v4 }
0x18d4   :  { %25324 = vmatpush1.bf16.msra.mxu0 %v33159_v51 }
0x18d5   :  { %25325 = vmatprep.subr.bf16.mxu0 %v32942_v4 }
0x18d8   :  { %25327 = vmatpush1.bf16.msra.mxu0 %v33160_v13 }
0x18d9   :  { %25328 = vmatprep.subr.bf16.mxu0 %v32942_v4 }
0x18db   :  { %11923 = vmatmul.mubr.f32.vlgmr.msra.gmra.mrb[30].mxu0 %v11506_v50  ;;  %v33168_v50 = vand.u32 4294901760, %v30047_v16  ;;  %v33174_v16 = vand.u32 4294901760, %v30183_v24  ;;  %v33180_v24 = vand.u32 4294901760, %v30205_v38  ;;  %v12171_v38 = vld [vmem:[%s33185_s21 + $0x18] sm:$0xff] }
0x18dc   :  { %25330 = vmatpush1.bf16.msra.mxu0 %v25329_v11  ;;  %12065 = vmatprep.mubr.f32.mxu0 %v30390_v5  ;;  %v12179_v37 = vand.u32 4294901760, %v12171_v38 }
0x18dd   :  { %25331 = vmatprep.subr.bf16.mxu0 %v32942_v4  ;;  %v25338_v40 = vpack.c.bf16 %v33168_v50, %v33167_v15  ;;  %v25347_v31 = vpack.c.bf16 %v33174_v16, %v33173_v7  ;;  %v25356_v20 = vpack.c.bf16 %v33180_v24, %v33179_v9  ;;  %v33189_v9 = vld [vmem:[#allocation54_spill] sm:$0xff] }
0x18de   :  { %v25400_v58 = vpack.c.bf16 %v12179_v37, %v12175_v27  ;;  %v12268_v14 = vsub.f32 %v12171_v38, %v12179_v37  ;;  %v33192_v38 = vld [vmem:[#allocation63_spill] sm:$0xff]  ;;  %v12824_v37 = vand.u32 4294901760, %v12755_v21 }
0x18e0   :  { %25333 = vmatpush1.bf16.msra.mxu0 %v25332_v55  ;;  %25401 = vmatprep.subr.bf16.mxu1 %v25400_v58  ;;  %v25408_v60 = vpack.c.bf16 %v12268_v14, %v12256_v47 }
0x18e1   :  { %25334 = vmatprep.subr.bf16.mxu0 %v32942_v4 }
0x18e4   :  { %25336 = vmatpush1.bf16.msra.mxu0 %v25335_v35 }
0x18e5   :  { %25337 = vmatprep.subr.bf16.mxu0 %v32942_v4 }
0x18e8   :  { %25339 = vmatpush1.bf16.msra.mxu0 %v25338_v40 }
0x18e9   :  { %25340 = vmatprep.subr.bf16.mxu0 %v32942_v4 }
0x18ec   :  { %25342 = vmatpush1.bf16.msra.mxu0 %v25341_v1 }
0x18ed   :  { %25343 = vmatprep.subr.bf16.mxu0 %v32942_v4 }
0x18f0   :  { %25345 = vmatpush1.bf16.msra.mxu0 %v25344_v22 }
0x18f1   :  { %25346 = vmatprep.subr.bf16.mxu0 %v32942_v4 }
0x18f4   :  { %25348 = vmatpush1.bf16.msra.mxu0 %v25347_v31 }
0x18f5   :  { %25349 = vmatprep.subr.bf16.mxu0 %v32942_v4 }
0x18f8   :  { %25351 = vmatpush1.bf16.msra.mxu0 %v25350_v33 }
0x18f9   :  { %25352 = vmatprep.subr.bf16.mxu0 %v32942_v4 }
0x18fc   :  { %25354 = vmatpush1.bf16.msra.mxu0 %v25353_v61 }
0x18fd   :  { %25355 = vmatprep.subr.bf16.mxu0 %v32942_v4 }
0x1900   :  { %25357 = vmatpush1.bf16.msra.mxu0 %v25356_v20 }
0x1901   :  { %25358 = vmatprep.subr.bf16.mxu0 %v32942_v4 }
0x1904   :  { %25360 = vmatpush1.bf16.msra.mxu0 %v25359_v23 }
0x1905   :  { %25361 = vmatprep.subr.bf16.mxu0 %v32942_v4 }
0x1908   :  { %25363 = vmatpush1.bf16.msra.mxu0 %v25362_v26  ;;  %v33191_v26 = vld [vmem:[#allocation55_spill] sm:$0xff] }
0x1909   :  { %25364 = vmatprep.subr.bf16.mxu0 %v32942_v4 }
0x190b   :  { %12067 = vmatmul.mubr.f32.vlgmr.msra.gmra.mrb[30].mxu0 %v30383_v2 }
0x190c   :  { %25366 = vmatpush1.bf16.msra.mxu0 %v33149_v36  ;;  %12161 = vmatprep.mubr.f32.mxu0 %v30390_v5  ;;  %v12177_v5 = vand.u32 4294901760, %v12168_v6  ;;  %v12257_v36 = vand.u32 4294901760, %v12256_v47 }
0x190d   :  { %25367 = vmatprep.subr.bf16.mxu0 %v32942_v4 }
0x190e   :  { %v25402_v25 = vpack.c.bf16 %v12181_v29, %v12177_v5  ;;  %v12262_v41 = vsub.f32 %v12168_v6, %v12177_v5  ;;  %v33193_v5 = vld [vmem:[#allocation69_spill] sm:$0xff] }
0x1910   :  { %25369 = vmatpush1.bf16.msra.mxu0 %v33150_v39  ;;  %v12269_v39 = vand.u32 4294901760, %v12268_v14  ;;  %25403 = vmatpush1.bf16.msra.mxu1 %v25402_v25  ;;  %v25410_v11 = vpack.c.bf16 %v12274_v34, %v12262_v41 }
0x1911   :  { %25370 = vmatprep.subr.bf16.mxu0 %v32942_v4 }
0x1912   :  { %v25416_v45 = vpack.c.bf16 %v12269_v39, %v12257_v36 }
0x1914   :  { %25372 = vmatpush1.bf16.msra.mxu0 %v33151_v49  ;;  %v12263_v49 = vand.u32 4294901760, %v12262_v41 }
0x1915   :  { %25373 = vmatprep.subr.bf16.mxu0 %v32942_v4 }
0x1918   :  { %25375 = vmatpush1.bf16.msra.mxu0 %v33152_v8  ;;  %v12258_v8 = vsub.f32 %v12256_v47, %v12257_v36 }
0x1919   :  { %25376 = vmatprep.subr.bf16.mxu0 %v32942_v4 }
0x191c   :  { %25378 = vmatpush1.bf16.msra.mxu0 %v33153_v54  ;;  %v12270_v54 = vsub.f32 %v12268_v14, %v12269_v39 }
0x191d   :  { %25379 = vmatprep.subr.bf16.mxu0 %v32942_v4 }
0x1920   :  { %25381 = vmatpush1.bf16.msra.mxu0 %v33154_v59  ;;  %v12264_v59 = vsub.f32 %v12262_v41, %v12263_v49 }
0x1921   :  { %25382 = vmatprep.subr.bf16.mxu0 %v32942_v4 }
0x1924   :  { %25384 = vmatpush1.bf16.msra.mxu0 %v33155_v28 }
0x1925   :  { %25385 = vmatprep.subr.bf16.mxu0 %v32942_v4 }
0x1928   :  { %25387 = vmatpush1.bf16.msra.mxu0 %v33156_v48  ;;  %v12259_v48 = vand.u32 4294901760, %v12258_v8 }
0x1929   :  { %25388 = vmatprep.subr.bf16.mxu0 %v32942_v4 }
0x192c   :  { %25390 = vmatpush1.bf16.msra.mxu0 %v33157_v32  ;;  %v12271_v32 = vand.u32 4294901760, %v12270_v54 }
0x192d   :  { %25391 = vmatprep.subr.bf16.mxu0 %v32942_v4 }
0x1930   :  { %25393 = vmatpush1.bf16.msra.mxu0 %v33158_v46  ;;  %v12265_v46 = vand.u32 4294901760, %v12264_v59 }
0x1931   :  { %25394 = vmatprep.subr.bf16.mxu0 %v32942_v4 }
0x1934   :  { %25396 = vmatpush1.bf16.msra.mxu0 %v33159_v51 }
0x1935   :  { %25397 = vmatprep.subr.bf16.mxu0 %v32942_v4 }
0x1938   :  { %25399 = vmatpush1.bf16.msra.mxu0 %v33160_v13  ;;  %v25404_v13 = vpack.c.bf16 %v12271_v32, %v12259_v48 }
0x193a   :  { %25405 = vmatprep.subr.bf16.mxu1 %v25404_v13 }
0x193b   :  { %12163 = vmatmul.mubr.f32.vlgmr.msra.gmra.mrb[30].mxu0 %v30383_v2  ;;  %v12275_v2 = vand.u32 4294901760, %v12274_v34 }
0x193d   :  { %v12276_v28 = vsub.f32 %v12274_v34, %v12275_v2  ;;  %v25418_v30 = vpack.c.bf16 %v12275_v2, %v12263_v49  ;;  %v12701_v34 = vld [vmem:[%s33190_s23] sm:$0x3] }
0x193f   :  { %v12277_v51 = vand.u32 4294901760, %v12276_v28 }
0x1941   :  { %v25406_v18 = vpack.c.bf16 %v12277_v51, %v12265_v46 }
0x1a0e   :  { %v12164_v55 = vpop.f32.mrb[30].mxu0 }
0x1a0f   :  { %v12173_v17 = vsel %vm4703_vm10, %v12164_v55, 0  ;;  %v12166_v53 = vpop.f32.mrb[31].mxu0  ;;  %vm13869_vm10 = vmor %vm307_vm1, %vm13868_vm11  ;;  %vm13880_vm11 = vsmask.f32 7452 }
0x1a10   :  { %v12244_v35 = vand.u32 4294901760, %v12173_v17 }
0x1a12   :  { %v12245_v15 = vsub.f32 %v12173_v17, %v12244_v35 }
0x1a14   :  { %v12246_v50 = vand.u32 4294901760, %v12245_v15 }
0x1a16   :  { %v12247_v40 = vsub.f32 %v12245_v15, %v12246_v50 }
0x1a18   :  { %v12248_v3 = vand.u32 4294901760, %v12247_v40 }
0x1a1a   :  { %12249 = vmatmul.mubr.f32.vlgmr.msra.gmra.mrb[18].mxu1 %v12248_v3 }
0x1a1b   :  { %25407 = vmatpush1.bf16.msra.mxu1 %v25406_v18  ;;  %12339 = vmatprep.mubr.f32.mxu1 %v33186_v10 }
0x1a1c   :  { %25409 = vmatprep.subr.bf16.mxu1 %v25408_v60 }
0x1a22   :  { %12341 = vmatmul.mubr.f32.vlgmr.msra.gmra.mrb[18].mxu1 %v12244_v35 }
0x1a23   :  { %25411 = vmatpush1.bf16.msra.mxu1 %v25410_v11  ;;  %12419 = vmatprep.mubr.f32.mxu1 %v33186_v10 }
0x1a24   :  { %25413 = vmatprep.subr.bf16.mxu1 %v25400_v58 }
0x1a2a   :  { %12422 = vmatmul.mubr.f32.vlgmr.msra.gmra.mrb[18].mxu1 %v12245_v15 }
0x1a2b   :  { %25415 = vmatpush1.bf16.msra.mxu1 %v25402_v25  ;;  %12496 = vmatprep.mubr.f32.mxu1 %v33186_v10 }
0x1a2c   :  { %25417 = vmatprep.subr.bf16.mxu1 %v25416_v45 }
0x1a32   :  { %12500 = vmatmul.mubr.f32.vlgmr.msra.gmra.mrb[18].mxu1 %v12246_v50 }
0x1a33   :  { %25419 = vmatpush1.bf16.msra.mxu1 %v25418_v30  ;;  %12582 = vmatprep.mubr.f32.mxu1 %v33186_v10 }
0x1a34   :  { %25421 = vmatprep.subr.bf16.mxu1 %v25400_v58  ;;  %v33194_v58 = vld [vmem:[#allocation70_spill] sm:$0xff] }
0x1a3a   :  { %12584 = vmatmul.mubr.f32.vlgmr.msra.gmra.mrb[18].mxu1 %v12244_v35 }
0x1a3b   :  { %25423 = vmatpush1.bf16.msra.mxu1 %v25402_v25  ;;  %12658 = vmatprep.mubr.f32.mxu1 %v33186_v10  ;;  %v12825_v25 = vsub.f32 %v12755_v21, %v12824_v37 }
0x1a3d   :  { %v12826_v49 = vand.u32 4294901760, %v12825_v25 }
0x1a3f   :  { %v12827_v28 = vsub.f32 %v12825_v25, %v12826_v49 }
0x1a41   :  { %v12828_v13 = vand.u32 4294901760, %v12827_v28 }
0x1a42   :  { %12660 = vmatmul.mubr.f32.vlgmr.msra.gmra.mrb[18].mxu1 %v12244_v35  ;;  %v13222_v35 = vld [vmem:[%s33195_s26] sm:$0xf] }
0x1a43   :  { %12823 = vmatprep.mubr.f32.mxu1 %v33186_v10  ;;  %v13224_v15 = vsel %vm5443_vm13, %v13222_v35, 0  ;;  %vm13870_vm13 = vsmask.f32 2312 }
0x1a44   :  { %v13293_v50 = vand.u32 4294901760, %v13224_v15  ;;  %vm13871_vm12 = vmor %vm13869_vm10, %vm13870_vm13 }
0x1a45   :  { %vm13873_vm1 = vmor %vm13871_vm12, %vm13872_vm7 }
0x1a46   :  { %v13294_v40 = vsub.f32 %v13224_v15, %v13293_v50  ;;  %vm13875_vm15 = vmor %vm13873_vm1, %vm13874_vm2  ;;  %vm14915_vm2 = vcmask 519168  }
0x1a47   :  { %vm13877_vm9 = vmor %vm13875_vm15, %vm13876_vm5  ;;  %vm33315_vm15 = vmmov 0   ;;  %vm33317_vm5 = vcmask 261120  }
0x1a48   :  { %v13295_v3 = vand.u32 4294901760, %v13294_v40  ;;  %vm13879_vm10 = vmor %vm13877_vm9, %vm13878_vm6  ;;  %vm33447_vm6 = vcmask 31744  }
0x1a49   :  { %vm30687_vm13 = vmor %vm13879_vm10, %vm13880_vm11 }
0x1a4a   :  { %vm33236_vm7 = vmmov %vm33234_vm4 }
0x1a4b   :  { %vm33237_vm12 = vmmov %vm33234_vm4 }
0x1a4c   :  { %vm33238_vm1 = vmmov %vm33234_vm4 }
0x1a4d   :  { %vm33364_vm9 = vmmov %vm33238_vm1 }
0x1a4e   :  { %vm33448_vm11 = vmmov %vm33447_vm6 }
0x1a4f   :  { %vm33453_vm10 = vmmov %vm33238_vm1 }
0x1b15   :  { %v12661_v1 = vpop.f32.mrb[18].mxu1 }
0x1b16   :  { %v12666_v56 = vmul.f32 %v12661_v1, %v12661_v1  ;;  %v12663_v19 = vpop.f32.mrb[19].mxu1 }
0x1b17   :  { %v12667_v22 = vmul.f32 %v12663_v19, %v12663_v19 }
0x1b18   :  { %v12670_v7 = vrot.slane %v12666_v56, 7 }
0x1b19   :  { %v12671_v16 = vrot.slane %v12667_v22, 7 }
0x1b1a   :  { %v12674_v31 = vsub.f32 %v12661_v1, %v12670_v7 }
0x1b1b   :  { %v12675_v44 = vsub.f32 %v12663_v19, %v12671_v16 }
0x1b1c   :  { %v12677_v63 = vadd.f32 1e-05, %v12674_v31 }
0x1b1d   :  { %v12678_v33 = vadd.f32 1e-05, %v12675_v44 }
0x1b1e   :  { %27040 = vrsqrt.f32 %v12677_v63 }
0x1b1f   :  { %27042 = vrsqrt.f32 %v12678_v33 }
0x1b28   :  { %v27041_v62 = vpop.eup %27040 }
0x1b29   :  { %v27043_v12 = vpop.eup %27042 }
0x1b2a   :  { %v12683_v61 = vcombine.low %v27041_v62, %v27043_v12 }
0x1b2c   :  { %v12690_v24 = vrot.slane %v12683_v61, %v33189_v9 }
0x1b2e   :  { %v12691_v20 = vcombine.high %v12690_v24, %v12690_v24 }
0x1b30   :  { %v12698_v23 = vrot.slane %v12691_v20, %v33189_v9 }
0x1b32   :  { %v12700_v52 = vmul.f32 %v12698_v23, %v12676_v42 }
0x1b34   :  { %v12706_v57 = vrot.slane %v12700_v52, %v33191_v26  ;;  %v12710_v27 = vrot.slane %v12700_v52, %v33192_v38 }
0x1b36   :  { %v12713_v6 = vmul.f32 %v12706_v57, %v12661_v1  ;;  %v12714_v0 = vmul.f32 %v12710_v27, %v12663_v19  ;;  %v12734_v29 = vmul.f32 %v12706_v57, %v33193_v5  ;;  %v12735_v47 = vmul.f32 %v12710_v27, %v33194_v58 }
0x1b37   :  { %v13296_v1 = vsub.f32 %v13294_v40, %v13295_v3 }
0x1b38   :  { %v12717_v14 = vcombine.low %v12713_v6, %v12714_v0 }
0x1b39   :  { %v13297_v56 = vand.u32 4294901760, %v13296_v1 }
0x1b3a   :  { %v12724_v41 = vrot.slane %v12717_v14, %v33189_v9 }
0x1b3c   :  { %v12731_v36 = vrot.slane %v12724_v41, %v33189_v9 }
0x1b3e   :  { %v12733_v39 = vsub.f32 %v12701_v34, %v12731_v36 }
0x1b40   :  { %v12740_v2 = vrot.slane %v12733_v39, %v33191_v26  ;;  %v12744_v8 = vrot.slane %v12733_v39, %v33192_v38  ;;  %v33198_v39 = vld [vmem:[#allocation59_spill] sm:$0xff] }
0x1b42   :  { %v12747_v54 = vadd.f32 %v12740_v2, %v12734_v29  ;;  %v12748_v59 = vadd.f32 %v12744_v8, %v12735_v47  ;;  %v33197_v29 = vmov 0  }
0x1b44   :  { %v12749_v48 = vmax.f32 %v12747_v54, 0.0  ;;  %v12750_v32 = vmax.f32 %v12748_v59, 0.0 }
0x1b46   :  { %12751 = vst [vmem:[%s27522_s20] sm:$0xff] %v12749_v48  ;;  %12752 = vst.msk [vmem:[%s27522_s20 + $0x8] sm:$0xff] %vm11354_vm8, %v12750_v32  ;;  %v12757_v46 = vand.u32 4294901760, %v12750_v32  ;;  %v12759_v51 = vand.u32 4294901760, %v12749_v48  ;;  %s33196_s20 = sld [smem:[#allocation39_spill]] }
0x1b48   :  { %12758 = vmatprep.subr.mxu1 %v12757_v46  ;;  %v12836_v18 = vsub.f32 %v12750_v32, %v12757_v46  ;;  %v12842_v60 = vsub.f32 %v12749_v48, %v12759_v51 }
0x1b49   :  { %12760 = vmatpush1.msra.mxu1 %v12759_v51 }
0x1b4a   :  { %12829 = vmatmul.mubr.f32.vlgmr.msra.gmra.mrb[20].mxu1 %v12828_v13  ;;  %v12837_v11 = vand.u32 4294901760, %v12836_v18  ;;  %v12843_v45 = vand.u32 4294901760, %v12842_v60 }
0x1b4b   :  { %12909 = vmatprep.mubr.f32.mxu1 %v33186_v10 }
0x1b4c   :  { %v12838_v30 = vsub.f32 %v12836_v18, %v12837_v11  ;;  %v12844_v55 = vsub.f32 %v12842_v60, %v12843_v45  ;;  %v26702_v19 = vld [vmem:[%s33196_s20 + $0x120] ss:$12 sps:$4 sm:$0xff]   ;;  %v26704_v22 = vld [vmem:[%s33196_s20 + $0x124] ss:$12 sps:$4 sm:$0xff]   ;;  %v26707_v7 = vld [vmem:[%s33196_s20 + $0x13c] ss:$12 sps:$4 sm:$0xff]  }
0x1b4d   :  { %v26705_v16 = vld [vmem:[%s33196_s20 + $0x138] ss:$12 sps:$4 sm:$0xff]   ;;  %v26710_v31 = vld [vmem:[%s33196_s20 + $0x154] ss:$12 sps:$4 sm:$0xff]   ;;  %v26708_v44 = vld [vmem:[%s33196_s20 + $0x150] ss:$12 sps:$4 sm:$0xff]  }
0x1b4e   :  { %v12839_v17 = vand.u32 4294901760, %v12838_v30  ;;  %v12845_v53 = vand.u32 4294901760, %v12844_v55  ;;  %v26713_v63 = vld [vmem:[%s33196_s20 + $0x16c] ss:$12 sps:$4 sm:$0xff]   ;;  %v26711_v33 = vld [vmem:[%s33196_s20 + $0x168] ss:$12 sps:$4 sm:$0xff]  }
0x1b4f   :  { %v26716_v62 = vld [vmem:[%s33196_s20 + $0x184] ss:$12 sps:$4 sm:$0xff]   ;;  %v26714_v12 = vld [vmem:[%s33196_s20 + $0x180] ss:$12 sps:$4 sm:$0xff]   ;;  %v26719_v61 = vld [vmem:[%s33196_s20 + $0x19c] ss:$12 sps:$4 sm:$0xff]  }
0x1b50   :  { %12840 = vmatprep.subr.mxu1 %v12839_v17  ;;  %v26717_v24 = vld [vmem:[%s33196_s20 + $0x198] ss:$12 sps:$4 sm:$0xff]   ;;  %v26722_v20 = vld [vmem:[%s33196_s20 + $0x1b4] ss:$12 sps:$4 sm:$0xff]   ;;  %v26720_v43 = vld [vmem:[%s33196_s20 + $0x1b0] ss:$12 sps:$4 sm:$0xff]  }
0x1b51   :  { %12846 = vmatpush1.msra.mxu1 %v12845_v53  ;;  %v26725_v42 = vld [vmem:[%s33196_s20 + $0x1cc] ss:$12 sps:$4 sm:$0xff]   ;;  %v26723_v23 = vld [vmem:[%s33196_s20 + $0x1c8] ss:$12 sps:$4 sm:$0xff]   ;;  %v26728_v21 = vld [vmem:[%s33196_s20 + $0x1e4] ss:$12 sps:$4 sm:$0xff]  }
0x1b52   :  { %12911 = vmatmul.mubr.f32.vlgmr.msra.gmra.mrb[20].mxu1 %v12824_v37  ;;  %12919 = vmatprep.subr.mxu1 %v12836_v18  ;;  %v26726_v52 = vld [vmem:[%s33196_s20 + $0x1e0] ss:$12 sps:$4 sm:$0xff]   ;;  %v26731_v57 = vld [vmem:[%s33196_s20 + $0x1fc] ss:$12 sps:$4 sm:$0xff]   ;;  %v26729_v27 = vld [vmem:[%s33196_s20 + $0x1f8] ss:$12 sps:$4 sm:$0xff]  }
0x1b53   :  { %12922 = vmatpush1.msra.mxu1 %v12842_v60  ;;  %12985 = vmatprep.mubr.f32.mxu1 %v33186_v10  ;;  %v26732_v6 = vld [vmem:[%s33196_s20 + $0x210] ss:$12 sps:$4 sm:$0xff]   ;;  %v26737_v0 = vld [vmem:[%s33196_s20 + $0x22c] ss:$12 sps:$4 sm:$0xff]   ;;  %v26735_v5 = vld [vmem:[%s33196_s20 + $0x228] ss:$12 sps:$4 sm:$0xff]  }
0x1b54   :  { %12995 = vmatprep.subr.mxu1 %v12757_v46 }
0x1b5a   :  { %12988 = vmatmul.mubr.f32.vlgmr.msra.gmra.mrb[20].mxu1 %v12825_v25 }
0x1b5b   :  { %12997 = vmatpush1.msra.mxu1 %v12759_v51  ;;  %13060 = vmatprep.mubr.f32.mxu1 %v33186_v10 }
0x1b5c   :  { %13073 = vmatprep.subr.mxu1 %v12837_v11 }
0x1b62   :  { %13064 = vmatmul.mubr.f32.vlgmr.msra.gmra.mrb[20].mxu1 %v12826_v49 }
0x1b63   :  { %13077 = vmatpush1.msra.mxu1 %v12843_v45  ;;  %13140 = vmatprep.mubr.f32.mxu1 %v33186_v10 }
0x1b64   :  { %13149 = vmatprep.subr.mxu1 %v12757_v46 }
0x1b6a   :  { %13142 = vmatmul.mubr.f32.vlgmr.msra.gmra.mrb[20].mxu1 %v12824_v37 }
0x1b6b   :  { %13151 = vmatpush1.msra.mxu1 %v12759_v51  ;;  %13214 = vmatprep.mubr.f32.mxu1 %v33186_v10 }
0x1b6c   :  { %13227 = vmatprep.subr.mxu1 %v12757_v46 }
0x1b72   :  { %13216 = vmatmul.mubr.f32.vlgmr.msra.gmra.mrb[20].mxu1 %v12824_v37  ;;  %v26734_v37 = vld [vmem:[%s33196_s20 + $0x214] ss:$12 sps:$4 sm:$0xff]  }
0x1b73   :  { %13229 = vmatpush1.msra.mxu1 %v12759_v51  ;;  %13292 = vmatprep.mubr.f32.mxu1 %v33186_v10 }
0x1b74   :  { %13309 = vmatprep.subr.mxu1 %v12839_v17 }
0x1b76   :  { %13298 = vmatmul.mubr.f32.vlgmr.msra.gmra.mrb[22].mxu1 %v13297_v56 }
0x1b77   :  { %13315 = vmatpush1.msra.mxu1 %v12845_v53  ;;  %13378 = vmatprep.mubr.f32.mxu1 %v33186_v10 }
0x1b78   :  { %13388 = vmatprep.subr.mxu1 %v12836_v18 }
0x1b7e   :  { %13380 = vmatmul.mubr.f32.vlgmr.msra.gmra.mrb[22].mxu1 %v13293_v50 }
0x1b7f   :  { %13391 = vmatpush1.msra.mxu1 %v12842_v60  ;;  %13454 = vmatprep.mubr.f32.mxu1 %v33186_v10 }
0x1b80   :  { %13464 = vmatprep.subr.mxu1 %v12757_v46 }
0x1b86   :  { %13457 = vmatmul.mubr.f32.vlgmr.msra.gmra.mrb[22].mxu1 %v13294_v40 }
0x1b87   :  { %13466 = vmatpush1.msra.mxu1 %v12759_v51  ;;  %13529 = vmatprep.mubr.f32.mxu1 %v33186_v10 }
0x1b88   :  { %13542 = vmatprep.subr.mxu1 %v12837_v11 }
0x1b8e   :  { %13533 = vmatmul.mubr.f32.vlgmr.msra.gmra.mrb[22].mxu1 %v13295_v3 }
0x1b8f   :  { %13546 = vmatpush1.msra.mxu1 %v12843_v45  ;;  %13609 = vmatprep.mubr.f32.mxu1 %v33186_v10 }
0x1b90   :  { %13618 = vmatprep.subr.mxu1 %v12757_v46 }
0x1b96   :  { %13611 = vmatmul.mubr.f32.vlgmr.msra.gmra.mrb[22].mxu1 %v13293_v50 }
0x1b97   :  { %13620 = vmatpush1.msra.mxu1 %v12759_v51  ;;  %13683 = vmatprep.mubr.f32.mxu1 %v33186_v10 }
0x1b98   :  { %14168 = vmatprep.subr.bf16.mxu1 %v26704_v22 }
0x1b9e   :  { %13685 = vmatmul.mubr.f32.vlgmr.msra.gmra.mrb[22].mxu1 %v13293_v50  ;;  %v33199_v50 = vmov 0 }
0x1b9f   :  { %14169 = vmatpush1.bf16.msra.mxu1 %v26702_v19  ;;  %v33200_v50 = vsel %vm30656_vm14, 4294967295, %v33199_v50 }
0x1ba0   :  { %14170 = vmatprep.subr.bf16.mxu1 %v26707_v7  ;;  %33201 = vst [vmem:[#allocation71_spill] sm:$0xff] %v33200_v50 }
0x1ba3   :  { %14171 = vmatpush1.bf16.msra.mxu1 %v26705_v16 }
0x1ba4   :  { %14172 = vmatprep.subr.bf16.mxu1 %v26710_v31 }
0x1ba7   :  { %14173 = vmatpush1.bf16.msra.mxu1 %v26708_v44 }
0x1ba8   :  { %14174 = vmatprep.subr.bf16.mxu1 %v26713_v63 }
0x1bab   :  { %14175 = vmatpush1.bf16.msra.mxu1 %v26711_v33 }
0x1bac   :  { %14176 = vmatprep.subr.bf16.mxu1 %v26716_v62 }
0x1baf   :  { %14177 = vmatpush1.bf16.msra.mxu1 %v26714_v12 }
0x1bb0   :  { %14178 = vmatprep.subr.bf16.mxu1 %v26719_v61 }
0x1bb3   :  { %14179 = vmatpush1.bf16.msra.mxu1 %v26717_v24 }
0x1bb4   :  { %14180 = vmatprep.subr.bf16.mxu1 %v26722_v20 }
0x1bb7   :  { %14181 = vmatpush1.bf16.msra.mxu1 %v26720_v43 }
0x1bb8   :  { %14182 = vmatprep.subr.bf16.mxu1 %v26725_v42 }
0x1bbb   :  { %14183 = vmatpush1.bf16.msra.mxu1 %v26723_v23 }
0x1bbc   :  { %14184 = vmatprep.subr.bf16.mxu1 %v26728_v21 }
0x1bbf   :  { %14185 = vmatpush1.bf16.msra.mxu1 %v26726_v52 }
0x1bc0   :  { %14186 = vmatprep.subr.bf16.mxu1 %v26731_v57 }
0x1bc3   :  { %14187 = vmatpush1.bf16.msra.mxu1 %v26729_v27 }
0x1bc4   :  { %14188 = vmatprep.subr.bf16.mxu1 %v26734_v37 }
0x1bc7   :  { %14189 = vmatpush1.bf16.msra.mxu1 %v26732_v6  ;;  %v33203_v6 = vmov 0 }
0x1bc8   :  { %14190 = vmatprep.subr.bf16.mxu1 %v26737_v0  ;;  %v33204_v6 = vsel %vm30687_vm13, 4294967295, %v33203_v6 }
0x1bc9   :  { %33205 = vst [vmem:[#allocation73_spill] sm:$0xff] %v33204_v6 }
0x1bcb   :  { %14191 = vmatpush1.bf16.msra.mxu1 %v26735_v5 }
0x1bcc   :  { %14209 = vmatprep.subr.bf16.mxu1 %v33197_v29 }
0x1c45   :  { %v13217_v58 = vpop.f32.mrb[20].mxu1 }
0x1c46   :  { %v13219_v47 = vpop.f32.mrb[21].mxu1 }
0x1c71   :  { %v13686_v14 = vpop.f32.mrb[22].mxu1 }
0x1c72   :  { %v13691_v25 = vmax.f32 %v13217_v58, %v13686_v14  ;;  %v13688_v41 = vpop.f32.mrb[23].mxu1 }
0x1c73   :  { %v13692_v34 = vmax.f32 %v13219_v47, %v13688_v41 }
0x1c75   :  { %v13695_v36 = vcombine.low %v13691_v25, %v13692_v34 }
0x1c77   :  { %v13702_v49 = vrot.slane %v13695_v36, %v33198_v39 }
0x1c79   :  { %v13703_v2 = vcombine.high %v13702_v49, %v13702_v49  ;;  %v13710_v8 = vrot.slane %v13702_v49, %v33198_v39 }
0x1c7b   :  { %v13711_v54 = vcombine.high %v13710_v8, %v13710_v8  ;;  %v13718_v59 = vrot.slane %v13703_v2, %v33198_v39  ;;  %v13724_v28 = vpack.c.bf16 %v13710_v8, %v13710_v8  ;;  %v26738_v2 = vld [vmem:[%s33196_s20 + $0x128] ss:$12 sps:$4 sm:$0xff]  }
0x1c7d   :  { %v13719_v48 = vcombine.high %v13718_v59, %v13718_v59  ;;  %v13725_v32 = vpack.c.bf16 %v13711_v54, %v13711_v54  ;;  %v13726_v46 = vpack.c.bf16 %v13718_v59, %v13718_v59  ;;  %v13729_v51 = vshrl.u32 %v13724_v28, 16  ;;  %v26739_v54 = vld [vmem:[%s33196_s20 + $0x140] ss:$12 sps:$4 sm:$0xff]   ;;  %v26740_v59 = vld [vmem:[%s33196_s20 + $0x158] ss:$12 sps:$4 sm:$0xff]  }
0x1c7e   :  { %v13732_v60 = vshll.u32 %v13724_v28, 16  ;;  %v26741_v28 = vld [vmem:[%s33196_s20 + $0x170] ss:$12 sps:$4 sm:$0xff]  }
0x1c7f   :  { %v13727_v13 = vpack.c.bf16 %v13719_v48, %v13719_v48  ;;  %v13731_v18 = vrot.slane %v13729_v51, 7  ;;  %v13736_v11 = vshrl.u32 %v13725_v32, 16  ;;  %v13743_v45 = vshrl.u32 %v13726_v46, 16  ;;  %v26742_v48 = vld [vmem:[%s33196_s20 + $0x188] ss:$12 sps:$4 sm:$0xff]  }
0x1c80   :  { %v13739_v17 = vshll.u32 %v13725_v32, 16  ;;  %v13746_v15 = vshll.u32 %v13726_v46, 16  ;;  %v26743_v32 = vld [vmem:[%s33196_s20 + $0x1a0] ss:$12 sps:$4 sm:$0xff]   ;;  %v26744_v46 = vld [vmem:[%s33196_s20 + $0x1b8] ss:$12 sps:$4 sm:$0xff]  }
0x1c81   :  { %v13734_v30 = vor.u32 %v13732_v60, %v13731_v18  ;;  %v13738_v55 = vrot.slane %v13736_v11, 7  ;;  %v13750_v53 = vshrl.u32 %v13727_v13, 16  ;;  %v13745_v35 = vrot.slane %v13743_v45, 7  ;;  %v26745_v51 = vld [vmem:[%s33196_s20 + $0x1d0] ss:$12 sps:$4 sm:$0xff]  }
0x1c82   :  { %v13753_v1 = vshll.u32 %v13727_v13, 16  ;;  %v26746_v13 = vld [vmem:[%s33196_s20 + $0x1e8] ss:$12 sps:$4 sm:$0xff]   ;;  %v26747_v18 = vld [vmem:[%s33196_s20 + $0x200] ss:$12 sps:$4 sm:$0xff]  }
0x1c83   :  { %v13741_v40 = vor.u32 %v13739_v17, %v13738_v55  ;;  %v13752_v3 = vrot.slane %v13750_v53, 7  ;;  %v13760_v19 = vsel %vm27568_vm3, 0, %v13734_v30  ;;  %v13748_v22 = vor.u32 %v13746_v15, %v13745_v35  ;;  %v26748_v11 = vld [vmem:[%s33196_s20 + $0x218] ss:$12 sps:$4 sm:$0xff]   ;;  %v26749_v30 = vld [vmem:[%s33196_s20 + $0x230] ss:$12 sps:$4 sm:$0xff]  }
0x1c84   :  { %v13766_v44 = vsel %vm30656_vm14, %v13760_v19, 0  ;;  %v26752_v55 = vld [vmem:[%s33196_s20 + $0x4] ss:$12 sps:$4 sm:$0xff]   ;;  %v26750_v53 = vld [vmem:[%s33196_s20] ss:$12 sps:$4 sm:$0xff]  }
0x1c85   :  { %v13755_v7 = vor.u32 %v13753_v1, %v13752_v3  ;;  %v13761_v16 = vsel %vm27568_vm3, 0, %v13741_v40  ;;  %v13762_v31 = vsel %vm27568_vm3, 0, %v13748_v22  ;;  %v26755_v35 = vld [vmem:[%s33196_s20 + $0x1c] ss:$12 sps:$4 sm:$0xff]   ;;  %v26753_v40 = vld [vmem:[%s33196_s20 + $0x18] ss:$12 sps:$4 sm:$0xff]  }
0x1c86   :  { %v13767_v63 = vsel %vm30656_vm14, %v13761_v16, 0  ;;  %v13768_v12 = vsel %vm30656_vm14, %v13762_v31, 0  ;;  %v26758_v3 = vld [vmem:[%s33196_s20 + $0x34] ss:$12 sps:$4 sm:$0xff]   ;;  %v26756_v1 = vld [vmem:[%s33196_s20 + $0x30] ss:$12 sps:$4 sm:$0xff]  }
0x1c87   :  { %v13763_v33 = vsel %vm27568_vm3, 0, %v13755_v7  ;;  %v13774_v62 = vcombine.low %v13766_v44, %v13767_v63  ;;  %v26761_v19 = vld [vmem:[%s33196_s20 + $0x4c] ss:$12 sps:$4 sm:$0xff]   ;;  %v26759_v22 = vld [vmem:[%s33196_s20 + $0x48] ss:$12 sps:$4 sm:$0xff]  }
0x1c88   :  { %v13769_v61 = vsel %vm30656_vm14, %v13763_v33, 0  ;;  %v26764_v7 = vld [vmem:[%s33196_s20 + $0x64] ss:$12 sps:$4 sm:$0xff]   ;;  %v26762_v16 = vld [vmem:[%s33196_s20 + $0x60] ss:$12 sps:$4 sm:$0xff]  }
0x1c89   :  { %v13781_v24 = vrot.slane %v13774_v62, %v33189_v9  ;;  %v13789_v20 = vcombine.low %v13768_v12, %v13769_v61  ;;  %v26767_v31 = vld [vmem:[%s33196_s20 + $0x7c] ss:$12 sps:$4 sm:$0xff]   ;;  %v26765_v44 = vld [vmem:[%s33196_s20 + $0x78] ss:$12 sps:$4 sm:$0xff]   ;;  %v26770_v63 = vld [vmem:[%s33196_s20 + $0x94] ss:$12 sps:$4 sm:$0xff]  }
0x1c8a   :  { %v26768_v33 = vld [vmem:[%s33196_s20 + $0x90] ss:$12 sps:$4 sm:$0xff]   ;;  %v26773_v62 = vld [vmem:[%s33196_s20 + $0xac] ss:$12 sps:$4 sm:$0xff]   ;;  %v26771_v12 = vld [vmem:[%s33196_s20 + $0xa8] ss:$12 sps:$4 sm:$0xff]  }
0x1c8b   :  { %v13796_v43 = vrot.slane %v13789_v20, %v33189_v9  ;;  %v13852_v42 = vcombine.high %v13781_v24, %v13781_v24  ;;  %v13788_v23 = vrot.slane %v13781_v24, %v33189_v9  ;;  %v26776_v61 = vld [vmem:[%s33196_s20 + $0xc4] ss:$12 sps:$4 sm:$0xff]   ;;  %v26774_v24 = vld [vmem:[%s33196_s20 + $0xc0] ss:$12 sps:$4 sm:$0xff]   ;;  %v26779_v20 = vld [vmem:[%s33196_s20 + $0xdc] ss:$12 sps:$4 sm:$0xff]  }
0x1c8d   :  { %v13860_v21 = vcombine.high %v13796_v43, %v13796_v43  ;;  %v13803_v52 = vrot.slane %v13796_v43, %v33189_v9  ;;  %v30681_v57 = vrot.slane %v13852_v42, %v33189_v9  ;;  %v13883_v0 = vshrl.u32 %v13788_v23, 16  ;;  %v26777_v43 = vld [vmem:[%s33196_s20 + $0xd8] ss:$12 sps:$4 sm:$0xff]   ;;  %v26782_v42 = vld [vmem:[%s33196_s20 + $0xf4] ss:$12 sps:$4 sm:$0xff]  }
0x1c8f   :  { %v30684_v27 = vrot.slane %v13860_v21, %v33189_v9  ;;  %v13888_v37 = vshll.u32 %v30681_v57, 16  ;;  %v13892_v5 = vshrl.u32 %v13803_v52, 16  ;;  %v14249_v60 = vcombine.low %v13788_v23, %v13803_v52  ;;  %v26780_v23 = vld [vmem:[%s33196_s20 + $0xf0] ss:$12 sps:$4 sm:$0xff]   ;;  %v26785_v21 = vld [vmem:[%s33196_s20 + $0x10c] ss:$12 sps:$4 sm:$0xff]  }
0x1c90   :  { %v26783_v52 = vld [vmem:[%s33196_s20 + $0x108] ss:$12 sps:$4 sm:$0xff]  }
0x1c91   :  { %v13897_v58 = vshll.u32 %v30684_v27, 16  ;;  %v14598_v47 = vcombine.low %v30681_v57, %v30684_v27  ;;  %v13890_v14 = vsel %vm30687_vm13, %v13883_v0, %v13888_v37  ;;  %v14256_v45 = vrot.slane %v14249_v60, %v33189_v9  ;;  %v26786_v37 = vld [vmem:[%s33196_s20 + $0x8] ss:$12 sps:$4 sm:$0xff]   ;;  %v26792_v60 = vld [vmem:[%s33196_s20 + $0x98] ss:$12 sps:$4 sm:$0xff]  }
0x1c92   :  { %v26801_v57 = vld [vmem:[%s33196_s20 + $0x258] ss:$12 sps:$4 sm:$0xff]   ;;  %v26806_v27 = vld [vmem:[%s33196_s20 + $0x274] ss:$12 sps:$4 sm:$0xff]  }
0x1c93   :  { %v13899_v25 = vsel %vm30687_vm13, %v13892_v5, %v13897_v58  ;;  %v14257_v17 = vcombine.high %v14256_v45, %v14256_v45  ;;  %v14264_v0 = vrot.slane %v14256_v45, %v33189_v9  ;;  %v26787_v5 = vld [vmem:[%s33196_s20 + $0x20] ss:$12 sps:$4 sm:$0xff]   ;;  %v26788_v58 = vld [vmem:[%s33196_s20 + $0x38] ss:$12 sps:$4 sm:$0xff]   ;;  %v26794_v45 = vld [vmem:[%s33196_s20 + $0xc8] ss:$12 sps:$4 sm:$0xff]  }
0x1c94   :  { %v13949_v41 = vcombine.low %v13890_v14, %v13899_v25  ;;  %v26789_v14 = vld [vmem:[%s33196_s20 + $0x50] ss:$12 sps:$4 sm:$0xff]   ;;  %v26790_v25 = vld [vmem:[%s33196_s20 + $0x68] ss:$12 sps:$4 sm:$0xff]  }
0x1c95   :  { %v14271_v15 = vrot.slane %v14257_v17, %v33189_v9  ;;  %v14605_v17 = vrot.slane %v14598_v47, %v33189_v9  ;;  %v26804_v47 = vld [vmem:[%s33196_s20 + $0x270] ss:$12 sps:$4 sm:$0xff]  }
0x1c96   :  { %v13956_v34 = vrot.slane %v13949_v41, %v33189_v9  ;;  %v14973_v41 = vld [vmem:[%s33206_s28 + $0x80] sm:$0xff] }
0x1c98   :  { %v13957_v36 = vcombine.high %v13956_v34, %v13956_v34  ;;  %v13964_v8 = vrot.slane %v13956_v34, %v33189_v9  ;;  %v14974_v34 = vld [vmem:[%s33206_s28 + $0x88] sm:$0xff] }
0x1c9a   :  { %v13971_v49 = vrot.slane %v13957_v36, %v33189_v9  ;;  %v14957_v36 = vld [vmem:[%s33206_s28] sm:$0xff] }
0x1c9c   :  { %21967 = vmatprep.mubr.msk.bf16.mxu1 %vm11354_vm8, %v13971_v49 }
0x1c9d   :  { %14201 = vmatmul.mubr.bf16.vlgmr.msra.gmra.mrb[24].mxu1 %v13964_v8 }
0x1c9e   :  { %14210 = vmatpush1.bf16.msra.mxu1 %v26738_v2  ;;  %21968 = vmatprep.mubr.msk.bf16.mxu1 %vm11354_vm8, %v13971_v49  ;;  %v26791_v49 = vld [vmem:[%s33196_s20 + $0x80] ss:$12 sps:$4 sm:$0xff]   ;;  %v15049_v2 = vand.u32 4294901760, %v14973_v41 }
0x1c9f   :  { %14211 = vmatprep.subr.bf16.mxu1 %v33197_v29 }
0x1ca2   :  { %14212 = vmatpush1.bf16.msra.mxu1 %v26739_v54  ;;  %v14958_v54 = vld [vmem:[%s33206_s28 + $0x8] sm:$0xff] }
0x1ca3   :  { %14213 = vmatprep.subr.bf16.mxu1 %v33197_v29 }
0x1ca6   :  { %14214 = vmatpush1.bf16.msra.mxu1 %v26740_v59  ;;  %v15001_v59 = vand.u32 4294901760, %v14957_v36 }
0x1ca7   :  { %14215 = vmatprep.subr.bf16.mxu1 %v33197_v29 }
0x1caa   :  { %14216 = vmatpush1.bf16.msra.mxu1 %v26741_v28  ;;  %v15004_v28 = vand.u32 4294901760, %v14958_v54 }
0x1cab   :  { %14217 = vmatprep.subr.bf16.mxu1 %v33197_v29 }
0x1cae   :  { %14218 = vmatpush1.bf16.msra.mxu1 %v26742_v48 }
0x1caf   :  { %14219 = vmatprep.subr.bf16.mxu1 %v33197_v29 }
0x1cb2   :  { %14220 = vmatpush1.bf16.msra.mxu1 %v26743_v32  ;;  %v30773_v32 = vsub.f32 %v14973_v41, %v15049_v2  ;;  %v26839_v41 = vld [vmem:[%s33196_s20 + $0x2c0] ss:$12 sps:$4 sm:$0xff]  }
0x1cb3   :  { %14221 = vmatprep.subr.bf16.mxu1 %v33197_v29 }
0x1cb6   :  { %14222 = vmatpush1.bf16.msra.mxu1 %v26744_v46 }
0x1cb7   :  { %14223 = vmatprep.subr.bf16.mxu1 %v33197_v29 }
0x1cba   :  { %14224 = vmatpush1.bf16.msra.mxu1 %v26745_v51  ;;  %v30777_v51 = vsub.f32 %v14957_v36, %v15001_v59  ;;  %v26841_v36 = vld [vmem:[%s33196_s20 + $0x2f0] ss:$12 sps:$4 sm:$0xff]  }
0x1cbb   :  { %14225 = vmatprep.subr.bf16.mxu1 %v33197_v29 }
0x1cbe   :  { %14226 = vmatpush1.bf16.msra.mxu1 %v26746_v13  ;;  %v30779_v13 = vpack.c.bf16 %v15004_v28, %v15001_v59  ;;  %v14975_v59 = vld [vmem:[%s33206_s28 + $0x90] sm:$0xff] }
0x1cbf   :  { %14227 = vmatprep.subr.bf16.mxu1 %v33197_v29 }
0x1cc0   :  { %33208 = vst [vmem:[#allocation78_spill] sm:$0xff] %v30779_v13 }
0x1cc2   :  { %14228 = vmatpush1.bf16.msra.mxu1 %v26747_v18  ;;  %v30781_v18 = vsub.f32 %v14958_v54, %v15004_v28  ;;  %v26845_v54 = vld [vmem:[%s33196_s20 + $0x350] ss:$12 sps:$4 sm:$0xff]  }
0x1cc3   :  { %14229 = vmatprep.subr.bf16.mxu1 %v33197_v29  ;;  %v14976_v28 = vld [vmem:[%s33206_s28 + $0x98] sm:$0xff] }
0x1cc6   :  { %14230 = vmatpush1.bf16.msra.mxu1 %v26748_v11  ;;  %v26793_v11 = vld [vmem:[%s33196_s20 + $0xb0] ss:$12 sps:$4 sm:$0xff]  }
0x1cc7   :  { %14231 = vmatprep.subr.bf16.mxu1 %v33197_v29 }
0x1cca   :  { %14232 = vmatpush1.bf16.msra.mxu1 %v26749_v30  ;;  %v26795_v30 = vld [vmem:[%s33196_s20 + $0xe0] ss:$12 sps:$4 sm:$0xff]  }
0x1ccb   :  { %14468 = vmatprep.subr.bf16.mxu1 %v26752_v55  ;;  %v26796_v55 = vld [vmem:[%s33196_s20 + $0xf8] ss:$12 sps:$4 sm:$0xff]  }
0x1ccd   :  { %14242 = vmatmul.mubr.bf16.vlgmr.msra.gmra.mrb[28].mxu1 %v13964_v8  ;;  %v15052_v8 = vand.u32 4294901760, %v14974_v34 }
0x1cce   :  { %14469 = vmatpush1.bf16.msra.mxu1 %v26750_v53  ;;  %22005 = vmatprep.mubr.msk.bf16.mxu1 %vm11354_vm8, %v14271_v15  ;;  %v26797_v53 = vld [vmem:[%s33196_s20 + $0x110] ss:$12 sps:$4 sm:$0xff]  }
0x1ccf   :  { %14470 = vmatprep.subr.bf16.mxu1 %v26755_v35  ;;  %v30771_v48 = vpack.c.bf16 %v15052_v8, %v15049_v2  ;;  %v30775_v46 = vsub.f32 %v14974_v34, %v15052_v8  ;;  %v26800_v35 = vld [vmem:[%s33196_s20 + $0x244] ss:$12 sps:$4 sm:$0xff]   ;;  %v26843_v2 = vld [vmem:[%s33196_s20 + $0x320] ss:$12 sps:$4 sm:$0xff]  }
0x1cd0   :  { %v26840_v34 = vld [vmem:[%s33196_s20 + $0x2d8] ss:$12 sps:$4 sm:$0xff]  }
0x1cd1   :  { %33207 = vst [vmem:[#allocation77_spill] sm:$0xff] %v30771_v48  ;;  %25425 = vmatprep.subr.bf16.mxu0 %v30771_v48  ;;  %v26844_v8 = vld [vmem:[%s33196_s20 + $0x338] ss:$12 sps:$4 sm:$0xff]  }
0x1cd2   :  { %14471 = vmatpush1.bf16.msra.mxu1 %v26753_v40  ;;  %25427 = vmatpush3.bf16.msra.mxu0 %v30779_v13  ;;  %v26798_v40 = vld [vmem:[%s33196_s20 + $0x240] ss:$12 sps:$4 sm:$0xff]  }
0x1cd3   :  { %14472 = vmatprep.subr.bf16.mxu1 %v26758_v3  ;;  %v26803_v3 = vld [vmem:[%s33196_s20 + $0x25c] ss:$12 sps:$4 sm:$0xff]  }
0x1cd6   :  { %14473 = vmatpush1.bf16.msra.mxu1 %v26756_v1 }
0x1cd7   :  { %14474 = vmatprep.subr.bf16.mxu1 %v26761_v19  ;;  %v26809_v19 = vld [vmem:[%s33196_s20 + $0x28c] ss:$12 sps:$4 sm:$0xff]  }
0x1cda   :  { %14475 = vmatpush1.bf16.msra.mxu1 %v26759_v22  ;;  %v26807_v22 = vld [vmem:[%s33196_s20 + $0x288] ss:$12 sps:$4 sm:$0xff]  }
0x1cdb   :  { %14476 = vmatprep.subr.bf16.mxu1 %v26764_v7  ;;  %v26812_v7 = vld [vmem:[%s33196_s20 + $0x2a4] ss:$12 sps:$4 sm:$0xff]  }
0x1cde   :  { %14477 = vmatpush1.bf16.msra.mxu1 %v26762_v16  ;;  %v26810_v16 = vld [vmem:[%s33196_s20 + $0x2a0] ss:$12 sps:$4 sm:$0xff]  }
0x1cdf   :  { %14478 = vmatprep.subr.bf16.mxu1 %v26767_v31  ;;  %v26815_v31 = vld [vmem:[%s33196_s20 + $0x2bc] ss:$12 sps:$4 sm:$0xff]  }
0x1ce2   :  { %14479 = vmatpush1.bf16.msra.mxu1 %v26765_v44  ;;  %v26813_v44 = vld [vmem:[%s33196_s20 + $0x2b8] ss:$12 sps:$4 sm:$0xff]  }
0x1ce3   :  { %14480 = vmatprep.subr.bf16.mxu1 %v26770_v63  ;;  %v26818_v63 = vld [vmem:[%s33196_s20 + $0x2d4] ss:$12 sps:$4 sm:$0xff]  }
0x1ce6   :  { %14481 = vmatpush1.bf16.msra.mxu1 %v26768_v33  ;;  %v26816_v33 = vld [vmem:[%s33196_s20 + $0x2d0] ss:$12 sps:$4 sm:$0xff]  }
0x1ce7   :  { %14482 = vmatprep.subr.bf16.mxu1 %v26773_v62  ;;  %v26821_v62 = vld [vmem:[%s33196_s20 + $0x2ec] ss:$12 sps:$4 sm:$0xff]  }
0x1cea   :  { %14483 = vmatpush1.bf16.msra.mxu1 %v26771_v12  ;;  %v26819_v12 = vld [vmem:[%s33196_s20 + $0x2e8] ss:$12 sps:$4 sm:$0xff]  }
0x1ceb   :  { %14484 = vmatprep.subr.bf16.mxu1 %v26776_v61  ;;  %v26824_v61 = vld [vmem:[%s33196_s20 + $0x304] ss:$12 sps:$4 sm:$0xff]  }
0x1cee   :  { %14485 = vmatpush1.bf16.msra.mxu1 %v26774_v24  ;;  %v26822_v24 = vld [vmem:[%s33196_s20 + $0x300] ss:$12 sps:$4 sm:$0xff]  }
0x1cef   :  { %14486 = vmatprep.subr.bf16.mxu1 %v26779_v20  ;;  %v26827_v20 = vld [vmem:[%s33196_s20 + $0x31c] ss:$12 sps:$4 sm:$0xff]  }
0x1cf2   :  { %14487 = vmatpush1.bf16.msra.mxu1 %v26777_v43  ;;  %v26825_v43 = vld [vmem:[%s33196_s20 + $0x318] ss:$12 sps:$4 sm:$0xff]  }
0x1cf3   :  { %14488 = vmatprep.subr.bf16.mxu1 %v26782_v42  ;;  %v26830_v42 = vld [vmem:[%s33196_s20 + $0x334] ss:$12 sps:$4 sm:$0xff]  }
0x1cf6   :  { %14489 = vmatpush1.bf16.msra.mxu1 %v26780_v23  ;;  %v26828_v23 = vld [vmem:[%s33196_s20 + $0x330] ss:$12 sps:$4 sm:$0xff]  }
0x1cf7   :  { %14490 = vmatprep.subr.bf16.mxu1 %v26785_v21  ;;  %v26833_v21 = vld [vmem:[%s33196_s20 + $0x34c] ss:$12 sps:$4 sm:$0xff]  }
0x1cfa   :  { %14491 = vmatpush1.bf16.msra.mxu1 %v26783_v52  ;;  %v26831_v52 = vld [vmem:[%s33196_s20 + $0x348] ss:$12 sps:$4 sm:$0xff]  }
0x1cfb   :  { %14509 = vmatprep.subr.bf16.mxu1 %v33197_v29 }
0x1cfd   :  { %14501 = vmatmul.mubr.bf16.vlgmr.msra.gmra.mrb[24].mxu1 %v14264_v0 }
0x1cfe   :  { %14510 = vmatpush1.bf16.msra.mxu1 %v26786_v37  ;;  %22006 = vmatprep.mubr.msk.bf16.mxu1 %vm11354_vm8, %v14271_v15  ;;  %v14606_v15 = vcombine.high %v14605_v17, %v14605_v17  ;;  %v26834_v37 = vld [vmem:[%s33196_s20 + $0x248] ss:$12 sps:$4 sm:$0xff]  }
0x1cff   :  { %14511 = vmatprep.subr.bf16.mxu1 %v33197_v29 }
0x1d00   :  { %v14620_v1 = vrot.slane %v14606_v15, %v33189_v9  ;;  %v14977_v15 = vld [vmem:[%s33206_s28 + $0xa0] sm:$0xff] }
0x1d02   :  { %14512 = vmatpush1.bf16.msra.mxu1 %v26787_v5  ;;  %v26835_v5 = vld [vmem:[%s33196_s20 + $0x260] ss:$12 sps:$4 sm:$0xff]  }
0x1d03   :  { %14513 = vmatprep.subr.bf16.mxu1 %v33197_v29 }
0x1d06   :  { %14514 = vmatpush1.bf16.msra.mxu1 %v26788_v58  ;;  %v26836_v58 = vld [vmem:[%s33196_s20 + $0x278] ss:$12 sps:$4 sm:$0xff]  }
0x1d07   :  { %14515 = vmatprep.subr.bf16.mxu1 %v33197_v29 }
0x1d0a   :  { %14516 = vmatpush1.bf16.msra.mxu1 %v26789_v14  ;;  %v26837_v14 = vld [vmem:[%s33196_s20 + $0x290] ss:$12 sps:$4 sm:$0xff]  }
0x1d0b   :  { %14517 = vmatprep.subr.bf16.mxu1 %v33197_v29 }
0x1d0e   :  { %14518 = vmatpush1.bf16.msra.mxu1 %v26790_v25  ;;  %v26838_v25 = vld [vmem:[%s33196_s20 + $0x2a8] ss:$12 sps:$4 sm:$0xff]  }
0x1d0f   :  { %14519 = vmatprep.subr.bf16.mxu1 %v33197_v29 }
0x1d12   :  { %14520 = vmatpush1.bf16.msra.mxu1 %v26791_v49  ;;  %v26842_v49 = vld [vmem:[%s33196_s20 + $0x308] ss:$12 sps:$4 sm:$0xff]  }
0x1d13   :  { %14521 = vmatprep.subr.bf16.mxu1 %v33197_v29 }
0x1d16   :  { %14522 = vmatpush1.bf16.msra.mxu1 %v26792_v60  ;;  %v15055_v60 = vand.u32 4294901760, %v14975_v59 }
0x1d17   :  { %14523 = vmatprep.subr.bf16.mxu1 %v33197_v29 }
0x1d18   :  { %v30900_v6 = vsub.f32 %v14975_v59, %v15055_v60  ;;  %v14985_v59 = vld [vmem:[%s33206_s28 + $0xe0] sm:$0xff] }
0x1d1a   :  { %14524 = vmatpush1.bf16.msra.mxu1 %v26793_v11  ;;  %v15058_v11 = vand.u32 4294901760, %v14976_v28 }
0x1d1b   :  { %14525 = vmatprep.subr.bf16.mxu1 %v33197_v29 }
0x1d1c   :  { %v30902_v50 = vsub.f32 %v14976_v28, %v15058_v11 }
0x1d1e   :  { %14526 = vmatpush1.bf16.msra.mxu1 %v26794_v45  ;;  %v14959_v45 = vld [vmem:[%s33206_s28 + $0x10] sm:$0xff] }
0x1d1f   :  { %14527 = vmatprep.subr.bf16.mxu1 %v33197_v29 }
0x1d22   :  { %14528 = vmatpush1.bf16.msra.mxu1 %v26795_v30  ;;  %v14960_v30 = vld [vmem:[%s33206_s28 + $0x18] sm:$0xff] }
0x1d23   :  { %14529 = vmatprep.subr.bf16.mxu1 %v33197_v29 }
0x1d26   :  { %14530 = vmatpush1.bf16.msra.mxu1 %v26796_v55  ;;  %v15007_v55 = vand.u32 4294901760, %v14959_v45 }
0x1d27   :  { %14531 = vmatprep.subr.bf16.mxu1 %v33197_v29 }
0x1d28   :  { %v30904_v56 = vsub.f32 %v14959_v45, %v15007_v55 }
0x1d2a   :  { %14532 = vmatpush1.bf16.msra.mxu1 %v26797_v53  ;;  %v30858_v53 = vpack.c.bf16 %v15058_v11, %v15055_v60 }
0x1d2b   :  { %14817 = vmatprep.subr.bf16.mxu1 %v26800_v35 }
0x1d2c   :  { %33209 = vst [vmem:[#allocation79_spill] sm:$0xff] %v30858_v53  ;;  %25429 = vmatprep.subr.bf16.mxu0 %v30858_v53 }
0x1d2d   :  { %14542 = vmatmul.mubr.bf16.vlgmr.msra.gmra.mrb[28].mxu1 %v14264_v0  ;;  %v14613_v0 = vrot.slane %v14605_v17, %v33189_v9  ;;  %v15010_v17 = vand.u32 4294901760, %v14960_v30 }
0x1d2e   :  { %14818 = vmatpush1.bf16.msra.mxu1 %v26798_v40  ;;  %22091 = vmatprep.mubr.msk.bf16.mxu1 %vm11354_vm8, %v14620_v1  ;;  %v14978_v40 = vld [vmem:[%s33206_s28 + $0xa8] sm:$0xff] }
0x1d2f   :  { %14819 = vmatprep.subr.bf16.mxu1 %v26803_v3  ;;  %v30860_v35 = vpack.c.bf16 %v15010_v17, %v15007_v55  ;;  %v15061_v3 = vand.u32 4294901760, %v14977_v15  ;;  %v30906_v39 = vsub.f32 %v14960_v30, %v15010_v17  ;;  %v14986_v30 = vld [vmem:[%s33206_s28 + $0xe8] sm:$0xff]  ;;  %v14969_v55 = vld [vmem:[%s33206_s28 + $0x60] sm:$0xff] }
0x1d30   :  { %v14970_v17 = vld [vmem:[%s33206_s28 + $0x68] sm:$0xff] }
0x1d31   :  { %33210 = vst [vmem:[#allocation80_spill] sm:$0xff] %v30860_v35  ;;  %25431 = vmatpush3.bf16.msra.mxu0 %v30860_v35  ;;  %v30908_v38 = vsub.f32 %v14977_v15, %v15061_v3 }
0x1d32   :  { %14820 = vmatpush1.bf16.msra.mxu1 %v26801_v57  ;;  %v14961_v57 = vld [vmem:[%s33206_s28 + $0x20] sm:$0xff] }
0x1d33   :  { %14821 = vmatprep.subr.bf16.mxu1 %v26806_v27  ;;  %v14962_v27 = vld [vmem:[%s33206_s28 + $0x28] sm:$0xff] }
0x1d36   :  { %14822 = vmatpush1.bf16.msra.mxu1 %v26804_v47  ;;  %v15013_v47 = vand.u32 4294901760, %v14961_v57 }
0x1d37   :  { %14823 = vmatprep.subr.bf16.mxu1 %v26809_v19  ;;  %v15016_v19 = vand.u32 4294901760, %v14962_v27 }
0x1d38   :  { %v30912_v9 = vsub.f32 %v14961_v57, %v15013_v47  ;;  %v14987_v57 = vld [vmem:[%s33206_s28 + $0xf0] sm:$0xff] }
0x1d3a   :  { %14824 = vmatpush1.bf16.msra.mxu1 %v26807_v22 }
0x1d3b   :  { %14825 = vmatprep.subr.bf16.mxu1 %v26812_v7  ;;  %v30870_v7 = vpack.c.bf16 %v15016_v19, %v15013_v47  ;;  %v14971_v47 = vld [vmem:[%s33206_s28 + $0x70] sm:$0xff] }
0x1d3d   :  { %33212 = vst [vmem:[#allocation65_spill] sm:$0xff] %v30870_v7 }
0x1d3e   :  { %14826 = vmatpush1.bf16.msra.mxu1 %v26810_v16  ;;  %v14979_v16 = vld [vmem:[%s33206_s28 + $0xb0] sm:$0xff] }
0x1d3f   :  { %14827 = vmatprep.subr.bf16.mxu1 %v26815_v31  ;;  %v14980_v31 = vld [vmem:[%s33206_s28 + $0xb8] sm:$0xff] }
0x1d42   :  { %14828 = vmatpush1.bf16.msra.mxu1 %v26813_v44  ;;  %v15067_v44 = vand.u32 4294901760, %v14979_v16 }
0x1d43   :  { %14829 = vmatprep.subr.bf16.mxu1 %v26818_v63  ;;  %v15070_v63 = vand.u32 4294901760, %v14980_v31 }
0x1d44   :  { %v30918_v28 = vsub.f32 %v14979_v16, %v15067_v44 }
0x1d45   :  { %v30920_v60 = vsub.f32 %v14980_v31, %v15070_v63 }
0x1d46   :  { %14830 = vmatpush1.bf16.msra.mxu1 %v26816_v33  ;;  %v14963_v33 = vld [vmem:[%s33206_s28 + $0x30] sm:$0xff] }
0x1d47   :  { %14831 = vmatprep.subr.bf16.mxu1 %v26821_v62  ;;  %v14964_v62 = vld [vmem:[%s33206_s28 + $0x38] sm:$0xff] }
0x1d4a   :  { %14832 = vmatpush1.bf16.msra.mxu1 %v26819_v12  ;;  %v15019_v12 = vand.u32 4294901760, %v14963_v33 }
0x1d4b   :  { %14833 = vmatprep.subr.bf16.mxu1 %v26824_v61  ;;  %v15022_v61 = vand.u32 4294901760, %v14964_v62 }
0x1d4c   :  { %v30922_v11 = vsub.f32 %v14963_v33, %v15019_v12  ;;  %v15085_v33 = vand.u32 4294901760, %v14985_v59 }
0x1d4d   :  { %v30924_v45 = vsub.f32 %v14964_v62, %v15022_v61  ;;  %v15088_v62 = vand.u32 4294901760, %v14986_v30 }
0x1d4e   :  { %14834 = vmatpush1.bf16.msra.mxu1 %v26822_v24  ;;  %v30878_v24 = vpack.c.bf16 %v15070_v63, %v15067_v44 }
0x1d4f   :  { %14835 = vmatprep.subr.bf16.mxu1 %v26827_v20  ;;  %v30880_v20 = vpack.c.bf16 %v15022_v61, %v15019_v12  ;;  %v15037_v12 = vand.u32 4294901760, %v14969_v55  ;;  %v15040_v61 = vand.u32 4294901760, %v14970_v17 }
0x1d50   :  { %33213 = vst [vmem:[#allocation66_spill] sm:$0xff] %v30878_v24 }
0x1d51   :  { %33214 = vst [vmem:[#allocation72_spill] sm:$0xff] %v30880_v20 }
0x1d52   :  { %14836 = vmatpush1.bf16.msra.mxu1 %v26825_v43  ;;  %v14981_v43 = vld [vmem:[%s33206_s28 + $0xc0] sm:$0xff] }
0x1d53   :  { %14837 = vmatprep.subr.bf16.mxu1 %v26830_v42  ;;  %v14982_v42 = vld [vmem:[%s33206_s28 + $0xc8] sm:$0xff] }
0x1d56   :  { %14838 = vmatpush1.bf16.msra.mxu1 %v26828_v23  ;;  %v15073_v23 = vand.u32 4294901760, %v14981_v43 }
0x1d57   :  { %14839 = vmatprep.subr.bf16.mxu1 %v26833_v21  ;;  %v15076_v21 = vand.u32 4294901760, %v14982_v42 }
0x1d58   :  { %v30929_v15 = vsub.f32 %v14981_v43, %v15073_v23  ;;  %v15091_v43 = vand.u32 4294901760, %v14987_v57 }
0x1d5a   :  { %14840 = vmatpush1.bf16.msra.mxu1 %v26831_v52  ;;  %v14965_v52 = vld [vmem:[%s33206_s28 + $0x40] sm:$0xff] }
0x1d5b   :  { %14858 = vmatprep.subr.bf16.mxu1 %v33197_v29 }
0x1d5d   :  { %14850 = vmatmul.mubr.bf16.vlgmr.msra.gmra.mrb[24].mxu1 %v14613_v0 }
0x1d5e   :  { %14859 = vmatpush1.bf16.msra.mxu1 %v26834_v37  ;;  %22092 = vmatprep.mubr.msk.bf16.mxu1 %vm11354_vm8, %v14620_v1  ;;  %v15064_v1 = vand.u32 4294901760, %v14978_v40  ;;  %v14966_v37 = vld [vmem:[%s33206_s28 + $0x48] sm:$0xff] }
0x1d5f   :  { %14860 = vmatprep.subr.bf16.mxu1 %v33197_v29 }
0x1d60   :  { %v30868_v22 = vpack.c.bf16 %v15064_v1, %v15061_v3  ;;  %v30910_v26 = vsub.f32 %v14978_v40, %v15064_v1  ;;  %v30931_v40 = vsub.f32 %v14982_v42, %v15076_v21 }
0x1d62   :  { %14861 = vmatpush1.bf16.msra.mxu1 %v26835_v5  ;;  %33211 = vst [vmem:[#allocation64_spill] sm:$0xff] %v30868_v22  ;;  %25433 = vmatprep.subr.bf16.mxu0 %v30868_v22  ;;  %v15028_v5 = vand.u32 4294901760, %v14966_v37 }
0x1d63   :  { %14862 = vmatprep.subr.bf16.mxu1 %v33197_v29  ;;  %25435 = vmatpush3.bf16.msra.mxu0 %v30870_v7 }
0x1d64   :  { %25437 = vmatprep.subr.bf16.mxu0 %v30878_v24  ;;  %v30935_v1 = vsub.f32 %v14966_v37, %v15028_v5  ;;  %v30954_v37 = vsub.f32 %v14985_v59, %v15085_v33  ;;  %v32704_v59 = vand.u32 4294901760, %v30775_v46 }
0x1d66   :  { %14863 = vmatpush1.bf16.msra.mxu1 %v26836_v58  ;;  %v30888_v58 = vpack.c.bf16 %v15076_v21, %v15073_v23  ;;  %v14972_v23 = vld [vmem:[%s33206_s28 + $0x78] sm:$0xff]  ;;  %v15043_v21 = vand.u32 4294901760, %v14971_v47  ;;  %33222 = vst [vmem:[#allocation57_spill] sm:$0xff] %v30954_v37 }
0x1d67   :  { %14864 = vmatprep.subr.bf16.mxu1 %v33197_v29  ;;  %25439 = vmatpush3.bf16.msra.mxu0 %v30880_v20 }
0x1d68   :  { %33215 = vst [vmem:[#allocation75_spill] sm:$0xff] %v30888_v58  ;;  %25441 = vmatprep.subr.bf16.mxu0 %v30888_v58 }
0x1d6a   :  { %14865 = vmatpush1.bf16.msra.mxu1 %v26837_v14 }
0x1d6b   :  { %14866 = vmatprep.subr.bf16.mxu1 %v33197_v29 }
0x1d6e   :  { %14867 = vmatpush1.bf16.msra.mxu1 %v26838_v25  ;;  %v14983_v25 = vld [vmem:[%s33206_s28 + $0xd0] sm:$0xff] }
0x1d6f   :  { %14868 = vmatprep.subr.bf16.mxu1 %v33197_v29 }
0x1d72   :  { %14869 = vmatpush1.bf16.msra.mxu1 %v26839_v41  ;;  %v14984_v41 = vld [vmem:[%s33206_s28 + $0xd8] sm:$0xff] }
0x1d73   :  { %14870 = vmatprep.subr.bf16.mxu1 %v33197_v29 }
0x1d76   :  { %14871 = vmatpush1.bf16.msra.mxu1 %v26840_v34  ;;  %v15079_v34 = vand.u32 4294901760, %v14983_v25 }
0x1d77   :  { %14872 = vmatprep.subr.bf16.mxu1 %v33197_v29 }
0x1d7a   :  { %14873 = vmatpush1.bf16.msra.mxu1 %v26841_v36  ;;  %v15082_v36 = vand.u32 4294901760, %v14984_v41 }
0x1d7b   :  { %14874 = vmatprep.subr.bf16.mxu1 %v33197_v29 }
0x1d7c   :  { %v30942_v16 = vsub.f32 %v14984_v41, %v15082_v36 }
0x1d7e   :  { %14875 = vmatpush1.bf16.msra.mxu1 %v26842_v49  ;;  %v14967_v49 = vld [vmem:[%s33206_s28 + $0x50] sm:$0xff] }
0x1d7f   :  { %14876 = vmatprep.subr.bf16.mxu1 %v33197_v29 }
0x1d82   :  { %14877 = vmatpush1.bf16.msra.mxu1 %v26843_v2  ;;  %v14968_v2 = vld [vmem:[%s33206_s28 + $0x58] sm:$0xff] }
0x1d83   :  { %14878 = vmatprep.subr.bf16.mxu1 %v33197_v29 }
0x1d86   :  { %14879 = vmatpush1.bf16.msra.mxu1 %v26844_v8  ;;  %v30898_v8 = vpack.c.bf16 %v15082_v36, %v15079_v34 }
0x1d87   :  { %14880 = vmatprep.subr.bf16.mxu1 %v33197_v29  ;;  %v15034_v29 = vand.u32 4294901760, %v14968_v2 }
0x1d88   :  { %33217 = vst [vmem:[#allocation76_spill] sm:$0xff] %v30898_v8 }
0x1d89   :  { %v30948_v63 = vsub.f32 %v14968_v2, %v15034_v29  ;;  %v30971_v2 = vsub.f32 %v14971_v47, %v15043_v21 }
0x1d8a   :  { %14881 = vmatpush1.bf16.msra.mxu1 %v26845_v54  ;;  %v15031_v54 = vand.u32 4294901760, %v14967_v49 }
0x1d8b   :  { %33220 = vst [vmem:[#allocation62_spill] sm:$0xff] %v30948_v63  ;;  %33230 = vst [vmem:[#allocation83_spill] sm:$0xff] %v30971_v2 }
0x1d8c   :  { %v30944_v31 = vpack.c.bf16 %v15034_v29, %v15031_v54  ;;  %v30946_v44 = vsub.f32 %v14967_v49, %v15031_v54  ;;  %v30960_v29 = vpack.c.bf16 %v15040_v61, %v15037_v12  ;;  %v15046_v49 = vand.u32 4294901760, %v14972_v23 }
0x1d8d   :  { %14891 = vmatmul.mubr.bf16.vlgmr.msra.gmra.mrb[28].mxu1 %v14613_v0  ;;  %v15025_v0 = vand.u32 4294901760, %v14965_v52  ;;  %v32705_v54 = vand.u32 4294901760, %v30773_v32 }
0x1d8e   :  { %16486 = vmatprep.mubr.f32.mxu1 %v33186_v10  ;;  %v30914_v10 = vsub.f32 %v14962_v27, %v15016_v19  ;;  %v14988_v27 = vld [vmem:[%s33206_s28 + $0xf8] sm:$0xff]  ;;  %v30940_v19 = vsub.f32 %v14983_v25, %v15079_v34  ;;  %33218 = vst [vmem:[#allocation60_spill] sm:$0xff] %v30944_v31  ;;  %33219 = vst [vmem:[#allocation61_spill] sm:$0xff] %v30946_v44  ;;  %v30962_v25 = vsub.f32 %v14970_v17, %v15040_v61 }
0x1d8f   :  { %v30890_v14 = vpack.c.bf16 %v15028_v5, %v15025_v0  ;;  %v30933_v3 = vsub.f32 %v14965_v52, %v15025_v0  ;;  %v15094_v42 = vand.u32 4294901760, %v14988_v27  ;;  %v30952_v52 = vpack.c.bf16 %v15088_v62, %v15085_v33  ;;  %33225 = vst [vmem:[#allocation68_spill] sm:$0xff] %v30960_v29 }
0x1d90   :  { %v30956_v0 = vsub.f32 %v14986_v30, %v15088_v62  ;;  %v30958_v5 = vsub.f32 %v14969_v55, %v15037_v12  ;;  %33226 = vst [vmem:[#allocation69_spill] sm:$0xff] %v30962_v25  ;;  %v30966_v34 = vsub.f32 %v14987_v57, %v15091_v43  ;;  %v32703_v30 = vand.u32 4294901760, %v30777_v51 }
0x1d91   :  { %33216 = vst [vmem:[#allocation74_spill] sm:$0xff] %v30890_v14  ;;  %25443 = vmatpush3.bf16.msra.mxu0 %v30890_v14  ;;  %33221 = vst [vmem:[#allocation56_spill] sm:$0xff] %v30952_v52  ;;  %v30964_v41 = vpack.c.bf16 %v15094_v42, %v15091_v43  ;;  %v30969_v36 = vsub.f32 %v14988_v27, %v15094_v42  ;;  %v32707_v55 = vand.u32 4294901760, %v30781_v18  ;;  %v32708_v17 = vand.u32 4294901760, %v30900_v6 }
0x1d92   :  { %25445 = vmatprep.subr.bf16.mxu0 %v30898_v8  ;;  %33223 = vst [vmem:[#allocation58_spill] sm:$0xff] %v30956_v0  ;;  %33224 = vst [vmem:[#allocation67_spill] sm:$0xff] %v30958_v5  ;;  %v30980_v57 = vpack.c.bf16 %v15046_v49, %v15043_v21  ;;  %v30982_v27 = vsub.f32 %v14972_v23, %v15046_v49  ;;  %v15228_v47 = vsub.f32 %v30773_v32, %v32705_v54 }
0x1d93   :  { %33227 = vst [vmem:[#allocation70_spill] sm:$0xff] %v30964_v41  ;;  %33228 = vst [vmem:[#allocation81_spill] sm:$0xff] %v30966_v34  ;;  %v32709_v33 = vand.u32 4294901760, %v30902_v50  ;;  %v15235_v62 = vsub.f32 %v30775_v46, %v32704_v59  ;;  %v15116_v12 = vsub.f32 %v30777_v51, %v32703_v30  ;;  %v15123_v61 = vsub.f32 %v30781_v18, %v32707_v55 }
0x1d94   :  { %33229 = vst [vmem:[#allocation82_spill] sm:$0xff] %v30969_v36  ;;  %33231 = vst [vmem:[#allocation84_spill] sm:$0xff] %v30980_v57  ;;  %v15242_v43 = vsub.f32 %v30900_v6, %v32708_v17  ;;  %v15229_v42 = vand.u32 4294901760, %v15228_v47  ;;  %v32721_v21 = vand.u32 4294901760, %v30904_v56  ;;  %v32716_v49 = vand.u32 4294901760, %v30906_v39 }
0x1d95   :  { %25447 = vmatpush3.bf16.msra.mxu0 %v30944_v31  ;;  %33232 = vst [vmem:[#allocation85_spill] sm:$0xff] %v30982_v27  ;;  %v15249_v23 = vsub.f32 %v30902_v50, %v32709_v33  ;;  %v15236_v30 = vand.u32 4294901760, %v15235_v62  ;;  %v15117_v59 = vand.u32 4294901760, %v15116_v12  ;;  %v15124_v54 = vand.u32 4294901760, %v15123_v61 }
0x1d96   :  { %25449 = vmatprep.subr.bf16.mxu0 %v30952_v52  ;;  %v15243_v4 = vand.u32 4294901760, %v15242_v43  ;;  %v15130_v17 = vsub.f32 %v30904_v56, %v32721_v21  ;;  %v15137_v47 = vsub.f32 %v30906_v39, %v32716_v49  ;;  %v32719_v33 = vand.u32 4294901760, %v30908_v38 }
0x1d97   :  { %v15250_v55 = vand.u32 4294901760, %v15249_v23  ;;  %v32718_v62 = vand.u32 4294901760, %v30912_v9  ;;  %v32756_v20 = vand.u32 4294901760, %v30966_v34 }
0x1d98   :  { %v15131_v61 = vand.u32 4294901760, %v15130_v17  ;;  %v15138_v43 = vand.u32 4294901760, %v15137_v47  ;;  %v15256_v23 = vsub.f32 %v30908_v38, %v32719_v33  ;;  %v32725_v17 = vand.u32 4294901760, %v30920_v60 }
0x1d99   :  { %25451 = vmatpush3.bf16.msra.mxu0 %v30960_v29  ;;  %v31013_v29 = vpack.c.bf16 %v15124_v54, %v15117_v59  ;;  %v31017_v12 = vpack.c.bf16 %v15250_v55, %v15243_v4  ;;  %v15144_v54 = vsub.f32 %v30912_v9, %v32718_v62  ;;  %v32720_v59 = vand.u32 4294901760, %v30914_v10 }
0x1d9a   :  { %25453 = vmatprep.subr.bf16.mxu0 %v30964_v41  ;;  %v25456_v41 = vpack.c.bf16 %v15236_v30, %v15229_v42  ;;  %v32724_v4 = vand.u32 4294901760, %v30918_v28  ;;  %v31030_v30 = vpack.c.bf16 %v15138_v43, %v15131_v61  ;;  %v15257_v55 = vand.u32 4294901760, %v15256_v23 }
0x1d9b   :  { %v32728_v42 = vand.u32 4294901760, %v30922_v11  ;;  %v15145_v47 = vand.u32 4294901760, %v15144_v54  ;;  %v15277_v61 = vsub.f32 %v30920_v60, %v32725_v17  ;;  %v32730_v23 = vand.u32 4294901760, %v30924_v45 }
0x1d9c   :  { %v15270_v62 = vsub.f32 %v30918_v28, %v32724_v4  ;;  %v32733_v17 = vand.u32 4294901760, %v30931_v40 }
0x1d9d   :  { %25455 = vmatpush3.bf16.msra.mxu0 %v30980_v57  ;;  %v32717_v57 = vand.u32 4294901760, %v30910_v26  ;;  %v15158_v43 = vsub.f32 %v30922_v11, %v32728_v42  ;;  %v15278_v21 = vand.u32 4294901760, %v15277_v61  ;;  %v15165_v4 = vsub.f32 %v30924_v45, %v32730_v23 }
0x1d9e   :  { %25457 = vmatprep.subr.bf16.mxu0 %v25456_v41  ;;  %v15271_v33 = vand.u32 4294901760, %v15270_v62  ;;  %v15291_v61 = vsub.f32 %v30931_v40, %v32733_v17 }
0x1d9f   :  { %v15263_v49 = vsub.f32 %v30910_v26, %v32717_v57  ;;  %v15151_v57 = vsub.f32 %v30914_v10, %v32720_v59  ;;  %v32729_v59 = vand.u32 4294901760, %v30929_v15  ;;  %v15159_v52 = vand.u32 4294901760, %v15158_v43 }
0x1da0   :  { %v31061_v62 = vpack.c.bf16 %v15278_v21, %v15271_v33  ;;  %v15292_v33 = vand.u32 4294901760, %v15291_v61  ;;  %v32741_v21 = vand.u32 4294901760, %v30942_v16 }
0x1da1   :  { %v15264_v41 = vand.u32 4294901760, %v15263_v49  ;;  %v15152_v54 = vand.u32 4294901760, %v15151_v57  ;;  %v15284_v42 = vsub.f32 %v30929_v15, %v32729_v59  ;;  %v32738_v57 = vand.u32 4294901760, %v30935_v1 }
0x1da2   :  { %v32737_v59 = vand.u32 4294901760, %v30940_v19 }
0x1da3   :  { %v31047_v49 = vpack.c.bf16 %v15264_v41, %v15257_v55  ;;  %v31054_v31 = vpack.c.bf16 %v15152_v54, %v15145_v47  ;;  %v32734_v55 = vand.u32 4294901760, %v30933_v3  ;;  %v15166_v41 = vand.u32 4294901760, %v15165_v4 }
0x1da4   :  { %v15285_v43 = vand.u32 4294901760, %v15284_v42  ;;  %v15179_v54 = vsub.f32 %v30935_v1, %v32738_v57  ;;  %v32742_v4 = vand.u32 4294901760, %v30946_v44  ;;  %v15298_v42 = vsub.f32 %v30940_v19, %v32737_v59 }
0x1da5   :  { %v15172_v47 = vsub.f32 %v30933_v3, %v32734_v55  ;;  %v31073_v23 = vpack.c.bf16 %v15166_v41, %v15159_v52  ;;  %v32743_v55 = vand.u32 4294901760, %v30948_v63  ;;  %v15305_v52 = vsub.f32 %v30942_v16, %v32741_v21 }
0x1da6   :  { %v15180_v17 = vand.u32 4294901760, %v15179_v54  ;;  %v31081_v14 = vpack.c.bf16 %v15292_v33, %v15285_v43  ;;  %v15186_v41 = vsub.f32 %v30946_v44, %v32742_v4  ;;  %v32744_v59 = vand.u32 4294901760, %v30954_v37 }
0x1da7   :  { %v15173_v8 = vand.u32 4294901760, %v15172_v47  ;;  %v15299_v47 = vand.u32 4294901760, %v15298_v42  ;;  %v15193_v54 = vsub.f32 %v30948_v63, %v32743_v55  ;;  %v15306_v57 = vand.u32 4294901760, %v15305_v52 }
0x1da8   :  { %v15187_v43 = vand.u32 4294901760, %v15186_v41  ;;  %v32749_v33 = vand.u32 4294901760, %v30956_v0  ;;  %v15312_v21 = vsub.f32 %v30954_v37, %v32744_v59  ;;  %v32751_v4 = vand.u32 4294901760, %v30958_v5 }
0x1da9   :  { %v31089_v61 = vpack.c.bf16 %v15180_v17, %v15173_v8  ;;  %v15194_v58 = vand.u32 4294901760, %v15193_v54  ;;  %v32750_v8 = vand.u32 4294901760, %v30962_v25  ;;  %v31101_v17 = vpack.c.bf16 %v15306_v57, %v15299_v47 }
0x1daa   :  { %v15319_v42 = vsub.f32 %v30956_v0, %v32749_v33  ;;  %v15313_v52 = vand.u32 4294901760, %v15312_v21  ;;  %v15200_v41 = vsub.f32 %v30958_v5, %v32751_v4  ;;  %v32757_v57 = vand.u32 4294901760, %v30969_v36 }
0x1dab   :  { %v31106_v55 = vpack.c.bf16 %v15194_v58, %v15187_v43  ;;  %v15207_v54 = vsub.f32 %v30962_v25, %v32750_v8  ;;  %v32758_v47 = vand.u32 4294901760, %v30971_v2  ;;  %v32759_v58 = vand.u32 4294901760, %v30982_v27 }
0x1dac   :  { %v15320_v59 = vand.u32 4294901760, %v15319_v42  ;;  %v15201_v24 = vand.u32 4294901760, %v15200_v41  ;;  %v15326_v43 = vsub.f32 %v30966_v34, %v32756_v20  ;;  %v15333_v42 = vsub.f32 %v30969_v36, %v32757_v57 }
0x1dad   :  { %v15208_v33 = vand.u32 4294901760, %v15207_v54  ;;  %v15214_v8 = vsub.f32 %v30971_v2, %v32758_v47  ;;  %v15221_v41 = vsub.f32 %v30982_v27, %v32759_v58 }
0x1dae   :  { %v31118_v21 = vpack.c.bf16 %v15320_v59, %v15313_v52  ;;  %v15327_v59 = vand.u32 4294901760, %v15326_v43  ;;  %v15334_v52 = vand.u32 4294901760, %v15333_v42 }
0x1daf   :  { %v31129_v4 = vpack.c.bf16 %v15208_v33, %v15201_v24  ;;  %v15215_v54 = vand.u32 4294901760, %v15214_v8  ;;  %v15222_v7 = vand.u32 4294901760, %v15221_v41 }
0x1db0   :  { %v31134_v22 = vpack.c.bf16 %v15334_v52, %v15327_v59 }
0x1db1   :  { %v31136_v20 = vpack.c.bf16 %v15222_v7, %v15215_v54 }
0x1e30   :  { %v31170_v43 = vpop.f32.mrb[24].mxu1 }
0x1e31   :  { %33233 = vst [vmem:[#allocation86_spill] sm:$0xff] %v31170_v43  ;;  %v14901_v52 = vsel %vm33234_vm4, %v31170_v43, 0.0  ;;  %v14927_v54 = vmul.f32 %v31170_v43, %v31170_v43  ;;  %v31176_v59 = vpop.f32.mrb[25].mxu1 }
0x1e32   :  { %33235 = vst [vmem:[#allocation87_spill] sm:$0xff] %v31176_v59  ;;  %v14902_v58 = vrot.slane %v14901_v52, 4  ;;  %v14908_v7 = vsel %vm33236_vm7, %v31176_v59, 0.0  ;;  %v14928_v42 = vmul.f32 %v31176_v59, %v31176_v59  ;;  %v14855_v8 = vpop.f32.mrb[26].mxu1 }
0x1e33   :  { %v14930_v41 = vsel %vm33237_vm12, %v14927_v54, 0.0  ;;  %v14909_v33 = vrot.slane %v14908_v7, 4  ;;  %v14856_v24 = vpop.f32.mrb[27].mxu1 }
0x1e34   :  { %v14903_v47 = vadd.f32 %v14902_v58, %v14901_v52  ;;  %v14931_v57 = vrot.slane %v14930_v41, 4  ;;  %v14937_v35 = vsel %vm33238_vm1, %v14928_v42, 0.0 }
0x1e35   :  { %v14910_v53 = vadd.f32 %v14909_v33, %v14908_v7  ;;  %v14938_v43 = vrot.slane %v14937_v35, 4 }
0x1e36   :  { %v14904_v13 = vrot.slane %v14903_v47, 2  ;;  %v14932_v48 = vadd.f32 %v14931_v57, %v14930_v41  ;;  %v33254_v41 = vld [vmem:[#allocation57_spill] sm:$0xff] }
0x1e37   :  { %v14911_v2 = vrot.slane %v14910_v53, 2  ;;  %v14939_v27 = vadd.f32 %v14938_v43, %v14937_v35  ;;  %v33253_v43 = vld [vmem:[#allocation58_spill] sm:$0xff] }
0x1e38   :  { %v14905_v34 = vadd.f32 %v14904_v13, %v14903_v47  ;;  %v14933_v36 = vrot.slane %v14932_v48, 2  ;;  %v33251_v47 = vld [vmem:[#allocation61_spill] sm:$0xff] }
0x1e39   :  { %v14912_v5 = vadd.f32 %v14911_v2, %v14910_v53  ;;  %v14940_v25 = vrot.slane %v14939_v27, 2 }
0x1e3a   :  { %v14906_v59 = vrot.slane %v14905_v34, 1  ;;  %v14934_v8 = vadd.f32 %v14933_v36, %v14932_v48 }
0x1e3b   :  { %v14913_v37 = vrot.slane %v14912_v5, 1  ;;  %v14941_v54 = vadd.f32 %v14940_v25, %v14939_v27 }
0x1e3c   :  { %v14907_v0 = vadd.f32 %v14906_v59, %v14905_v34  ;;  %v14935_v24 = vrot.slane %v14934_v8, 1  ;;  %v33255_v59 = vpack.c.bf16 %v33253_v43, %v33254_v41 }
0x1e3d   :  { %v14914_v58 = vadd.f32 %v14913_v37, %v14912_v5  ;;  %v14942_v52 = vrot.slane %v14941_v54, 1 }
0x1e3e   :  { %v14936_v44 = vadd.f32 %v14935_v24, %v14934_v8  ;;  %v14924_v33 = vmul.f32 0.25, %v14907_v0  ;;  %v33256_v8 = vld [vmem:[#allocation69_spill] sm:$0xff] }
0x1e3f   :  { %v14943_v42 = vadd.f32 %v14942_v52, %v14941_v54  ;;  %v14925_v63 = vmul.f32 0.25, %v14914_v58  ;;  %v33257_v54 = vld [vmem:[#allocation67_spill] sm:$0xff]  ;;  %v33259_v58 = vld [vmem:[#allocation82_spill] sm:$0xff]  ;;  %v33260_v52 = vld [vmem:[#allocation81_spill] sm:$0xff] }
0x1e40   :  { %v14951_v7 = vmul.f32 0.25, %v14936_v44  ;;  %v33258_v24 = vpack.c.bf16 %v33256_v8, %v33257_v54 }
0x1e41   :  { %v14952_v57 = vmul.f32 0.25, %v14943_v42  ;;  %v33261_v42 = vpack.c.bf16 %v33259_v58, %v33260_v52 }
0x1e42   :  { %v14954_v35 = vsel %vm306_vm0, %v14924_v33, %v14951_v7  ;;  %v33262_v33 = vld [vmem:[#allocation85_spill] sm:$0xff]  ;;  %v33263_v7 = vld [vmem:[#allocation83_spill] sm:$0xff] }
0x1e43   :  { %v14955_v13 = vsel %vm306_vm0, %v14925_v63, %v14952_v57  ;;  %v31186_v53 = vand.u32 4294901760, %v14954_v35  ;;  %v33264_v57 = vpack.c.bf16 %v33262_v33, %v33263_v7 }
0x1e44   :  { %v31188_v2 = vand.u32 4294901760, %v14955_v13 }
0x1e45   :  { %v31191_v48 = vsub.f32 %v14954_v35, %v31186_v53  ;;  %v33265_v35 = vld [vmem:[#allocation77_spill] sm:$0xff] }
0x1e46   :  { %v15097_v37 = vsub.f32 %v14955_v13, %v31188_v2  ;;  %v33266_v13 = vld [vmem:[#allocation78_spill] sm:$0xff] }
0x1e47   :  { %v15104_v5 = vand.u32 4294901760, %v31191_v48 }
0x1e48   :  { %v15098_v25 = vand.u32 4294901760, %v15097_v37 }
0x1e49   :  { %v15105_v44 = vsub.f32 %v31191_v48, %v15104_v5 }
0x1e4a   :  { %v15099_v0 = vsub.f32 %v15097_v37, %v15098_v25 }
0x1e4b   :  { %v15106_v36 = vand.u32 4294901760, %v15105_v44  ;;  %v33268_v44 = vld [vmem:[#allocation80_spill] sm:$0xff] }
0x1e4c   :  { %v15100_v34 = vand.u32 4294901760, %v15099_v0  ;;  %v33269_v0 = vld [vmem:[#allocation64_spill] sm:$0xff] }
0x1e4e   :  { %15101 = vmatprep.mubr.f32.mxu0 %v15100_v34  ;;  %v33270_v34 = vld [vmem:[#allocation65_spill] sm:$0xff] }
0x1e4f   :  { %15107 = vmatmul.mubr.f32.vlgmr.msra.gmra.mrb[36].mxu0 %v15106_v36  ;;  %v33271_v36 = vld [vmem:[#allocation66_spill] sm:$0xff] }
0x1e50   :  { %25459 = vmatpush3.bf16.msra.mxu0 %v31013_v29  ;;  %15337 = vmatprep.mubr.f32.mxu0 %v31188_v2 }
0x1e51   :  { %25461 = vmatprep.subr.bf16.mxu0 %v31017_v12 }
0x1e54   :  { %25463 = vmatpush3.bf16.msra.mxu0 %v31030_v30  ;;  %v33241_v30 = vpack.c.bf16 %v30902_v50, %v30900_v6 }
0x1e55   :  { %25465 = vmatprep.subr.bf16.mxu0 %v31047_v49  ;;  %v33245_v49 = vpack.c.bf16 %v30920_v60, %v30918_v28 }
0x1e58   :  { %25467 = vmatpush3.bf16.msra.mxu0 %v31054_v31  ;;  %v33240_v31 = vpack.c.bf16 %v30781_v18, %v30777_v51 }
0x1e59   :  { %25469 = vmatprep.subr.bf16.mxu0 %v31061_v62  ;;  %v33247_v62 = vpack.c.bf16 %v30931_v40, %v30929_v15 }
0x1e5c   :  { %25471 = vmatpush3.bf16.msra.mxu0 %v31073_v23  ;;  %v33244_v23 = vpack.c.bf16 %v30914_v10, %v30912_v9 }
0x1e5d   :  { %25473 = vmatprep.subr.bf16.mxu0 %v31081_v14  ;;  %v33239_v14 = vpack.c.bf16 %v30775_v46, %v30773_v32 }
0x1e60   :  { %25475 = vmatpush3.bf16.msra.mxu0 %v31089_v61  ;;  %v31208_v63 = vpop.f32.mrb[28].mxu1  ;;  %v33249_v61 = vpack.c.bf16 %v30942_v16, %v30940_v19 }
0x1e61   :  { %v14894_v29 = vpop.f32.mrb[29].mxu1  ;;  %25477 = vmatprep.subr.bf16.mxu0 %v31101_v17  ;;  %v33250_v17 = vld [vmem:[#allocation62_spill] sm:$0xff] }
0x1e62   :  { %v14895_v27 = vpop.f32.mrb[30].mxu1  ;;  %v33272_v29 = vld [vmem:[#allocation72_spill] sm:$0xff] }
0x1e63   :  { %v14896_v12 = vpop.f32.mrb[31].mxu1  ;;  %v33273_v27 = vld [vmem:[#allocation75_spill] sm:$0xff] }
0x1e64   :  { %25479 = vmatpush3.bf16.msra.mxu0 %v31106_v55  ;;  %v33246_v55 = vpack.c.bf16 %v30924_v45, %v30922_v11  ;;  %v33274_v12 = vld [vmem:[#allocation74_spill] sm:$0xff] }
0x1e65   :  { %25481 = vmatprep.subr.bf16.mxu0 %v31118_v21  ;;  %v33252_v21 = vpack.c.bf16 %v33250_v17, %v33251_v47 }
0x1e68   :  { %25483 = vmatpush3.bf16.msra.mxu0 %v31129_v4  ;;  %v33248_v4 = vpack.c.bf16 %v30935_v1, %v30933_v3 }
0x1e69   :  { %25485 = vmatprep.subr.bf16.mxu0 %v31134_v22  ;;  %v33242_v22 = vpack.c.bf16 %v30906_v39, %v30904_v56 }
0x1e6c   :  { %25487 = vmatpush3.bf16.msra.mxu0 %v31136_v20  ;;  %v33243_v20 = vpack.c.bf16 %v30910_v26, %v30908_v38 }
0x1e6d   :  { %25489 = vmatprep.subr.bf16.mxu0 %v33239_v14  ;;  %v33275_v14 = vld [vmem:[#allocation76_spill] sm:$0xff] }
0x1e6f   :  { %15339 = vmatmul.mubr.f32.vlgmr.msra.gmra.mrb[38].mxu0 %v31186_v53 }
0x1e70   :  { %25491 = vmatpush3.bf16.msra.mxu0 %v33240_v31  ;;  %15474 = vmatprep.mubr.f32.mxu0 %v15097_v37  ;;  %v33267_v37 = vld [vmem:[#allocation79_spill] sm:$0xff]  ;;  %v33276_v31 = vld [vmem:[#allocation60_spill] sm:$0xff] }
0x1e71   :  { %25493 = vmatprep.subr.bf16.mxu0 %v33241_v30  ;;  %v33278_v30 = vld [vmem:[#allocation68_spill] sm:$0xff] }
0x1e74   :  { %25495 = vmatpush3.bf16.msra.mxu0 %v33242_v22  ;;  %v33279_v22 = vld [vmem:[#allocation70_spill] sm:$0xff] }
0x1e75   :  { %25497 = vmatprep.subr.bf16.mxu0 %v33243_v20  ;;  %v33280_v20 = vand.u32 4294901760, %v30773_v32  ;;  %v33287_v32 = vand.u32 4294901760, %v30904_v56  ;;  %v33294_v56 = vand.u32 4294901760, %v30920_v60  ;;  %v33301_v60 = vand.u32 4294901760, %v30940_v19 }
0x1e76   :  { %v33307_v19 = vand.u32 4294901760, %v33257_v54  ;;  %v14916_v54 = vsel %vm14915_vm2, %v31208_v63, 0.0 }
0x1e78   :  { %25499 = vmatpush3.bf16.msra.mxu0 %v33244_v23  ;;  %v33281_v23 = vand.u32 4294901760, %v30775_v46  ;;  %v33288_v46 = vand.u32 4294901760, %v30906_v39  ;;  %v33295_v39 = vand.u32 4294901760, %v30922_v11  ;;  %v33302_v11 = vand.u32 4294901760, %v30942_v16 }
0x1e79   :  { %25501 = vmatprep.subr.bf16.mxu0 %v33245_v49  ;;  %v33308_v16 = vand.u32 4294901760, %v33256_v8  ;;  %v14917_v8 = vrot.slane %v14916_v54, 4 }
0x1e7a   :  { %v25552_v49 = vpack.c.bf16 %v33281_v23, %v33280_v20 }
0x1e7c   :  { %25503 = vmatpush3.bf16.msra.mxu0 %v33246_v55  ;;  %v33282_v55 = vld [vmem:[#allocation84_spill] sm:$0xff] }
0x1e7d   :  { %25505 = vmatprep.subr.bf16.mxu0 %v33247_v62  ;;  %v33283_v62 = vand.u32 4294901760, %v30777_v51  ;;  %v25558_v51 = vpack.c.bf16 %v33288_v46, %v33287_v32  ;;  %v33312_v32 = vand.u32 4294901760, %v33262_v33 }
0x1e80   :  { %25507 = vmatpush3.bf16.msra.mxu0 %v33248_v4  ;;  %v33284_v4 = vand.u32 4294901760, %v30781_v18  ;;  %v33289_v18 = vand.u32 4294901760, %v30908_v38  ;;  %v33296_v38 = vand.u32 4294901760, %v30924_v45  ;;  %v33303_v45 = vand.u32 4294901760, %v33251_v47 }
0x1e81   :  { %25509 = vmatprep.subr.bf16.mxu0 %v33249_v61  ;;  %v33309_v47 = vand.u32 4294901760, %v33260_v52 }
0x1e82   :  { %v25554_v61 = vpack.c.bf16 %v33284_v4, %v33283_v62  ;;  %v25566_v23 = vpack.c.bf16 %v33296_v38, %v33295_v39  ;;  %v25572_v4 = vpack.c.bf16 %v33302_v11, %v33301_v60 }
0x1e84   :  { %25511 = vmatpush3.bf16.msra.mxu0 %v33252_v21  ;;  %v33285_v21 = vand.u32 4294901760, %v30900_v6 }
0x1e85   :  { %25513 = vmatprep.subr.bf16.mxu0 %v33255_v59  ;;  %v33286_v59 = vand.u32 4294901760, %v30902_v50  ;;  %v33291_v50 = vand.u32 4294901760, %v30912_v9  ;;  %v33298_v9 = vand.u32 4294901760, %v30931_v40  ;;  %v33305_v40 = vand.u32 4294901760, %v33254_v41 }
0x1e88   :  { %25515 = vmatpush3.bf16.msra.mxu0 %v33258_v24  ;;  %v25556_v24 = vpack.c.bf16 %v33286_v59, %v33285_v21  ;;  %v25578_v59 = vpack.c.bf16 %v33308_v16, %v33307_v19 }
0x1e89   :  { %25517 = vmatprep.subr.bf16.mxu0 %v33261_v42  ;;  %v33290_v42 = vand.u32 4294901760, %v30910_v26  ;;  %v33297_v26 = vand.u32 4294901760, %v30929_v15  ;;  %v33304_v15 = vand.u32 4294901760, %v33250_v17  ;;  %v33310_v17 = vand.u32 4294901760, %v33259_v58 }
0x1e8a   :  { %v14918_v58 = vadd.f32 %v14917_v8, %v14916_v54 }
0x1e8b   :  { %v25560_v6 = vpack.c.bf16 %v33290_v42, %v33289_v18  ;;  %v14990_v42 = vld [vmem:[%s33206_s28 + $0x108] sm:$0xff] }
0x1e8c   :  { %25519 = vmatpush3.bf16.msra.mxu0 %v33264_v57  ;;  %v33293_v57 = vand.u32 4294901760, %v30918_v28  ;;  %v33300_v28 = vand.u32 4294901760, %v30935_v1  ;;  %v14929_v1 = vmul.f32 %v31208_v63, %v31208_v63 }
0x1e8d   :  { %25521 = vmatprep.subr.bf16.mxu0 %v33265_v35 }
0x1e8e   :  { %v25564_v20 = vpack.c.bf16 %v33294_v56, %v33293_v57  ;;  %v14944_v41 = vsel %vm14915_vm2, %v14929_v1, 0.0  ;;  %v33313_v57 = vmov 0.0|0.0   ;;  %v14993_v56 = vld [vmem:[%s33206_s28 + $0x120] sm:$0xff] }
0x1e8f   :  { %15477 = vmatmul.mubr.f32.vlgmr.msra.gmra.mrb[40].mxu0 %v31191_v48  ;;  %v33292_v48 = vand.u32 4294901760, %v30914_v10  ;;  %v33299_v10 = vand.u32 4294901760, %v30933_v3  ;;  %v33306_v3 = vand.u32 4294901760, %v33253_v43  ;;  %v33311_v43 = vand.u32 4294901760, %v33263_v7 }
0x1e90   :  { %25523 = vmatpush3.bf16.msra.mxu0 %v33266_v13  ;;  %15581 = vmatprep.mubr.f32.mxu0 %v15098_v25  ;;  %v33277_v25 = vld [vmem:[#allocation56_spill] sm:$0xff]  ;;  %v14919_v7 = vrot.slane %v14918_v58, 2 }
0x1e91   :  { %25525 = vmatprep.subr.bf16.mxu0 %v33267_v37  ;;  %v25570_v62 = vpack.c.bf16 %v33300_v28, %v33299_v10  ;;  %v25576_v21 = vpack.c.bf16 %v33306_v3, %v33305_v40  ;;  %v25582_v46 = vpack.c.bf16 %v33312_v32, %v33311_v43  ;;  %v15875_v10 = vand.u32 4294901760, %v14993_v56 }
0x1e93   :  { %v31416_v3 = vsub.f32 %v14993_v56, %v15875_v10 }
0x1e94   :  { %25527 = vmatpush3.bf16.msra.mxu0 %v33268_v44 }
0x1e95   :  { %25529 = vmatprep.subr.bf16.mxu0 %v33269_v0  ;;  %v15976_v43 = vand.u32 4294901760, %v31416_v3 }
0x1e98   :  { %25531 = vmatpush3.bf16.msra.mxu0 %v33270_v34 }
0x1e99   :  { %25533 = vmatprep.subr.bf16.mxu0 %v33271_v36 }
0x1e9c   :  { %25535 = vmatpush3.bf16.msra.mxu0 %v33272_v29 }
0x1e9d   :  { %25537 = vmatprep.subr.bf16.mxu0 %v33273_v27 }
0x1ea0   :  { %25539 = vmatpush3.bf16.msra.mxu0 %v33274_v12 }
0x1ea1   :  { %25541 = vmatprep.subr.bf16.mxu0 %v33275_v14 }
0x1ea4   :  { %25543 = vmatpush3.bf16.msra.mxu0 %v33276_v31 }
0x1ea5   :  { %25545 = vmatprep.subr.bf16.mxu0 %v33277_v25 }
0x1ea8   :  { %25547 = vmatpush3.bf16.msra.mxu0 %v33278_v30 }
0x1ea9   :  { %25549 = vmatprep.subr.bf16.mxu0 %v33279_v22 }
0x1eac   :  { %25551 = vmatpush3.bf16.msra.mxu0 %v33282_v55 }
0x1ead   :  { %25553 = vmatprep.subr.bf16.mxu0 %v25552_v49  ;;  %v25568_v49 = vpack.c.bf16 %v33298_v9, %v33297_v26  ;;  %v14996_v26 = vld [vmem:[%s33206_s28 + $0x138] sm:$0xff] }
0x1eae   :  { %v15884_v11 = vand.u32 4294901760, %v14996_v26 }
0x1eaf   :  { %15585 = vmatmul.mubr.f32.vlgmr.msra.gmra.mrb[42].mxu0 %v15104_v5  ;;  %v25562_v5 = vpack.c.bf16 %v33292_v48, %v33291_v50 }
0x1eb0   :  { %25555 = vmatpush3.bf16.msra.mxu0 %v25554_v61  ;;  %15751 = vmatprep.mubr.f32.mxu0 %v31188_v2  ;;  %v25574_v61 = vpack.c.bf16 %v33304_v15, %v33303_v45 }
0x1eb1   :  { %25557 = vmatprep.subr.bf16.mxu0 %v25556_v24  ;;  %v25580_v24 = vpack.c.bf16 %v33310_v17, %v33309_v47 }
0x1eb4   :  { %25559 = vmatpush3.bf16.msra.mxu0 %v25558_v51  ;;  %v14945_v51 = vrot.slane %v14944_v41, 4 }
0x1eb5   :  { %25561 = vmatprep.subr.bf16.mxu0 %v25560_v6  ;;  %v15866_v6 = vand.u32 4294901760, %v14990_v42 }
0x1eb6   :  { %v14946_v52 = vadd.f32 %v14945_v51, %v14944_v41  ;;  %v31433_v41 = vsub.f32 %v14996_v26, %v15884_v11 }
0x1eb8   :  { %25563 = vmatpush3.bf16.msra.mxu0 %v25562_v5  ;;  %v14947_v33 = vrot.slane %v14946_v52, 2 }
0x1eb9   :  { %25565 = vmatprep.subr.bf16.mxu0 %v25564_v20 }
0x1eba   :  { %v14948_v18 = vadd.f32 %v14947_v33, %v14946_v52  ;;  %v15977_v52 = vsub.f32 %v31416_v3, %v15976_v43 }
0x1ebc   :  { %25567 = vmatpush3.bf16.msra.mxu0 %v25566_v23  ;;  %v14995_v23 = vld [vmem:[%s33206_s28 + $0x130] sm:$0xff] }
0x1ebd   :  { %25569 = vmatprep.subr.bf16.mxu0 %v25568_v49  ;;  %v15881_v60 = vand.u32 4294901760, %v14995_v23 }
0x1ebf   :  { %v31422_v19 = vpack.c.bf16 %v15884_v11, %v15881_v60  ;;  %v16400_v11 = vld [vmem:[%s33316_s14 + $0x8] sm:$0xff] }
0x1ec0   :  { %25571 = vmatpush3.bf16.msra.mxu0 %v25570_v62  ;;  %v33314_v62 = vmov 0.0  }
0x1ec1   :  { %25573 = vmatprep.subr.bf16.mxu0 %v25572_v4 }
0x1ec4   :  { %25575 = vmatpush3.bf16.msra.mxu0 %v25574_v61 }
0x1ec5   :  { %25577 = vmatprep.subr.bf16.mxu0 %v25576_v21 }
0x1ec8   :  { %25579 = vmatpush3.bf16.msra.mxu0 %v25578_v59 }
0x1ec9   :  { %25581 = vmatprep.subr.bf16.mxu0 %v25580_v24  ;;  %v31431_v24 = vsub.f32 %v14995_v23, %v15881_v60 }
0x1ecb   :  { %v15990_v33 = vand.u32 4294901760, %v31431_v24 }
0x1ecc   :  { %25583 = vmatpush3.bf16.msra.mxu0 %v25582_v46 }
0x1ecd   :  { %25585 = vmatprep.subr.bf16.mxu0 %v33265_v35  ;;  %v14920_v35 = vadd.f32 %v14919_v7, %v14918_v58  ;;  %v15997_v7 = vand.u32 4294901760, %v31433_v41 }
0x1ecf   :  { %15753 = vmatmul.mubr.f32.vlgmr.msra.gmra.mrb[44].mxu0 %v31186_v53 }
0x1ed0   :  { %25587 = vmatpush3.bf16.msra.mxu0 %v33266_v13  ;;  %15855 = vmatprep.mubr.f32.mxu0 %v31188_v2  ;;  %v14949_v13 = vrot.slane %v14948_v18, 1  ;;  %v14921_v2 = vrot.slane %v14920_v35, 1 }
0x1ed1   :  { %25589 = vmatprep.subr.bf16.mxu0 %v33267_v37 }
0x1ed2   :  { %v14950_v37 = vadd.f32 %v14949_v13, %v14948_v18  ;;  %v15978_v13 = vand.u32 4294901760, %v15977_v52 }
0x1ed4   :  { %25591 = vmatpush3.bf16.msra.mxu0 %v33268_v44  ;;  %v14922_v44 = vadd.f32 %v14921_v2, %v14920_v35 }
0x1ed5   :  { %25593 = vmatprep.subr.bf16.mxu0 %v33269_v0  ;;  %v14953_v0 = vmul.f32 0.25, %v14950_v37  ;;  %v15991_v37 = vsub.f32 %v31431_v24, %v15990_v33 }
0x1ed8   :  { %25595 = vmatpush3.bf16.msra.mxu0 %v33270_v34  ;;  %v14926_v34 = vmul.f32 0.25, %v14922_v44  ;;  %v15998_v44 = vsub.f32 %v31433_v41, %v15997_v7 }
0x1ed9   :  { %25597 = vmatprep.subr.bf16.mxu0 %v33271_v36  ;;  %v14989_v36 = vld [vmem:[%s33206_s28 + $0x100] sm:$0xff] }
0x1edc   :  { %25599 = vmatpush3.bf16.msra.mxu0 %v33272_v29  ;;  %v14956_v29 = vsel %vm306_vm0, %v14926_v34, %v14953_v0  ;;  %v15992_v34 = vand.u32 4294901760, %v15991_v37 }
0x1edd   :  { %25601 = vmatprep.subr.bf16.mxu0 %v33273_v27  ;;  %v15863_v27 = vand.u32 4294901760, %v14989_v36 }
0x1edf   :  { %v31375_v50 = vsub.f32 %v14989_v36, %v15863_v27  ;;  %v31380_v48 = vpack.c.bf16 %v15866_v6, %v15863_v27  ;;  %v15999_v36 = vand.u32 4294901760, %v15998_v44 }
0x1ee0   :  { %25603 = vmatpush3.bf16.msra.mxu0 %v33274_v12  ;;  %v14991_v12 = vld [vmem:[%s33206_s28 + $0x110] sm:$0xff] }
0x1ee1   :  { %25605 = vmatprep.subr.bf16.mxu0 %v33275_v14  ;;  %v14992_v14 = vld [vmem:[%s33206_s28 + $0x118] sm:$0xff]  ;;  %v15869_v5 = vand.u32 4294901760, %v14991_v12 }
0x1ee3   :  { %v31388_v39 = vsub.f32 %v14991_v12, %v15869_v5  ;;  %v25650_v12 = vpack.c.bf16 %v31433_v41, %v31431_v24 }
0x1ee4   :  { %25607 = vmatpush3.bf16.msra.mxu0 %v33276_v31  ;;  %v14998_v31 = vsel %vm11354_vm8, %v14956_v29, 0 }
0x1ee5   :  { %25609 = vmatprep.subr.bf16.mxu0 %v33277_v25  ;;  %v31377_v25 = vsub.f32 %v14990_v42, %v15866_v6  ;;  %v31385_v20 = vand.u32 4294901760, %v14998_v31  ;;  %v15962_v15 = vand.u32 4294901760, %v31388_v39  ;;  %v25638_v42 = vpack.c.bf16 %v15999_v36, %v15992_v34 }
0x1ee7   :  { %v15955_v9 = vand.u32 4294901760, %v31377_v25  ;;  %v15963_v47 = vsub.f32 %v31388_v39, %v15962_v15  ;;  %v25641_v29 = vpack.c.bf16 %v31377_v25, %v31375_v50 }
0x1ee8   :  { %25611 = vmatpush3.bf16.msra.mxu0 %v33278_v30  ;;  %v15872_v30 = vand.u32 4294901760, %v14992_v14 }
0x1ee9   :  { %25613 = vmatprep.subr.bf16.mxu0 %v33279_v22  ;;  %v14994_v22 = vld [vmem:[%s33206_s28 + $0x128] sm:$0xff]  ;;  %v15956_v45 = vsub.f32 %v31377_v25, %v15955_v9  ;;  %v15964_v51 = vand.u32 4294901760, %v15963_v47  ;;  %v25674_v25 = vpack.c.bf16 %v15997_v7, %v15990_v33 }
0x1eea   :  { %v31390_v38 = vsub.f32 %v14992_v14, %v15872_v30  ;;  %v31397_v49 = vpack.c.bf16 %v15872_v30, %v15869_v5  ;;  %v15878_v28 = vand.u32 4294901760, %v14994_v22 }
0x1eeb   :  { %v15957_v59 = vand.u32 4294901760, %v15956_v45 }
0x1eec   :  { %25615 = vmatpush3.bf16.msra.mxu0 %v33282_v55  ;;  %v15948_v55 = vand.u32 4294901760, %v31375_v50  ;;  %v15969_v61 = vand.u32 4294901760, %v31390_v38  ;;  %v31414_v40 = vpack.c.bf16 %v15878_v28, %v15875_v10  ;;  %v31418_v21 = vsub.f32 %v14994_v22, %v15878_v28 }
0x1eed   :  { %25616 = vmatprep.subr.bf16.mxu0 %v33313_v57  ;;  %v25644_v27 = vpack.c.bf16 %v31390_v38, %v31388_v39 }
0x1eee   :  { %v15949_v4 = vsub.f32 %v31375_v50, %v15948_v55  ;;  %v15970_v17 = vsub.f32 %v31390_v38, %v15969_v61  ;;  %v15983_v32 = vand.u32 4294901760, %v31418_v21  ;;  %v25647_v6 = vpack.c.bf16 %v31418_v21, %v31416_v3  ;;  %v16402_v3 = vld [vmem:[%s33316_s14 + $0x18] sm:$0xff] }
0x1eef   :  { %15857 = vmatmul.mubr.f32.vlgmr.msra.gmra.mrb[46].mxu0 %v31186_v53  ;;  %v31403_v53 = vsub.f32 %v14998_v31, %v31385_v20  ;;  %v25665_v30 = vpack.c.bf16 %v15955_v9, %v15948_v55  ;;  %v25668_v56 = vpack.c.bf16 %v15969_v61, %v15962_v15  ;;  %v16414_v15 = vand.u32 4294901760, %v16400_v11 }
0x1ef0   :  { %25618 = vmatpush3.bf16.msra.mxu0 %v31380_v48  ;;  %24126 = vmatprep.mubr.msk.f32.mxu0 %vm33315_vm15, %v33314_v62  ;;  %v15950_v16 = vand.u32 4294901760, %v15949_v4  ;;  %v15971_v8 = vand.u32 4294901760, %v15970_v17  ;;  %v15984_v58 = vsub.f32 %v31418_v21, %v15983_v32  ;;  %v25671_v50 = vpack.c.bf16 %v15983_v32, %v15976_v43  ;;  %v16403_v4 = vld [vmem:[%s33316_s14 + $0x20] sm:$0xff]  ;;  %v16406_v43 = vld [vmem:[%s33316_s14 + $0x38] sm:$0xff]  ;;  %v16409_v32 = vld [vmem:[%s33316_s14 + $0x50] sm:$0xff] }
0x1ef1   :  { %25619 = vmatprep.subr.bf16.mxu0 %v33313_v57  ;;  %v15937_v1 = vand.u32 4294901760, %v31403_v53  ;;  %v16418_v61 = vand.u32 4294901760, %v16403_v4 }
0x1ef2   :  { %v25629_v54 = vpack.c.bf16 %v15957_v59, %v15950_v16  ;;  %v25632_v35 = vpack.c.bf16 %v15971_v8, %v15964_v51  ;;  %v15985_v2 = vand.u32 4294901760, %v15984_v58  ;;  %v31522_v16 = vsub.f32 %v16400_v11, %v16414_v15  ;;  %v16405_v51 = vld [vmem:[%s33316_s14 + $0x30] sm:$0xff]  ;;  %v16408_v8 = vld [vmem:[%s33316_s14 + $0x48] sm:$0xff] }
0x1ef3   :  { %v15938_v46 = vsub.f32 %v31403_v53, %v15937_v1  ;;  %v31524_v59 = vsub.f32 %v16403_v4, %v16418_v61  ;;  %v16424_v33 = vand.u32 4294901760, %v16405_v51  ;;  %v16428_v7 = vand.u32 4294901760, %v16408_v8 }
0x1ef4   :  { %25621 = vmatpush3.bf16.msra.mxu0 %v31397_v49  ;;  %v25635_v0 = vpack.c.bf16 %v15985_v2, %v15978_v13  ;;  %v16500_v52 = vand.u32 4294901760, %v31522_v16 }
0x1ef5   :  { %25622 = vmatprep.subr.bf16.mxu0 %v33313_v57  ;;  %v15939_v18 = vand.u32 4294901760, %v15938_v46  ;;  %v16422_v46 = vand.u32 4294901760, %v16406_v43  ;;  %v16512_v58 = vand.u32 4294901760, %v31524_v59  ;;  %v16529_v34 = vsub.f32 %v16405_v51, %v16424_v33 }
0x1ef6   :  { %v16501_v44 = vsub.f32 %v31522_v16, %v16500_v52  ;;  %v16541_v36 = vsub.f32 %v16408_v8, %v16428_v7  ;;  %v16404_v8 = vld [vmem:[%s33316_s14 + $0x28] sm:$0xff] }
0x1ef7   :  { %v16523_v2 = vsub.f32 %v16406_v43, %v16422_v46 }
0x1ef8   :  { %25624 = vmatpush3.bf16.msra.mxu0 %v31414_v40  ;;  %v25710_v4 = vpack.c.bf16 %v16541_v36, %v16529_v34 }
0x1ef9   :  { %25625 = vmatprep.subr.bf16.mxu0 %v33313_v57 }
0x1efc   :  { %25627 = vmatpush3.bf16.msra.mxu0 %v31422_v19 }
0x1efd   :  { %25628 = vmatprep.subr.bf16.mxu0 %v33313_v57 }
0x1eff   :  { %24127 = vmatmul.mubr.f32.vlgmr.msra.gmra.mrb[48].mxu0 %v15939_v18 }
0x1f00   :  { %25630 = vmatpush3.bf16.msra.mxu0 %v25629_v54  ;;  %24145 = vmatprep.mubr.msk.f32.mxu0 %vm33315_vm15, %v33314_v62  ;;  %v16426_v54 = vand.u32 4294901760, %v16409_v32 }
0x1f01   :  { %25631 = vmatprep.subr.bf16.mxu0 %v33313_v57 }
0x1f02   :  { %v31542_v13 = vpack.c.bf16 %v16426_v54, %v16422_v46  ;;  %v16535_v37 = vsub.f32 %v16409_v32, %v16426_v54 }
0x1f04   :  { %25633 = vmatpush3.bf16.msra.mxu0 %v25632_v35  ;;  %v25708_v11 = vpack.c.bf16 %v16535_v37, %v16523_v2 }
0x1f05   :  { %25634 = vmatprep.subr.bf16.mxu0 %v33313_v57 }
0x1f08   :  { %25636 = vmatpush3.bf16.msra.mxu0 %v25635_v0  ;;  %v31545_v0 = vpack.c.bf16 %v16428_v7, %v16424_v33  ;;  %v16407_v33 = vld [vmem:[%s33316_s14 + $0x40] sm:$0xff]  ;;  %v16410_v7 = vld [vmem:[%s33316_s14 + $0x58] sm:$0xff] }
0x1f09   :  { %25637 = vmatprep.subr.bf16.mxu0 %v33313_v57 }
0x1f0c   :  { %25639 = vmatpush3.bf16.msra.mxu0 %v25638_v42  ;;  %v16513_v42 = vsub.f32 %v31524_v59, %v16512_v58 }
0x1f0d   :  { %25640 = vmatprep.subr.bf16.mxu0 %v33313_v57 }
0x1f0f   :  { %24146 = vmatmul.mubr.f32.vlgmr.msra.gmra.mrb[48].mxu0 %v31385_v20 }
0x1f10   :  { %25642 = vmatpush3.bf16.msra.mxu0 %v25641_v29  ;;  %24164 = vmatprep.mubr.msk.f32.mxu0 %vm33315_vm15, %v33314_v62  ;;  %v16502_v29 = vand.u32 4294901760, %v16501_v44 }
0x1f11   :  { %25643 = vmatprep.subr.bf16.mxu0 %v33313_v57 }
0x1f14   :  { %25645 = vmatpush3.bf16.msra.mxu0 %v25644_v27 }
0x1f15   :  { %25646 = vmatprep.subr.bf16.mxu0 %v33313_v57 }
0x1f18   :  { %25648 = vmatpush3.bf16.msra.mxu0 %v25647_v6 }
0x1f19   :  { %25649 = vmatprep.subr.bf16.mxu0 %v33313_v57 }
0x1f1c   :  { %25651 = vmatpush3.bf16.msra.mxu0 %v25650_v12  ;;  %v16514_v12 = vand.u32 4294901760, %v16513_v42 }
0x1f1d   :  { %25652 = vmatprep.subr.bf16.mxu0 %v33313_v57 }
0x1f1f   :  { %24165 = vmatmul.mubr.f32.vlgmr.msra.gmra.mrb[48].mxu0 %v31403_v53 }
0x1f20   :  { %25654 = vmatpush3.bf16.msra.mxu0 %v31380_v48  ;;  %24183 = vmatprep.mubr.msk.f32.mxu0 %vm33315_vm15, %v33314_v62 }
0x1f21   :  { %25655 = vmatprep.subr.bf16.mxu0 %v33313_v57 }
0x1f22   :  { %v22756_v14 = vpop.f32.mrb[36].mxu0 }
0x1f23   :  { %v22757_v31 = vpop.f32.mrb[37].mxu0 }
0x1f24   :  { %v22758_v5 = vadd.f32 %v22757_v31, %v22756_v14  ;;  %25657 = vmatpush3.bf16.msra.mxu0 %v31397_v49  ;;  %v16524_v14 = vand.u32 4294901760, %v16523_v2  ;;  %v16536_v31 = vand.u32 4294901760, %v16535_v37 }
0x1f25   :  { %25658 = vmatprep.subr.bf16.mxu0 %v33313_v57 }
0x1f28   :  { %25660 = vmatpush3.bf16.msra.mxu0 %v31414_v40 }
0x1f29   :  { %25661 = vmatprep.subr.bf16.mxu0 %v33313_v57 }
0x1f2c   :  { %25663 = vmatpush3.bf16.msra.mxu0 %v31422_v19 }
0x1f2d   :  { %25664 = vmatprep.subr.bf16.mxu0 %v33313_v57 }
0x1f2f   :  { %24184 = vmatmul.mubr.f32.vlgmr.msra.gmra.mrb[48].mxu0 %v15937_v1  ;;  %v16420_v1 = vand.u32 4294901760, %v16402_v3 }
0x1f30   :  { %25666 = vmatpush3.bf16.msra.mxu0 %v25665_v30  ;;  %24202 = vmatprep.mubr.msk.f32.mxu0 %vm33315_vm15, %v33314_v62 }
0x1f31   :  { %25667 = vmatprep.subr.bf16.mxu0 %v33313_v57  ;;  %v31530_v41 = vsub.f32 %v16402_v3, %v16420_v1 }
0x1f33   :  { %v16518_v35 = vand.u32 4294901760, %v31530_v41 }
0x1f34   :  { %25669 = vmatpush3.bf16.msra.mxu0 %v25668_v56  ;;  %v16530_v56 = vand.u32 4294901760, %v16529_v34 }
0x1f35   :  { %25670 = vmatprep.subr.bf16.mxu0 %v33313_v57  ;;  %v16519_v6 = vsub.f32 %v31530_v41, %v16518_v35 }
0x1f37   :  { %v16520_v30 = vand.u32 4294901760, %v16519_v6 }
0x1f38   :  { %25672 = vmatpush3.bf16.msra.mxu0 %v25671_v50  ;;  %v16542_v50 = vand.u32 4294901760, %v16541_v36 }
0x1f39   :  { %25673 = vmatprep.subr.bf16.mxu0 %v33313_v57 }
0x1f3c   :  { %25675 = vmatpush3.bf16.msra.mxu0 %v25674_v25  ;;  %v25696_v25 = vpack.c.bf16 %v16514_v12, %v16502_v29 }
0x1f3d   :  { %25676 = vmatprep.subr.bf16.mxu0 %v33313_v57 }
0x1f3f   :  { %24203 = vmatmul.mubr.f32.vlgmr.msra.gmra.mrb[48].mxu0 %v31385_v20 }
0x1f40   :  { %25678 = vmatpush3.bf16.msra.mxu0 %v31380_v48  ;;  %24221 = vmatprep.mubr.msk.f32.mxu0 %vm33315_vm15, %v33314_v62 }
0x1f41   :  { %25679 = vmatprep.subr.bf16.mxu0 %v33313_v57 }
0x1f42   :  { %v22791_v22 = vpop.f32.mrb[38].mxu0 }
0x1f43   :  { %v22792_v39 = vpop.f32.mrb[39].mxu0 }
0x1f44   :  { %v22793_v38 = vadd.f32 %v22792_v39, %v22791_v22  ;;  %25681 = vmatpush3.bf16.msra.mxu0 %v31397_v49  ;;  %v16525_v22 = vsub.f32 %v16523_v2, %v16524_v14  ;;  %v16537_v39 = vsub.f32 %v16535_v37, %v16536_v31  ;;  %v16964_v2 = vand.u32 4294901760, %v16407_v33 }
0x1f45   :  { %25682 = vmatprep.subr.bf16.mxu0 %v33313_v57  ;;  %v16967_v37 = vand.u32 4294901760, %v16410_v7 }
0x1f46   :  { %v15341_v23 = vadd.f32 %v22793_v38, %v22758_v5  ;;  %v17052_v44 = vsub.f32 %v16407_v33, %v16964_v2  ;;  %v26891_v33 = vld [vmem:[%s33318_s25 + $0x230] ss:$8 sps:$4 sm:$0xff]  }
0x1f48   :  { %25684 = vmatpush3.bf16.msra.mxu0 %v31414_v40  ;;  %v16399_v40 = vld [vmem:[%s33316_s14] sm:$0xff]  ;;  %v17053_v12 = vand.u32 4294901760, %v17052_v44 }
0x1f49   :  { %25685 = vmatprep.subr.bf16.mxu0 %v33313_v57  ;;  %v16416_v21 = vand.u32 4294901760, %v16399_v40 }
0x1f4b   :  { %v31526_v17 = vpack.c.bf16 %v16420_v1, %v16416_v21  ;;  %v31528_v24 = vsub.f32 %v16399_v40, %v16416_v21  ;;  %v25720_v40 = vpack.c.bf16 %v16512_v58, %v16500_v52  ;;  %v25724_v21 = vpack.c.bf16 %v16536_v31, %v16524_v14 }
0x1f4c   :  { %25687 = vmatpush3.bf16.msra.mxu0 %v31422_v19  ;;  %v31520_v19 = vpack.c.bf16 %v16418_v61, %v16414_v15  ;;  %v25726_v1 = vpack.c.bf16 %v16542_v50, %v16530_v56  ;;  %v16961_v58 = vand.u32 4294901760, %v16404_v8 }
0x1f4d   :  { %v16506_v18 = vand.u32 4294901760, %v31528_v24 }
0x1f4e   :  { %25689 = vmatprep.subr.bf16.mxu1 %v31520_v19 }
0x1f4f   :  { %24222 = vmatmul.mubr.f32.vlgmr.msra.gmra.mrb[48].mxu0 %v31385_v20  ;;  %25691 = vmatpush1.bf16.msra.mxu1 %v31526_v17  ;;  %v16507_v27 = vsub.f32 %v31528_v24, %v16506_v18 }
0x1f50   :  { %25693 = vmatprep.subr.bf16.mxu1 %v31542_v13 }
0x1f51   :  { %v16508_v5 = vand.u32 4294901760, %v16507_v27 }
0x1f53   :  { %25695 = vmatpush1.bf16.msra.mxu1 %v31545_v0  ;;  %v25698_v38 = vpack.c.bf16 %v16520_v30, %v16508_v5  ;;  %v17054_v5 = vsub.f32 %v17052_v44, %v17053_v12 }
0x1f54   :  { %25697 = vmatprep.subr.bf16.mxu1 %v25696_v25 }
0x1f55   :  { %v17055_v30 = vand.u32 4294901760, %v17054_v5 }
0x1f62   :  { %v22826_v48 = vpop.f32.mrb[40].mxu0 }
0x1f63   :  { %v22827_v26 = vpop.f32.mrb[41].mxu0 }
0x1f64   :  { %v22828_v55 = vadd.f32 %v22827_v26, %v22826_v48  ;;  %v16543_v48 = vsub.f32 %v16541_v36, %v16542_v50  ;;  %v16526_v26 = vand.u32 4294901760, %v16525_v22 }
0x1f66   :  { %v15479_v9 = vadd.f32 %v22828_v55, %v15341_v23  ;;  %v16531_v23 = vsub.f32 %v16529_v34, %v16530_v56  ;;  %v16538_v55 = vand.u32 4294901760, %v16537_v39  ;;  %v17059_v34 = vsub.f32 %v16410_v7, %v16967_v37 }
0x1f68   :  { %v17060_v14 = vand.u32 4294901760, %v17059_v34  ;;  %v25752_v22 = vpack.c.bf16 %v17059_v34, %v17052_v44 }
0x1f82   :  { %v22861_v49 = vpop.f32.mrb[42].mxu0 }
0x1f83   :  { %v22862_v10 = vpop.f32.mrb[43].mxu0 }
0x1f84   :  { %v22863_v28 = vadd.f32 %v22862_v10, %v22861_v49  ;;  %v16544_v49 = vand.u32 4294901760, %v16543_v48  ;;  %v25700_v10 = vpack.c.bf16 %v16538_v55, %v16526_v26  ;;  %v26846_v48 = vld [vmem:[%s33318_s25 + $0x140] ss:$8 sps:$4 sm:$0xff]   ;;  %v26851_v26 = vld [vmem:[%s33318_s25 + $0x154] ss:$8 sps:$4 sm:$0xff]  }
0x1f85   :  { %v26849_v55 = vld [vmem:[%s33318_s25 + $0x150] ss:$8 sps:$4 sm:$0xff]  }
0x1f86   :  { %v15587_v53 = vadd.f32 %v22863_v28, %v15479_v9  ;;  %v16532_v9 = vand.u32 4294901760, %v16531_v23  ;;  %v26848_v23 = vld [vmem:[%s33318_s25 + $0x144] ss:$8 sps:$4 sm:$0xff]  }
0x1f87   :  { %18085 = vmatprep.subr.bf16.mxu0 %v26848_v23  ;;  %v33323_v23 = vld [vmem:[#allocation55_spill] sm:$0xff] }
0x1f88   :  { %v25702_v28 = vpack.c.bf16 %v16544_v49, %v16532_v9  ;;  %18086 = vmatpush1.bf16.msra.mxu0 %v26846_v48  ;;  %v26854_v9 = vld [vmem:[%s33318_s25 + $0x164] ss:$8 sps:$4 sm:$0xff]   ;;  %v26852_v49 = vld [vmem:[%s33318_s25 + $0x160] ss:$8 sps:$4 sm:$0xff]  }
0x1f89   :  { %18087 = vmatprep.subr.bf16.mxu0 %v26851_v26  ;;  %v33324_v26 = vld [vmem:[#allocation63_spill] sm:$0xff] }
0x1f8c   :  { %18088 = vmatpush1.bf16.msra.mxu0 %v26849_v55 }
0x1f8d   :  { %18089 = vmatprep.subr.bf16.mxu0 %v26854_v9 }
0x1f90   :  { %18090 = vmatpush1.bf16.msra.mxu0 %v26852_v49 }
0x1fa2   :  { %v22896_v60 = vpop.f32.mrb[44].mxu0 }
0x1fa3   :  { %v22897_v45 = vpop.f32.mrb[45].mxu0 }
0x1fa4   :  { %v22898_v20 = vadd.f32 %v22897_v45, %v22896_v60  ;;  %v25706_v60 = vpack.c.bf16 %v31530_v41, %v31528_v24  ;;  %v16401_v41 = vld [vmem:[%s33316_s14 + $0x10] sm:$0xff] }
0x1fa5   :  { %v16958_v52 = vand.u32 4294901760, %v16401_v41 }
0x1fa6   :  { %v15755_v47 = vadd.f32 %v22898_v20, %v15587_v53  ;;  %v25704_v53 = vpack.c.bf16 %v31524_v59, %v31522_v16  ;;  %v25722_v20 = vpack.c.bf16 %v16518_v35, %v16506_v18  ;;  %v17045_v35 = vsub.f32 %v16404_v8, %v16961_v58 }
0x1fa7   :  { %v17038_v18 = vsub.f32 %v16401_v41, %v16958_v52  ;;  %v25737_v29 = vpack.c.bf16 %v16961_v58, %v16958_v52  ;;  %v26893_v41 = vld [vmem:[%s33318_s25 + $0x234] ss:$8 sps:$4 sm:$0xff]  }
0x1fa8   :  { %v17046_v42 = vand.u32 4294901760, %v17045_v35 }
0x1fa9   :  { %v17039_v36 = vand.u32 4294901760, %v17038_v18  ;;  %v25749_v25 = vpack.c.bf16 %v17045_v35, %v17038_v18 }
0x1faa   :  { %v17047_v6 = vsub.f32 %v17045_v35, %v17046_v42 }
0x1fab   :  { %v17040_v27 = vsub.f32 %v17038_v18, %v17039_v36  ;;  %v25761_v39 = vpack.c.bf16 %v17046_v42, %v17039_v36 }
0x1fac   :  { %v17048_v31 = vand.u32 4294901760, %v17047_v6 }
0x1fc2   :  { %v22931_v45 = vpop.f32.mrb[46].mxu0 }
0x1fc3   :  { %v22932_v15 = vpop.f32.mrb[47].mxu0 }
0x1fc4   :  { %v22933_v61 = vadd.f32 %v22932_v15, %v22931_v45  ;;  %v26864_v45 = vld [vmem:[%s33318_s25 + $0x1a0] ss:$8 sps:$4 sm:$0xff]   ;;  %v26869_v15 = vld [vmem:[%s33318_s25 + $0x1b4] ss:$8 sps:$4 sm:$0xff]  }
0x1fc6   :  { %v15859_v3 = vadd.f32 %v22933_v61, %v15755_v47  ;;  %v26867_v61 = vld [vmem:[%s33318_s25 + $0x1b0] ss:$8 sps:$4 sm:$0xff]  }
0x2022   :  { %v16395_v43 = vpop.f32.mrb[48].mxu0 }
0x2023   :  { %v26012_v32 = vadd.f32 %v16395_v43, %v15859_v3  ;;  %v24223_v46 = vpop.f32.mrb[49].mxu0  ;;  %v26870_v3 = vld [vmem:[%s33318_s25 + $0x1c0] ss:$8 sps:$4 sm:$0xff]   ;;  %v26878_v43 = vld [vmem:[%s33318_s25 + $0x1e4] ss:$8 sps:$4 sm:$0xff]  }
0x2024   :  { %v26879_v46 = vld [vmem:[%s33318_s25 + $0x1f0] ss:$8 sps:$4 sm:$0xff]  }
0x2025   :  { %v16412_v54 = vsel %vm33317_vm5, %v26012_v32, 0  ;;  %v26881_v32 = vld [vmem:[%s33318_s25 + $0x1f4] ss:$8 sps:$4 sm:$0xff]  }
0x2026   :  { %v31557_v51 = vand.u32 4294901760, %v16412_v54 }
0x2028   :  { %v31560_v16 = vsub.f32 %v16412_v54, %v31557_v51  ;;  %v26884_v54 = vld [vmem:[%s33318_s25 + $0x204] ss:$8 sps:$4 sm:$0xff]  }
0x202a   :  { %v31563_v59 = vand.u32 4294901760, %v31560_v16 }
0x202c   :  { %v16490_v24 = vsub.f32 %v31560_v16, %v31563_v59 }
0x202e   :  { %v31567_v47 = vand.u32 4294901760, %v16490_v24  ;;  %v26890_v24 = vld [vmem:[%s33318_s25 + $0x224] ss:$8 sps:$4 sm:$0xff]  }
0x2030   :  { %16492 = vmatmul.mubr.f32.vlgmr.msra.gmra.mrb[32].mxu1 %v31567_v47 }
0x2031   :  { %25699 = vmatpush1.bf16.msra.mxu1 %v25698_v38  ;;  %16602 = vmatprep.mubr.f32.mxu1 %v33314_v62  ;;  %v25764_v38 = vpack.c.bf16 %v17060_v14, %v17053_v12 }
0x2032   :  { %25701 = vmatprep.subr.bf16.mxu1 %v25700_v10  ;;  %v26855_v10 = vld [vmem:[%s33318_s25 + $0x170] ss:$8 sps:$4 sm:$0xff]  }
0x2035   :  { %25703 = vmatpush1.bf16.msra.mxu1 %v25702_v28  ;;  %v26860_v28 = vld [vmem:[%s33318_s25 + $0x184] ss:$8 sps:$4 sm:$0xff]  }
0x2036   :  { %25705 = vmatprep.subr.bf16.mxu1 %v25704_v53  ;;  %v26858_v53 = vld [vmem:[%s33318_s25 + $0x180] ss:$8 sps:$4 sm:$0xff]  }
0x2038   :  { %16604 = vmatmul.mubr.f32.vlgmr.msra.gmra.mrb[32].mxu1 %v31557_v51 }
0x2039   :  { %25707 = vmatpush1.bf16.msra.mxu1 %v25706_v60  ;;  %16690 = vmatprep.mubr.f32.mxu1 %v33314_v62  ;;  %v26863_v60 = vld [vmem:[%s33318_s25 + $0x194] ss:$8 sps:$4 sm:$0xff]  }
0x203a   :  { %25709 = vmatprep.subr.bf16.mxu1 %v25708_v11  ;;  %v26861_v11 = vld [vmem:[%s33318_s25 + $0x190] ss:$8 sps:$4 sm:$0xff]  }
0x203d   :  { %25711 = vmatpush1.bf16.msra.mxu1 %v25710_v4  ;;  %v26866_v4 = vld [vmem:[%s33318_s25 + $0x1a4] ss:$8 sps:$4 sm:$0xff]  }
0x203e   :  { %25713 = vmatprep.subr.bf16.mxu1 %v31520_v19 }
0x2040   :  { %16693 = vmatmul.mubr.f32.vlgmr.msra.gmra.mrb[32].mxu1 %v31560_v16 }
0x2041   :  { %25715 = vmatpush1.bf16.msra.mxu1 %v31526_v17  ;;  %16771 = vmatprep.mubr.f32.mxu1 %v33314_v62 }
0x2042   :  { %25717 = vmatprep.subr.bf16.mxu1 %v31542_v13 }
0x2045   :  { %25719 = vmatpush1.bf16.msra.mxu1 %v31545_v0 }
0x2046   :  { %25721 = vmatprep.subr.bf16.mxu1 %v25720_v40  ;;  %v26872_v40 = vld [vmem:[%s33318_s25 + $0x1c4] ss:$8 sps:$4 sm:$0xff]  }
0x2048   :  { %16775 = vmatmul.mubr.f32.vlgmr.msra.gmra.mrb[32].mxu1 %v31563_v59 }
0x2049   :  { %25723 = vmatpush1.bf16.msra.mxu1 %v25722_v20  ;;  %16869 = vmatprep.mubr.f32.mxu1 %v33314_v62  ;;  %v26875_v20 = vld [vmem:[%s33318_s25 + $0x1d4] ss:$8 sps:$4 sm:$0xff]  }
0x204a   :  { %25725 = vmatprep.subr.bf16.mxu1 %v25724_v21  ;;  %v26873_v21 = vld [vmem:[%s33318_s25 + $0x1d0] ss:$8 sps:$4 sm:$0xff]  }
0x204d   :  { %25727 = vmatpush1.bf16.msra.mxu1 %v25726_v1  ;;  %v26876_v1 = vld [vmem:[%s33318_s25 + $0x1e0] ss:$8 sps:$4 sm:$0xff]  }
0x204e   :  { %25729 = vmatprep.subr.bf16.mxu1 %v31520_v19  ;;  %v25740_v19 = vpack.c.bf16 %v16967_v37, %v16964_v2 }
0x2050   :  { %16871 = vmatmul.mubr.f32.vlgmr.msra.gmra.mrb[32].mxu1 %v31557_v51 }
0x2051   :  { %25731 = vmatpush1.bf16.msra.mxu1 %v31526_v17  ;;  %16949 = vmatprep.mubr.f32.mxu1 %v33314_v62  ;;  %v17041_v17 = vand.u32 4294901760, %v17040_v27 }
0x2052   :  { %25733 = vmatprep.subr.bf16.mxu1 %v31542_v13  ;;  %v17061_v13 = vsub.f32 %v17059_v34, %v17060_v14  ;;  %v26896_v34 = vld [vmem:[%s33318_s25 + $0x244] ss:$8 sps:$4 sm:$0xff]  }
0x2054   :  { %v17062_v56 = vand.u32 4294901760, %v17061_v13  ;;  %v33320_v13 = vld [vmem:[#allocation54_spill] sm:$0xff] }
0x2055   :  { %25735 = vmatpush1.bf16.msra.mxu1 %v31545_v0  ;;  %v25743_v0 = vpack.c.bf16 %v17048_v31, %v17041_v17 }
0x2056   :  { %25736 = vmatprep.subr.bf16.mxu1 %v33313_v57  ;;  %v25746_v50 = vpack.c.bf16 %v17062_v56, %v17055_v30 }
0x2058   :  { %16951 = vmatmul.mubr.f32.vlgmr.msra.gmra.mrb[32].mxu1 %v31557_v51 }
0x2059   :  { %25738 = vmatpush3.bf16.msra.mxu1 %v25737_v29  ;;  %24232 = vmatprep.mubr.msk.f32.mxu1 %vm33315_vm15, %v33314_v62 }
0x205a   :  { %25739 = vmatprep.subr.bf16.mxu1 %v33313_v57 }
0x205d   :  { %25741 = vmatpush3.bf16.msra.mxu1 %v25740_v19 }
0x205e   :  { %25742 = vmatprep.subr.bf16.mxu1 %v33313_v57 }
0x2060   :  { %24233 = vmatmul.mubr.f32.vlgmr.msra.gmra.mrb[34].mxu1 %v31567_v47  ;;  %v26888_v47 = vld [vmem:[%s33318_s25 + $0x220] ss:$8 sps:$4 sm:$0xff]  }
0x2061   :  { %25744 = vmatpush3.bf16.msra.mxu1 %v25743_v0  ;;  %24243 = vmatprep.mubr.msk.f32.mxu1 %vm33315_vm15, %v33314_v62 }
0x2062   :  { %25745 = vmatprep.subr.bf16.mxu1 %v33313_v57 }
0x2065   :  { %25747 = vmatpush3.bf16.msra.mxu1 %v25746_v50  ;;  %v17457_v50 = vld [vmem:[%s33319_s1] sm:$0x7] }
0x2066   :  { %25748 = vmatprep.subr.bf16.mxu1 %v33313_v57 }
0x2068   :  { %24244 = vmatmul.mubr.f32.vlgmr.msra.gmra.mrb[34].mxu1 %v31557_v51 }
0x2069   :  { %25750 = vmatpush3.bf16.msra.mxu1 %v25749_v25  ;;  %24254 = vmatprep.mubr.msk.f32.mxu1 %vm33315_vm15, %v33314_v62 }
0x206a   :  { %25751 = vmatprep.subr.bf16.mxu1 %v33313_v57 }
0x206d   :  { %25753 = vmatpush3.bf16.msra.mxu1 %v25752_v22  ;;  %v33321_v22 = vld [vmem:[#allocation53_spill] sm:$0xff] }
0x206e   :  { %25754 = vmatprep.subr.bf16.mxu1 %v33313_v57 }
0x2070   :  { %24255 = vmatmul.mubr.f32.vlgmr.msra.gmra.mrb[34].mxu1 %v31560_v16  ;;  %v26887_v16 = vld [vmem:[%s33318_s25 + $0x214] ss:$8 sps:$4 sm:$0xff]  }
0x2071   :  { %25756 = vmatpush3.bf16.msra.mxu1 %v25737_v29  ;;  %24265 = vmatprep.mubr.msk.f32.mxu1 %vm33315_vm15, %v33314_v62 }
0x2072   :  { %25757 = vmatprep.subr.bf16.mxu1 %v33313_v57 }
0x2075   :  { %25759 = vmatpush3.bf16.msra.mxu1 %v25740_v19 }
0x2076   :  { %25760 = vmatprep.subr.bf16.mxu1 %v33313_v57 }
0x2078   :  { %24266 = vmatmul.mubr.f32.vlgmr.msra.gmra.mrb[34].mxu1 %v31563_v59  ;;  %v26885_v59 = vld [vmem:[%s33318_s25 + $0x210] ss:$8 sps:$4 sm:$0xff]  }
0x2079   :  { %25762 = vmatpush3.bf16.msra.mxu1 %v25761_v39  ;;  %24276 = vmatprep.mubr.msk.f32.mxu1 %vm33315_vm15, %v33314_v62  ;;  %v17504_v39 = vsub.s32 2, %v33321_v22 }
0x207a   :  { %25763 = vmatprep.subr.bf16.mxu1 %v33313_v57 }
0x207d   :  { %25765 = vmatpush3.bf16.msra.mxu1 %v25764_v38 }
0x207e   :  { %25766 = vmatprep.subr.bf16.mxu1 %v33313_v57 }
0x2080   :  { %24277 = vmatmul.mubr.f32.vlgmr.msra.gmra.mrb[34].mxu1 %v31557_v51 }
0x2081   :  { %25768 = vmatpush3.bf16.msra.mxu1 %v25737_v29  ;;  %24287 = vmatprep.mubr.msk.f32.mxu1 %vm33315_vm15, %v33314_v62 }
0x2082   :  { %25769 = vmatprep.subr.bf16.mxu1 %v33313_v57  ;;  %v26857_v57 = vld [vmem:[%s33318_s25 + $0x174] ss:$8 sps:$4 sm:$0xff]  }
0x2083   :  { %18091 = vmatprep.subr.bf16.mxu0 %v26857_v57 }
0x2084   :  { %18092 = vmatpush1.bf16.msra.mxu0 %v26855_v10 }
0x2085   :  { %25771 = vmatpush3.bf16.msra.mxu1 %v25740_v19  ;;  %18093 = vmatprep.subr.bf16.mxu0 %v26860_v28  ;;  %v33325_v28 = vld [vmem:[#allocation86_spill] sm:$0xff] }
0x2088   :  { %24288 = vmatmul.mubr.f32.vlgmr.msra.gmra.mrb[34].mxu1 %v31557_v51  ;;  %18094 = vmatpush1.bf16.msra.mxu0 %v26858_v53  ;;  %v26882_v51 = vld [vmem:[%s33318_s25 + $0x200] ss:$8 sps:$4 sm:$0xff]  }
0x2089   :  { %18095 = vmatprep.subr.bf16.mxu0 %v26863_v60  ;;  %v33326_v60 = vld [vmem:[#allocation87_spill] sm:$0xff] }
0x208c   :  { %18096 = vmatpush1.bf16.msra.mxu0 %v26861_v11 }
0x208d   :  { %18097 = vmatprep.subr.bf16.mxu0 %v26866_v4 }
0x2090   :  { %18098 = vmatpush1.bf16.msra.mxu0 %v26864_v45 }
0x2091   :  { %18099 = vmatprep.subr.bf16.mxu0 %v26869_v15 }
0x2094   :  { %18100 = vmatpush1.bf16.msra.mxu0 %v26867_v61 }
0x2095   :  { %18101 = vmatprep.subr.bf16.mxu0 %v26872_v40 }
0x2098   :  { %18102 = vmatpush1.bf16.msra.mxu0 %v26870_v3  ;;  %v17492_v3 = vld [vmem:[%s33322_s5] sm:$0x7] }
0x2099   :  { %18103 = vmatprep.subr.bf16.mxu0 %v26875_v20 }
0x209c   :  { %18104 = vmatpush1.bf16.msra.mxu0 %v26873_v21 }
0x209d   :  { %18105 = vmatprep.subr.bf16.mxu0 %v26878_v43 }
0x20a0   :  { %18106 = vmatpush1.bf16.msra.mxu0 %v26876_v1 }
0x20a1   :  { %18107 = vmatprep.subr.bf16.mxu0 %v26881_v32 }
0x20a4   :  { %18108 = vmatpush1.bf16.msra.mxu0 %v26879_v46 }
0x20a5   :  { %18109 = vmatprep.subr.bf16.mxu0 %v26884_v54 }
0x20a8   :  { %18110 = vmatpush1.bf16.msra.mxu0 %v26882_v51 }
0x20a9   :  { %18111 = vmatprep.subr.bf16.mxu0 %v26887_v16 }
0x20ac   :  { %18112 = vmatpush1.bf16.msra.mxu0 %v26885_v59 }
0x20ad   :  { %18113 = vmatprep.subr.bf16.mxu0 %v26890_v24 }
0x20b0   :  { %18114 = vmatpush1.bf16.msra.mxu0 %v26888_v47  ;;  %v33327_v47 = vld [vmem:[#allocation59_spill] sm:$0xff] }
0x20b1   :  { %18115 = vmatprep.subr.bf16.mxu0 %v26893_v41 }
0x20b4   :  { %18116 = vmatpush1.bf16.msra.mxu0 %v26891_v33 }
0x20b5   :  { %18126 = vmatprep.subr.bf16.mxu0 %v26896_v34 }
0x212b   :  { %v16952_v8 = vpop.f32.mrb[32].mxu1 }
0x212c   :  { %v17442_v52 = vmul.f32 %v16952_v8, %v16952_v8  ;;  %v16954_v58 = vpop.f32.mrb[33].mxu1 }
0x212d   :  { %v17443_v7 = vmul.f32 %v16954_v58, %v16954_v58 }
0x212e   :  { %v17448_v18 = vrot.slane %v17442_v52, 7 }
0x212f   :  { %v17449_v35 = vrot.slane %v17443_v7, 7 }
0x2130   :  { %v17454_v2 = vsub.f32 %v16952_v8, %v17448_v18 }
0x2131   :  { %v17455_v37 = vsub.f32 %v16954_v58, %v17449_v35 }
0x2132   :  { %v17458_v44 = vadd.f32 1e-05, %v17454_v2 }
0x2133   :  { %v17459_v36 = vadd.f32 1e-05, %v17455_v37 }
0x2134   :  { %27044 = vrsqrt.f32 %v17458_v44 }
0x2135   :  { %27046 = vrsqrt.f32 %v17459_v36 }
0x213e   :  { %v27045_v42 = vpop.eup %27044 }
0x213f   :  { %v27047_v29 = vpop.eup %27046 }
0x2140   :  { %v17467_v27 = vcombine.low %v27045_v42, %v27047_v29 }
0x2142   :  { %v17474_v0 = vrot.slane %v17467_v27, %v33320_v13 }
0x215b   :  { %v17438_v6 = vpop.f32.mrb[34].mxu1 }
0x215c   :  { %v17444_v12 = vmul.f32 %v17438_v6, %v17438_v6  ;;  %v24289_v14 = vpop.f32.mrb[35].mxu1 }
0x215e   :  { %v17450_v19 = vrot.slane %v17444_v12, 7 }
0x2160   :  { %v17456_v17 = vsub.f32 %v17438_v6, %v17450_v19 }
0x2162   :  { %v17460_v31 = vadd.f32 1e-05, %v17456_v17 }
0x2164   :  { %27048 = vrsqrt.f32 %v17460_v31 }
0x216e   :  { %v27049_v5 = vpop.eup %27048 }
0x216f   :  { %v17481_v30 = vrot.slane %v27049_v5, %v33320_v13 }
0x2171   :  { %v17482_v56 = vcombine.high %v17474_v0, %v17481_v30 }
0x2173   :  { %v17489_v25 = vrot.slane %v17482_v56, %v33320_v13 }
0x2175   :  { %v17491_v38 = vmul.f32 %v17489_v25, %v17457_v50 }
0x2177   :  { %v17497_v48 = vrot.slane %v17491_v38, %v33323_v23  ;;  %v17501_v55 = vrot.slane %v17491_v38, %v33324_v26  ;;  %v17505_v9 = vrot.slane %v17491_v38, %v17504_v39 }
0x2179   :  { %v17509_v49 = vmul.f32 %v17497_v48, %v16952_v8  ;;  %v17510_v57 = vmul.f32 %v17501_v55, %v16954_v58  ;;  %v17511_v10 = vmul.f32 %v17505_v9, %v17438_v6  ;;  %v17540_v53 = vmul.f32 %v17497_v48, %v33325_v28 }
0x217a   :  { %v17541_v11 = vmul.f32 %v17501_v55, %v33326_v60  ;;  %v17542_v4 = vmul.f32 %v17505_v9, %v31208_v63 }
0x217b   :  { %v17515_v45 = vcombine.low %v17509_v49, %v17510_v57  ;;  %v17529_v61 = vrot.slane %v17511_v10, %v33320_v13 }
0x217d   :  { %v17522_v15 = vrot.slane %v17515_v45, %v33320_v13 }
0x217f   :  { %v17530_v40 = vcombine.low %v17522_v15, %v17529_v61 }
0x2181   :  { %v17537_v20 = vrot.slane %v17530_v40, %v33320_v13 }
0x2183   :  { %v17539_v21 = vsub.f32 %v17492_v3, %v17537_v20 }
0x2185   :  { %v17547_v1 = vrot.slane %v17539_v21, %v33323_v23  ;;  %v17551_v43 = vrot.slane %v17539_v21, %v33324_v26  ;;  %v17555_v32 = vrot.slane %v17539_v21, %v17504_v39 }
0x2187   :  { %v17559_v46 = vadd.f32 %v17547_v1, %v17540_v53  ;;  %v17560_v54 = vadd.f32 %v17551_v43, %v17541_v11  ;;  %v17561_v51 = vadd.f32 %v17555_v32, %v17542_v4  ;;  %v26914_v11 = vld [vmem:[%s33318_s25 + $0x24] ss:$8 sps:$4 sm:$0xff]   ;;  %v26924_v1 = vld [vmem:[%s33318_s25 + $0x60] ss:$8 sps:$4 sm:$0xff]  }
0x2189   :  { %v17562_v16 = vmax.f32 %v17559_v46, 0.0  ;;  %v17563_v63 = vmax.f32 %v17560_v54, 0.0  ;;  %v17564_v59 = vmax.f32 %v17561_v51, 0.0 }
0x218b   :  { %v17568_v24 = vcombine.low %v17562_v16, %v17563_v63  ;;  %v17582_v41 = vrot.slane %v17564_v59, %v33327_v47 }
0x218d   :  { %v17575_v8 = vrot.slane %v17568_v24, %v33327_v47  ;;  %v22093_v52 = vcombine.low %v17582_v41, %v17582_v41  ;;  %v22094_v58 = vcombine.high %v17582_v41, %v17582_v41 }
0x218f   :  { %v17583_v33 = vcombine.low %v17575_v8, %v17582_v41  ;;  %v17584_v7 = vcombine.high %v17575_v8, %v17582_v41  ;;  %v17599_v18 = vrot.slane %v22093_v52, %v33327_v47  ;;  %v17615_v35 = vrot.slane %v22094_v58, %v33327_v47 }
0x2191   :  { %v17592_v2 = vrot.slane %v17583_v33, %v33327_v47  ;;  %v17608_v37 = vrot.slane %v17584_v7, %v33327_v47  ;;  %v17625_v44 = vpack.c.bf16 %v17599_v18, %v17599_v18  ;;  %v17628_v34 = vpack.c.bf16 %v17615_v35, %v17615_v35 }
0x2193   :  { %v17600_v36 = vcombine.high %v17592_v2, %v17592_v2  ;;  %v17616_v42 = vcombine.high %v17608_v37, %v17608_v37  ;;  %v17623_v29 = vpack.c.bf16 %v17592_v2, %v17592_v2  ;;  %v17626_v27 = vpack.c.bf16 %v17608_v37, %v17608_v37 }
0x2194   :  { %v17644_v6 = vshrl.u32 %v17625_v44, 16  ;;  %v17647_v12 = vshll.u32 %v17625_v44, 16  ;;  %v17665_v14 = vshrl.u32 %v17628_v34, 16  ;;  %v17668_v5 = vshll.u32 %v17628_v34, 16 }
0x2195   :  { %v17624_v19 = vpack.c.bf16 %v17600_v36, %v17600_v36  ;;  %v17627_v17 = vpack.c.bf16 %v17616_v42, %v17616_v42  ;;  %v17630_v31 = vshrl.u32 %v17623_v29, 16  ;;  %v17633_v0 = vshll.u32 %v17623_v29, 16 }
0x2196   :  { %v17646_v30 = vrot.slane %v17644_v6, 7  ;;  %v17651_v56 = vshrl.u32 %v17626_v27, 16  ;;  %v17667_v50 = vrot.slane %v17665_v14, 7  ;;  %v17654_v39 = vshll.u32 %v17626_v27, 16  ;;  %v26939_v6 = vld [vmem:[%s33318_s25 + $0xb0] ss:$8 sps:$4 sm:$0xff]  }
0x2197   :  { %v17632_v25 = vrot.slane %v17630_v31, 7  ;;  %v17637_v22 = vshrl.u32 %v17624_v19, 16  ;;  %v17658_v38 = vshrl.u32 %v17627_v17, 16  ;;  %v17640_v48 = vshll.u32 %v17624_v19, 16 }
0x2198   :  { %v17653_v55 = vrot.slane %v17651_v56, 7  ;;  %v17649_v9 = vor.u32 %v17647_v12, %v17646_v30  ;;  %v17670_v49 = vor.u32 %v17668_v5, %v17667_v50  ;;  %v17661_v28 = vshll.u32 %v17627_v17, 16  ;;  %v26899_v56 = vld [vmem:[%s33318_s25 + $0x254] ss:$8 sps:$4 sm:$0xff]   ;;  %v26897_v50 = vld [vmem:[%s33318_s25 + $0x250] ss:$8 sps:$4 sm:$0xff]  }
0x2199   :  { %v17639_v57 = vrot.slane %v17637_v22, 7  ;;  %v17660_v10 = vrot.slane %v17658_v38, 7  ;;  %v17635_v53 = vor.u32 %v17633_v0, %v17632_v25  ;;  %v26894_v0 = vld [vmem:[%s33318_s25 + $0x240] ss:$8 sps:$4 sm:$0xff]   ;;  %v33331_v25 = vmov 0  }
0x219a   :  { %v17656_v60 = vor.u32 %v17654_v39, %v17653_v55  ;;  %v17679_v4 = vsel %vm27568_vm3, 0, %v17649_v9  ;;  %v17682_v40 = vsel %vm27568_vm3, 0, %v17670_v49  ;;  %v26902_v22 = vld [vmem:[%s33318_s25 + $0x264] ss:$8 sps:$4 sm:$0xff]   ;;  %v26900_v39 = vld [vmem:[%s33318_s25 + $0x260] ss:$8 sps:$4 sm:$0xff]  }
0x219b   :  { %v17642_v45 = vor.u32 %v17640_v48, %v17639_v57  ;;  %v17663_v15 = vor.u32 %v17661_v28, %v17660_v10  ;;  %v17677_v61 = vsel %vm27568_vm3, 0, %v17635_v53  ;;  %v17685_v32 = vsel %vm30656_vm14, %v17679_v4, 0  ;;  %v26905_v38 = vld [vmem:[%s33318_s25 + $0x274] ss:$8 sps:$4 sm:$0xff]   ;;  %v26903_v55 = vld [vmem:[%s33318_s25 + $0x270] ss:$8 sps:$4 sm:$0xff]  }
0x219c   :  { %v17680_v3 = vsel %vm27568_vm3, 0, %v17656_v60  ;;  %v17683_v43 = vsel %vm30656_vm14, %v17677_v61, 0  ;;  %v17688_v16 = vsel %vm30656_vm14, %v17682_v40, 0  ;;  %v17709_v47 = vrot.slane %v17685_v32, %v33320_v13  ;;  %v26908_v9 = vld [vmem:[%s33318_s25 + $0x4] ss:$8 sps:$4 sm:$0xff]  }
0x219d   :  { %v17678_v20 = vsel %vm27568_vm3, 0, %v17642_v45  ;;  %v17681_v21 = vsel %vm27568_vm3, 0, %v17663_v15  ;;  %v17686_v54 = vsel %vm30656_vm14, %v17680_v3, 0  ;;  %v17732_v8 = vrot.slane %v17688_v16, %v33320_v13  ;;  %v26906_v57 = vld [vmem:[%s33318_s25] ss:$8 sps:$4 sm:$0xff]   ;;  %vm33360_vm3 = vmmov %vm33238_vm1 }
0x219e   :  { %v17684_v46 = vsel %vm30656_vm14, %v17678_v20, 0  ;;  %v17687_v51 = vsel %vm30656_vm14, %v17681_v21, 0  ;;  %v26911_v28 = vld [vmem:[%s33318_s25 + $0x14] ss:$8 sps:$4 sm:$0xff]   ;;  %v26909_v60 = vld [vmem:[%s33318_s25 + $0x10] ss:$8 sps:$4 sm:$0xff]   ;;  %vm33363_vm14 = vmmov %vm33238_vm1 }
0x219f   :  { %v17695_v63 = vcombine.low %v17683_v43, %v17684_v46  ;;  %v17718_v59 = vcombine.low %v17686_v54, %v17687_v51  ;;  %v26912_v4 = vld [vmem:[%s33318_s25 + $0x20] ss:$8 sps:$4 sm:$0xff]   ;;  %v26917_v45 = vld [vmem:[%s33318_s25 + $0x34] ss:$8 sps:$4 sm:$0xff]   ;;  %v26915_v15 = vld [vmem:[%s33318_s25 + $0x30] ss:$8 sps:$4 sm:$0xff]  }
0x21a0   :  { %v26920_v61 = vld [vmem:[%s33318_s25 + $0x44] ss:$8 sps:$4 sm:$0xff]   ;;  %v26918_v40 = vld [vmem:[%s33318_s25 + $0x40] ss:$8 sps:$4 sm:$0xff]   ;;  %v26923_v3 = vld [vmem:[%s33318_s25 + $0x54] ss:$8 sps:$4 sm:$0xff]  }
0x21a1   :  { %v17702_v24 = vrot.slane %v17695_v63, %v33320_v13  ;;  %v17725_v41 = vrot.slane %v17718_v59, %v33320_v13  ;;  %v26921_v20 = vld [vmem:[%s33318_s25 + $0x50] ss:$8 sps:$4 sm:$0xff]   ;;  %v26926_v21 = vld [vmem:[%s33318_s25 + $0x64] ss:$8 sps:$4 sm:$0xff]   ;;  %v26929_v43 = vld [vmem:[%s33318_s25 + $0x74] ss:$8 sps:$4 sm:$0xff]  }
0x21a2   :  { %v26927_v32 = vld [vmem:[%s33318_s25 + $0x70] ss:$8 sps:$4 sm:$0xff]   ;;  %v26932_v46 = vld [vmem:[%s33318_s25 + $0x84] ss:$8 sps:$4 sm:$0xff]   ;;  %v26930_v54 = vld [vmem:[%s33318_s25 + $0x80] ss:$8 sps:$4 sm:$0xff]  }
0x21a3   :  { %v17710_v52 = vcombine.low %v17702_v24, %v17709_v47  ;;  %v17733_v58 = vcombine.low %v17725_v41, %v17732_v8  ;;  %v17781_v33 = vcombine.high %v17702_v24, %v17709_v47  ;;  %v17789_v7 = vcombine.high %v17725_v41, %v17732_v8  ;;  %v26935_v51 = vld [vmem:[%s33318_s25 + $0x94] ss:$8 sps:$4 sm:$0xff]   ;;  %v18884_v16 = vld [vmem:[%s33332_s9 + $0x80] sm:$0xff]  ;;  %v18885_v63 = vld [vmem:[%s33332_s9 + $0x88] sm:$0xff] }
0x21a4   :  { %v18868_v59 = vld [vmem:[%s33332_s9] sm:$0xff]  ;;  %v26933_v24 = vld [vmem:[%s33318_s25 + $0x90] ss:$8 sps:$4 sm:$0xff]   ;;  %v18949_v47 = vand.u32 4294901760, %v18884_v16  ;;  %v18952_v41 = vand.u32 4294901760, %v18885_v63  ;;  %v18869_v8 = vld [vmem:[%s33332_s9 + $0x8] sm:$0xff] }
0x21a5   :  { %v17717_v18 = vrot.slane %v17710_v52, %v33320_v13  ;;  %v17740_v35 = vrot.slane %v17733_v58, %v33320_v13  ;;  %v31708_v2 = vrot.slane %v17781_v33, %v33320_v13  ;;  %v31711_v37 = vrot.slane %v17789_v7, %v33320_v13  ;;  %v26938_v58 = vld [vmem:[%s33318_s25 + $0xa4] ss:$8 sps:$4 sm:$0xff]  }
0x21a6   :  { %v18901_v52 = vand.u32 4294901760, %v18868_v59  ;;  %v18904_v33 = vand.u32 4294901760, %v18869_v8  ;;  %v31764_v7 = vpack.c.bf16 %v18952_v41, %v18949_v47 }
0x21a7   :  { %v17798_v44 = vshrl.u32 %v17717_v18, 16  ;;  %v17803_v34 = vshll.u32 %v31708_v2, 16  ;;  %v17807_v36 = vshrl.u32 %v17740_v35, 16  ;;  %v17812_v42 = vshll.u32 %v31711_v37, 16 }
0x21a8   :  { %v18167_v29 = vcombine.low %v17717_v18, %v17740_v35  ;;  %v18519_v27 = vcombine.low %v31708_v2, %v31711_v37  ;;  %33333 = vst [vmem:[#allocation62_spill] sm:$0xff] %v31764_v7  ;;  %v31766_v18 = vsub.f32 %v18884_v16, %v18949_v47  ;;  %v31768_v35 = vsub.f32 %v18885_v63, %v18952_v41  ;;  %v26971_v2 = vld [vmem:[%s33318_s25 + $0x294] ss:$8 sps:$4 sm:$0xff]   ;;  %v26993_v16 = vld [vmem:[%s33318_s25 + $0x310] ss:$8 sps:$4 sm:$0xff]  }
0x21a9   :  { %v17805_v12 = vsel %vm30687_vm13, %v17798_v44, %v17803_v34  ;;  %v17814_v14 = vsel %vm30687_vm13, %v17807_v36, %v17812_v42  ;;  %v31770_v44 = vsub.f32 %v18868_v59, %v18901_v52  ;;  %v31772_v34 = vpack.c.bf16 %v18904_v33, %v18901_v52  ;;  %v26936_v42 = vld [vmem:[%s33318_s25 + $0xa0] ss:$8 sps:$4 sm:$0xff]   ;;  %25773 = vmatprep.subr.bf16.mxu1 %v31764_v7  ;;  %v26998_v63 = vld [vmem:[%s33318_s25 + $0x324] ss:$8 sps:$4 sm:$0xff]   ;;  %v26999_v47 = vld [vmem:[%s33318_s25 + $0x330] ss:$8 sps:$4 sm:$0xff]  }
0x21aa   :  { %v17856_v19 = vcombine.low %v17805_v12, %v17814_v14  ;;  %v31732_v48 = vrot.slane %v18167_v29, %v33320_v13  ;;  %v31774_v36 = vsub.f32 %v18869_v8, %v18904_v33  ;;  %v26941_v29 = vld [vmem:[%s33318_s25 + $0xb4] ss:$8 sps:$4 sm:$0xff]   ;;  %v26944_v12 = vld [vmem:[%s33318_s25 + $0xc4] ss:$8 sps:$4 sm:$0xff]   ;;  %v26942_v14 = vld [vmem:[%s33318_s25 + $0xc0] ss:$8 sps:$4 sm:$0xff]  }
0x21ab   :  { %33334 = vst [vmem:[#allocation61_spill] sm:$0xff] %v31772_v34  ;;  %25775 = vmatpush3.bf16.msra.mxu1 %v31772_v34  ;;  %v26996_v59 = vld [vmem:[%s33318_s25 + $0x320] ss:$8 sps:$4 sm:$0xff]   ;;  %v27004_v41 = vld [vmem:[%s33318_s25 + $0x344] ss:$8 sps:$4 sm:$0xff]   ;;  %vm33454_vm13 = vmmov %vm33238_vm1 }
0x21ac   :  { %v17863_v17 = vrot.slane %v17856_v19, %v33320_v13  ;;  %v18175_v49 = vcombine.high %v31732_v48, %v31732_v48  ;;  %v26947_v19 = vld [vmem:[%s33318_s25 + $0xd4] ss:$8 sps:$4 sm:$0xff]   ;;  %v27002_v8 = vld [vmem:[%s33318_s25 + $0x340] ss:$8 sps:$4 sm:$0xff]   ;;  %v27010_v33 = vld [vmem:[%s33318_s25 + $0x364] ss:$8 sps:$4 sm:$0xff]  }
0x21ad   :  { %v27007_v52 = vld [vmem:[%s33318_s25 + $0x354] ss:$8 sps:$4 sm:$0xff]  }
0x21ae   :  { %v17864_v31 = vcombine.high %v17863_v17, %v17863_v17  ;;  %v17871_v30 = vrot.slane %v17863_v17, %v33320_v13  ;;  %v18189_v53 = vrot.slane %v18175_v49, %v33320_v13  ;;  %v26945_v17 = vld [vmem:[%s33318_s25 + $0xd0] ss:$8 sps:$4 sm:$0xff]   ;;  %v26965_v49 = vld [vmem:[%s33318_s25 + $0x134] ss:$8 sps:$4 sm:$0xff]  }
0x21b0   :  { %v17878_v5 = vrot.slane %v17864_v31, %v33320_v13  ;;  %v17879_v10 = vcombine.high %v17871_v30, %v17871_v30  ;;  %v26950_v31 = vld [vmem:[%s33318_s25 + $0xe4] ss:$8 sps:$4 sm:$0xff]  }
0x21b2   :  { %18117 = vmatprep.mubr.bf16.mxu0 %v17878_v5  ;;  %v26948_v5 = vld [vmem:[%s33318_s25 + $0xe0] ss:$8 sps:$4 sm:$0xff]  }
0x21b3   :  { %18118 = vmatmul.mubr.bf16.vlgmr.msra.gmra.mrb[52].mxu0 %v17871_v30  ;;  %v26951_v30 = vld [vmem:[%s33318_s25 + $0xf0] ss:$8 sps:$4 sm:$0xff]  }
0x21b4   :  { %18127 = vmatpush1.bf16.msra.mxu0 %v26894_v0  ;;  %18158 = vmatprep.mubr.bf16.mxu0 %v33331_v25  ;;  %v26953_v0 = vld [vmem:[%s33318_s25 + $0xf4] ss:$8 sps:$4 sm:$0xff]  }
0x21b5   :  { %18128 = vmatprep.subr.bf16.mxu0 %v26899_v56  ;;  %v26956_v56 = vld [vmem:[%s33318_s25 + $0x104] ss:$8 sps:$4 sm:$0xff]  }
0x21b8   :  { %18129 = vmatpush1.bf16.msra.mxu0 %v26897_v50  ;;  %v26954_v50 = vld [vmem:[%s33318_s25 + $0x100] ss:$8 sps:$4 sm:$0xff]  }
0x21b9   :  { %18130 = vmatprep.subr.bf16.mxu0 %v26902_v22  ;;  %v18182_v22 = vrot.slane %v31732_v48, %v33320_v13  ;;  %v31803_v48 = vrot.slane %v18519_v27, %v33320_v13  ;;  %v26969_v27 = vld [vmem:[%s33318_s25 + $0x290] ss:$8 sps:$4 sm:$0xff]  }
0x21bc   :  { %18131 = vmatpush1.bf16.msra.mxu0 %v26900_v39  ;;  %v26959_v39 = vld [vmem:[%s33318_s25 + $0x114] ss:$8 sps:$4 sm:$0xff]  }
0x21bd   :  { %18132 = vmatprep.subr.bf16.mxu0 %v26905_v38  ;;  %v26957_v38 = vld [vmem:[%s33318_s25 + $0x110] ss:$8 sps:$4 sm:$0xff]  }
0x21c0   :  { %18133 = vmatpush1.bf16.msra.mxu0 %v26903_v55  ;;  %v26962_v55 = vld [vmem:[%s33318_s25 + $0x124] ss:$8 sps:$4 sm:$0xff]  }
0x21c1   :  { %18396 = vmatprep.subr.bf16.mxu0 %v26908_v9  ;;  %v26960_v9 = vld [vmem:[%s33318_s25 + $0x120] ss:$8 sps:$4 sm:$0xff]  }
0x21c3   :  { %22177 = vmatmul.mubr.msk.bf16.vlgmr.msra.gmra.mrb[52].mxu0 %vm11354_vm8, %v17879_v10  ;;  %v26968_v10 = vld [vmem:[%s33318_s25 + $0x284] ss:$8 sps:$4 sm:$0xff]  }
0x21c4   :  { %18397 = vmatpush1.bf16.msra.mxu0 %v26906_v57  ;;  %18428 = vmatprep.mubr.bf16.mxu0 %v18189_v53  ;;  %v26963_v57 = vld [vmem:[%s33318_s25 + $0x130] ss:$8 sps:$4 sm:$0xff]   ;;  %v26966_v53 = vld [vmem:[%s33318_s25 + $0x280] ss:$8 sps:$4 sm:$0xff]  }
0x21c5   :  { %18398 = vmatprep.subr.bf16.mxu0 %v26911_v28  ;;  %v18527_v28 = vcombine.high %v31803_v48, %v31803_v48 }
0x21c7   :  { %v18541_v37 = vrot.slane %v18527_v28, %v33320_v13  ;;  %v18888_v28 = vld [vmem:[%s33332_s9 + $0xa0] sm:$0xff] }
0x21c8   :  { %18399 = vmatpush1.bf16.msra.mxu0 %v26909_v60  ;;  %v18190_v60 = vcombine.high %v18182_v22, %v18182_v22 }
0x21c9   :  { %18400 = vmatprep.subr.bf16.mxu0 %v26914_v11  ;;  %v26974_v11 = vld [vmem:[%s33318_s25 + $0x2a4] ss:$8 sps:$4 sm:$0xff]  }
0x21cc   :  { %18401 = vmatpush1.bf16.msra.mxu0 %v26912_v4  ;;  %v26972_v4 = vld [vmem:[%s33318_s25 + $0x2a0] ss:$8 sps:$4 sm:$0xff]  }
0x21cd   :  { %18402 = vmatprep.subr.bf16.mxu0 %v26917_v45  ;;  %v26977_v45 = vld [vmem:[%s33318_s25 + $0x2b4] ss:$8 sps:$4 sm:$0xff]  }
0x21d0   :  { %18403 = vmatpush1.bf16.msra.mxu0 %v26915_v15  ;;  %v26975_v15 = vld [vmem:[%s33318_s25 + $0x2b0] ss:$8 sps:$4 sm:$0xff]  }
0x21d1   :  { %18404 = vmatprep.subr.bf16.mxu0 %v26920_v61  ;;  %v26980_v61 = vld [vmem:[%s33318_s25 + $0x2c4] ss:$8 sps:$4 sm:$0xff]  }
0x21d4   :  { %18405 = vmatpush1.bf16.msra.mxu0 %v26918_v40  ;;  %v26978_v40 = vld [vmem:[%s33318_s25 + $0x2c0] ss:$8 sps:$4 sm:$0xff]  }
0x21d5   :  { %18406 = vmatprep.subr.bf16.mxu0 %v26923_v3  ;;  %v26983_v3 = vld [vmem:[%s33318_s25 + $0x2d4] ss:$8 sps:$4 sm:$0xff]  }
0x21d8   :  { %18407 = vmatpush1.bf16.msra.mxu0 %v26921_v20  ;;  %v26981_v20 = vld [vmem:[%s33318_s25 + $0x2d0] ss:$8 sps:$4 sm:$0xff]  }
0x21d9   :  { %18408 = vmatprep.subr.bf16.mxu0 %v26926_v21  ;;  %v26986_v21 = vld [vmem:[%s33318_s25 + $0x2e4] ss:$8 sps:$4 sm:$0xff]  }
0x21dc   :  { %18409 = vmatpush1.bf16.msra.mxu0 %v26924_v1  ;;  %v26984_v1 = vld [vmem:[%s33318_s25 + $0x2e0] ss:$8 sps:$4 sm:$0xff]  }
0x21dd   :  { %18410 = vmatprep.subr.bf16.mxu0 %v26929_v43  ;;  %v26989_v43 = vld [vmem:[%s33318_s25 + $0x2f4] ss:$8 sps:$4 sm:$0xff]  }
0x21e0   :  { %18411 = vmatpush1.bf16.msra.mxu0 %v26927_v32  ;;  %v26987_v32 = vld [vmem:[%s33318_s25 + $0x2f0] ss:$8 sps:$4 sm:$0xff]  }
0x21e1   :  { %18412 = vmatprep.subr.bf16.mxu0 %v26932_v46  ;;  %v26992_v46 = vld [vmem:[%s33318_s25 + $0x304] ss:$8 sps:$4 sm:$0xff]  }
0x21e4   :  { %18413 = vmatpush1.bf16.msra.mxu0 %v26930_v54  ;;  %v26990_v54 = vld [vmem:[%s33318_s25 + $0x300] ss:$8 sps:$4 sm:$0xff]  }
0x21e5   :  { %18414 = vmatprep.subr.bf16.mxu0 %v26935_v51  ;;  %v26995_v51 = vld [vmem:[%s33318_s25 + $0x314] ss:$8 sps:$4 sm:$0xff]  }
0x21e8   :  { %18415 = vmatpush1.bf16.msra.mxu0 %v26933_v24  ;;  %v27001_v24 = vld [vmem:[%s33318_s25 + $0x334] ss:$8 sps:$4 sm:$0xff]  }
0x21e9   :  { %18416 = vmatprep.subr.bf16.mxu0 %v26938_v58  ;;  %v27005_v58 = vld [vmem:[%s33318_s25 + $0x350] ss:$8 sps:$4 sm:$0xff]  }
0x21ec   :  { %18417 = vmatpush1.bf16.msra.mxu0 %v26936_v42  ;;  %v27008_v42 = vld [vmem:[%s33318_s25 + $0x360] ss:$8 sps:$4 sm:$0xff]  }
0x21ed   :  { %18418 = vmatprep.subr.bf16.mxu0 %v26941_v29  ;;  %v27013_v29 = vld [vmem:[%s33318_s25 + $0x374] ss:$8 sps:$4 sm:$0xff]  }
0x21f0   :  { %18419 = vmatpush1.bf16.msra.mxu0 %v26939_v6  ;;  %v27011_v6 = vld [vmem:[%s33318_s25 + $0x370] ss:$8 sps:$4 sm:$0xff]  }
0x21f1   :  { %18420 = vmatprep.subr.bf16.mxu0 %v26944_v12  ;;  %v27016_v12 = vld [vmem:[%s33318_s25 + $0x384] ss:$8 sps:$4 sm:$0xff]  }
0x21f4   :  { %18421 = vmatpush1.bf16.msra.mxu0 %v26942_v14  ;;  %v27014_v14 = vld [vmem:[%s33318_s25 + $0x380] ss:$8 sps:$4 sm:$0xff]  }
0x21f5   :  { %18422 = vmatprep.subr.bf16.mxu0 %v26947_v19  ;;  %v18534_v19 = vrot.slane %v31803_v48, %v33320_v13 }
0x21f8   :  { %18423 = vmatpush1.bf16.msra.mxu0 %v26945_v17  ;;  %v27019_v17 = vld [vmem:[%s33318_s25 + $0x394] ss:$8 sps:$4 sm:$0xff]  }
0x21f9   :  { %18424 = vmatprep.subr.bf16.mxu0 %v26950_v31  ;;  %v27017_v31 = vld [vmem:[%s33318_s25 + $0x390] ss:$8 sps:$4 sm:$0xff]  }
0x21fc   :  { %18425 = vmatpush1.bf16.msra.mxu0 %v26948_v5  ;;  %v27022_v5 = vld [vmem:[%s33318_s25 + $0x3a4] ss:$8 sps:$4 sm:$0xff]  }
0x21fd   :  { %18426 = vmatprep.subr.bf16.mxu0 %v26953_v0  ;;  %v27020_v0 = vld [vmem:[%s33318_s25 + $0x3a0] ss:$8 sps:$4 sm:$0xff]  }
0x2200   :  { %18427 = vmatpush1.bf16.msra.mxu0 %v26951_v30  ;;  %v27025_v30 = vld [vmem:[%s33318_s25 + $0x3b4] ss:$8 sps:$4 sm:$0xff]  }
0x2201   :  { %18437 = vmatprep.subr.bf16.mxu0 %v26956_v56  ;;  %v27023_v56 = vld [vmem:[%s33318_s25 + $0x3b0] ss:$8 sps:$4 sm:$0xff]  }
0x2203   :  { %18429 = vmatmul.mubr.bf16.vlgmr.msra.gmra.mrb[52].mxu0 %v18182_v22  ;;  %v18887_v22 = vld [vmem:[%s33332_s9 + $0x98] sm:$0xff] }
0x2204   :  { %18438 = vmatpush1.bf16.msra.mxu0 %v26954_v50  ;;  %18469 = vmatprep.mubr.bf16.mxu0 %v33331_v25  ;;  %v18542_v50 = vcombine.high %v18534_v19, %v18534_v19 }
0x2205   :  { %18439 = vmatprep.subr.bf16.mxu0 %v26959_v39 }
0x2208   :  { %18440 = vmatpush1.bf16.msra.mxu0 %v26957_v38  ;;  %v18958_v38 = vand.u32 4294901760, %v18887_v22 }
0x2209   :  { %18441 = vmatprep.subr.bf16.mxu0 %v26962_v55  ;;  %v18870_v55 = vld [vmem:[%s33332_s9 + $0x10] sm:$0xff] }
0x220c   :  { %18442 = vmatpush1.bf16.msra.mxu0 %v26960_v9  ;;  %v18871_v9 = vld [vmem:[%s33332_s9 + $0x18] sm:$0xff] }
0x220d   :  { %18443 = vmatprep.subr.bf16.mxu0 %v26965_v49  ;;  %v18907_v49 = vand.u32 4294901760, %v18870_v55  ;;  %v18910_v48 = vand.u32 4294901760, %v18871_v9 }
0x2210   :  { %18444 = vmatpush1.bf16.msra.mxu0 %v26963_v57 }
0x2211   :  { %18748 = vmatprep.subr.bf16.mxu0 %v26968_v10  ;;  %v31861_v10 = vpack.c.bf16 %v18910_v48, %v18907_v49 }
0x2213   :  { %22218 = vmatmul.mubr.msk.bf16.vlgmr.msra.gmra.mrb[52].mxu0 %vm11354_vm8, %v18190_v60  ;;  %33336 = vst [vmem:[#allocation57_spill] sm:$0xff] %v31861_v10  ;;  %v18961_v60 = vand.u32 4294901760, %v18888_v28 }
0x2214   :  { %18749 = vmatpush1.bf16.msra.mxu0 %v26966_v53  ;;  %18780 = vmatprep.mubr.bf16.mxu0 %v18541_v37  ;;  %v18889_v53 = vld [vmem:[%s33332_s9 + $0xa8] sm:$0xff]  ;;  %v18872_v37 = vld [vmem:[%s33332_s9 + $0x20] sm:$0xff] }
0x2215   :  { %18750 = vmatprep.subr.bf16.mxu0 %v26971_v2  ;;  %v18964_v2 = vand.u32 4294901760, %v18889_v53 }
0x2218   :  { %18751 = vmatpush1.bf16.msra.mxu0 %v26969_v27  ;;  %v18873_v27 = vld [vmem:[%s33332_s9 + $0x28] sm:$0xff] }
0x2219   :  { %18752 = vmatprep.subr.bf16.mxu0 %v26974_v11  ;;  %v18913_v11 = vand.u32 4294901760, %v18872_v37 }
0x221b   :  { %v31911_v26 = vsub.f32 %v18872_v37, %v18913_v11  ;;  %v18899_v37 = vld [vmem:[%s33332_s9 + $0xf8] sm:$0xff] }
0x221c   :  { %18753 = vmatpush1.bf16.msra.mxu0 %v26972_v4  ;;  %v18916_v4 = vand.u32 4294901760, %v18873_v27 }
0x221d   :  { %18754 = vmatprep.subr.bf16.mxu0 %v26977_v45  ;;  %v31869_v45 = vpack.c.bf16 %v18964_v2, %v18961_v60 }
0x221e   :  { %v31913_v23 = vsub.f32 %v18873_v27, %v18916_v4 }
0x221f   :  { %33337 = vst [vmem:[#allocation69_spill] sm:$0xff] %v31869_v45 }
0x2220   :  { %18755 = vmatpush1.bf16.msra.mxu0 %v26975_v15  ;;  %v31871_v15 = vpack.c.bf16 %v18916_v4, %v18913_v11 }
0x2221   :  { %18756 = vmatprep.subr.bf16.mxu0 %v26980_v61  ;;  %v18890_v61 = vld [vmem:[%s33332_s9 + $0xb0] sm:$0xff] }
0x2222   :  { %33338 = vst [vmem:[#allocation67_spill] sm:$0xff] %v31871_v15 }
0x2224   :  { %18757 = vmatpush1.bf16.msra.mxu0 %v26978_v40  ;;  %v18891_v40 = vld [vmem:[%s33332_s9 + $0xb8] sm:$0xff] }
0x2225   :  { %18758 = vmatprep.subr.bf16.mxu0 %v26983_v3  ;;  %v18967_v3 = vand.u32 4294901760, %v18890_v61 }
0x2227   :  { %v31915_v13 = vsub.f32 %v18890_v61, %v18967_v3 }
0x2228   :  { %18759 = vmatpush1.bf16.msra.mxu0 %v26981_v20  ;;  %v18970_v20 = vand.u32 4294901760, %v18891_v40 }
0x2229   :  { %18760 = vmatprep.subr.bf16.mxu0 %v26986_v21  ;;  %v18874_v21 = vld [vmem:[%s33332_s9 + $0x30] sm:$0xff] }
0x222c   :  { %18761 = vmatpush1.bf16.msra.mxu0 %v26984_v1  ;;  %v18875_v1 = vld [vmem:[%s33332_s9 + $0x38] sm:$0xff] }
0x222d   :  { %18762 = vmatprep.subr.bf16.mxu0 %v26989_v43  ;;  %v18919_v43 = vand.u32 4294901760, %v18874_v21 }
0x2230   :  { %18763 = vmatpush1.bf16.msra.mxu0 %v26987_v32  ;;  %v18922_v32 = vand.u32 4294901760, %v18875_v1 }
0x2231   :  { %18764 = vmatprep.subr.bf16.mxu0 %v26992_v46  ;;  %v31879_v46 = vpack.c.bf16 %v18970_v20, %v18967_v3 }
0x2233   :  { %33339 = vst [vmem:[#allocation82_spill] sm:$0xff] %v31879_v46 }
0x2234   :  { %18765 = vmatpush1.bf16.msra.mxu0 %v26990_v54  ;;  %v31881_v54 = vpack.c.bf16 %v18922_v32, %v18919_v43 }
0x2235   :  { %18766 = vmatprep.subr.bf16.mxu0 %v26995_v51  ;;  %v18892_v51 = vld [vmem:[%s33332_s9 + $0xc0] sm:$0xff] }
0x2236   :  { %33340 = vst [vmem:[#allocation81_spill] sm:$0xff] %v31881_v54 }
0x2238   :  { %18767 = vmatpush1.bf16.msra.mxu0 %v26993_v16  ;;  %v18893_v16 = vld [vmem:[%s33332_s9 + $0xc8] sm:$0xff] }
0x2239   :  { %18768 = vmatprep.subr.bf16.mxu0 %v26998_v63  ;;  %v18973_v63 = vand.u32 4294901760, %v18892_v51 }
0x223c   :  { %18769 = vmatpush1.bf16.msra.mxu0 %v26996_v59  ;;  %v18976_v59 = vand.u32 4294901760, %v18893_v16 }
0x223d   :  { %18770 = vmatprep.subr.bf16.mxu0 %v27001_v24  ;;  %v18876_v24 = vld [vmem:[%s33332_s9 + $0x40] sm:$0xff] }
0x2240   :  { %18771 = vmatpush1.bf16.msra.mxu0 %v26999_v47  ;;  %v18877_v47 = vld [vmem:[%s33332_s9 + $0x48] sm:$0xff] }
0x2241   :  { %18772 = vmatprep.subr.bf16.mxu0 %v27004_v41  ;;  %v18925_v41 = vand.u32 4294901760, %v18876_v24 }
0x2244   :  { %18773 = vmatpush1.bf16.msra.mxu0 %v27002_v8  ;;  %v18928_v8 = vand.u32 4294901760, %v18877_v47 }
0x2245   :  { %18774 = vmatprep.subr.bf16.mxu0 %v27007_v52  ;;  %v31889_v52 = vpack.c.bf16 %v18976_v59, %v18973_v63 }
0x2247   :  { %33341 = vst [vmem:[#allocation85_spill] sm:$0xff] %v31889_v52 }
0x2248   :  { %18775 = vmatpush1.bf16.msra.mxu0 %v27005_v58  ;;  %v31891_v58 = vpack.c.bf16 %v18928_v8, %v18925_v41 }
0x2249   :  { %18776 = vmatprep.subr.bf16.mxu0 %v27010_v33  ;;  %v18894_v33 = vld [vmem:[%s33332_s9 + $0xd0] sm:$0xff] }
0x224a   :  { %33342 = vst [vmem:[#allocation83_spill] sm:$0xff] %v31891_v58 }
0x224c   :  { %18777 = vmatpush1.bf16.msra.mxu0 %v27008_v42  ;;  %v18895_v42 = vld [vmem:[%s33332_s9 + $0xd8] sm:$0xff] }
0x224d   :  { %18778 = vmatprep.subr.bf16.mxu0 %v27013_v29  ;;  %v18878_v29 = vld [vmem:[%s33332_s9 + $0x50] sm:$0xff] }
0x2250   :  { %18779 = vmatpush1.bf16.msra.mxu0 %v27011_v6  ;;  %v18879_v6 = vld [vmem:[%s33332_s9 + $0x58] sm:$0xff] }
0x2251   :  { %18789 = vmatprep.subr.bf16.mxu0 %v27016_v12  ;;  %v18979_v12 = vand.u32 4294901760, %v18894_v33 }
0x2253   :  { %18781 = vmatmul.mubr.bf16.vlgmr.msra.gmra.mrb[52].mxu0 %v18534_v19  ;;  %v18931_v19 = vand.u32 4294901760, %v18878_v29  ;;  %v31939_v11 = vsub.f32 %v18894_v33, %v18979_v12 }
0x2254   :  { %18790 = vmatpush1.bf16.msra.mxu0 %v27014_v14  ;;  %18821 = vmatprep.mubr.bf16.mxu0 %v33331_v25  ;;  %v18886_v25 = vld [vmem:[%s33332_s9 + $0x90] sm:$0xff]  ;;  %v18982_v14 = vand.u32 4294901760, %v18895_v42 }
0x2255   :  { %18791 = vmatprep.subr.bf16.mxu0 %v27019_v17  ;;  %v18955_v39 = vand.u32 4294901760, %v18886_v25  ;;  %v18934_v17 = vand.u32 4294901760, %v18879_v6  ;;  %v31946_v3 = vsub.f32 %v18878_v29, %v18931_v19 }
0x2256   :  { %v31937_v27 = vpack.c.bf16 %v18982_v14, %v18979_v12  ;;  %v31941_v4 = vsub.f32 %v18895_v42, %v18982_v14 }
0x2257   :  { %v31859_v57 = vpack.c.bf16 %v18958_v38, %v18955_v39  ;;  %v31943_v61 = vpack.c.bf16 %v18934_v17, %v18931_v19  ;;  %33345 = vst [vmem:[#allocation79_spill] sm:$0xff] %v31946_v3 }
0x2258   :  { %18792 = vmatpush1.bf16.msra.mxu0 %v27017_v31  ;;  %v31899_v31 = vsub.f32 %v18886_v25, %v18955_v39  ;;  %v31917_v25 = vsub.f32 %v18891_v40, %v18970_v20  ;;  %v31921_v39 = vsub.f32 %v18875_v1, %v18922_v32  ;;  %33343 = vst [vmem:[#allocation77_spill] sm:$0xff] %v31937_v27  ;;  %v18882_v40 = vld [vmem:[%s33332_s9 + $0x70] sm:$0xff] }
0x2259   :  { %18793 = vmatprep.subr.bf16.mxu0 %v27022_v5  ;;  %33335 = vst [vmem:[#allocation58_spill] sm:$0xff] %v31859_v57  ;;  %25777 = vmatprep.subr.bf16.mxu1 %v31859_v57  ;;  %v31901_v5 = vsub.f32 %v18887_v22, %v18958_v38  ;;  %v31919_v22 = vsub.f32 %v18874_v21, %v18919_v43  ;;  %v18896_v38 = vld [vmem:[%s33332_s9 + $0xe0] sm:$0xff]  ;;  %33344 = vst [vmem:[#allocation78_spill] sm:$0xff] %v31943_v61 }
0x225a   :  { %25779 = vmatpush3.bf16.msra.mxu1 %v31861_v10  ;;  %v31948_v20 = vsub.f32 %v18879_v6, %v18934_v17  ;;  %v18985_v21 = vand.u32 4294901760, %v18896_v38  ;;  %v32794_v17 = vand.u32 4294901760, %v31766_v18 }
0x225b   :  { %25781 = vmatprep.subr.bf16.mxu1 %v31869_v45 }
0x225c   :  { %18794 = vmatpush1.bf16.msra.mxu0 %v27020_v0  ;;  %v31903_v0 = vsub.f32 %v18870_v55, %v18907_v49  ;;  %v18897_v55 = vld [vmem:[%s33332_s9 + $0xe8] sm:$0xff]  ;;  %v31926_v49 = vsub.f32 %v18892_v51, %v18973_v63  ;;  %33346 = vst [vmem:[#allocation80_spill] sm:$0xff] %v31948_v20  ;;  %v18883_v63 = vld [vmem:[%s33332_s9 + $0x78] sm:$0xff] }
0x225d   :  { %18795 = vmatprep.subr.bf16.mxu0 %v27025_v30  ;;  %v31905_v30 = vsub.f32 %v18871_v9, %v18910_v48  ;;  %v18880_v9 = vld [vmem:[%s33332_s9 + $0x60] sm:$0xff]  ;;  %v31928_v48 = vsub.f32 %v18893_v16, %v18976_v59  ;;  %v18988_v1 = vand.u32 4294901760, %v18897_v55  ;;  %v18994_v16 = vand.u32 4294901760, %v18899_v37 }
0x225e   :  { %25783 = vmatpush3.bf16.msra.mxu1 %v31871_v15  ;;  %v18937_v43 = vand.u32 4294901760, %v18880_v9  ;;  %v18946_v14 = vand.u32 4294901760, %v18883_v63 }
0x225f   :  { %25785 = vmatprep.subr.bf16.mxu1 %v31879_v46  ;;  %v31953_v59 = vpack.c.bf16 %v18988_v1, %v18985_v21  ;;  %v31970_v12 = vsub.f32 %v18899_v37, %v18994_v16  ;;  %v32799_v37 = vand.u32 4294901760, %v31901_v5 }
0x2260   :  { %18796 = vmatpush1.bf16.msra.mxu0 %v27023_v56  ;;  %v31907_v56 = vsub.f32 %v18888_v28, %v18961_v60  ;;  %v31930_v28 = vsub.f32 %v18876_v24, %v18925_v41  ;;  %v18881_v60 = vld [vmem:[%s33332_s9 + $0x68] sm:$0xff]  ;;  %v31955_v24 = vsub.f32 %v18896_v38, %v18985_v21  ;;  %v18943_v41 = vand.u32 4294901760, %v18882_v40 }
0x2261   :  { %v18940_v32 = vand.u32 4294901760, %v18881_v60  ;;  %33347 = vst [vmem:[#allocation64_spill] sm:$0xff] %v31953_v59  ;;  %v31961_v33 = vsub.f32 %v18880_v9, %v18937_v43  ;;  %33355 = vst [vmem:[#allocation56_spill] sm:$0xff] %v31970_v12  ;;  %v32793_v38 = vand.u32 4294901760, %v31768_v35  ;;  %v32797_v9 = vand.u32 4294901760, %v31774_v36 }
0x2262   :  { %25787 = vmatpush3.bf16.msra.mxu1 %v31881_v54  ;;  %33348 = vst [vmem:[#allocation65_spill] sm:$0xff] %v31955_v24  ;;  %v31972_v19 = vsub.f32 %v18882_v40, %v18943_v41  ;;  %v31981_v21 = vsub.f32 %v18883_v63, %v18946_v14  ;;  %v19128_v40 = vsub.f32 %v31766_v18, %v32794_v17  ;;  %v32804_v63 = vand.u32 4294901760, %v31903_v0 }
0x2263   :  { %22299 = vmatmul.mubr.msk.bf16.vlgmr.msra.gmra.mrb[52].mxu0 %vm11354_vm8, %v18542_v50  ;;  %25789 = vmatprep.subr.bf16.mxu1 %v31889_v52  ;;  %v31909_v50 = vsub.f32 %v18889_v53, %v18964_v2  ;;  %v31932_v53 = vsub.f32 %v18877_v47, %v18928_v8  ;;  %v18898_v2 = vld [vmem:[%s33332_s9 + $0xf0] sm:$0xff]  ;;  %v31957_v47 = vsub.f32 %v18897_v55, %v18988_v1  ;;  %v32795_v55 = vand.u32 4294901760, %v31770_v44  ;;  %vm33362_vm8 = vmmov %vm33238_vm1 }
0x2264   :  { %19845 = vmatprep.mubr.f32.mxu0 %v33314_v62  ;;  %v18991_v51 = vand.u32 4294901760, %v18898_v2  ;;  %v31959_v8 = vpack.c.bf16 %v18940_v32, %v18937_v43  ;;  %33351 = vst [vmem:[#allocation75_spill] sm:$0xff] %v31961_v33  ;;  %v31963_v42 = vsub.f32 %v18881_v60, %v18940_v32  ;;  %33356 = vst [vmem:[#allocation68_spill] sm:$0xff] %v31972_v19  ;;  %v32840_v52 = vand.u32 4294901760, %v31961_v33 }
0x2265   :  { %33349 = vst [vmem:[#allocation66_spill] sm:$0xff] %v31957_v47  ;;  %v31979_v60 = vpack.c.bf16 %v18946_v14, %v18943_v41  ;;  %33358 = vst [vmem:[#allocation84_spill] sm:$0xff] %v31981_v21  ;;  %v19135_v1 = vsub.f32 %v31768_v35, %v32793_v38  ;;  %v19016_v43 = vsub.f32 %v31770_v44, %v32795_v55  ;;  %v32808_v41 = vand.u32 4294901760, %v31905_v30 }
0x2266   :  { %25791 = vmatpush3.bf16.msra.mxu1 %v31891_v58  ;;  %33350 = vst [vmem:[#allocation72_spill] sm:$0xff] %v31959_v8  ;;  %33352 = vst [vmem:[#allocation74_spill] sm:$0xff] %v31963_v42  ;;  %v31965_v29 = vpack.c.bf16 %v18994_v16, %v18991_v51  ;;  %v31968_v6 = vsub.f32 %v18898_v2, %v18991_v51  ;;  %v32798_v2 = vand.u32 4294901760, %v31899_v31  ;;  %v19129_v14 = vand.u32 4294901760, %v19128_v40 }
0x2267   :  { %25793 = vmatprep.subr.bf16.mxu1 %v31937_v27  ;;  %33357 = vst [vmem:[#allocation70_spill] sm:$0xff] %v31979_v60  ;;  %v19023_v32 = vsub.f32 %v31774_v36, %v32797_v9  ;;  %v19149_v16 = vsub.f32 %v31901_v5, %v32799_v37  ;;  %v19136_v38 = vand.u32 4294901760, %v19135_v1  ;;  %v19017_v17 = vand.u32 4294901760, %v19016_v43 }
0x2268   :  { %33353 = vst [vmem:[#allocation76_spill] sm:$0xff] %v31965_v29  ;;  %33354 = vst [vmem:[#allocation60_spill] sm:$0xff] %v31968_v6  ;;  %v19142_v51 = vsub.f32 %v31899_v31, %v32798_v2  ;;  %v19030_v2 = vsub.f32 %v31903_v0, %v32804_v63  ;;  %v19037_v37 = vsub.f32 %v31905_v30, %v32808_v41  ;;  %v32806_v40 = vand.u32 4294901760, %v31907_v56 }
0x2269   :  { %v19024_v55 = vand.u32 4294901760, %v19023_v32  ;;  %v19150_v9 = vand.u32 4294901760, %v19149_v16  ;;  %v32805_v1 = vand.u32 4294901760, %v31909_v50  ;;  %v32807_v16 = vand.u32 4294901760, %v31911_v26 }
0x226a   :  { %25795 = vmatpush3.bf16.msra.mxu1 %v31943_v61  ;;  %v19143_v62 = vand.u32 4294901760, %v19142_v51  ;;  %v19031_v32 = vand.u32 4294901760, %v19030_v2  ;;  %v19038_v51 = vand.u32 4294901760, %v19037_v37  ;;  %v19156_v63 = vsub.f32 %v31907_v56, %v32806_v40 }
0x226b   :  { %25797 = vmatprep.subr.bf16.mxu1 %v31953_v59  ;;  %v32848_v46 = vand.u32 4294901760, %v31972_v19 }
0x226c   :  { %v32017_v43 = vpack.c.bf16 %v19150_v9, %v19143_v62  ;;  %v19044_v62 = vsub.f32 %v31911_v26, %v32807_v16  ;;  %v32818_v9 = vand.u32 4294901760, %v31919_v22  ;;  %v19157_v2 = vand.u32 4294901760, %v19156_v63 }
0x226d   :  { %v32820_v63 = vand.u32 4294901760, %v31921_v39 }
0x226e   :  { %25799 = vmatpush3.bf16.msra.mxu1 %v31959_v8  ;;  %v32013_v8 = vpack.c.bf16 %v19024_v55, %v19017_v17  ;;  %v19163_v17 = vsub.f32 %v31909_v50, %v32805_v1  ;;  %v32817_v55 = vand.u32 4294901760, %v31915_v13  ;;  %v19058_v16 = vsub.f32 %v31919_v22, %v32818_v9 }
0x226f   :  { %25801 = vmatprep.subr.bf16.mxu1 %v31965_v29  ;;  %v25804_v29 = vpack.c.bf16 %v19136_v38, %v19129_v14  ;;  %v32811_v38 = vand.u32 4294901760, %v31913_v23  ;;  %v32028_v14 = vpack.c.bf16 %v19038_v51, %v19031_v32  ;;  %v19045_v32 = vand.u32 4294901760, %v19044_v62 }
0x2270   :  { %v19164_v37 = vand.u32 4294901760, %v19163_v17  ;;  %v19170_v40 = vsub.f32 %v31915_v13, %v32817_v55  ;;  %v19059_v61 = vand.u32 4294901760, %v19058_v16  ;;  %v19065_v62 = vsub.f32 %v31921_v39, %v32820_v63 }
0x2271   :  { %v19051_v1 = vsub.f32 %v31913_v23, %v32811_v38  ;;  %v32819_v38 = vand.u32 4294901760, %v31926_v49 }
0x2272   :  { %25803 = vmatpush3.bf16.msra.mxu1 %v31979_v60  ;;  %v32048_v17 = vpack.c.bf16 %v19164_v37, %v19157_v2  ;;  %v19171_v60 = vand.u32 4294901760, %v19170_v40  ;;  %v32824_v2 = vand.u32 4294901760, %v31930_v28  ;;  %v32828_v40 = vand.u32 4294901760, %v31932_v53 }
0x2273   :  { %25805 = vmatprep.subr.bf16.mxu1 %v25804_v29  ;;  %v32816_v29 = vand.u32 4294901760, %v31917_v25  ;;  %v19052_v41 = vand.u32 4294901760, %v19051_v1  ;;  %v19184_v9 = vsub.f32 %v31926_v49, %v32819_v38  ;;  %v19066_v37 = vand.u32 4294901760, %v19065_v62 }
0x2274   :  { %v32827_v38 = vand.u32 4294901760, %v31939_v11  ;;  %v32832_v62 = vand.u32 4294901760, %v31946_v3 }
0x2275   :  { %v19177_v51 = vsub.f32 %v31917_v25, %v32816_v29  ;;  %v32823_v29 = vand.u32 4294901760, %v31928_v48  ;;  %v32055_v55 = vpack.c.bf16 %v19052_v41, %v19045_v32  ;;  %v19072_v41 = vsub.f32 %v31930_v28, %v32824_v2 }
0x2276   :  { %v19079_v32 = vsub.f32 %v31932_v53, %v32828_v40  ;;  %v32074_v63 = vpack.c.bf16 %v19066_v37, %v19059_v61  ;;  %v32833_v2 = vand.u32 4294901760, %v31948_v20  ;;  %v19086_v37 = vsub.f32 %v31946_v3, %v32832_v62 }
0x2277   :  { %v19178_v59 = vand.u32 4294901760, %v19177_v51  ;;  %v19191_v16 = vsub.f32 %v31928_v48, %v32823_v29  ;;  %v19185_v51 = vand.u32 4294901760, %v19184_v9  ;;  %v19073_v27 = vand.u32 4294901760, %v19072_v41 }
0x2278   :  { %v19080_v29 = vand.u32 4294901760, %v19079_v32  ;;  %v19198_v9 = vsub.f32 %v31939_v11, %v32827_v38  ;;  %v19093_v32 = vsub.f32 %v31948_v20, %v32833_v2  ;;  %v32834_v38 = vand.u32 4294901760, %v31955_v24 }
0x2279   :  { %v32062_v1 = vpack.c.bf16 %v19178_v59, %v19171_v60  ;;  %v19192_v59 = vand.u32 4294901760, %v19191_v16  ;;  %v32831_v60 = vand.u32 4294901760, %v31941_v4 }
0x227a   :  { %v32090_v16 = vpack.c.bf16 %v19080_v29, %v19073_v27  ;;  %v19199_v41 = vand.u32 4294901760, %v19198_v9  ;;  %v19212_v62 = vsub.f32 %v31955_v24, %v32834_v38  ;;  %v32841_v27 = vand.u32 4294901760, %v31963_v42 }
0x227b   :  { %v32082_v58 = vpack.c.bf16 %v19192_v59, %v19185_v51  ;;  %v19205_v61 = vsub.f32 %v31941_v4, %v32831_v60  ;;  %v19087_v51 = vand.u32 4294901760, %v19086_v37  ;;  %v32839_v59 = vand.u32 4294901760, %v31957_v47 }
0x227c   :  { %v19094_v60 = vand.u32 4294901760, %v19093_v32  ;;  %v19213_v2 = vand.u32 4294901760, %v19212_v62  ;;  %v19107_v32 = vsub.f32 %v31963_v42, %v32841_v27  ;;  %v32842_v38 = vand.u32 4294901760, %v31968_v6 }
0x227d   :  { %v19206_v40 = vand.u32 4294901760, %v19205_v61  ;;  %v19219_v9 = vsub.f32 %v31957_v47, %v32839_v59  ;;  %v19100_v61 = vsub.f32 %v31961_v33, %v32840_v52 }
0x227e   :  { %v32110_v37 = vpack.c.bf16 %v19094_v60, %v19087_v51  ;;  %v19108_v59 = vand.u32 4294901760, %v19107_v32  ;;  %v19226_v52 = vsub.f32 %v31968_v6, %v32842_v38  ;;  %v32849_v60 = vand.u32 4294901760, %v31981_v21 }
0x227f   :  { %v32102_v29 = vpack.c.bf16 %v19206_v40, %v19199_v41  ;;  %v19220_v54 = vand.u32 4294901760, %v19219_v9  ;;  %v19101_v40 = vand.u32 4294901760, %v19100_v61  ;;  %v32847_v41 = vand.u32 4294901760, %v31970_v12 }
0x2280   :  { %v19114_v9 = vsub.f32 %v31972_v19, %v32848_v46  ;;  %v19227_v27 = vand.u32 4294901760, %v19226_v52  ;;  %v19121_v32 = vsub.f32 %v31981_v21, %v32849_v60 }
0x2281   :  { %v32122_v62 = vpack.c.bf16 %v19220_v54, %v19213_v2  ;;  %v19233_v51 = vsub.f32 %v31970_v12, %v32847_v41  ;;  %v32130_v61 = vpack.c.bf16 %v19108_v59, %v19101_v40 }
0x2282   :  { %v19115_v15 = vand.u32 4294901760, %v19114_v9  ;;  %v19122_v45 = vand.u32 4294901760, %v19121_v32 }
0x2283   :  { %v19234_v38 = vand.u32 4294901760, %v19233_v51 }
0x2284   :  { %v32137_v2 = vpack.c.bf16 %v19122_v45, %v19115_v15 }
0x2285   :  { %v32135_v54 = vpack.c.bf16 %v19234_v38, %v19227_v27 }
0x2336   :  { %v32171_v38 = vpop.f32.mrb[52].mxu0 }
0x2337   :  { %33359 = vst [vmem:[#allocation53_spill] sm:$0xff] %v32171_v38  ;;  %v18832_v9 = vsel %vm33360_vm3, %v32171_v38, 0.0  ;;  %v18848_v32 = vmul.f32 %v32171_v38, %v32171_v38  ;;  %v32177_v51 = vpop.f32.mrb[53].mxu0 }
0x2338   :  { %33361 = vst [vmem:[#allocation86_spill] sm:$0xff] %v32177_v51  ;;  %v18833_v60 = vrot.slane %v18832_v9, 4  ;;  %v18839_v45 = vsel %vm33362_vm8, %v32177_v51, 0.0  ;;  %v18849_v15 = vmul.f32 %v32177_v51, %v32177_v51  ;;  %v18827_v40 = vpop.f32.mrb[54].mxu0 }
0x2339   :  { %v18850_v27 = vsel %vm33363_vm14, %v18848_v32, 0.0  ;;  %v18840_v59 = vrot.slane %v18839_v45, 4  ;;  %v18828_v52 = vpop.f32.mrb[55].mxu0 }
0x233a   :  { %v18834_v46 = vadd.f32 %v18833_v60, %v18832_v9  ;;  %v18851_v41 = vrot.slane %v18850_v27, 4  ;;  %v18857_v10 = vsel %vm33364_vm9, %v18849_v15, 0.0 }
0x233b   :  { %v18841_v57 = vadd.f32 %v18840_v59, %v18839_v45  ;;  %v18858_v38 = vrot.slane %v18857_v10, 4 }
0x233c   :  { %v18835_v34 = vrot.slane %v18834_v46, 2  ;;  %v18852_v7 = vadd.f32 %v18851_v41, %v18850_v27 }
0x233d   :  { %v18842_v19 = vrot.slane %v18841_v57, 2  ;;  %v18859_v21 = vadd.f32 %v18858_v38, %v18857_v10  ;;  %v33383_v38 = vld [vmem:[#allocation75_spill] sm:$0xff] }
0x233e   :  { %v18836_v6 = vadd.f32 %v18835_v34, %v18834_v46  ;;  %v18853_v12 = vrot.slane %v18852_v7, 2 }
0x233f   :  { %v18843_v33 = vadd.f32 %v18842_v19, %v18841_v57  ;;  %v18860_v42 = vrot.slane %v18859_v21, 2  ;;  %v33368_v19 = vpack.c.bf16 %v31905_v30, %v31903_v0 }
0x2340   :  { %v18837_v51 = vrot.slane %v18836_v6, 1  ;;  %v18854_v40 = vadd.f32 %v18853_v12, %v18852_v7 }
0x2341   :  { %v18844_v24 = vrot.slane %v18843_v33, 1  ;;  %v18861_v32 = vadd.f32 %v18860_v42, %v18859_v21  ;;  %v33369_v21 = vpack.c.bf16 %v31909_v50, %v31907_v56 }
0x2342   :  { %v18838_v47 = vadd.f32 %v18837_v51, %v18836_v6  ;;  %v18855_v52 = vrot.slane %v18854_v40, 1  ;;  %v33385_v51 = vld [vmem:[#allocation56_spill] sm:$0xff] }
0x2343   :  { %v18845_v60 = vadd.f32 %v18844_v24, %v18843_v33  ;;  %v18862_v9 = vrot.slane %v18861_v32, 1 }
0x2344   :  { %v18856_v3 = vadd.f32 %v18855_v52, %v18854_v40  ;;  %v18846_v59 = vmul.f32 0.25, %v18838_v47  ;;  %v33386_v40 = vld [vmem:[#allocation60_spill] sm:$0xff] }
0x2345   :  { %v18863_v15 = vadd.f32 %v18862_v9, %v18861_v32  ;;  %v18847_v20 = vmul.f32 0.25, %v18845_v60  ;;  %v33387_v32 = vpack.c.bf16 %v33385_v51, %v33386_v40  ;;  %v33388_v52 = vld [vmem:[#allocation84_spill] sm:$0xff] }
0x2346   :  { %v18864_v45 = vmul.f32 0.25, %v18856_v3  ;;  %v33389_v60 = vld [vmem:[#allocation68_spill] sm:$0xff] }
0x2347   :  { %v18865_v41 = vmul.f32 0.25, %v18863_v15  ;;  %v33390_v9 = vpack.c.bf16 %v33388_v52, %v33389_v60  ;;  %v33391_v15 = vld [vmem:[#allocation62_spill] sm:$0xff] }
0x2348   :  { %v18866_v10 = vsel %vm306_vm0, %v18846_v59, %v18864_v45  ;;  %v33392_v59 = vld [vmem:[#allocation61_spill] sm:$0xff]  ;;  %v33393_v45 = vld [vmem:[#allocation58_spill] sm:$0xff] }
0x2349   :  { %v18867_v34 = vsel %vm306_vm0, %v18847_v20, %v18865_v41  ;;  %v32187_v57 = vand.u32 4294901760, %v18866_v10  ;;  %v33365_v20 = vpack.c.bf16 %v31768_v35, %v31766_v18  ;;  %v33394_v41 = vld [vmem:[#allocation57_spill] sm:$0xff]  ;;  %vm33441_vm0 = vmmov %vm33317_vm5 }
0x234a   :  { %v32189_v46 = vand.u32 4294901760, %v18867_v34 }
0x234b   :  { %v32192_v7 = vsub.f32 %v18866_v10, %v32187_v57  ;;  %v33395_v10 = vld [vmem:[#allocation69_spill] sm:$0xff] }
0x234c   :  { %v18997_v24 = vsub.f32 %v18867_v34, %v32189_v46  ;;  %v33396_v34 = vld [vmem:[#allocation67_spill] sm:$0xff] }
0x234d   :  { %v19004_v33 = vand.u32 4294901760, %v32192_v7 }
0x234e   :  { %v18998_v42 = vand.u32 4294901760, %v18997_v24 }
0x234f   :  { %v19005_v3 = vsub.f32 %v32192_v7, %v19004_v33 }
0x2350   :  { %v18999_v47 = vsub.f32 %v18997_v24, %v18998_v42 }
0x2351   :  { %v19006_v12 = vand.u32 4294901760, %v19005_v3  ;;  %v33398_v3 = vld [vmem:[#allocation81_spill] sm:$0xff] }
0x2352   :  { %v19000_v6 = vand.u32 4294901760, %v18999_v47  ;;  %v33399_v47 = vld [vmem:[#allocation85_spill] sm:$0xff] }
0x2354   :  { %19001 = vmatprep.mubr.f32.mxu1 %v19000_v6  ;;  %v33400_v6 = vld [vmem:[#allocation83_spill] sm:$0xff] }
0x2355   :  { %19007 = vmatmul.mubr.f32.vlgmr.msra.gmra.mrb[36].mxu1 %v19006_v12  ;;  %v33401_v12 = vld [vmem:[#allocation77_spill] sm:$0xff] }
0x2356   :  { %25807 = vmatpush3.bf16.msra.mxu1 %v32013_v8  ;;  %19237 = vmatprep.mubr.f32.mxu1 %v32189_v46  ;;  %v33367_v8 = vpack.c.bf16 %v31901_v5, %v31899_v31 }
0x2357   :  { %25809 = vmatprep.subr.bf16.mxu1 %v32017_v43  ;;  %v33370_v43 = vpack.c.bf16 %v31913_v23, %v31911_v26 }
0x235a   :  { %25811 = vmatpush3.bf16.msra.mxu1 %v32028_v14  ;;  %v33372_v14 = vpack.c.bf16 %v31921_v39, %v31919_v22 }
0x235b   :  { %25813 = vmatprep.subr.bf16.mxu1 %v32048_v17  ;;  %v33374_v17 = vpack.c.bf16 %v31932_v53, %v31930_v28 }
0x235e   :  { %25815 = vmatpush3.bf16.msra.mxu1 %v32055_v55  ;;  %v33371_v55 = vpack.c.bf16 %v31917_v25, %v31915_v13 }
0x235f   :  { %25817 = vmatprep.subr.bf16.mxu1 %v32062_v1  ;;  %v33375_v1 = vpack.c.bf16 %v31941_v4, %v31939_v11 }
0x2362   :  { %25819 = vmatpush3.bf16.msra.mxu1 %v32074_v63  ;;  %v33373_v63 = vpack.c.bf16 %v31928_v48, %v31926_v49 }
0x2363   :  { %25821 = vmatprep.subr.bf16.mxu1 %v32082_v58  ;;  %v33366_v58 = vpack.c.bf16 %v31774_v36, %v31770_v44 }
0x2366   :  { %25823 = vmatpush3.bf16.msra.mxu1 %v32090_v16  ;;  %v33376_v16 = vld [vmem:[#allocation80_spill] sm:$0xff] }
0x2367   :  { %25825 = vmatprep.subr.bf16.mxu1 %v32102_v29  ;;  %v33377_v29 = vld [vmem:[#allocation79_spill] sm:$0xff] }
0x236a   :  { %25827 = vmatpush3.bf16.msra.mxu1 %v32110_v37  ;;  %v33378_v37 = vpack.c.bf16 %v33376_v16, %v33377_v29 }
0x236b   :  { %25829 = vmatprep.subr.bf16.mxu1 %v32122_v62  ;;  %v33379_v62 = vld [vmem:[#allocation66_spill] sm:$0xff] }
0x236e   :  { %25831 = vmatpush3.bf16.msra.mxu1 %v32130_v61  ;;  %v33380_v61 = vld [vmem:[#allocation65_spill] sm:$0xff] }
0x236f   :  { %25833 = vmatprep.subr.bf16.mxu1 %v32135_v54  ;;  %v33381_v54 = vpack.c.bf16 %v33379_v62, %v33380_v61 }
0x2372   :  { %25835 = vmatpush3.bf16.msra.mxu1 %v32137_v2  ;;  %v33382_v2 = vld [vmem:[#allocation74_spill] sm:$0xff] }
0x2373   :  { %25837 = vmatprep.subr.bf16.mxu1 %v33365_v20  ;;  %v33384_v27 = vpack.c.bf16 %v33382_v2, %v33383_v38  ;;  %v33402_v20 = vld [vmem:[#allocation78_spill] sm:$0xff] }
0x2375   :  { %19239 = vmatmul.mubr.f32.vlgmr.msra.gmra.mrb[38].mxu1 %v32187_v57 }
0x2376   :  { %25839 = vmatpush3.bf16.msra.mxu1 %v33366_v58  ;;  %19374 = vmatprep.mubr.f32.mxu1 %v18997_v24  ;;  %v33397_v24 = vld [vmem:[#allocation82_spill] sm:$0xff]  ;;  %v33404_v58 = vld [vmem:[#allocation72_spill] sm:$0xff] }
0x2377   :  { %25841 = vmatprep.subr.bf16.mxu1 %v33367_v8  ;;  %v33405_v8 = vld [vmem:[#allocation76_spill] sm:$0xff] }
0x237a   :  { %25843 = vmatpush3.bf16.msra.mxu1 %v33368_v19  ;;  %v33406_v19 = vand.u32 4294901760, %v31766_v18  ;;  %v33413_v18 = vand.u32 4294901760, %v31903_v0  ;;  %v33420_v0 = vand.u32 4294901760, %v31917_v25  ;;  %v33427_v25 = vand.u32 4294901760, %v31939_v11 }
0x237b   :  { %25845 = vmatprep.subr.bf16.mxu1 %v33369_v21  ;;  %v33407_v21 = vand.u32 4294901760, %v31768_v35  ;;  %v33414_v35 = vand.u32 4294901760, %v31905_v30  ;;  %v33421_v30 = vand.u32 4294901760, %v31919_v22  ;;  %v33428_v22 = vand.u32 4294901760, %v31941_v4 }
0x237c   :  { %v33434_v11 = vand.u32 4294901760, %v33382_v2  ;;  %v33435_v4 = vand.u32 4294901760, %v33386_v40  ;;  %v19765_v40 = vld [vmem:[%s33439_s13 + $0x18] sm:$0xff] }
0x237e   :  { %25847 = vmatpush3.bf16.msra.mxu1 %v33370_v43  ;;  %v25900_v43 = vpack.c.bf16 %v33407_v21, %v33406_v19 }
0x237f   :  { %25849 = vmatprep.subr.bf16.mxu1 %v33371_v55  ;;  %v33408_v55 = vld [vmem:[#allocation70_spill] sm:$0xff] }
0x2382   :  { %25851 = vmatpush3.bf16.msra.mxu1 %v33372_v14  ;;  %v33409_v14 = vand.u32 4294901760, %v31770_v44  ;;  %v25906_v44 = vpack.c.bf16 %v33414_v35, %v33413_v18 }
0x2383   :  { %25853 = vmatprep.subr.bf16.mxu1 %v33373_v63  ;;  %v33410_v63 = vand.u32 4294901760, %v31774_v36  ;;  %v33415_v36 = vand.u32 4294901760, %v31907_v56  ;;  %v33422_v56 = vand.u32 4294901760, %v31921_v39  ;;  %v33429_v39 = vand.u32 4294901760, %v33377_v29 }
0x2384   :  { %v33436_v29 = vand.u32 4294901760, %v33385_v51  ;;  %v19763_v51 = vld [vmem:[%s33439_s13 + $0x8] sm:$0xff] }
0x2385   :  { %v25914_v19 = vpack.c.bf16 %v33422_v56, %v33421_v30 }
0x2386   :  { %25855 = vmatpush3.bf16.msra.mxu1 %v33374_v17  ;;  %v25902_v17 = vpack.c.bf16 %v33410_v63, %v33409_v14  ;;  %v25920_v14 = vpack.c.bf16 %v33428_v22, %v33427_v25 }
0x2387   :  { %25857 = vmatprep.subr.bf16.mxu1 %v33375_v1  ;;  %v33411_v1 = vand.u32 4294901760, %v31899_v31 }
0x238a   :  { %25859 = vmatpush3.bf16.msra.mxu1 %v33378_v37  ;;  %v33412_v37 = vand.u32 4294901760, %v31901_v5  ;;  %v33417_v5 = vand.u32 4294901760, %v31911_v26  ;;  %v33424_v26 = vand.u32 4294901760, %v31928_v48  ;;  %v33431_v48 = vand.u32 4294901760, %v33380_v61 }
0x238b   :  { %25861 = vmatprep.subr.bf16.mxu1 %v33381_v54  ;;  %v33438_v61 = vand.u32 4294901760, %v33388_v52  ;;  %v19773_v52 = vand.u32 4294901760, %v19763_v51 }
0x238c   :  { %v25904_v54 = vpack.c.bf16 %v33412_v37, %v33411_v1  ;;  %v25928_v37 = vpack.c.bf16 %v33436_v29, %v33435_v4 }
0x238e   :  { %25863 = vmatpush3.bf16.msra.mxu1 %v33384_v27  ;;  %v33416_v27 = vand.u32 4294901760, %v31909_v50  ;;  %v33423_v50 = vand.u32 4294901760, %v31926_v49  ;;  %v33430_v49 = vand.u32 4294901760, %v33376_v16  ;;  %v33437_v16 = vand.u32 4294901760, %v33389_v60 }
0x238f   :  { %25865 = vmatprep.subr.bf16.mxu1 %v33387_v32  ;;  %v33419_v32 = vand.u32 4294901760, %v31915_v13  ;;  %v33426_v13 = vand.u32 4294901760, %v31932_v53  ;;  %v33433_v53 = vand.u32 4294901760, %v33383_v38  ;;  %v19777_v60 = vand.u32 4294901760, %v19765_v40 }
0x2390   :  { %v25908_v31 = vpack.c.bf16 %v33416_v27, %v33415_v36  ;;  %v25916_v21 = vpack.c.bf16 %v33424_v26, %v33423_v50  ;;  %v25922_v63 = vpack.c.bf16 %v33430_v49, %v33429_v39 }
0x2391   :  { %v25926_v1 = vpack.c.bf16 %v33434_v11, %v33433_v53 }
0x2392   :  { %25867 = vmatpush3.bf16.msra.mxu1 %v33390_v9  ;;  %v25912_v9 = vpack.c.bf16 %v33420_v0, %v33419_v32 }
0x2393   :  { %25869 = vmatprep.subr.bf16.mxu1 %v33391_v15 }
0x2395   :  { %19377 = vmatmul.mubr.f32.vlgmr.msra.gmra.mrb[40].mxu1 %v32192_v7  ;;  %v33418_v7 = vand.u32 4294901760, %v31913_v23  ;;  %v33425_v23 = vand.u32 4294901760, %v31930_v28  ;;  %v33432_v28 = vand.u32 4294901760, %v33379_v62 }
0x2396   :  { %25871 = vmatpush3.bf16.msra.mxu1 %v33392_v59  ;;  %19481 = vmatprep.mubr.f32.mxu1 %v18998_v42  ;;  %v33403_v42 = vld [vmem:[#allocation64_spill] sm:$0xff] }
0x2397   :  { %25873 = vmatprep.subr.bf16.mxu1 %v33393_v45 }
0x239a   :  { %25875 = vmatpush3.bf16.msra.mxu1 %v33394_v41 }
0x239b   :  { %25877 = vmatprep.subr.bf16.mxu1 %v33395_v10 }
0x239e   :  { %25879 = vmatpush3.bf16.msra.mxu1 %v33396_v34 }
0x239f   :  { %25881 = vmatprep.subr.bf16.mxu1 %v33397_v24 }
0x23a2   :  { %25883 = vmatpush3.bf16.msra.mxu1 %v33398_v3 }
0x23a3   :  { %25885 = vmatprep.subr.bf16.mxu1 %v33399_v47 }
0x23a6   :  { %25887 = vmatpush3.bf16.msra.mxu1 %v33400_v6 }
0x23a7   :  { %25889 = vmatprep.subr.bf16.mxu1 %v33401_v12 }
0x23aa   :  { %25891 = vmatpush3.bf16.msra.mxu1 %v33402_v20 }
0x23ab   :  { %25893 = vmatprep.subr.bf16.mxu1 %v33403_v42 }
0x23ae   :  { %25895 = vmatpush3.bf16.msra.mxu1 %v33404_v58 }
0x23af   :  { %25897 = vmatprep.subr.bf16.mxu1 %v33405_v8 }
0x23b2   :  { %25899 = vmatpush3.bf16.msra.mxu1 %v33408_v55 }
0x23b3   :  { %25901 = vmatprep.subr.bf16.mxu1 %v25900_v43  ;;  %v25918_v43 = vpack.c.bf16 %v33426_v13, %v33425_v23 }
0x23b5   :  { %19485 = vmatmul.mubr.f32.vlgmr.msra.gmra.mrb[42].mxu1 %v19004_v33  ;;  %v25910_v33 = vpack.c.bf16 %v33418_v7, %v33417_v5 }
0x23b6   :  { %25903 = vmatpush3.bf16.msra.mxu1 %v25902_v17  ;;  %19651 = vmatprep.mubr.f32.mxu1 %v32189_v46  ;;  %v25924_v17 = vpack.c.bf16 %v33432_v28, %v33431_v48 }
0x23b7   :  { %25905 = vmatprep.subr.bf16.mxu1 %v25904_v54  ;;  %v25930_v54 = vpack.c.bf16 %v33438_v61, %v33437_v16 }
0x23ba   :  { %25907 = vmatpush3.bf16.msra.mxu1 %v25906_v44 }
0x23bb   :  { %25909 = vmatprep.subr.bf16.mxu1 %v25908_v31 }
0x23be   :  { %25911 = vmatpush3.bf16.msra.mxu1 %v25910_v33 }
0x23bf   :  { %25913 = vmatprep.subr.bf16.mxu1 %v25912_v9 }
0x23c2   :  { %25915 = vmatpush3.bf16.msra.mxu1 %v25914_v19 }
0x23c3   :  { %25917 = vmatprep.subr.bf16.mxu1 %v25916_v21 }
0x23c6   :  { %25919 = vmatpush3.bf16.msra.mxu1 %v25918_v43 }
0x23c7   :  { %25921 = vmatprep.subr.bf16.mxu1 %v25920_v14 }
0x23ca   :  { %25923 = vmatpush3.bf16.msra.mxu1 %v25922_v63 }
0x23cb   :  { %25925 = vmatprep.subr.bf16.mxu1 %v25924_v17 }
0x23ce   :  { %25927 = vmatpush3.bf16.msra.mxu1 %v25926_v1 }
0x23cf   :  { %25929 = vmatprep.subr.bf16.mxu1 %v25928_v37  ;;  %v25964_v37 = vpack.c.bf16 %v19777_v60, %v19773_v52 }
0x23d1   :  { %25965 = vmatprep.subr.bf16.mxu0 %v25964_v37 }
0x23d2   :  { %25931 = vmatpush3.bf16.msra.mxu1 %v25930_v54 }
0x23d3   :  { %25933 = vmatprep.subr.bf16.mxu1 %v33391_v15  ;;  %v19762_v15 = vld [vmem:[%s33439_s13] sm:$0xff] }
0x23d5   :  { %19653 = vmatmul.mubr.f32.vlgmr.msra.gmra.mrb[44].mxu1 %v32187_v57 }
0x23d6   :  { %25935 = vmatpush3.bf16.msra.mxu1 %v33392_v59  ;;  %19755 = vmatprep.mubr.f32.mxu1 %v32189_v46  ;;  %v33440_v46 = vmov 0.0   ;;  %v19764_v59 = vld [vmem:[%s33439_s13 + $0x10] sm:$0xff] }
0x23d7   :  { %25937 = vmatprep.subr.bf16.mxu1 %v33393_v45  ;;  %v19775_v45 = vand.u32 4294901760, %v19762_v15 }
0x23da   :  { %25939 = vmatpush3.bf16.msra.mxu1 %v33394_v41  ;;  %v19779_v41 = vand.u32 4294901760, %v19764_v59 }
0x23db   :  { %25941 = vmatprep.subr.bf16.mxu1 %v33395_v10  ;;  %v32372_v10 = vsub.f32 %v19763_v51, %v19773_v52 }
0x23dc   :  { %v25966_v61 = vpack.c.bf16 %v19779_v41, %v19775_v45 }
0x23de   :  { %25943 = vmatpush3.bf16.msra.mxu1 %v33396_v34  ;;  %v32376_v34 = vsub.f32 %v19762_v15, %v19775_v45  ;;  %25967 = vmatpush1.bf16.msra.mxu0 %v25966_v61 }
0x23df   :  { %25945 = vmatprep.subr.bf16.mxu1 %v33397_v24  ;;  %v32378_v24 = vsub.f32 %v19764_v59, %v19779_v41 }
0x23e1   :  { %v19877_v18 = vand.u32 4294901760, %v32378_v24  ;;  %v25982_v54 = vpack.c.bf16 %v32378_v24, %v32376_v34 }
0x23e2   :  { %25947 = vmatpush3.bf16.msra.mxu1 %v33398_v3  ;;  %v19767_v3 = vld [vmem:[%s33439_s13 + $0x28] sm:$0xff] }
0x23e3   :  { %25949 = vmatprep.subr.bf16.mxu1 %v33399_v47  ;;  %v19769_v47 = vld [vmem:[%s33439_s13 + $0x38] sm:$0xff]  ;;  %v19878_v33 = vsub.f32 %v32378_v24, %v19877_v18 }
0x23e5   :  { %v19879_v26 = vand.u32 4294901760, %v19878_v33 }
0x23e6   :  { %25951 = vmatpush3.bf16.msra.mxu1 %v33400_v6  ;;  %v19859_v6 = vand.u32 4294901760, %v32372_v10 }
0x23e7   :  { %25953 = vmatprep.subr.bf16.mxu1 %v33401_v12 }
0x23e8   :  { %v19860_v36 = vsub.f32 %v32372_v10, %v19859_v6 }
0x23ea   :  { %25955 = vmatpush3.bf16.msra.mxu1 %v33402_v20  ;;  %v19781_v20 = vand.u32 4294901760, %v19767_v3  ;;  %v19861_v9 = vand.u32 4294901760, %v19860_v36 }
0x23eb   :  { %25957 = vmatprep.subr.bf16.mxu1 %v33403_v42  ;;  %v19785_v42 = vand.u32 4294901760, %v19769_v47 }
0x23ec   :  { %v32390_v31 = vsub.f32 %v19767_v3, %v19781_v20 }
0x23ed   :  { %v32392_v5 = vsub.f32 %v19769_v47, %v19785_v42 }
0x23ee   :  { %25959 = vmatpush3.bf16.msra.mxu1 %v33404_v58  ;;  %v19766_v58 = vld [vmem:[%s33439_s13 + $0x20] sm:$0xff]  ;;  %v19883_v56 = vand.u32 4294901760, %v32390_v31 }
0x23ef   :  { %25961 = vmatprep.subr.bf16.mxu1 %v33405_v8  ;;  %v19768_v8 = vld [vmem:[%s33439_s13 + $0x30] sm:$0xff]  ;;  %v19783_v35 = vand.u32 4294901760, %v19766_v58  ;;  %v19895_v19 = vand.u32 4294901760, %v32392_v5 }
0x23f0   :  { %v19787_v44 = vand.u32 4294901760, %v19768_v8  ;;  %v19884_v43 = vsub.f32 %v32390_v31, %v19883_v56 }
0x23f1   :  { %v32396_v32 = vsub.f32 %v19766_v58, %v19783_v35  ;;  %v19896_v25 = vsub.f32 %v32392_v5, %v19895_v19 }
0x23f2   :  { %25963 = vmatpush3.bf16.msra.mxu1 %v33408_v55  ;;  %v19865_v55 = vand.u32 4294901760, %v32376_v34  ;;  %v32398_v0 = vsub.f32 %v19768_v8, %v19787_v44  ;;  %v19885_v48 = vand.u32 4294901760, %v19884_v43  ;;  %v25970_v51 = vpack.c.bf16 %v19787_v44, %v19783_v35 }
0x23f3   :  { %v19889_v21 = vand.u32 4294901760, %v32396_v32  ;;  %v19897_v28 = vand.u32 4294901760, %v19896_v25 }
0x23f4   :  { %v19866_v7 = vsub.f32 %v32376_v34, %v19865_v55  ;;  %v19901_v23 = vand.u32 4294901760, %v32398_v0  ;;  %v25998_v52 = vpack.c.bf16 %v19877_v18, %v19865_v55 }
0x23f5   :  { %19757 = vmatmul.mubr.f32.vlgmr.msra.gmra.mrb[46].mxu1 %v32187_v57  ;;  %v32374_v57 = vsub.f32 %v19765_v40, %v19777_v60  ;;  %v19890_v39 = vsub.f32 %v32396_v32, %v19889_v21  ;;  %v25976_v1 = vpack.c.bf16 %v19897_v28, %v19885_v48  ;;  %v26000_v60 = vpack.c.bf16 %v19895_v19, %v19883_v56  ;;  %v20406_v28 = vld [vmem:[%s33443_s29] sm:$0x3] }
0x23f6   :  { %19961 = vmatprep.mubr.f32.mxu1 %v33440_v46  ;;  %v19867_v50 = vand.u32 4294901760, %v19866_v7  ;;  %v19902_v49 = vsub.f32 %v32398_v0, %v19901_v23  ;;  %v26002_v15 = vpack.c.bf16 %v19901_v23, %v19889_v21 }
0x23f7   :  { %v19871_v12 = vand.u32 4294901760, %v32374_v57  ;;  %v19891_v53 = vand.u32 4294901760, %v19890_v39  ;;  %v25980_v16 = vpack.c.bf16 %v32374_v57, %v32372_v10 }
0x23f8   :  { %v25974_v14 = vpack.c.bf16 %v19879_v26, %v19867_v50  ;;  %v19903_v11 = vand.u32 4294901760, %v19902_v49 }
0x23f9   :  { %v19872_v27 = vsub.f32 %v32374_v57, %v19871_v12  ;;  %v25996_v40 = vpack.c.bf16 %v19871_v12, %v19859_v6 }
0x23fa   :  { %v25978_v29 = vpack.c.bf16 %v19903_v11, %v19891_v53  ;;  %v20408_v11 = vsel %vm33447_vm6, %v20406_v28, 0 }
0x23fb   :  { %v19873_v30 = vand.u32 4294901760, %v19872_v27 }
0x23fd   :  { %v25972_v13 = vpack.c.bf16 %v19873_v30, %v19861_v9 }
0x23ff   :  { %25973 = vmatprep.subr.bf16.mxu1 %v25972_v13 }
0x2400   :  { %25975 = vmatpush1.bf16.msra.mxu1 %v25974_v14  ;;  %v33445_v14 = vld [vmem:[#allocation54_spill] sm:$0xff] }
0x2401   :  { %25977 = vmatprep.subr.bf16.mxu1 %v25976_v1 }
0x2404   :  { %25979 = vmatpush1.bf16.msra.mxu1 %v25978_v29 }
0x2405   :  { %25981 = vmatprep.subr.bf16.mxu1 %v25980_v16 }
0x2428   :  { %v23050_v62 = vpop.f32.mrb[36].mxu1 }
0x2429   :  { %v23051_v2 = vpop.f32.mrb[37].mxu1 }
0x242a   :  { %v23052_v38 = vadd.f32 %v23051_v2, %v23050_v62  ;;  %v25968_v62 = vpack.c.bf16 %v19785_v42, %v19781_v20  ;;  %v25984_v2 = vpack.c.bf16 %v32392_v5, %v32390_v31 }
0x242c   :  { %25969 = vmatprep.subr.bf16.mxu0 %v25968_v62 }
0x242d   :  { %25971 = vmatpush1.bf16.msra.mxu0 %v25970_v51 }
0x2448   :  { %v23085_v22 = vpop.f32.mrb[38].mxu1 }
0x2449   :  { %v23086_v63 = vpop.f32.mrb[39].mxu1 }
0x244a   :  { %v23087_v17 = vadd.f32 %v23086_v63, %v23085_v22  ;;  %v20326_v63 = vld [vmem:[%s33442_s17] sm:$0x3] }
0x244c   :  { %v19241_v4 = vadd.f32 %v23087_v17, %v23052_v38  ;;  %v25986_v38 = vpack.c.bf16 %v32398_v0, %v32396_v32  ;;  %v20879_v17 = vld [vmem:[%s33444_s3] sm:$0x3] }
0x244d   :  { %v20881_v1 = vsel %vm33448_vm11, %v20879_v17, 0 }
0x2468   :  { %v23120_v59 = vpop.f32.mrb[40].mxu1 }
0x2469   :  { %v23121_v45 = vpop.f32.mrb[41].mxu1 }
0x246a   :  { %v23122_v41 = vadd.f32 %v23121_v45, %v23120_v59 }
0x246c   :  { %v19379_v10 = vadd.f32 %v23122_v41, %v19241_v4  ;;  %v33449_v4 = vld [vmem:[#allocation55_spill] sm:$0xff]  ;;  %v20351_v41 = vld [vmem:[%s33446_s8] sm:$0x3] }
0x2488   :  { %v23155_v57 = vpop.f32.mrb[42].mxu1 }
0x2489   :  { %v23156_v34 = vpop.f32.mrb[43].mxu1 }
0x248a   :  { %v23157_v24 = vadd.f32 %v23156_v34, %v23155_v57 }
0x248c   :  { %v19487_v3 = vadd.f32 %v23157_v24, %v19379_v10 }
0x24a8   :  { %v23190_v47 = vpop.f32.mrb[44].mxu1 }
0x24a9   :  { %v23191_v20 = vpop.f32.mrb[45].mxu1 }
0x24aa   :  { %v23192_v42 = vadd.f32 %v23191_v20, %v23190_v47 }
0x24ac   :  { %v19655_v58 = vadd.f32 %v23192_v42, %v19487_v3 }
0x24c8   :  { %v23225_v8 = vpop.f32.mrb[46].mxu1 }
0x24c9   :  { %v23226_v35 = vpop.f32.mrb[47].mxu1 }
0x24ca   :  { %v23227_v44 = vadd.f32 %v23226_v35, %v23225_v8 }
0x24cc   :  { %v19759_v36 = vadd.f32 %v23227_v44, %v19655_v58 }
0x24ce   :  { %v19771_v6 = vsel %vm33441_vm0, %v19759_v36, 0 }
0x24cf   :  { %v19846_v12 = vand.u32 4294901760, %v19771_v6 }
0x24d1   :  { %v19847_v55 = vsub.f32 %v19771_v6, %v19846_v12  ;;  %19963 = vmatmul.mubr.f32.vlgmr.msra.gmra.mrb[48].mxu1 %v19846_v12 }
0x24d2   :  { %25983 = vmatpush1.bf16.msra.mxu1 %v25982_v54  ;;  %20049 = vmatprep.mubr.f32.mxu1 %v33440_v46 }
0x24d3   :  { %25985 = vmatprep.subr.bf16.mxu1 %v25984_v2  ;;  %v19848_v18 = vand.u32 4294901760, %v19847_v55 }
0x24d5   :  { %v19849_v27 = vsub.f32 %v19847_v55, %v19848_v18 }
0x24d6   :  { %25987 = vmatpush1.bf16.msra.mxu1 %v25986_v38 }
0x24d7   :  { %v19850_v31 = vand.u32 4294901760, %v19849_v27  ;;  %25989 = vmatprep.subr.bf16.mxu1 %v25964_v37 }
0x24d9   :  { %19851 = vmatmul.mubr.f32.vlgmr.msra.gmra.mrb[50].mxu0 %v19850_v31  ;;  %20052 = vmatmul.mubr.f32.vlgmr.msra.gmra.mrb[48].mxu1 %v19847_v55 }
0x24da   :  { %25991 = vmatpush1.bf16.msra.mxu1 %v25966_v61  ;;  %20130 = vmatprep.mubr.f32.mxu1 %v33440_v46 }
0x24db   :  { %25993 = vmatprep.subr.bf16.mxu1 %v25968_v62  ;;  %20480 = vmatprep.mubr.f32.mxu0 %v33440_v46 }
0x24de   :  { %25995 = vmatpush1.bf16.msra.mxu1 %v25970_v51 }
0x24df   :  { %25997 = vmatprep.subr.bf16.mxu1 %v25996_v40  ;;  %v32434_v40 = vand.u32 4294901760, %v20408_v11 }
0x24e1   :  { %20134 = vmatmul.mubr.f32.vlgmr.msra.gmra.mrb[48].mxu1 %v19848_v18  ;;  %v20482_v59 = vsub.f32 %v20408_v11, %v32434_v40 }
0x24e2   :  { %25999 = vmatpush1.bf16.msra.mxu1 %v25998_v52  ;;  %20228 = vmatprep.mubr.f32.mxu1 %v33440_v46  ;;  %v32436_v52 = vand.u32 4294901760, %v20881_v1 }
0x24e3   :  { %26001 = vmatprep.subr.bf16.mxu1 %v26000_v60  ;;  %v20483_v34 = vand.u32 4294901760, %v20482_v59 }
0x24e4   :  { %v20951_v45 = vsub.f32 %v20881_v1, %v32436_v52 }
0x24e5   :  { %v20484_v58 = vsub.f32 %v20482_v59, %v20483_v34 }
0x24e6   :  { %26003 = vmatpush1.bf16.msra.mxu1 %v26002_v15  ;;  %v20952_v24 = vand.u32 4294901760, %v20951_v45 }
0x24e7   :  { %26005 = vmatprep.subr.bf16.mxu1 %v25964_v37  ;;  %v33450_v37 = vld [vmem:[#allocation63_spill] sm:$0xff]  ;;  %v20485_v27 = vand.u32 4294901760, %v20484_v58 }
0x24e8   :  { %v20953_v8 = vsub.f32 %v20951_v45, %v20952_v24 }
0x24e9   :  { %20230 = vmatmul.mubr.f32.vlgmr.msra.gmra.mrb[48].mxu1 %v19846_v12 }
0x24ea   :  { %26007 = vmatpush1.bf16.msra.mxu1 %v25966_v61  ;;  %20308 = vmatprep.mubr.f32.mxu1 %v33440_v46  ;;  %v20954_v31 = vand.u32 4294901760, %v20953_v8 }
0x24eb   :  { %26009 = vmatprep.subr.bf16.mxu1 %v25968_v62  ;;  %v33451_v62 = vld [vmem:[#allocation53_spill] sm:$0xff] }
0x24ee   :  { %26011 = vmatpush1.bf16.msra.mxu1 %v25970_v51  ;;  %v33452_v51 = vld [vmem:[#allocation86_spill] sm:$0xff] }
0x24f1   :  { %20310 = vmatmul.mubr.f32.vlgmr.msra.gmra.mrb[48].mxu1 %v19846_v12 }
0x24f2   :  { %20949 = vmatprep.mubr.f32.mxu1 %v33440_v46 }
0x25ac   :  { %v19852_v5 = vpop.f32.mrb[50].mxu0 }
0x25ad   :  { %v19854_v7 = vpop.f32.mrb[51].mxu0 }
0x25c4   :  { %v20311_v33 = vpop.f32.mrb[48].mxu1 }
0x25c5   :  { %v26013_v32 = vadd.f32 %v20311_v33, %v19852_v5  ;;  %v20313_v0 = vpop.f32.mrb[49].mxu1 }
0x25c6   :  { %v26014_v9 = vadd.f32 %v20313_v0, %v19854_v7 }
0x25c7   :  { %v20316_v30 = vmul.f32 %v26013_v32, %v26013_v32 }
0x25c8   :  { %v20317_v56 = vmul.f32 %v26014_v9, %v26014_v9 }
0x25c9   :  { %v20320_v19 = vrot.slane %v20316_v30, 7 }
0x25ca   :  { %v20321_v50 = vrot.slane %v20317_v56, 7 }
0x25cb   :  { %v20324_v26 = vsub.f32 %v26013_v32, %v20320_v19 }
0x25cc   :  { %v20325_v21 = vsub.f32 %v26014_v9, %v20321_v50 }
0x25cd   :  { %v20327_v23 = vadd.f32 1e-05, %v20324_v26 }
0x25ce   :  { %v20328_v13 = vadd.f32 1e-05, %v20325_v21 }
0x25cf   :  { %27050 = vrsqrt.f32 %v20327_v23 }
0x25d0   :  { %27052 = vrsqrt.f32 %v20328_v13 }
0x25d9   :  { %v27051_v43 = vpop.eup %27050 }
0x25da   :  { %v27053_v25 = vpop.eup %27052 }
0x25db   :  { %v20333_v22 = vcombine.low %v27051_v43, %v27053_v25 }
0x25dd   :  { %v20340_v39 = vrot.slane %v20333_v22, %v33445_v14 }
0x25df   :  { %v20341_v49 = vcombine.high %v20340_v39, %v20340_v39 }
0x25e1   :  { %v20348_v48 = vrot.slane %v20341_v49, %v33445_v14 }
0x25e3   :  { %v20350_v53 = vmul.f32 %v20348_v48, %v20326_v63 }
0x25e5   :  { %v20356_v29 = vrot.slane %v20350_v53, %v33449_v4  ;;  %v20360_v16 = vrot.slane %v20350_v53, %v33450_v37 }
0x25e7   :  { %v20363_v61 = vmul.f32 %v26013_v32, %v20356_v29  ;;  %v20364_v54 = vmul.f32 %v26014_v9, %v20360_v16  ;;  %v20384_v2 = vmul.f32 %v20356_v29, %v33451_v62  ;;  %v20385_v38 = vmul.f32 %v20360_v16, %v33452_v51 }
0x25e9   :  { %v20367_v60 = vcombine.low %v20363_v61, %v20364_v54 }
0x25eb   :  { %v20374_v15 = vrot.slane %v20367_v60, %v33445_v14 }
0x25ed   :  { %v20381_v10 = vrot.slane %v20374_v15, %v33445_v14 }
0x25ef   :  { %v20383_v57 = vsub.f32 %v20351_v41, %v20381_v10 }
0x25f1   :  { %v20390_v3 = vrot.slane %v20383_v57, %v33449_v4  ;;  %v20394_v47 = vrot.slane %v20383_v57, %v33450_v37 }
0x25f3   :  { %v20397_v20 = vadd.f32 %v20390_v3, %v20384_v2  ;;  %v20398_v42 = vadd.f32 %v20394_v47, %v20385_v38 }
0x25f5   :  { %v20399_v35 = vmax.f32 %v20397_v20, 0.0  ;;  %v20400_v44 = vmax.f32 %v20398_v42, 0.0 }
0x25f7   :  { %v20403_v36 = vcombine.low %v20399_v35, %v20400_v44  ;;  %v20410_v6 = vsel %vm33453_vm10, %v20399_v35, 0  ;;  %v20412_v12 = vsel %vm33454_vm13, %v20400_v44, 0 }
0x25f8   :  { %v20414_v55 = vand.u32 4294901760, %v20412_v12  ;;  %v20416_v18 = vand.u32 4294901760, %v20410_v6 }
0x25f9   :  { %20405 = vst [vmem:[%s27527_s27] sm:$0xff] %v20403_v36 }
0x25fa   :  { %20415 = vmatprep.subr.mxu0 %v20414_v55  ;;  %20884 = vmatprep.subr.mxu1 %v20414_v55  ;;  %v20493_v5 = vsub.f32 %v20412_v12, %v20414_v55  ;;  %v20499_v7 = vsub.f32 %v20410_v6, %v20416_v18 }
0x25fb   :  { %20417 = vmatpush1.msra.mxu0 %v20416_v18  ;;  %20886 = vmatpush1.msra.mxu1 %v20416_v18 }
0x25fc   :  { %20486 = vmatmul.mubr.f32.vlgmr.msra.gmra.mrb[56].mxu0 %v20485_v27  ;;  %20955 = vmatmul.mubr.f32.vlgmr.msra.gmra.mrb[50].mxu1 %v20954_v31  ;;  %v20494_v33 = vand.u32 4294901760, %v20493_v5  ;;  %v20500_v32 = vand.u32 4294901760, %v20499_v7 }
0x25fd   :  { %20566 = vmatprep.mubr.f32.mxu0 %v33440_v46  ;;  %21035 = vmatprep.mubr.f32.mxu1 %v33440_v46 }
0x25fe   :  { %v20495_v0 = vsub.f32 %v20493_v5, %v20494_v33  ;;  %v20501_v9 = vsub.f32 %v20499_v7, %v20500_v32 }
0x2600   :  { %v20496_v30 = vand.u32 4294901760, %v20495_v0  ;;  %v20502_v56 = vand.u32 4294901760, %v20501_v9 }
0x2602   :  { %20497 = vmatprep.subr.mxu0 %v20496_v30  ;;  %20966 = vmatprep.subr.mxu1 %v20496_v30 }
0x2603   :  { %20503 = vmatpush1.msra.mxu0 %v20502_v56  ;;  %20972 = vmatpush1.msra.mxu1 %v20502_v56 }
0x2604   :  { %20568 = vmatmul.mubr.f32.vlgmr.msra.gmra.mrb[56].mxu0 %v32434_v40  ;;  %20576 = vmatprep.subr.mxu0 %v20493_v5 }
0x2605   :  { %21037 = vmatmul.mubr.f32.vlgmr.msra.gmra.mrb[50].mxu1 %v32436_v52  ;;  %21045 = vmatprep.subr.mxu1 %v20493_v5 }
0x2606   :  { %20579 = vmatpush1.msra.mxu0 %v20499_v7  ;;  %21048 = vmatpush1.msra.mxu1 %v20499_v7 }
0x2607   :  { %20652 = vmatprep.subr.mxu0 %v20414_v55  ;;  %21121 = vmatprep.subr.mxu1 %v20414_v55 }
0x2608   :  { %20642 = vmatprep.mubr.f32.mxu0 %v33440_v46  ;;  %21111 = vmatprep.mubr.f32.mxu1 %v33440_v46 }
0x260c   :  { %20645 = vmatmul.mubr.f32.vlgmr.msra.gmra.mrb[56].mxu0 %v20482_v59 }
0x260d   :  { %20654 = vmatpush1.msra.mxu0 %v20416_v18  ;;  %21114 = vmatmul.mubr.f32.vlgmr.msra.gmra.mrb[50].mxu1 %v20951_v45 }
0x260e   :  { %21123 = vmatpush1.msra.mxu1 %v20416_v18  ;;  %20730 = vmatprep.subr.mxu0 %v20494_v33 }
0x260f   :  { %21199 = vmatprep.subr.mxu1 %v20494_v33  ;;  %20717 = vmatprep.mubr.f32.mxu0 %v33440_v46 }
0x2610   :  { %21186 = vmatprep.mubr.f32.mxu1 %v33440_v46 }
0x2614   :  { %20721 = vmatmul.mubr.f32.vlgmr.msra.gmra.mrb[56].mxu0 %v20483_v34 }
0x2615   :  { %20734 = vmatpush1.msra.mxu0 %v20500_v32  ;;  %21190 = vmatmul.mubr.f32.vlgmr.msra.gmra.mrb[50].mxu1 %v20952_v24 }
0x2616   :  { %21203 = vmatpush1.msra.mxu1 %v20500_v32  ;;  %20806 = vmatprep.subr.mxu0 %v20414_v55 }
0x2617   :  { %21275 = vmatprep.subr.mxu1 %v20414_v55  ;;  %20797 = vmatprep.mubr.f32.mxu0 %v33440_v46 }
0x2618   :  { %21266 = vmatprep.mubr.f32.mxu1 %v33440_v46 }
0x261c   :  { %20799 = vmatmul.mubr.f32.vlgmr.msra.gmra.mrb[56].mxu0 %v32434_v40 }
0x261d   :  { %20808 = vmatpush1.msra.mxu0 %v20416_v18  ;;  %21268 = vmatmul.mubr.f32.vlgmr.msra.gmra.mrb[50].mxu1 %v32436_v52 }
0x261e   :  { %21277 = vmatpush1.msra.mxu1 %v20416_v18  ;;  %20871 = vmatprep.mubr.f32.mxu0 %v33440_v46 }
0x261f   :  { %21340 = vmatprep.mubr.f32.mxu1 %v33440_v46 }
0x2624   :  { %20873 = vmatmul.mubr.f32.vlgmr.msra.gmra.mrb[56].mxu0 %v32434_v40 }
0x2625   :  { %21342 = vmatmul.mubr.f32.vlgmr.msra.gmra.mrb[50].mxu1 %v32436_v52 }
0x26f7   :  { %v20874_v19 = vpop.f32.mrb[56].mxu0 }
0x26f8   :  { %v21343_v50 = vpop.f32.mrb[50].mxu1  ;;  %v20876_v26 = vpop.f32.mrb[57].mxu0 }
0x26f9   :  { %v21348_v21 = vmax.f32 %v20874_v19, %v21343_v50  ;;  %v21345_v23 = vpop.f32.mrb[51].mxu1 }
0x26fa   :  { %v21349_v13 = vmax.f32 %v20876_v26, %v21345_v23 }
0x26fc   :  { %v21352_v43 = vcombine.low %v21348_v21, %v21349_v13 }
0x26fe   :  { %22300 = vst.sshfl [vmem:[%s27532_s6] sm:$0x33 pattern:$0x76325410] %v21352_v43 }
0x26ff   :  { %21382 = vsyncpa [#allocation3], 1 }
0x2700   :  { %21383 = vsyncpa [#allocation5], 1 }
0x2701   :  { %21384 = vsyncpa [#allocation8], 1 }
0x2702   :  { %21385 = vsyncpa [#allocation11], 1 }

</bundles_post_ra>
